<compile_context>
chip_gen: v7x
topology: tpu7x:2x2x1
jax: 0.10.0
libtpu: 0.0.40
codegen_flags: <defaults>
</compile_context>

<pallas_src>
import functools

import jax
import jax.numpy as jnp
from jax.experimental import pallas as pl
from jax.experimental.pallas import tpu as pltpu

LANES = 128          # lane-padded channel width used end-to-end
NEG = -1.0e30        # finite "minus infinity" for maxpool padding


def _round_up(x, m):
    return ((x + m - 1) // m) * m


# ----------------------------------------------------------------------------
# Pallas kernels
# ----------------------------------------------------------------------------
def _conv_s2_kernel(x00, x01, x10, x11, w_ref, b_ref, o_ref, *, kh, kw, pw, m_out):
    """Stride-2 conv on parity-decomposed, row-flattened slabs.

    For window (i, j): parity slab (i%2, j%2), row offset (i//2)*pw + (j//2).
    out = relu(sum_ij patch_ij @ W_ij + bias)      (BN scale folded into W).
    """
    slabs = (x00, x01, x10, x11)
    acc = jnp.zeros((m_out, o_ref.shape[-1]), jnp.float32)
    for i in range(kh):
        for j in range(kw):
            s = slabs[(i % 2) * 2 + (j % 2)]
            off = (i // 2) * pw + (j // 2)
            patch = s[pl.ds(off, m_out), :]                    # (m_out, Cin)
            acc = acc + jnp.dot(patch, w_ref[i * kw + j],
                                preferred_element_type=jnp.float32)
    o_ref[...] = jnp.maximum(acc + b_ref[...], 0.0)


def _conv_s1_kernel(x_ref, w_ref, b_ref, o_ref, *, k, pw, m_out):
    """Stride-1 KxK conv on a row-flattened padded slab: out = relu(acc + bias)."""
    acc = jnp.zeros((m_out, o_ref.shape[-1]), jnp.float32)
    for i in range(k):
        for j in range(k):
            patch = x_ref[pl.ds(i * pw + j, m_out), :]         # (m_out, C)
            acc = acc + jnp.dot(patch, w_ref[i * k + j],
                                preferred_element_type=jnp.float32)
    o_ref[...] = jnp.maximum(acc + b_ref[...], 0.0)


def _conv_s1_res_kernel(x_ref, w_ref, b_ref, res_ref, o_ref, *, k, pw, m_out):
    """Same as _conv_s1_kernel but with fused residual add before the ReLU."""
    acc = jnp.zeros((m_out, o_ref.shape[-1]), jnp.float32)
    for i in range(k):
        for j in range(k):
            patch = x_ref[pl.ds(i * pw + j, m_out), :]
            acc = acc + jnp.dot(patch, w_ref[i * k + j],
                                preferred_element_type=jnp.float32)
    o_ref[...] = jnp.maximum(acc + b_ref[...] + res_ref[...], 0.0)


def _maxpool_s2_kernel(x00, x01, x10, x11, o_ref, *, k, pw, m_out):
    """3x3 stride-2 maxpool as k*k elementwise maxima of shifted slices (VPU only)."""
    slabs = (x00, x01, x10, x11)
    out = None
    for i in range(k):
        for j in range(k):
            s = slabs[(i % 2) * 2 + (j % 2)]
            off = (i // 2) * pw + (j // 2)
            v = s[pl.ds(off, m_out), :]
            out = v if out is None else jnp.maximum(out, v)
    o_ref[...] = out


def _head_kernel(x_ref, w_ref, b_ref, task_ref, feat_ref, *, inv_hw):
    """Fused global-average-pool + fc; emits (task_output, features) padded to 128."""
    feat = jnp.sum(x_ref[...], axis=1) * inv_hw                # (N, 128)
    task = jnp.dot(feat, w_ref[...],
                   preferred_element_type=jnp.float32) + b_ref[...]
    feat_ref[...] = feat
    task_ref[...] = task


# ----------------------------------------------------------------------------
# Layer wrappers (JAX-side layout glue is O(activation size); no 9x/49x blow-up)
# ----------------------------------------------------------------------------
def _parity_slabs(xp, rp, pad_value):
    """Split padded NHWC into 4 parity slabs, flatten rows per batch, pad to rp rows."""
    N, Hp, Wp, C = xp.shape
    PH, PW = Hp // 2, Wp // 2
    slabs = []
    for pi in range(2):
        for pj in range(2):
            s = xp[:, pi::2, pj::2, :].reshape(N, PH * PW, C)
            s = jnp.pad(s, ((0, 0), (0, rp - PH * PW), (0, 0)),
                        constant_values=pad_value)
            slabs.append(s.reshape(N * rp, C))
    return slabs, PH, PW


def conv_stem(x_nhwc, w, bias, *, kh=7, kw=7, pad=3):
    """7x7 stride-2 conv + folded BN + ReLU (lane-padded Cout)."""
    N, H, W, Cin = x_nhwc.shape
    cout = w.shape[-1]
    OH = (H + 2 * pad - kh) // 2 + 1
    OW = (W + 2 * pad - kw) // 2 + 1
    xp = jnp.pad(x_nhwc, ((0, 0), (pad, pad), (pad, pad), (0, 0)))
    Hp, Wp = H + 2 * pad, W + 2 * pad
    if Hp % 2:
        xp = jnp.pad(xp, ((0, 0), (0, 1), (0, 0), (0, 0))); Hp += 1
    if Wp % 2:
        xp = jnp.pad(xp, ((0, 0), (0, 0), (0, 1), (0, 0))); Wp += 1
    PH, PW = Hp // 2, Wp // 2
    a_max, b_max = (kh - 1) // 2, (kw - 1) // 2
    assert OH - 1 + a_max < PH and OW - 1 + b_max < PW
    m_out = _round_up(OH * PW, 8)
    rp = _round_up(max(PH * PW, m_out + a_max * PW + b_max), 8)
    slabs, _, _ = _parity_slabs(xp, rp, 0.0)

    kernel = functools.partial(_conv_s2_kernel, kh=kh, kw=kw, pw=PW, m_out=m_out)
    out = pl.pallas_call(
        kernel,
        out_shape=jax.ShapeDtypeStruct((N * m_out, cout), jnp.float32),
        grid=(N,),
        in_specs=[pl.BlockSpec((rp, Cin), lambda n: (n, 0))] * 4 + [
            pl.BlockSpec(w.shape, lambda n: (0, 0, 0)),
            pl.BlockSpec((1, cout), lambda n: (0, 0)),
        ],
        out_specs=pl.BlockSpec((m_out, cout), lambda n: (n, 0)),
        compiler_params=pltpu.CompilerParams(dimension_semantics=("parallel",)),
    )(*slabs, w, bias)
    out = out.reshape(N, m_out, cout)[:, :OH * PW].reshape(N, OH, PW, cout)
    return out[:, :, :OW, :]


def max_pool_3x3_s2(x_nhwc, *, k=3, pad=1):
    N, H, W, C = x_nhwc.shape
    OH = (H + 2 * pad - k) // 2 + 1
    OW = (W + 2 * pad - k) // 2 + 1
    xp = jnp.pad(x_nhwc, ((0, 0), (pad, pad), (pad, pad), (0, 0)),
                 constant_values=NEG)
    Hp, Wp = H + 2 * pad, W + 2 * pad
    if Hp % 2:
        xp = jnp.pad(xp, ((0, 0), (0, 1), (0, 0), (0, 0)), constant_values=NEG); Hp += 1
    if Wp % 2:
        xp = jnp.pad(xp, ((0, 0), (0, 0), (0, 1), (0, 0)), constant_values=NEG); Wp += 1
    PH, PW = Hp // 2, Wp // 2
    a_max = b_max = (k - 1) // 2
    assert OH - 1 + a_max < PH and OW - 1 + b_max < PW
    m_out = _round_up(OH * PW, 8)
    rp = _round_up(max(PH * PW, m_out + a_max * PW + b_max), 8)
    slabs, _, _ = _parity_slabs(xp, rp, NEG)

    kernel = functools.partial(_maxpool_s2_kernel, k=k, pw=PW, m_out=m_out)
    out = pl.pallas_call(
        kernel,
        out_shape=jax.ShapeDtypeStruct((N * m_out, C), jnp.float32),
        grid=(N,),
        in_specs=[pl.BlockSpec((rp, C), lambda n: (n, 0))] * 4,
        out_specs=pl.BlockSpec((m_out, C), lambda n: (n, 0)),
        compiler_params=pltpu.CompilerParams(dimension_semantics=("parallel",)),
    )(*slabs)
    out = out.reshape(N, m_out, C)[:, :OH * PW].reshape(N, OH, PW, C)
    return out[:, :, :OW, :]


def conv3x3(x_nhwc, w, bias, residual=None, *, k=3, pad=1):
    """Stride-1 3x3 conv + folded BN (+ optional fused residual) + ReLU."""
    N, H, W, C = x_nhwc.shape
    cout = w.shape[-1]
    OH = H + 2 * pad - k + 1
    OW = W + 2 * pad - k + 1
    xp = jnp.pad(x_nhwc, ((0, 0), (pad, pad), (pad, pad), (0, 0)))
    Hp, Wp = H + 2 * pad, W + 2 * pad
    m_out = _round_up(OH * Wp, 8)
    rp = _round_up(max(Hp * Wp, m_out + (k - 1) * Wp + (k - 1)), 8)
    xf = xp.reshape(N, Hp * Wp, C)
    xf = jnp.pad(xf, ((0, 0), (0, rp - Hp * Wp), (0, 0))).reshape(N * rp, C)

    in_specs = [
        pl.BlockSpec((rp, C), lambda n: (n, 0)),
        pl.BlockSpec(w.shape, lambda n: (0, 0, 0)),
        pl.BlockSpec((1, cout), lambda n: (0, 0)),
    ]
    args = [xf, w, bias]
    if residual is None:
        kernel = functools.partial(_conv_s1_kernel, k=k, pw=Wp, m_out=m_out)
    else:
        # Bring the residual into the same padded/flattened row layout.
        res = jnp.pad(residual, ((0, 0), (0, 0), (0, Wp - OW), (0, 0)))
        res = res.reshape(N, OH * Wp, cout)
        res = jnp.pad(res, ((0, 0), (0, m_out - OH * Wp), (0, 0)))
        args.append(res.reshape(N * m_out, cout))
        in_specs.append(pl.BlockSpec((m_out, cout), lambda n: (n, 0)))
        kernel = functools.partial(_conv_s1_res_kernel, k=k, pw=Wp, m_out=m_out)

    out = pl.pallas_call(
        kernel,
        out_shape=jax.ShapeDtypeStruct((N * m_out, cout), jnp.float32),
        grid=(N,),
        in_specs=in_specs,
        out_specs=pl.BlockSpec((m_out, cout), lambda n: (n, 0)),
        compiler_params=pltpu.CompilerParams(dimension_semantics=("parallel",)),
    )(*args)
    out = out.reshape(N, m_out, cout)[:, :OH * Wp].reshape(N, OH, Wp, cout)
    return out[:, :, :OW, :]


def head_pool_fc(x_nhwc, wfc, bfc, *, feat_dim, num_classes):
    """Fused global average pool + flatten + fc; returns (task_output, features)."""
    N, H, W, C = x_nhwc.shape
    hw = H * W
    xr = x_nhwc.reshape(N, hw, C)
    kernel = functools.partial(_head_kernel, inv_hw=1.0 / hw)
    task_pad, feat_pad = pl.pallas_call(
        kernel,
        out_shape=(jax.ShapeDtypeStruct((N, C), jnp.float32),
                   jax.ShapeDtypeStruct((N, C), jnp.float32)),
        grid=(1,),
        in_specs=[pl.BlockSpec((N, hw, C), lambda i: (0, 0, 0)),
                  pl.BlockSpec((C, C), lambda i: (0, 0)),
                  pl.BlockSpec((1, C), lambda i: (0, 0))],
        out_specs=(pl.BlockSpec((N, C), lambda i: (0, 0)),
                   pl.BlockSpec((N, C), lambda i: (0, 0))),
    )(xr, wfc, bfc)
    return task_pad[:, :num_classes], feat_pad[:, :feat_dim]


# ----------------------------------------------------------------------------
# Parameter construction (deterministic, synthetic) + one-time folding/padding
# ----------------------------------------------------------------------------
def _fold_bn(key, c):
    k1, k2, k3, k4 = jax.random.split(key, 4)
    gamma = 1.0 + 0.1 * jax.random.normal(k1, (c,), jnp.float32)
    beta = 0.1 * jax.random.normal(k2, (c,), jnp.float32)
    mean = 0.1 * jax.random.normal(k3, (c,), jnp.float32)
    var = 0.5 + 0.1 * jnp.abs(jax.random.normal(k4, (c,), jnp.float32))
    scale = gamma / jnp.sqrt(var + 1e-5)
    shift = beta - mean * scale
    return scale.reshape(1, c), shift.reshape(1, c)


def init_params(key, cin=3, width=16, num_classes=2):
    ks = jax.random.split(key, 8)
    params = {
        "w1": 0.1 * jax.random.normal(ks[0], (7, 7, cin, width), jnp.float32),
        "wb1": 0.1 * jax.random.normal(ks[1], (3, 3, width, width), jnp.float32),
        "wb2": 0.1 * jax.random.normal(ks[2], (3, 3, width, width), jnp.float32),
        "wfc": 0.1 * jax.random.normal(ks[3], (width, num_classes), jnp.float32),
        "bfc": 0.1 * jax.random.normal(ks[4], (num_classes,), jnp.float32),
    }
    params["s1"], params["t1"] = _fold_bn(ks[5], width)
    params["sb1"], params["tb1"] = _fold_bn(ks[6], width)
    params["sb2"], params["tb2"] = _fold_bn(ks[7], width)
    return params


def fold_params(p):
    """One-time prep: fold BN scale into conv weights, pad channels to 128 lanes."""
    def pad_last(a, n):
        return jnp.pad(a, [(0, 0)] * (a.ndim - 1) + [(0, n - a.shape[-1])])

    # Stem: (7,7,3,16)*scale -> pad Cout -> (49, 3, 128)
    w1 = p["w1"] * p["s1"].reshape(1, 1, 1, -1)
    w1 = pad_last(w1, LANES).reshape(49, p["w1"].shape[2], LANES)
    b1 = pad_last(p["t1"], LANES)

    def fold_block(w, s, t):
        wf = w * s.reshape(1, 1, 1, -1)
        wf = jnp.pad(wf, ((0, 0), (0, 0), (0, LANES - wf.shape[2]), (0, 0)))
        wf = pad_last(wf, LANES)                       # (3,3,128,128)
        return wf.reshape(9, LANES, LANES), pad_last(t, LANES)

    wb1, bb1 = fold_block(p["wb1"], p["sb1"], p["tb1"])
    wb2, bb2 = fold_block(p["wb2"], p["sb2"], p["tb2"])

    wfc = jnp.pad(p["wfc"], ((0, LANES - p["wfc"].shape[0]),
                             (0, LANES - p["wfc"].shape[1])))
    bfc = pad_last(p["bfc"].reshape(1, -1), LANES)
    return {"w1": w1, "b1": b1, "wb1": wb1, "bb1": bb1,
            "wb2": wb2, "bb2": bb2, "wfc": wfc, "bfc": bfc}


# ----------------------------------------------------------------------------
# FairResNet forward: returns (task_output, features)
# ----------------------------------------------------------------------------
@functools.partial(jax.jit, static_argnames=("feat_dim", "num_classes"))
def fair_resnet_forward(x_nchw, params, *, feat_dim=16, num_classes=2):
    # PyTorch NCHW -> NHWC for the kernels.
    x = jnp.transpose(x_nchw, (0, 2, 3, 1)).astype(jnp.float32)

    # Stem: conv7x7 s2 p3 + BN + ReLU, then maxpool3x3 s2 p1.
    h = conv_stem(x, params["w1"], params["b1"], kh=7, kw=7, pad=3)      # (N,8,8,128)
    h = max_pool_3x3_s2(h)                                               # (N,4,4,128)

    # BasicBlock (identity shortcut): relu(bn2(conv2(relu(bn1(conv1(h))))) + h)
    identity = h
    o = conv3x3(h, params["wb1"], params["bb1"])                         # (N,4,4,128)
    o = conv3x3(o, params["wb2"], params["bb2"], residual=identity)      # (N,4,4,128)

    # Fused global-average-pool + fc -> (task_output, features)
    task_output, features = head_pool_fc(
        o, params["wfc"], params["bfc"],
        feat_dim=feat_dim, num_classes=num_classes)
    return task_output, features


if __name__ == "__main__":
    key = jax.random.PRNGKey(0)
    kx, kp = jax.random.split(key)
    x = jax.random.normal(kx, (2, 3, 16, 16), jnp.float32)   # NCHW like PyTorch
    raw_params = init_params(kp, cin=3, width=16, num_classes=2)
    params = fold_params(raw_params)                          # one-time fold/pad

    task_output, features = fair_resnet_forward(x, params)
    jax.block_until_ready((task_output, features))

    assert task_output.shape == (2, 2), task_output.shape
    assert features.shape == (2, 16), features.shape
    print("KERNEL_OK")
</pallas_src>

<mosaic_0001>
module attributes {stable_mosaic.version = 11 : i64} {
  func.func @_conv_s2_kernel(%arg0: i32, %arg1: memref<128x3xf32, #tpu.memory_space<vmem>>, %arg2: memref<128x3xf32, #tpu.memory_space<vmem>>, %arg3: memref<128x3xf32, #tpu.memory_space<vmem>>, %arg4: memref<128x3xf32, #tpu.memory_space<vmem>>, %arg5: memref<49x3x128xf32, #tpu.memory_space<vmem>>, %arg6: memref<1x128xf32, #tpu.memory_space<vmem>>, %arg7: memref<88x128xf32, #tpu.memory_space<vmem>>) attributes {dimension_semantics = [#tpu.dimension_semantics<parallel>], iteration_bounds = array<i64: 2>, scalar_prefetch = 0 : i64, scratch_operands = 0 : i64, tpu.core_type = #tpu.core_type<tc>, window_params = [{transform_indices = @transform_0, window_bounds = array<i64: 128, 3>}, {transform_indices = @transform_1, window_bounds = array<i64: 128, 3>}, {transform_indices = @transform_2, window_bounds = array<i64: 128, 3>}, {transform_indices = @transform_3, window_bounds = array<i64: 128, 3>}, {pipeline_mode = #tpu.pipeline_mode<synchronous>, transform_indices = @transform_4, window_bounds = array<i64: 49, 3, 128>}, {pipeline_mode = #tpu.pipeline_mode<synchronous>, transform_indices = @transform_5, window_bounds = array<i64: 1, 128>}, {transform_indices = @transform_6, window_bounds = array<i64: 88, 128>}]} {
    %cst = arith.constant 0.000000e+00 : f32
    %0 = vector.broadcast %cst : f32 to vector<88x128xf32>
    %c0 = arith.constant 0 : index
    %c0_0 = arith.constant 0 : index
    %1 = vector.load %arg1[%c0, %c0_0] : memref<128x3xf32, #tpu.memory_space<vmem>>, vector<88x3xf32>
    %c0_1 = arith.constant 0 : index
    %c0_2 = arith.constant 0 : index
    %c0_3 = arith.constant 0 : index
    %2 = vector.load %arg5[%c0_1, %c0_2, %c0_3] : memref<49x3x128xf32, #tpu.memory_space<vmem>>, vector<1x3x128xf32>
    %3 = vector.shape_cast %2 : vector<1x3x128xf32> to vector<3x128xf32>
    %cst_4 = arith.constant dense<0.000000e+00> : vector<88x128xf32>
    %4 = tpu.matmul %1, %3, %cst_4 {dimension_numbers = #tpu.dot_dimension_numbers<[1], [0], [0], [1], [0, 0, 1, 1], [], []>} : vector<88x3xf32>, vector<3x128xf32>, vector<88x128xf32> -> vector<88x128xf32>
    %5 = arith.addf %0, %4 : vector<88x128xf32>
    %c0_5 = arith.constant 0 : index
    %c0_6 = arith.constant 0 : index
    %6 = vector.load %arg2[%c0_5, %c0_6] : memref<128x3xf32, #tpu.memory_space<vmem>>, vector<88x3xf32>
    %c1 = arith.constant 1 : index
    %c0_7 = arith.constant 0 : index
    %c0_8 = arith.constant 0 : index
    %7 = vector.load %arg5[%c1, %c0_7, %c0_8] : memref<49x3x128xf32, #tpu.memory_space<vmem>>, vector<1x3x128xf32>
    %8 = vector.shape_cast %7 : vector<1x3x128xf32> to vector<3x128xf32>
    %cst_9 = arith.constant dense<0.000000e+00> : vector<88x128xf32>
    %9 = tpu.matmul %6, %8, %cst_9 {dimension_numbers = #tpu.dot_dimension_numbers<[1], [0], [0], [1], [0, 0, 1, 1], [], []>} : vector<88x3xf32>, vector<3x128xf32>, vector<88x128xf32> -> vector<88x128xf32>
    %10 = arith.addf %5, %9 : vector<88x128xf32>
    %c1_10 = arith.constant 1 : index
    %c0_11 = arith.constant 0 : index
    %11 = vector.load %arg1[%c1_10, %c0_11] : memref<128x3xf32, #tpu.memory_space<vmem>>, vector<88x3xf32>
    %c2 = arith.constant 2 : index
    %c0_12 = arith.constant 0 : index
    %c0_13 = arith.constant 0 : index
    %12 = vector.load %arg5[%c2, %c0_12, %c0_13] : memref<49x3x128xf32, #tpu.memory_space<vmem>>, vector<1x3x128xf32>
    %13 = vector.shape_cast %12 : vector<1x3x128xf32> to vector<3x128xf32>
    %cst_14 = arith.constant dense<0.000000e+00> : vector<88x128xf32>
    %14 = tpu.matmul %11, %13, %cst_14 {dimension_numbers = #tpu.dot_dimension_numbers<[1], [0], [0], [1], [0, 0, 1, 1], [], []>} : vector<88x3xf32>, vector<3x128xf32>, vector<88x128xf32> -> vector<88x128xf32>
    %15 = arith.addf %10, %14 : vector<88x128xf32>
    %c1_15 = arith.constant 1 : index
    %c0_16 = arith.constant 0 : index
    %16 = vector.load %arg2[%c1_15, %c0_16] : memref<128x3xf32, #tpu.memory_space<vmem>>, vector<88x3xf32>
    %c3 = arith.constant 3 : index
    %c0_17 = arith.constant 0 : index
    %c0_18 = arith.constant 0 : index
    %17 = vector.load %arg5[%c3, %c0_17, %c0_18] : memref<49x3x128xf32, #tpu.memory_space<vmem>>, vector<1x3x128xf32>
    %18 = vector.shape_cast %17 : vector<1x3x128xf32> to vector<3x128xf32>
    %cst_19 = arith.constant dense<0.000000e+00> : vector<88x128xf32>
    %19 = tpu.matmul %16, %18, %cst_19 {dimension_numbers = #tpu.dot_dimension_numbers<[1], [0], [0], [1], [0, 0, 1, 1], [], []>} : vector<88x3xf32>, vector<3x128xf32>, vector<88x128xf32> -> vector<88x128xf32>
    %20 = arith.addf %15, %19 : vector<88x128xf32>
    %c2_20 = arith.constant 2 : index
    %c0_21 = arith.constant 0 : index
    %21 = vector.load %arg1[%c2_20, %c0_21] : memref<128x3xf32, #tpu.memory_space<vmem>>, vector<88x3xf32>
    %c4 = arith.constant 4 : index
    %c0_22 = arith.constant 0 : index
    %c0_23 = arith.constant 0 : index
    %22 = vector.load %arg5[%c4, %c0_22, %c0_23] : memref<49x3x128xf32, #tpu.memory_space<vmem>>, vector<1x3x128xf32>
    %23 = vector.shape_cast %22 : vector<1x3x128xf32> to vector<3x128xf32>
    %cst_24 = arith.constant dense<0.000000e+00> : vector<88x128xf32>
    %24 = tpu.matmul %21, %23, %cst_24 {dimension_numbers = #tpu.dot_dimension_numbers<[1], [0], [0], [1], [0, 0, 1, 1], [], []>} : vector<88x3xf32>, vector<3x128xf32>, vector<88x128xf32> -> vector<88x128xf32>
    %25 = arith.addf %20, %24 : vector<88x128xf32>
    %c2_25 = arith.constant 2 : index
    %c0_26 = arith.constant 0 : index
    %26 = vector.load %arg2[%c2_25, %c0_26] : memref<128x3xf32, #tpu.memory_space<vmem>>, vector<88x3xf32>
    %c5 = arith.constant 5 : index
    %c0_27 = arith.constant 0 : index
    %c0_28 = arith.constant 0 : index
    %27 = vector.load %arg5[%c5, %c0_27, %c0_28] : memref<49x3x128xf32, #tpu.memory_space<vmem>>, vector<1x3x128xf32>
    %28 = vector.shape_cast %27 : vector<1x3x128xf32> to vector<3x128xf32>
    %cst_29 = arith.constant dense<0.000000e+00> : vector<88x128xf32>
    %29 = tpu.matmul %26, %28, %cst_29 {dimension_numbers = #tpu.dot_dimension_numbers<[1], [0], [0], [1], [0, 0, 1, 1], [], []>} : vector<88x3xf32>, vector<3x128xf32>, vector<88x128xf32> -> vector<88x128xf32>
    %30 = arith.addf %25, %29 : vector<88x128xf32>
    %c3_30 = arith.constant 3 : index
    %c0_31 = arith.constant 0 : index
    %31 = vector.load %arg1[%c3_30, %c0_31] : memref<128x3xf32, #tpu.memory_space<vmem>>, vector<88x3xf32>
    %c6 = arith.constant 6 : index
    %c0_32 = arith.constant 0 : index
    %c0_33 = arith.constant 0 : index
    %32 = vector.load %arg5[%c6, %c0_32, %c0_33] : memref<49x3x128xf32, #tpu.memory_space<vmem>>, vector<1x3x128xf32>
    %33 = vector.shape_cast %32 : vector<1x3x128xf32> to vector<3x128xf32>
    %cst_34 = arith.constant dense<0.000000e+00> : vector<88x128xf32>
    %34 = tpu.matmul %31, %33, %cst_34 {dimension_numbers = #tpu.dot_dimension_numbers<[1], [0], [0], [1], [0, 0, 1, 1], [], []>} : vector<88x3xf32>, vector<3x128xf32>, vector<88x128xf32> -> vector<88x128xf32>
    %35 = arith.addf %30, %34 : vector<88x128xf32>
    %c0_35 = arith.constant 0 : index
    %c0_36 = arith.constant 0 : index
    %36 = vector.load %arg3[%c0_35, %c0_36] : memref<128x3xf32, #tpu.memory_space<vmem>>, vector<88x3xf32>
    %c7 = arith.constant 7 : index
    %c0_37 = arith.constant 0 : index
    %c0_38 = arith.constant 0 : index
    %37 = vector.load %arg5[%c7, %c0_37, %c0_38] : memref<49x3x128xf32, #tpu.memory_space<vmem>>, vector<1x3x128xf32>
    %38 = vector.shape_cast %37 : vector<1x3x128xf32> to vector<3x128xf32>
    %cst_39 = arith.constant dense<0.000000e+00> : vector<88x128xf32>
    %39 = tpu.matmul %36, %38, %cst_39 {dimension_numbers = #tpu.dot_dimension_numbers<[1], [0], [0], [1], [0, 0, 1, 1], [], []>} : vector<88x3xf32>, vector<3x128xf32>, vector<88x128xf32> -> vector<88x128xf32>
    %40 = arith.addf %35, %39 : vector<88x128xf32>
    %c0_40 = arith.constant 0 : index
    %c0_41 = arith.constant 0 : index
    %41 = vector.load %arg4[%c0_40, %c0_41] : memref<128x3xf32, #tpu.memory_space<vmem>>, vector<88x3xf32>
    %c8 = arith.constant 8 : index
    %c0_42 = arith.constant 0 : index
    %c0_43 = arith.constant 0 : index
    %42 = vector.load %arg5[%c8, %c0_42, %c0_43] : memref<49x3x128xf32, #tpu.memory_space<vmem>>, vector<1x3x128xf32>
    %43 = vector.shape_cast %42 : vector<1x3x128xf32> to vector<3x128xf32>
    %cst_44 = arith.constant dense<0.000000e+00> : vector<88x128xf32>
    %44 = tpu.matmul %41, %43, %cst_44 {dimension_numbers = #tpu.dot_dimension_numbers<[1], [0], [0], [1], [0, 0, 1, 1], [], []>} : vector<88x3xf32>, vector<3x128xf32>, vector<88x128xf32> -> vector<88x128xf32>
    %45 = arith.addf %40, %44 : vector<88x128xf32>
    %c1_45 = arith.constant 1 : index
    %c0_46 = arith.constant 0 : index
    %46 = vector.load %arg3[%c1_45, %c0_46] : memref<128x3xf32, #tpu.memory_space<vmem>>, vector<88x3xf32>
    %c9 = arith.constant 9 : index
    %c0_47 = arith.constant 0 : index
    %c0_48 = arith.constant 0 : index
    %47 = vector.load %arg5[%c9, %c0_47, %c0_48] : memref<49x3x128xf32, #tpu.memory_space<vmem>>, vector<1x3x128xf32>
    %48 = vector.shape_cast %47 : vector<1x3x128xf32> to vector<3x128xf32>
    %cst_49 = arith.constant dense<0.000000e+00> : vector<88x128xf32>
    %49 = tpu.matmul %46, %48, %cst_49 {dimension_numbers = #tpu.dot_dimension_numbers<[1], [0], [0], [1], [0, 0, 1, 1], [], []>} : vector<88x3xf32>, vector<3x128xf32>, vector<88x128xf32> -> vector<88x128xf32>
    %50 = arith.addf %45, %49 : vector<88x128xf32>
    %c1_50 = arith.constant 1 : index
    %c0_51 = arith.constant 0 : index
    %51 = vector.load %arg4[%c1_50, %c0_51] : memref<128x3xf32, #tpu.memory_space<vmem>>, vector<88x3xf32>
    %c10 = arith.constant 10 : index
    %c0_52 = arith.constant 0 : index
    %c0_53 = arith.constant 0 : index
    %52 = vector.load %arg5[%c10, %c0_52, %c0_53] : memref<49x3x128xf32, #tpu.memory_space<vmem>>, vector<1x3x128xf32>
    %53 = vector.shape_cast %52 : vector<1x3x128xf32> to vector<3x128xf32>
    %cst_54 = arith.constant dense<0.000000e+00> : vector<88x128xf32>
    %54 = tpu.matmul %51, %53, %cst_54 {dimension_numbers = #tpu.dot_dimension_numbers<[1], [0], [0], [1], [0, 0, 1, 1], [], []>} : vector<88x3xf32>, vector<3x128xf32>, vector<88x128xf32> -> vector<88x128xf32>
    %55 = arith.addf %50, %54 : vector<88x128xf32>
    %c2_55 = arith.constant 2 : index
    %c0_56 = arith.constant 0 : index
    %56 = vector.load %arg3[%c2_55, %c0_56] : memref<128x3xf32, #tpu.memory_space<vmem>>, vector<88x3xf32>
    %c11 = arith.constant 11 : index
    %c0_57 = arith.constant 0 : index
    %c0_58 = arith.constant 0 : index
    %57 = vector.load %arg5[%c11, %c0_57, %c0_58] : memref<49x3x128xf32, #tpu.memory_space<vmem>>, vector<1x3x128xf32>
    %58 = vector.shape_cast %57 : vector<1x3x128xf32> to vector<3x128xf32>
    %cst_59 = arith.constant dense<0.000000e+00> : vector<88x128xf32>
    %59 = tpu.matmul %56, %58, %cst_59 {dimension_numbers = #tpu.dot_dimension_numbers<[1], [0], [0], [1], [0, 0, 1, 1], [], []>} : vector<88x3xf32>, vector<3x128xf32>, vector<88x128xf32> -> vector<88x128xf32>
    %60 = arith.addf %55, %59 : vector<88x128xf32>
    %c2_60 = arith.constant 2 : index
    %c0_61 = arith.constant 0 : index
    %61 = vector.load %arg4[%c2_60, %c0_61] : memref<128x3xf32, #tpu.memory_space<vmem>>, vector<88x3xf32>
    %c12 = arith.constant 12 : index
    %c0_62 = arith.constant 0 : index
    %c0_63 = arith.constant 0 : index
    %62 = vector.load %arg5[%c12, %c0_62, %c0_63] : memref<49x3x128xf32, #tpu.memory_space<vmem>>, vector<1x3x128xf32>
    %63 = vector.shape_cast %62 : vector<1x3x128xf32> to vector<3x128xf32>
    %cst_64 = arith.constant dense<0.000000e+00> : vector<88x128xf32>
    %64 = tpu.matmul %61, %63, %cst_64 {dimension_numbers = #tpu.dot_dimension_numbers<[1], [0], [0], [1], [0, 0, 1, 1], [], []>} : vector<88x3xf32>, vector<3x128xf32>, vector<88x128xf32> -> vector<88x128xf32>
    %65 = arith.addf %60, %64 : vector<88x128xf32>
    %c3_65 = arith.constant 3 : index
    %c0_66 = arith.constant 0 : index
    %66 = vector.load %arg3[%c3_65, %c0_66] : memref<128x3xf32, #tpu.memory_space<vmem>>, vector<88x3xf32>
    %c13 = arith.constant 13 : index
    %c0_67 = arith.constant 0 : index
    %c0_68 = arith.constant 0 : index
    %67 = vector.load %arg5[%c13, %c0_67, %c0_68] : memref<49x3x128xf32, #tpu.memory_space<vmem>>, vector<1x3x128xf32>
    %68 = vector.shape_cast %67 : vector<1x3x128xf32> to vector<3x128xf32>
    %cst_69 = arith.constant dense<0.000000e+00> : vector<88x128xf32>
    %69 = tpu.matmul %66, %68, %cst_69 {dimension_numbers = #tpu.dot_dimension_numbers<[1], [0], [0], [1], [0, 0, 1, 1], [], []>} : vector<88x3xf32>, vector<3x128xf32>, vector<88x128xf32> -> vector<88x128xf32>
    %70 = arith.addf %65, %69 : vector<88x128xf32>
    %c11_70 = arith.constant 11 : index
    %c0_71 = arith.constant 0 : index
    %71 = vector.load %arg1[%c11_70, %c0_71] : memref<128x3xf32, #tpu.memory_space<vmem>>, vector<88x3xf32>
    %c14 = arith.constant 14 : index
    %c0_72 = arith.constant 0 : index
    %c0_73 = arith.constant 0 : index
    %72 = vector.load %arg5[%c14, %c0_72, %c0_73] : memref<49x3x128xf32, #tpu.memory_space<vmem>>, vector<1x3x128xf32>
    %73 = vector.shape_cast %72 : vector<1x3x128xf32> to vector<3x128xf32>
    %cst_74 = arith.constant dense<0.000000e+00> : vector<88x128xf32>
    %74 = tpu.matmul %71, %73, %cst_74 {dimension_numbers = #tpu.dot_dimension_numbers<[1], [0], [0], [1], [0, 0, 1, 1], [], []>} : vector<88x3xf32>, vector<3x128xf32>, vector<88x128xf32> -> vector<88x128xf32>
    %75 = arith.addf %70, %74 : vector<88x128xf32>
    %c11_75 = arith.constant 11 : index
    %c0_76 = arith.constant 0 : index
    %76 = vector.load %arg2[%c11_75, %c0_76] : memref<128x3xf32, #tpu.memory_space<vmem>>, vector<88x3xf32>
    %c15 = arith.constant 15 : index
    %c0_77 = arith.constant 0 : index
    %c0_78 = arith.constant 0 : index
    %77 = vector.load %arg5[%c15, %c0_77, %c0_78] : memref<49x3x128xf32, #tpu.memory_space<vmem>>, vector<1x3x128xf32>
    %78 = vector.shape_cast %77 : vector<1x3x128xf32> to vector<3x128xf32>
    %cst_79 = arith.constant dense<0.000000e+00> : vector<88x128xf32>
    %79 = tpu.matmul %76, %78, %cst_79 {dimension_numbers = #tpu.dot_dimension_numbers<[1], [0], [0], [1], [0, 0, 1, 1], [], []>} : vector<88x3xf32>, vector<3x128xf32>, vector<88x128xf32> -> vector<88x128xf32>
    %80 = arith.addf %75, %79 : vector<88x128xf32>
    %c12_80 = arith.constant 12 : index
    %c0_81 = arith.constant 0 : index
    %81 = vector.load %arg1[%c12_80, %c0_81] : memref<128x3xf32, #tpu.memory_space<vmem>>, vector<88x3xf32>
    %c16 = arith.constant 16 : index
    %c0_82 = arith.constant 0 : index
    %c0_83 = arith.constant 0 : index
    %82 = vector.load %arg5[%c16, %c0_82, %c0_83] : memref<49x3x128xf32, #tpu.memory_space<vmem>>, vector<1x3x128xf32>
    %83 = vector.shape_cast %82 : vector<1x3x128xf32> to vector<3x128xf32>
    %cst_84 = arith.constant dense<0.000000e+00> : vector<88x128xf32>
    %84 = tpu.matmul %81, %83, %cst_84 {dimension_numbers = #tpu.dot_dimension_numbers<[1], [0], [0], [1], [0, 0, 1, 1], [], []>} : vector<88x3xf32>, vector<3x128xf32>, vector<88x128xf32> -> vector<88x128xf32>
    %85 = arith.addf %80, %84 : vector<88x128xf32>
    %c12_85 = arith.constant 12 : index
    %c0_86 = arith.constant 0 : index
    %86 = vector.load %arg2[%c12_85, %c0_86] : memref<128x3xf32, #tpu.memory_space<vmem>>, vector<88x3xf32>
    %c17 = arith.constant 17 : index
    %c0_87 = arith.constant 0 : index
    %c0_88 = arith.constant 0 : index
    %87 = vector.load %arg5[%c17, %c0_87, %c0_88] : memref<49x3x128xf32, #tpu.memory_space<vmem>>, vector<1x3x128xf32>
    %88 = vector.shape_cast %87 : vector<1x3x128xf32> to vector<3x128xf32>
    %cst_89 = arith.constant dense<0.000000e+00> : vector<88x128xf32>
    %89 = tpu.matmul %86, %88, %cst_89 {dimension_numbers = #tpu.dot_dimension_numbers<[1], [0], [0], [1], [0, 0, 1, 1], [], []>} : vector<88x3xf32>, vector<3x128xf32>, vector<88x128xf32> -> vector<88x128xf32>
    %90 = arith.addf %85, %89 : vector<88x128xf32>
    %c13_90 = arith.constant 13 : index
    %c0_91 = arith.constant 0 : index
    %91 = vector.load %arg1[%c13_90, %c0_91] : memref<128x3xf32, #tpu.memory_space<vmem>>, vector<88x3xf32>
    %c18 = arith.constant 18 : index
    %c0_92 = arith.constant 0 : index
    %c0_93 = arith.constant 0 : index
    %92 = vector.load %arg5[%c18, %c0_92, %c0_93] : memref<49x3x128xf32, #tpu.memory_space<vmem>>, vector<1x3x128xf32>
    %93 = vector.shape_cast %92 : vector<1x3x128xf32> to vector<3x128xf32>
    %cst_94 = arith.constant dense<0.000000e+00> : vector<88x128xf32>
    %94 = tpu.matmul %91, %93, %cst_94 {dimension_numbers = #tpu.dot_dimension_numbers<[1], [0], [0], [1], [0, 0, 1, 1], [], []>} : vector<88x3xf32>, vector<3x128xf32>, vector<88x128xf32> -> vector<88x128xf32>
    %95 = arith.addf %90, %94 : vector<88x128xf32>
    %c13_95 = arith.constant 13 : index
    %c0_96 = arith.constant 0 : index
    %96 = vector.load %arg2[%c13_95, %c0_96] : memref<128x3xf32, #tpu.memory_space<vmem>>, vector<88x3xf32>
    %c19 = arith.constant 19 : index
    %c0_97 = arith.constant 0 : index
    %c0_98 = arith.constant 0 : index
    %97 = vector.load %arg5[%c19, %c0_97, %c0_98] : memref<49x3x128xf32, #tpu.memory_space<vmem>>, vector<1x3x128xf32>
    %98 = vector.shape_cast %97 : vector<1x3x128xf32> to vector<3x128xf32>
    %cst_99 = arith.constant dense<0.000000e+00> : vector<88x128xf32>
    %99 = tpu.matmul %96, %98, %cst_99 {dimension_numbers = #tpu.dot_dimension_numbers<[1], [0], [0], [1], [0, 0, 1, 1], [], []>} : vector<88x3xf32>, vector<3x128xf32>, vector<88x128xf32> -> vector<88x128xf32>
    %100 = arith.addf %95, %99 : vector<88x128xf32>
    %c14_100 = arith.constant 14 : index
    %c0_101 = arith.constant 0 : index
    %101 = vector.load %arg1[%c14_100, %c0_101] : memref<128x3xf32, #tpu.memory_space<vmem>>, vector<88x3xf32>
    %c20 = arith.constant 20 : index
    %c0_102 = arith.constant 0 : index
    %c0_103 = arith.constant 0 : index
    %102 = vector.load %arg5[%c20, %c0_102, %c0_103] : memref<49x3x128xf32, #tpu.memory_space<vmem>>, vector<1x3x128xf32>
    %103 = vector.shape_cast %102 : vector<1x3x128xf32> to vector<3x128xf32>
    %cst_104 = arith.constant dense<0.000000e+00> : vector<88x128xf32>
    %104 = tpu.matmul %101, %103, %cst_104 {dimension_numbers = #tpu.dot_dimension_numbers<[1], [0], [0], [1], [0, 0, 1, 1], [], []>} : vector<88x3xf32>, vector<3x128xf32>, vector<88x128xf32> -> vector<88x128xf32>
    %105 = arith.addf %100, %104 : vector<88x128xf32>
    %c11_105 = arith.constant 11 : index
    %c0_106 = arith.constant 0 : index
    %106 = vector.load %arg3[%c11_105, %c0_106] : memref<128x3xf32, #tpu.memory_space<vmem>>, vector<88x3xf32>
    %c21 = arith.constant 21 : index
    %c0_107 = arith.constant 0 : index
    %c0_108 = arith.constant 0 : index
    %107 = vector.load %arg5[%c21, %c0_107, %c0_108] : memref<49x3x128xf32, #tpu.memory_space<vmem>>, vector<1x3x128xf32>
    %108 = vector.shape_cast %107 : vector<1x3x128xf32> to vector<3x128xf32>
    %cst_109 = arith.constant dense<0.000000e+00> : vector<88x128xf32>
    %109 = tpu.matmul %106, %108, %cst_109 {dimension_numbers = #tpu.dot_dimension_numbers<[1], [0], [0], [1], [0, 0, 1, 1], [], []>} : vector<88x3xf32>, vector<3x128xf32>, vector<88x128xf32> -> vector<88x128xf32>
    %110 = arith.addf %105, %109 : vector<88x128xf32>
    %c11_110 = arith.constant 11 : index
    %c0_111 = arith.constant 0 : index
    %111 = vector.load %arg4[%c11_110, %c0_111] : memref<128x3xf32, #tpu.memory_space<vmem>>, vector<88x3xf32>
    %c22 = arith.constant 22 : index
    %c0_112 = arith.constant 0 : index
    %c0_113 = arith.constant 0 : index
    %112 = vector.load %arg5[%c22, %c0_112, %c0_113] : memref<49x3x128xf32, #tpu.memory_space<vmem>>, vector<1x3x128xf32>
    %113 = vector.shape_cast %112 : vector<1x3x128xf32> to vector<3x128xf32>
    %cst_114 = arith.constant dense<0.000000e+00> : vector<88x128xf32>
    %114 = tpu.matmul %111, %113, %cst_114 {dimension_numbers = #tpu.dot_dimension_numbers<[1], [0], [0], [1], [0, 0, 1, 1], [], []>} : vector<88x3xf32>, vector<3x128xf32>, vector<88x128xf32> -> vector<88x128xf32>
    %115 = arith.addf %110, %114 : vector<88x128xf32>
    %c12_115 = arith.constant 12 : index
    %c0_116 = arith.constant 0 : index
    %116 = vector.load %arg3[%c12_115, %c0_116] : memref<128x3xf32, #tpu.memory_space<vmem>>, vector<88x3xf32>
    %c23 = arith.constant 23 : index
    %c0_117 = arith.constant 0 : index
    %c0_118 = arith.constant 0 : index
    %117 = vector.load %arg5[%c23, %c0_117, %c0_118] : memref<49x3x128xf32, #tpu.memory_space<vmem>>, vector<1x3x128xf32>
    %118 = vector.shape_cast %117 : vector<1x3x128xf32> to vector<3x128xf32>
    %cst_119 = arith.constant dense<0.000000e+00> : vector<88x128xf32>
    %119 = tpu.matmul %116, %118, %cst_119 {dimension_numbers = #tpu.dot_dimension_numbers<[1], [0], [0], [1], [0, 0, 1, 1], [], []>} : vector<88x3xf32>, vector<3x128xf32>, vector<88x128xf32> -> vector<88x128xf32>
    %120 = arith.addf %115, %119 : vector<88x128xf32>
    %c12_120 = arith.constant 12 : index
    %c0_121 = arith.constant 0 : index
    %121 = vector.load %arg4[%c12_120, %c0_121] : memref<128x3xf32, #tpu.memory_space<vmem>>, vector<88x3xf32>
    %c24 = arith.constant 24 : index
    %c0_122 = arith.constant 0 : index
    %c0_123 = arith.constant 0 : index
    %122 = vector.load %arg5[%c24, %c0_122, %c0_123] : memref<49x3x128xf32, #tpu.memory_space<vmem>>, vector<1x3x128xf32>
    %123 = vector.shape_cast %122 : vector<1x3x128xf32> to vector<3x128xf32>
    %cst_124 = arith.constant dense<0.000000e+00> : vector<88x128xf32>
    %124 = tpu.matmul %121, %123, %cst_124 {dimension_numbers = #tpu.dot_dimension_numbers<[1], [0], [0], [1], [0, 0, 1, 1], [], []>} : vector<88x3xf32>, vector<3x128xf32>, vector<88x128xf32> -> vector<88x128xf32>
    %125 = arith.addf %120, %124 : vector<88x128xf32>
    %c13_125 = arith.constant 13 : index
    %c0_126 = arith.constant 0 : index
    %126 = vector.load %arg3[%c13_125, %c0_126] : memref<128x3xf32, #tpu.memory_space<vmem>>, vector<88x3xf32>
    %c25 = arith.constant 25 : index
    %c0_127 = arith.constant 0 : index
    %c0_128 = arith.constant 0 : index
    %127 = vector.load %arg5[%c25, %c0_127, %c0_128] : memref<49x3x128xf32, #tpu.memory_space<vmem>>, vector<1x3x128xf32>
    %128 = vector.shape_cast %127 : vector<1x3x128xf32> to vector<3x128xf32>
    %cst_129 = arith.constant dense<0.000000e+00> : vector<88x128xf32>
    %129 = tpu.matmul %126, %128, %cst_129 {dimension_numbers = #tpu.dot_dimension_numbers<[1], [0], [0], [1], [0, 0, 1, 1], [], []>} : vector<88x3xf32>, vector<3x128xf32>, vector<88x128xf32> -> vector<88x128xf32>
    %130 = arith.addf %125, %129 : vector<88x128xf32>
    %c13_130 = arith.constant 13 : index
    %c0_131 = arith.constant 0 : index
    %131 = vector.load %arg4[%c13_130, %c0_131] : memref<128x3xf32, #tpu.memory_space<vmem>>, vector<88x3xf32>
    %c26 = arith.constant 26 : index
    %c0_132 = arith.constant 0 : index
    %c0_133 = arith.constant 0 : index
    %132 = vector.load %arg5[%c26, %c0_132, %c0_133] : memref<49x3x128xf32, #tpu.memory_space<vmem>>, vector<1x3x128xf32>
    %133 = vector.shape_cast %132 : vector<1x3x128xf32> to vector<3x128xf32>
    %cst_134 = arith.constant dense<0.000000e+00> : vector<88x128xf32>
    %134 = tpu.matmul %131, %133, %cst_134 {dimension_numbers = #tpu.dot_dimension_numbers<[1], [0], [0], [1], [0, 0, 1, 1], [], []>} : vector<88x3xf32>, vector<3x128xf32>, vector<88x128xf32> -> vector<88x128xf32>
    %135 = arith.addf %130, %134 : vector<88x128xf32>
    %c14_135 = arith.constant 14 : index
    %c0_136 = arith.constant 0 : index
    %136 = vector.load %arg3[%c14_135, %c0_136] : memref<128x3xf32, #tpu.memory_space<vmem>>, vector<88x3xf32>
    %c27 = arith.constant 27 : index
    %c0_137 = arith.constant 0 : index
    %c0_138 = arith.constant 0 : index
    %137 = vector.load %arg5[%c27, %c0_137, %c0_138] : memref<49x3x128xf32, #tpu.memory_space<vmem>>, vector<1x3x128xf32>
    %138 = vector.shape_cast %137 : vector<1x3x128xf32> to vector<3x128xf32>
    %cst_139 = arith.constant dense<0.000000e+00> : vector<88x128xf32>
    %139 = tpu.matmul %136, %138, %cst_139 {dimension_numbers = #tpu.dot_dimension_numbers<[1], [0], [0], [1], [0, 0, 1, 1], [], []>} : vector<88x3xf32>, vector<3x128xf32>, vector<88x128xf32> -> vector<88x128xf32>
    %140 = arith.addf %135, %139 : vector<88x128xf32>
    %c22_140 = arith.constant 22 : index
    %c0_141 = arith.constant 0 : index
    %141 = vector.load %arg1[%c22_140, %c0_141] : memref<128x3xf32, #tpu.memory_space<vmem>>, vector<88x3xf32>
    %c28 = arith.constant 28 : index
    %c0_142 = arith.constant 0 : index
    %c0_143 = arith.constant 0 : index
    %142 = vector.load %arg5[%c28, %c0_142, %c0_143] : memref<49x3x128xf32, #tpu.memory_space<vmem>>, vector<1x3x128xf32>
    %143 = vector.shape_cast %142 : vector<1x3x128xf32> to vector<3x128xf32>
    %cst_144 = arith.constant dense<0.000000e+00> : vector<88x128xf32>
    %144 = tpu.matmul %141, %143, %cst_144 {dimension_numbers = #tpu.dot_dimension_numbers<[1], [0], [0], [1], [0, 0, 1, 1], [], []>} : vector<88x3xf32>, vector<3x128xf32>, vector<88x128xf32> -> vector<88x128xf32>
    %145 = arith.addf %140, %144 : vector<88x128xf32>
    %c22_145 = arith.constant 22 : index
    %c0_146 = arith.constant 0 : index
    %146 = vector.load %arg2[%c22_145, %c0_146] : memref<128x3xf32, #tpu.memory_space<vmem>>, vector<88x3xf32>
    %c29 = arith.constant 29 : index
    %c0_147 = arith.constant 0 : index
    %c0_148 = arith.constant 0 : index
    %147 = vector.load %arg5[%c29, %c0_147, %c0_148] : memref<49x3x128xf32, #tpu.memory_space<vmem>>, vector<1x3x128xf32>
    %148 = vector.shape_cast %147 : vector<1x3x128xf32> to vector<3x128xf32>
    %cst_149 = arith.constant dense<0.000000e+00> : vector<88x128xf32>
    %149 = tpu.matmul %146, %148, %cst_149 {dimension_numbers = #tpu.dot_dimension_numbers<[1], [0], [0], [1], [0, 0, 1, 1], [], []>} : vector<88x3xf32>, vector<3x128xf32>, vector<88x128xf32> -> vector<88x128xf32>
    %150 = arith.addf %145, %149 : vector<88x128xf32>
    %c23_150 = arith.constant 23 : index
    %c0_151 = arith.constant 0 : index
    %151 = vector.load %arg1[%c23_150, %c0_151] : memref<128x3xf32, #tpu.memory_space<vmem>>, vector<88x3xf32>
    %c30 = arith.constant 30 : index
    %c0_152 = arith.constant 0 : index
    %c0_153 = arith.constant 0 : index
    %152 = vector.load %arg5[%c30, %c0_152, %c0_153] : memref<49x3x128xf32, #tpu.memory_space<vmem>>, vector<1x3x128xf32>
    %153 = vector.shape_cast %152 : vector<1x3x128xf32> to vector<3x128xf32>
    %cst_154 = arith.constant dense<0.000000e+00> : vector<88x128xf32>
    %154 = tpu.matmul %151, %153, %cst_154 {dimension_numbers = #tpu.dot_dimension_numbers<[1], [0], [0], [1], [0, 0, 1, 1], [], []>} : vector<88x3xf32>, vector<3x128xf32>, vector<88x128xf32> -> vector<88x128xf32>
    %155 = arith.addf %150, %154 : vector<88x128xf32>
    %c23_155 = arith.constant 23 : index
    %c0_156 = arith.constant 0 : index
    %156 = vector.load %arg2[%c23_155, %c0_156] : memref<128x3xf32, #tpu.memory_space<vmem>>, vector<88x3xf32>
    %c31 = arith.constant 31 : index
    %c0_157 = arith.constant 0 : index
    %c0_158 = arith.constant 0 : index
    %157 = vector.load %arg5[%c31, %c0_157, %c0_158] : memref<49x3x128xf32, #tpu.memory_space<vmem>>, vector<1x3x128xf32>
    %158 = vector.shape_cast %157 : vector<1x3x128xf32> to vector<3x128xf32>
    %cst_159 = arith.constant dense<0.000000e+00> : vector<88x128xf32>
    %159 = tpu.matmul %156, %158, %cst_159 {dimension_numbers = #tpu.dot_dimension_numbers<[1], [0], [0], [1], [0, 0, 1, 1], [], []>} : vector<88x3xf32>, vector<3x128xf32>, vector<88x128xf32> -> vector<88x128xf32>
    %160 = arith.addf %155, %159 : vector<88x128xf32>
    %c24_160 = arith.constant 24 : index
    %c0_161 = arith.constant 0 : index
    %161 = vector.load %arg1[%c24_160, %c0_161] : memref<128x3xf32, #tpu.memory_space<vmem>>, vector<88x3xf32>
    %c32 = arith.constant 32 : index
    %c0_162 = arith.constant 0 : index
    %c0_163 = arith.constant 0 : index
    %162 = vector.load %arg5[%c32, %c0_162, %c0_163] : memref<49x3x128xf32, #tpu.memory_space<vmem>>, vector<1x3x128xf32>
    %163 = vector.shape_cast %162 : vector<1x3x128xf32> to vector<3x128xf32>
    %cst_164 = arith.constant dense<0.000000e+00> : vector<88x128xf32>
    %164 = tpu.matmul %161, %163, %cst_164 {dimension_numbers = #tpu.dot_dimension_numbers<[1], [0], [0], [1], [0, 0, 1, 1], [], []>} : vector<88x3xf32>, vector<3x128xf32>, vector<88x128xf32> -> vector<88x128xf32>
    %165 = arith.addf %160, %164 : vector<88x128xf32>
    %c24_165 = arith.constant 24 : index
    %c0_166 = arith.constant 0 : index
    %166 = vector.load %arg2[%c24_165, %c0_166] : memref<128x3xf32, #tpu.memory_space<vmem>>, vector<88x3xf32>
    %c33 = arith.constant 33 : index
    %c0_167 = arith.constant 0 : index
    %c0_168 = arith.constant 0 : index
    %167 = vector.load %arg5[%c33, %c0_167, %c0_168] : memref<49x3x128xf32, #tpu.memory_space<vmem>>, vector<1x3x128xf32>
    %168 = vector.shape_cast %167 : vector<1x3x128xf32> to vector<3x128xf32>
    %cst_169 = arith.constant dense<0.000000e+00> : vector<88x128xf32>
    %169 = tpu.matmul %166, %168, %cst_169 {dimension_numbers = #tpu.dot_dimension_numbers<[1], [0], [0], [1], [0, 0, 1, 1], [], []>} : vector<88x3xf32>, vector<3x128xf32>, vector<88x128xf32> -> vector<88x128xf32>
    %170 = arith.addf %165, %169 : vector<88x128xf32>
    %c25_170 = arith.constant 25 : index
    %c0_171 = arith.constant 0 : index
    %171 = vector.load %arg1[%c25_170, %c0_171] : memref<128x3xf32, #tpu.memory_space<vmem>>, vector<88x3xf32>
    %c34 = arith.constant 34 : index
    %c0_172 = arith.constant 0 : index
    %c0_173 = arith.constant 0 : index
    %172 = vector.load %arg5[%c34, %c0_172, %c0_173] : memref<49x3x128xf32, #tpu.memory_space<vmem>>, vector<1x3x128xf32>
    %173 = vector.shape_cast %172 : vector<1x3x128xf32> to vector<3x128xf32>
    %cst_174 = arith.constant dense<0.000000e+00> : vector<88x128xf32>
    %174 = tpu.matmul %171, %173, %cst_174 {dimension_numbers = #tpu.dot_dimension_numbers<[1], [0], [0], [1], [0, 0, 1, 1], [], []>} : vector<88x3xf32>, vector<3x128xf32>, vector<88x128xf32> -> vector<88x128xf32>
    %175 = arith.addf %170, %174 : vector<88x128xf32>
    %c22_175 = arith.constant 22 : index
    %c0_176 = arith.constant 0 : index
    %176 = vector.load %arg3[%c22_175, %c0_176] : memref<128x3xf32, #tpu.memory_space<vmem>>, vector<88x3xf32>
    %c35 = arith.constant 35 : index
    %c0_177 = arith.constant 0 : index
    %c0_178 = arith.constant 0 : index
    %177 = vector.load %arg5[%c35, %c0_177, %c0_178] : memref<49x3x128xf32, #tpu.memory_space<vmem>>, vector<1x3x128xf32>
    %178 = vector.shape_cast %177 : vector<1x3x128xf32> to vector<3x128xf32>
    %cst_179 = arith.constant dense<0.000000e+00> : vector<88x128xf32>
    %179 = tpu.matmul %176, %178, %cst_179 {dimension_numbers = #tpu.dot_dimension_numbers<[1], [0], [0], [1], [0, 0, 1, 1], [], []>} : vector<88x3xf32>, vector<3x128xf32>, vector<88x128xf32> -> vector<88x128xf32>
    %180 = arith.addf %175, %179 : vector<88x128xf32>
    %c22_180 = arith.constant 22 : index
    %c0_181 = arith.constant 0 : index
    %181 = vector.load %arg4[%c22_180, %c0_181] : memref<128x3xf32, #tpu.memory_space<vmem>>, vector<88x3xf32>
    %c36 = arith.constant 36 : index
    %c0_182 = arith.constant 0 : index
    %c0_183 = arith.constant 0 : index
    %182 = vector.load %arg5[%c36, %c0_182, %c0_183] : memref<49x3x128xf32, #tpu.memory_space<vmem>>, vector<1x3x128xf32>
    %183 = vector.shape_cast %182 : vector<1x3x128xf32> to vector<3x128xf32>
    %cst_184 = arith.constant dense<0.000000e+00> : vector<88x128xf32>
    %184 = tpu.matmul %181, %183, %cst_184 {dimension_numbers = #tpu.dot_dimension_numbers<[1], [0], [0], [1], [0, 0, 1, 1], [], []>} : vector<88x3xf32>, vector<3x128xf32>, vector<88x128xf32> -> vector<88x128xf32>
    %185 = arith.addf %180, %184 : vector<88x128xf32>
    %c23_185 = arith.constant 23 : index
    %c0_186 = arith.constant 0 : index
    %186 = vector.load %arg3[%c23_185, %c0_186] : memref<128x3xf32, #tpu.memory_space<vmem>>, vector<88x3xf32>
    %c37 = arith.constant 37 : index
    %c0_187 = arith.constant 0 : index
    %c0_188 = arith.constant 0 : index
    %187 = vector.load %arg5[%c37, %c0_187, %c0_188] : memref<49x3x128xf32, #tpu.memory_space<vmem>>, vector<1x3x128xf32>
    %188 = vector.shape_cast %187 : vector<1x3x128xf32> to vector<3x128xf32>
    %cst_189 = arith.constant dense<0.000000e+00> : vector<88x128xf32>
    %189 = tpu.matmul %186, %188, %cst_189 {dimension_numbers = #tpu.dot_dimension_numbers<[1], [0], [0], [1], [0, 0, 1, 1], [], []>} : vector<88x3xf32>, vector<3x128xf32>, vector<88x128xf32> -> vector<88x128xf32>
    %190 = arith.addf %185, %189 : vector<88x128xf32>
    %c23_190 = arith.constant 23 : index
    %c0_191 = arith.constant 0 : index
    %191 = vector.load %arg4[%c23_190, %c0_191] : memref<128x3xf32, #tpu.memory_space<vmem>>, vector<88x3xf32>
    %c38 = arith.constant 38 : index
    %c0_192 = arith.constant 0 : index
    %c0_193 = arith.constant 0 : index
    %192 = vector.load %arg5[%c38, %c0_192, %c0_193] : memref<49x3x128xf32, #tpu.memory_space<vmem>>, vector<1x3x128xf32>
    %193 = vector.shape_cast %192 : vector<1x3x128xf32> to vector<3x128xf32>
    %cst_194 = arith.constant dense<0.000000e+00> : vector<88x128xf32>
    %194 = tpu.matmul %191, %193, %cst_194 {dimension_numbers = #tpu.dot_dimension_numbers<[1], [0], [0], [1], [0, 0, 1, 1], [], []>} : vector<88x3xf32>, vector<3x128xf32>, vector<88x128xf32> -> vector<88x128xf32>
    %195 = arith.addf %190, %194 : vector<88x128xf32>
    %c24_195 = arith.constant 24 : index
    %c0_196 = arith.constant 0 : index
    %196 = vector.load %arg3[%c24_195, %c0_196] : memref<128x3xf32, #tpu.memory_space<vmem>>, vector<88x3xf32>
    %c39 = arith.constant 39 : index
    %c0_197 = arith.constant 0 : index
    %c0_198 = arith.constant 0 : index
    %197 = vector.load %arg5[%c39, %c0_197, %c0_198] : memref<49x3x128xf32, #tpu.memory_space<vmem>>, vector<1x3x128xf32>
    %198 = vector.shape_cast %197 : vector<1x3x128xf32> to vector<3x128xf32>
    %cst_199 = arith.constant dense<0.000000e+00> : vector<88x128xf32>
    %199 = tpu.matmul %196, %198, %cst_199 {dimension_numbers = #tpu.dot_dimension_numbers<[1], [0], [0], [1], [0, 0, 1, 1], [], []>} : vector<88x3xf32>, vector<3x128xf32>, vector<88x128xf32> -> vector<88x128xf32>
    %200 = arith.addf %195, %199 : vector<88x128xf32>
    %c24_200 = arith.constant 24 : index
    %c0_201 = arith.constant 0 : index
    %201 = vector.load %arg4[%c24_200, %c0_201] : memref<128x3xf32, #tpu.memory_space<vmem>>, vector<88x3xf32>
    %c40 = arith.constant 40 : index
    %c0_202 = arith.constant 0 : index
    %c0_203 = arith.constant 0 : index
    %202 = vector.load %arg5[%c40, %c0_202, %c0_203] : memref<49x3x128xf32, #tpu.memory_space<vmem>>, vector<1x3x128xf32>
    %203 = vector.shape_cast %202 : vector<1x3x128xf32> to vector<3x128xf32>
    %cst_204 = arith.constant dense<0.000000e+00> : vector<88x128xf32>
    %204 = tpu.matmul %201, %203, %cst_204 {dimension_numbers = #tpu.dot_dimension_numbers<[1], [0], [0], [1], [0, 0, 1, 1], [], []>} : vector<88x3xf32>, vector<3x128xf32>, vector<88x128xf32> -> vector<88x128xf32>
    %205 = arith.addf %200, %204 : vector<88x128xf32>
    %c25_205 = arith.constant 25 : index
    %c0_206 = arith.constant 0 : index
    %206 = vector.load %arg3[%c25_205, %c0_206] : memref<128x3xf32, #tpu.memory_space<vmem>>, vector<88x3xf32>
    %c41 = arith.constant 41 : index
    %c0_207 = arith.constant 0 : index
    %c0_208 = arith.constant 0 : index
    %207 = vector.load %arg5[%c41, %c0_207, %c0_208] : memref<49x3x128xf32, #tpu.memory_space<vmem>>, vector<1x3x128xf32>
    %208 = vector.shape_cast %207 : vector<1x3x128xf32> to vector<3x128xf32>
    %cst_209 = arith.constant dense<0.000000e+00> : vector<88x128xf32>
    %209 = tpu.matmul %206, %208, %cst_209 {dimension_numbers = #tpu.dot_dimension_numbers<[1], [0], [0], [1], [0, 0, 1, 1], [], []>} : vector<88x3xf32>, vector<3x128xf32>, vector<88x128xf32> -> vector<88x128xf32>
    %210 = arith.addf %205, %209 : vector<88x128xf32>
    %c33_210 = arith.constant 33 : index
    %c0_211 = arith.constant 0 : index
    %211 = vector.load %arg1[%c33_210, %c0_211] : memref<128x3xf32, #tpu.memory_space<vmem>>, vector<88x3xf32>
    %c42 = arith.constant 42 : index
    %c0_212 = arith.constant 0 : index
    %c0_213 = arith.constant 0 : index
    %212 = vector.load %arg5[%c42, %c0_212, %c0_213] : memref<49x3x128xf32, #tpu.memory_space<vmem>>, vector<1x3x128xf32>
    %213 = vector.shape_cast %212 : vector<1x3x128xf32> to vector<3x128xf32>
    %cst_214 = arith.constant dense<0.000000e+00> : vector<88x128xf32>
    %214 = tpu.matmul %211, %213, %cst_214 {dimension_numbers = #tpu.dot_dimension_numbers<[1], [0], [0], [1], [0, 0, 1, 1], [], []>} : vector<88x3xf32>, vector<3x128xf32>, vector<88x128xf32> -> vector<88x128xf32>
    %215 = arith.addf %210, %214 : vector<88x128xf32>
    %c33_215 = arith.constant 33 : index
    %c0_216 = arith.constant 0 : index
    %216 = vector.load %arg2[%c33_215, %c0_216] : memref<128x3xf32, #tpu.memory_space<vmem>>, vector<88x3xf32>
    %c43 = arith.constant 43 : index
    %c0_217 = arith.constant 0 : index
    %c0_218 = arith.constant 0 : index
    %217 = vector.load %arg5[%c43, %c0_217, %c0_218] : memref<49x3x128xf32, #tpu.memory_space<vmem>>, vector<1x3x128xf32>
    %218 = vector.shape_cast %217 : vector<1x3x128xf32> to vector<3x128xf32>
    %cst_219 = arith.constant dense<0.000000e+00> : vector<88x128xf32>
    %219 = tpu.matmul %216, %218, %cst_219 {dimension_numbers = #tpu.dot_dimension_numbers<[1], [0], [0], [1], [0, 0, 1, 1], [], []>} : vector<88x3xf32>, vector<3x128xf32>, vector<88x128xf32> -> vector<88x128xf32>
    %220 = arith.addf %215, %219 : vector<88x128xf32>
    %c34_220 = arith.constant 34 : index
    %c0_221 = arith.constant 0 : index
    %221 = vector.load %arg1[%c34_220, %c0_221] : memref<128x3xf32, #tpu.memory_space<vmem>>, vector<88x3xf32>
    %c44 = arith.constant 44 : index
    %c0_222 = arith.constant 0 : index
    %c0_223 = arith.constant 0 : index
    %222 = vector.load %arg5[%c44, %c0_222, %c0_223] : memref<49x3x128xf32, #tpu.memory_space<vmem>>, vector<1x3x128xf32>
    %223 = vector.shape_cast %222 : vector<1x3x128xf32> to vector<3x128xf32>
    %cst_224 = arith.constant dense<0.000000e+00> : vector<88x128xf32>
    %224 = tpu.matmul %221, %223, %cst_224 {dimension_numbers = #tpu.dot_dimension_numbers<[1], [0], [0], [1], [0, 0, 1, 1], [], []>} : vector<88x3xf32>, vector<3x128xf32>, vector<88x128xf32> -> vector<88x128xf32>
    %225 = arith.addf %220, %224 : vector<88x128xf32>
    %c34_225 = arith.constant 34 : index
    %c0_226 = arith.constant 0 : index
    %226 = vector.load %arg2[%c34_225, %c0_226] : memref<128x3xf32, #tpu.memory_space<vmem>>, vector<88x3xf32>
    %c45 = arith.constant 45 : index
    %c0_227 = arith.constant 0 : index
    %c0_228 = arith.constant 0 : index
    %227 = vector.load %arg5[%c45, %c0_227, %c0_228] : memref<49x3x128xf32, #tpu.memory_space<vmem>>, vector<1x3x128xf32>
    %228 = vector.shape_cast %227 : vector<1x3x128xf32> to vector<3x128xf32>
    %cst_229 = arith.constant dense<0.000000e+00> : vector<88x128xf32>
    %229 = tpu.matmul %226, %228, %cst_229 {dimension_numbers = #tpu.dot_dimension_numbers<[1], [0], [0], [1], [0, 0, 1, 1], [], []>} : vector<88x3xf32>, vector<3x128xf32>, vector<88x128xf32> -> vector<88x128xf32>
    %230 = arith.addf %225, %229 : vector<88x128xf32>
    %c35_230 = arith.constant 35 : index
    %c0_231 = arith.constant 0 : index
    %231 = vector.load %arg1[%c35_230, %c0_231] : memref<128x3xf32, #tpu.memory_space<vmem>>, vector<88x3xf32>
    %c46 = arith.constant 46 : index
    %c0_232 = arith.constant 0 : index
    %c0_233 = arith.constant 0 : index
    %232 = vector.load %arg5[%c46, %c0_232, %c0_233] : memref<49x3x128xf32, #tpu.memory_space<vmem>>, vector<1x3x128xf32>
    %233 = vector.shape_cast %232 : vector<1x3x128xf32> to vector<3x128xf32>
    %cst_234 = arith.constant dense<0.000000e+00> : vector<88x128xf32>
    %234 = tpu.matmul %231, %233, %cst_234 {dimension_numbers = #tpu.dot_dimension_numbers<[1], [0], [0], [1], [0, 0, 1, 1], [], []>} : vector<88x3xf32>, vector<3x128xf32>, vector<88x128xf32> -> vector<88x128xf32>
    %235 = arith.addf %230, %234 : vector<88x128xf32>
    %c35_235 = arith.constant 35 : index
    %c0_236 = arith.constant 0 : index
    %236 = vector.load %arg2[%c35_235, %c0_236] : memref<128x3xf32, #tpu.memory_space<vmem>>, vector<88x3xf32>
    %c47 = arith.constant 47 : index
    %c0_237 = arith.constant 0 : index
    %c0_238 = arith.constant 0 : index
    %237 = vector.load %arg5[%c47, %c0_237, %c0_238] : memref<49x3x128xf32, #tpu.memory_space<vmem>>, vector<1x3x128xf32>
    %238 = vector.shape_cast %237 : vector<1x3x128xf32> to vector<3x128xf32>
    %cst_239 = arith.constant dense<0.000000e+00> : vector<88x128xf32>
    %239 = tpu.matmul %236, %238, %cst_239 {dimension_numbers = #tpu.dot_dimension_numbers<[1], [0], [0], [1], [0, 0, 1, 1], [], []>} : vector<88x3xf32>, vector<3x128xf32>, vector<88x128xf32> -> vector<88x128xf32>
    %240 = arith.addf %235, %239 : vector<88x128xf32>
    %c36_240 = arith.constant 36 : index
    %c0_241 = arith.constant 0 : index
    %241 = vector.load %arg1[%c36_240, %c0_241] : memref<128x3xf32, #tpu.memory_space<vmem>>, vector<88x3xf32>
    %c48 = arith.constant 48 : index
    %c0_242 = arith.constant 0 : index
    %c0_243 = arith.constant 0 : index
    %242 = vector.load %arg5[%c48, %c0_242, %c0_243] : memref<49x3x128xf32, #tpu.memory_space<vmem>>, vector<1x3x128xf32>
    %243 = vector.shape_cast %242 : vector<1x3x128xf32> to vector<3x128xf32>
    %cst_244 = arith.constant dense<0.000000e+00> : vector<88x128xf32>
    %244 = tpu.matmul %241, %243, %cst_244 {dimension_numbers = #tpu.dot_dimension_numbers<[1], [0], [0], [1], [0, 0, 1, 1], [], []>} : vector<88x3xf32>, vector<3x128xf32>, vector<88x128xf32> -> vector<88x128xf32>
    %245 = arith.addf %240, %244 : vector<88x128xf32>
    %c0_245 = arith.constant 0 : index
    %c0_246 = arith.constant 0 : index
    %246 = vector.load %arg6[%c0_245, %c0_246] : memref<1x128xf32, #tpu.memory_space<vmem>>, vector<1x128xf32>
    %247 = vector.broadcast %246 : vector<1x128xf32> to vector<88x128xf32>
    %248 = arith.addf %245, %247 : vector<88x128xf32>
    %cst_247 = arith.constant 0.000000e+00 : f32
    %249 = vector.broadcast %cst_247 : f32 to vector<88x128xf32>
    %250 = arith.maximumf %248, %249 : vector<88x128xf32>
    %c0_248 = arith.constant 0 : index
    %c0_249 = arith.constant 0 : index
    %251 = vector.load %arg7[%c0_248, %c0_249] : memref<88x128xf32, #tpu.memory_space<vmem>>, vector<88x128xf32>
    tpu.vector_store %arg7[%c0_248, %c0_249], %250 {strides = array<i32>} : memref<88x128xf32, #tpu.memory_space<vmem>>, vector<88x128xf32>,
    return
  }
  func.func @transform_0(%arg0: i32) -> (i32, i32) {
    %c0_i32 = arith.constant 0 : i32
    %c0_i32_0 = arith.constant 0 : i32
    return %arg0, %c0_i32 : i32, i32
  }
  func.func @transform_1(%arg0: i32) -> (i32, i32) {
    %c0_i32 = arith.constant 0 : i32
    %c0_i32_0 = arith.constant 0 : i32
    return %arg0, %c0_i32 : i32, i32
  }
  func.func @transform_2(%arg0: i32) -> (i32, i32) {
    %c0_i32 = arith.constant 0 : i32
    %c0_i32_0 = arith.constant 0 : i32
    return %arg0, %c0_i32 : i32, i32
  }
  func.func @transform_3(%arg0: i32) -> (i32, i32) {
    %c0_i32 = arith.constant 0 : i32
    %c0_i32_0 = arith.constant 0 : i32
    return %arg0, %c0_i32 : i32, i32
  }
  func.func @transform_4(%arg0: i32) -> (i32, i32, i32) {
    %c0_i32 = arith.constant 0 : i32
    %c0_i32_0 = arith.constant 0 : i32
    %c0_i32_1 = arith.constant 0 : i32
    %c0_i32_2 = arith.constant 0 : i32
    return %c0_i32, %c0_i32_0, %c0_i32_1 : i32, i32, i32
  }
  func.func @transform_5(%arg0: i32) -> (i32, i32) {
    %c0_i32 = arith.constant 0 : i32
    %c0_i32_0 = arith.constant 0 : i32
    %c0_i32_1 = arith.constant 0 : i32
    return %c0_i32, %c0_i32_0 : i32, i32
  }
  func.func @transform_6(%arg0: i32) -> (i32, i32) {
    %c0_i32 = arith.constant 0 : i32
    %c0_i32_0 = arith.constant 0 : i32
    return %arg0, %c0_i32 : i32, i32
  }
}

module attributes {stable_mosaic.version = 11 : i64} {
  func.func @_maxpool_s2_kernel(%arg0: i32, %arg1: memref<32x128xf32, #tpu.memory_space<vmem>>, %arg2: memref<32x128xf32, #tpu.memory_space<vmem>>, %arg3: memref<32x128xf32, #tpu.memory_space<vmem>>, %arg4: memref<32x128xf32, #tpu.memory_space<vmem>>, %arg5: memref<24x128xf32, #tpu.memory_space<vmem>>) attributes {dimension_semantics = [#tpu.dimension_semantics<parallel>], iteration_bounds = array<i64: 2>, scalar_prefetch = 0 : i64, scratch_operands = 0 : i64, tpu.core_type = #tpu.core_type<tc>, window_params = [{transform_indices = @transform_0, window_bounds = array<i64: 32, 128>}, {transform_indices = @transform_1, window_bounds = array<i64: 32, 128>}, {transform_indices = @transform_2, window_bounds = array<i64: 32, 128>}, {transform_indices = @transform_3, window_bounds = array<i64: 32, 128>}, {transform_indices = @transform_4, window_bounds = array<i64: 24, 128>}]} {
    %c0 = arith.constant 0 : index
    %c0_0 = arith.constant 0 : index
    %0 = vector.load %arg1[%c0, %c0_0] : memref<32x128xf32, #tpu.memory_space<vmem>>, vector<24x128xf32>
    %c0_1 = arith.constant 0 : index
    %c0_2 = arith.constant 0 : index
    %1 = vector.load %arg2[%c0_1, %c0_2] : memref<32x128xf32, #tpu.memory_space<vmem>>, vector<24x128xf32>
    %2 = arith.maximumf %0, %1 : vector<24x128xf32>
    %c1 = arith.constant 1 : index
    %c0_3 = arith.constant 0 : index
    %3 = vector.load %arg1[%c1, %c0_3] : memref<32x128xf32, #tpu.memory_space<vmem>>, vector<24x128xf32>
    %4 = arith.maximumf %2, %3 : vector<24x128xf32>
    %c0_4 = arith.constant 0 : index
    %c0_5 = arith.constant 0 : index
    %5 = vector.load %arg3[%c0_4, %c0_5] : memref<32x128xf32, #tpu.memory_space<vmem>>, vector<24x128xf32>
    %6 = arith.maximumf %4, %5 : vector<24x128xf32>
    %c0_6 = arith.constant 0 : index
    %c0_7 = arith.constant 0 : index
    %7 = vector.load %arg4[%c0_6, %c0_7] : memref<32x128xf32, #tpu.memory_space<vmem>>, vector<24x128xf32>
    %8 = arith.maximumf %6, %7 : vector<24x128xf32>
    %c1_8 = arith.constant 1 : index
    %c0_9 = arith.constant 0 : index
    %9 = vector.load %arg3[%c1_8, %c0_9] : memref<32x128xf32, #tpu.memory_space<vmem>>, vector<24x128xf32>
    %10 = arith.maximumf %8, %9 : vector<24x128xf32>
    %c5 = arith.constant 5 : index
    %c0_10 = arith.constant 0 : index
    %11 = vector.load %arg1[%c5, %c0_10] : memref<32x128xf32, #tpu.memory_space<vmem>>, vector<24x128xf32>
    %12 = arith.maximumf %10, %11 : vector<24x128xf32>
    %c5_11 = arith.constant 5 : index
    %c0_12 = arith.constant 0 : index
    %13 = vector.load %arg2[%c5_11, %c0_12] : memref<32x128xf32, #tpu.memory_space<vmem>>, vector<24x128xf32>
    %14 = arith.maximumf %12, %13 : vector<24x128xf32>
    %c6 = arith.constant 6 : index
    %c0_13 = arith.constant 0 : index
    %15 = vector.load %arg1[%c6, %c0_13] : memref<32x128xf32, #tpu.memory_space<vmem>>, vector<24x128xf32>
    %16 = arith.maximumf %14, %15 : vector<24x128xf32>
    %c0_14 = arith.constant 0 : index
    %c0_15 = arith.constant 0 : index
    %17 = vector.load %arg5[%c0_14, %c0_15] : memref<24x128xf32, #tpu.memory_space<vmem>>, vector<24x128xf32>
    tpu.vector_store %arg5[%c0_14, %c0_15], %16 {strides = array<i32>} : memref<24x128xf32, #tpu.memory_space<vmem>>, vector<24x128xf32>,
    return
  }
  func.func @transform_0(%arg0: i32) -> (i32, i32) {
    %c0_i32 = arith.constant 0 : i32
    %c0_i32_0 = arith.constant 0 : i32
    return %arg0, %c0_i32 : i32, i32
  }
  func.func @transform_1(%arg0: i32) -> (i32, i32) {
    %c0_i32 = arith.constant 0 : i32
    %c0_i32_0 = arith.constant 0 : i32
    return %arg0, %c0_i32 : i32, i32
  }
  func.func @transform_2(%arg0: i32) -> (i32, i32) {
    %c0_i32 = arith.constant 0 : i32
    %c0_i32_0 = arith.constant 0 : i32
    return %arg0, %c0_i32 : i32, i32
  }
  func.func @transform_3(%arg0: i32) -> (i32, i32) {
    %c0_i32 = arith.constant 0 : i32
    %c0_i32_0 = arith.constant 0 : i32
    return %arg0, %c0_i32 : i32, i32
  }
  func.func @transform_4(%arg0: i32) -> (i32, i32) {
    %c0_i32 = arith.constant 0 : i32
    %c0_i32_0 = arith.constant 0 : i32
    return %arg0, %c0_i32 : i32, i32
  }
}

module attributes {stable_mosaic.version = 11 : i64} {
  func.func @_conv_s1_kernel(%arg0: i32, %arg1: memref<40x128xf32, #tpu.memory_space<vmem>>, %arg2: memref<9x128x128xf32, #tpu.memory_space<vmem>>, %arg3: memref<1x128xf32, #tpu.memory_space<vmem>>, %arg4: memref<24x128xf32, #tpu.memory_space<vmem>>) attributes {dimension_semantics = [#tpu.dimension_semantics<parallel>], iteration_bounds = array<i64: 2>, scalar_prefetch = 0 : i64, scratch_operands = 0 : i64, tpu.core_type = #tpu.core_type<tc>, window_params = [{transform_indices = @transform_0, window_bounds = array<i64: 40, 128>}, {pipeline_mode = #tpu.pipeline_mode<synchronous>, transform_indices = @transform_1, window_bounds = array<i64: 9, 128, 128>}, {pipeline_mode = #tpu.pipeline_mode<synchronous>, transform_indices = @transform_2, window_bounds = array<i64: 1, 128>}, {transform_indices = @transform_3, window_bounds = array<i64: 24, 128>}]} {
    %cst = arith.constant 0.000000e+00 : f32
    %0 = vector.broadcast %cst : f32 to vector<24x128xf32>
    %c0 = arith.constant 0 : index
    %c0_0 = arith.constant 0 : index
    %1 = vector.load %arg1[%c0, %c0_0] : memref<40x128xf32, #tpu.memory_space<vmem>>, vector<24x128xf32>
    %c0_1 = arith.constant 0 : index
    %c0_2 = arith.constant 0 : index
    %c0_3 = arith.constant 0 : index
    %2 = vector.load %arg2[%c0_1, %c0_2, %c0_3] : memref<9x128x128xf32, #tpu.memory_space<vmem>>, vector<1x128x128xf32>
    %3 = vector.shape_cast %2 : vector<1x128x128xf32> to vector<128x128xf32>
    %cst_4 = arith.constant dense<0.000000e+00> : vector<24x128xf32>
    %4 = tpu.matmul %1, %3, %cst_4 {dimension_numbers = #tpu.dot_dimension_numbers<[1], [0], [0], [1], [0, 0, 1, 1], [], []>} : vector<24x128xf32>, vector<128x128xf32>, vector<24x128xf32> -> vector<24x128xf32>
    %5 = arith.addf %0, %4 : vector<24x128xf32>
    %c1 = arith.constant 1 : index
    %c0_5 = arith.constant 0 : index
    %6 = vector.load %arg1[%c1, %c0_5] : memref<40x128xf32, #tpu.memory_space<vmem>>, vector<24x128xf32>
    %c1_6 = arith.constant 1 : index
    %c0_7 = arith.constant 0 : index
    %c0_8 = arith.constant 0 : index
    %7 = vector.load %arg2[%c1_6, %c0_7, %c0_8] : memref<9x128x128xf32, #tpu.memory_space<vmem>>, vector<1x128x128xf32>
    %8 = vector.shape_cast %7 : vector<1x128x128xf32> to vector<128x128xf32>
    %cst_9 = arith.constant dense<0.000000e+00> : vector<24x128xf32>
    %9 = tpu.matmul %6, %8, %cst_9 {dimension_numbers = #tpu.dot_dimension_numbers<[1], [0], [0], [1], [0, 0, 1, 1], [], []>} : vector<24x128xf32>, vector<128x128xf32>, vector<24x128xf32> -> vector<24x128xf32>
    %10 = arith.addf %5, %9 : vector<24x128xf32>
    %c2 = arith.constant 2 : index
    %c0_10 = arith.constant 0 : index
    %11 = vector.load %arg1[%c2, %c0_10] : memref<40x128xf32, #tpu.memory_space<vmem>>, vector<24x128xf32>
    %c2_11 = arith.constant 2 : index
    %c0_12 = arith.constant 0 : index
    %c0_13 = arith.constant 0 : index
    %12 = vector.load %arg2[%c2_11, %c0_12, %c0_13] : memref<9x128x128xf32, #tpu.memory_space<vmem>>, vector<1x128x128xf32>
    %13 = vector.shape_cast %12 : vector<1x128x128xf32> to vector<128x128xf32>
    %cst_14 = arith.constant dense<0.000000e+00> : vector<24x128xf32>
    %14 = tpu.matmul %11, %13, %cst_14 {dimension_numbers = #tpu.dot_dimension_numbers<[1], [0], [0], [1], [0, 0, 1, 1], [], []>} : vector<24x128xf32>, vector<128x128xf32>, vector<24x128xf32> -> vector<24x128xf32>
    %15 = arith.addf %10, %14 : vector<24x128xf32>
    %c6 = arith.constant 6 : index
    %c0_15 = arith.constant 0 : index
    %16 = vector.load %arg1[%c6, %c0_15] : memref<40x128xf32, #tpu.memory_space<vmem>>, vector<24x128xf32>
    %c3 = arith.constant 3 : index
    %c0_16 = arith.constant 0 : index
    %c0_17 = arith.constant 0 : index
    %17 = vector.load %arg2[%c3, %c0_16, %c0_17] : memref<9x128x128xf32, #tpu.memory_space<vmem>>, vector<1x128x128xf32>
    %18 = vector.shape_cast %17 : vector<1x128x128xf32> to vector<128x128xf32>
    %cst_18 = arith.constant dense<0.000000e+00> : vector<24x128xf32>
    %19 = tpu.matmul %16, %18, %cst_18 {dimension_numbers = #tpu.dot_dimension_numbers<[1], [0], [0], [1], [0, 0, 1, 1], [], []>} : vector<24x128xf32>, vector<128x128xf32>, vector<24x128xf32> -> vector<24x128xf32>
    %20 = arith.addf %15, %19 : vector<24x128xf32>
    %c7 = arith.constant 7 : index
    %c0_19 = arith.constant 0 : index
    %21 = vector.load %arg1[%c7, %c0_19] : memref<40x128xf32, #tpu.memory_space<vmem>>, vector<24x128xf32>
    %c4 = arith.constant 4 : index
    %c0_20 = arith.constant 0 : index
    %c0_21 = arith.constant 0 : index
    %22 = vector.load %arg2[%c4, %c0_20, %c0_21] : memref<9x128x128xf32, #tpu.memory_space<vmem>>, vector<1x128x128xf32>
    %23 = vector.shape_cast %22 : vector<1x128x128xf32> to vector<128x128xf32>
    %cst_22 = arith.constant dense<0.000000e+00> : vector<24x128xf32>
    %24 = tpu.matmul %21, %23, %cst_22 {dimension_numbers = #tpu.dot_dimension_numbers<[1], [0], [0], [1], [0, 0, 1, 1], [], []>} : vector<24x128xf32>, vector<128x128xf32>, vector<24x128xf32> -> vector<24x128xf32>
    %25 = arith.addf %20, %24 : vector<24x128xf32>
    %c8 = arith.constant 8 : index
    %c0_23 = arith.constant 0 : index
    %26 = vector.load %arg1[%c8, %c0_23] : memref<40x128xf32, #tpu.memory_space<vmem>>, vector<24x128xf32>
    %c5 = arith.constant 5 : index
    %c0_24 = arith.constant 0 : index
    %c0_25 = arith.constant 0 : index
    %27 = vector.load %arg2[%c5, %c0_24, %c0_25] : memref<9x128x128xf32, #tpu.memory_space<vmem>>, vector<1x128x128xf32>
    %28 = vector.shape_cast %27 : vector<1x128x128xf32> to vector<128x128xf32>
    %cst_26 = arith.constant dense<0.000000e+00> : vector<24x128xf32>
    %29 = tpu.matmul %26, %28, %cst_26 {dimension_numbers = #tpu.dot_dimension_numbers<[1], [0], [0], [1], [0, 0, 1, 1], [], []>} : vector<24x128xf32>, vector<128x128xf32>, vector<24x128xf32> -> vector<24x128xf32>
    %30 = arith.addf %25, %29 : vector<24x128xf32>
    %c12 = arith.constant 12 : index
    %c0_27 = arith.constant 0 : index
    %31 = vector.load %arg1[%c12, %c0_27] : memref<40x128xf32, #tpu.memory_space<vmem>>, vector<24x128xf32>
    %c6_28 = arith.constant 6 : index
    %c0_29 = arith.constant 0 : index
    %c0_30 = arith.constant 0 : index
    %32 = vector.load %arg2[%c6_28, %c0_29, %c0_30] : memref<9x128x128xf32, #tpu.memory_space<vmem>>, vector<1x128x128xf32>
    %33 = vector.shape_cast %32 : vector<1x128x128xf32> to vector<128x128xf32>
    %cst_31 = arith.constant dense<0.000000e+00> : vector<24x128xf32>
    %34 = tpu.matmul %31, %33, %cst_31 {dimension_numbers = #tpu.dot_dimension_numbers<[1], [0], [0], [1], [0, 0, 1, 1], [], []>} : vector<24x128xf32>, vector<128x128xf32>, vector<24x128xf32> -> vector<24x128xf32>
    %35 = arith.addf %30, %34 : vector<24x128xf32>
    %c13 = arith.constant 13 : index
    %c0_32 = arith.constant 0 : index
    %36 = vector.load %arg1[%c13, %c0_32] : memref<40x128xf32, #tpu.memory_space<vmem>>, vector<24x128xf32>
    %c7_33 = arith.constant 7 : index
    %c0_34 = arith.constant 0 : index
    %c0_35 = arith.constant 0 : index
    %37 = vector.load %arg2[%c7_33, %c0_34, %c0_35] : memref<9x128x128xf32, #tpu.memory_space<vmem>>, vector<1x128x128xf32>
    %38 = vector.shape_cast %37 : vector<1x128x128xf32> to vector<128x128xf32>
    %cst_36 = arith.constant dense<0.000000e+00> : vector<24x128xf32>
    %39 = tpu.matmul %36, %38, %cst_36 {dimension_numbers = #tpu.dot_dimension_numbers<[1], [0], [0], [1], [0, 0, 1, 1], [], []>} : vector<24x128xf32>, vector<128x128xf32>, vector<24x128xf32> -> vector<24x128xf32>
    %40 = arith.addf %35, %39 : vector<24x128xf32>
    %c14 = arith.constant 14 : index
    %c0_37 = arith.constant 0 : index
    %41 = vector.load %arg1[%c14, %c0_37] : memref<40x128xf32, #tpu.memory_space<vmem>>, vector<24x128xf32>
    %c8_38 = arith.constant 8 : index
    %c0_39 = arith.constant 0 : index
    %c0_40 = arith.constant 0 : index
    %42 = vector.load %arg2[%c8_38, %c0_39, %c0_40] : memref<9x128x128xf32, #tpu.memory_space<vmem>>, vector<1x128x128xf32>
    %43 = vector.shape_cast %42 : vector<1x128x128xf32> to vector<128x128xf32>
    %cst_41 = arith.constant dense<0.000000e+00> : vector<24x128xf32>
    %44 = tpu.matmul %41, %43, %cst_41 {dimension_numbers = #tpu.dot_dimension_numbers<[1], [0], [0], [1], [0, 0, 1, 1], [], []>} : vector<24x128xf32>, vector<128x128xf32>, vector<24x128xf32> -> vector<24x128xf32>
    %45 = arith.addf %40, %44 : vector<24x128xf32>
    %c0_42 = arith.constant 0 : index
    %c0_43 = arith.constant 0 : index
    %46 = vector.load %arg3[%c0_42, %c0_43] : memref<1x128xf32, #tpu.memory_space<vmem>>, vector<1x128xf32>
    %47 = vector.broadcast %46 : vector<1x128xf32> to vector<24x128xf32>
    %48 = arith.addf %45, %47 : vector<24x128xf32>
    %cst_44 = arith.constant 0.000000e+00 : f32
    %49 = vector.broadcast %cst_44 : f32 to vector<24x128xf32>
    %50 = arith.maximumf %48, %49 : vector<24x128xf32>
    %c0_45 = arith.constant 0 : index
    %c0_46 = arith.constant 0 : index
    %51 = vector.load %arg4[%c0_45, %c0_46] : memref<24x128xf32, #tpu.memory_space<vmem>>, vector<24x128xf32>
    tpu.vector_store %arg4[%c0_45, %c0_46], %50 {strides = array<i32>} : memref<24x128xf32, #tpu.memory_space<vmem>>, vector<24x128xf32>,
    return
  }
  func.func @transform_0(%arg0: i32) -> (i32, i32) {
    %c0_i32 = arith.constant 0 : i32
    %c0_i32_0 = arith.constant 0 : i32
    return %arg0, %c0_i32 : i32, i32
  }
  func.func @transform_1(%arg0: i32) -> (i32, i32, i32) {
    %c0_i32 = arith.constant 0 : i32
    %c0_i32_0 = arith.constant 0 : i32
    %c0_i32_1 = arith.constant 0 : i32
    %c0_i32_2 = arith.constant 0 : i32
    return %c0_i32, %c0_i32_0, %c0_i32_1 : i32, i32, i32
  }
  func.func @transform_2(%arg0: i32) -> (i32, i32) {
    %c0_i32 = arith.constant 0 : i32
    %c0_i32_0 = arith.constant 0 : i32
    %c0_i32_1 = arith.constant 0 : i32
    return %c0_i32, %c0_i32_0 : i32, i32
  }
  func.func @transform_3(%arg0: i32) -> (i32, i32) {
    %c0_i32 = arith.constant 0 : i32
    %c0_i32_0 = arith.constant 0 : i32
    return %arg0, %c0_i32 : i32, i32
  }
}

module attributes {stable_mosaic.version = 11 : i64} {
  func.func @_head_kernel(%arg0: i32, %arg1: memref<2x16x128xf32, #tpu.memory_space<vmem>>, %arg2: memref<128x128xf32, #tpu.memory_space<vmem>>, %arg3: memref<1x128xf32, #tpu.memory_space<vmem>>, %arg4: memref<2x128xf32, #tpu.memory_space<vmem>>, %arg5: memref<2x128xf32, #tpu.memory_space<vmem>>) attributes {dimension_semantics = [#tpu.dimension_semantics<arbitrary>], iteration_bounds = array<i64: 1>, scalar_prefetch = 0 : i64, scratch_operands = 0 : i64, tpu.core_type = #tpu.core_type<tc>, window_params = [{pipeline_mode = #tpu.pipeline_mode<synchronous>, transform_indices = @transform_0, window_bounds = array<i64: 2, 16, 128>}, {pipeline_mode = #tpu.pipeline_mode<synchronous>, transform_indices = @transform_1, window_bounds = array<i64: 128, 128>}, {pipeline_mode = #tpu.pipeline_mode<synchronous>, transform_indices = @transform_2, window_bounds = array<i64: 1, 128>}, {pipeline_mode = #tpu.pipeline_mode<synchronous>, transform_indices = @transform_3, window_bounds = array<i64: 2, 128>}, {pipeline_mode = #tpu.pipeline_mode<synchronous>, transform_indices = @transform_4, window_bounds = array<i64: 2, 128>}]} {
    %c0 = arith.constant 0 : index
    %c0_0 = arith.constant 0 : index
    %c0_1 = arith.constant 0 : index
    %0 = vector.load %arg1[%c0, %c0_0, %c0_1] : memref<2x16x128xf32, #tpu.memory_space<vmem>>, vector<2x16x128xf32>
    %cst = arith.constant dense<0.000000e+00> : vector<2x128xf32>
    %1 = vector.multi_reduction <add>, %0, %cst [1] : vector<2x16x128xf32> to vector<2x128xf32>
    %cst_2 = arith.constant 6.250000e-02 : f32
    %2 = vector.broadcast %cst_2 : f32 to vector<2x128xf32>
    %3 = arith.mulf %1, %2 : vector<2x128xf32>
    %c0_3 = arith.constant 0 : index
    %c0_4 = arith.constant 0 : index
    %4 = vector.load %arg2[%c0_3, %c0_4] : memref<128x128xf32, #tpu.memory_space<vmem>>, vector<128x128xf32>
    %cst_5 = arith.constant dense<0.000000e+00> : vector<2x128xf32>
    %5 = tpu.matmul %3, %4, %cst_5 {dimension_numbers = #tpu.dot_dimension_numbers<[1], [0], [0], [1], [0, 0, 1, 1], [], []>} : vector<2x128xf32>, vector<128x128xf32>, vector<2x128xf32> -> vector<2x128xf32>
    %c0_6 = arith.constant 0 : index
    %c0_7 = arith.constant 0 : index
    %6 = vector.load %arg3[%c0_6, %c0_7] : memref<1x128xf32, #tpu.memory_space<vmem>>, vector<1x128xf32>
    %7 = vector.broadcast %6 : vector<1x128xf32> to vector<2x128xf32>
    %8 = arith.addf %5, %7 : vector<2x128xf32>
    %c0_8 = arith.constant 0 : index
    %c0_9 = arith.constant 0 : index
    %9 = vector.load %arg5[%c0_8, %c0_9] : memref<2x128xf32, #tpu.memory_space<vmem>>, vector<2x128xf32>
    tpu.vector_store %arg5[%c0_8, %c0_9], %3 {strides = array<i32>} : memref<2x128xf32, #tpu.memory_space<vmem>>, vector<2x128xf32>,
    %c0_10 = arith.constant 0 : index
    %c0_11 = arith.constant 0 : index
    %10 = vector.load %arg4[%c0_10, %c0_11] : memref<2x128xf32, #tpu.memory_space<vmem>>, vector<2x128xf32>
    tpu.vector_store %arg4[%c0_10, %c0_11], %8 {strides = array<i32>} : memref<2x128xf32, #tpu.memory_space<vmem>>, vector<2x128xf32>,
    return
  }
  func.func @transform_0(%arg0: i32) -> (i32, i32, i32) {
    %c0_i32 = arith.constant 0 : i32
    %c0_i32_0 = arith.constant 0 : i32
    %c0_i32_1 = arith.constant 0 : i32
    %c0_i32_2 = arith.constant 0 : i32
    return %c0_i32, %c0_i32_0, %c0_i32_1 : i32, i32, i32
  }
  func.func @transform_1(%arg0: i32) -> (i32, i32) {
    %c0_i32 = arith.constant 0 : i32
    %c0_i32_0 = arith.constant 0 : i32
    %c0_i32_1 = arith.constant 0 : i32
    return %c0_i32, %c0_i32_0 : i32, i32
  }
  func.func @transform_2(%arg0: i32) -> (i32, i32) {
    %c0_i32 = arith.constant 0 : i32
    %c0_i32_0 = arith.constant 0 : i32
    %c0_i32_1 = arith.constant 0 : i32
    return %c0_i32, %c0_i32_0 : i32, i32
  }
  func.func @transform_3(%arg0: i32) -> (i32, i32) {
    %c0_i32 = arith.constant 0 : i32
    %c0_i32_0 = arith.constant 0 : i32
    %c0_i32_1 = arith.constant 0 : i32
    return %c0_i32, %c0_i32_0 : i32, i32
  }
  func.func @transform_4(%arg0: i32) -> (i32, i32) {
    %c0_i32 = arith.constant 0 : i32
    %c0_i32_0 = arith.constant 0 : i32
    %c0_i32_1 = arith.constant 0 : i32
    return %c0_i32, %c0_i32_0 : i32, i32
  }
}

module attributes {stable_mosaic.version = 11 : i64} {
  func.func @_conv_s1_res_kernel(%arg0: i32, %arg1: memref<40x128xf32, #tpu.memory_space<vmem>>, %arg2: memref<9x128x128xf32, #tpu.memory_space<vmem>>, %arg3: memref<1x128xf32, #tpu.memory_space<vmem>>, %arg4: memref<24x128xf32, #tpu.memory_space<vmem>>, %arg5: memref<24x128xf32, #tpu.memory_space<vmem>>) attributes {dimension_semantics = [#tpu.dimension_semantics<parallel>], iteration_bounds = array<i64: 2>, scalar_prefetch = 0 : i64, scratch_operands = 0 : i64, tpu.core_type = #tpu.core_type<tc>, window_params = [{transform_indices = @transform_0, window_bounds = array<i64: 40, 128>}, {pipeline_mode = #tpu.pipeline_mode<synchronous>, transform_indices = @transform_1, window_bounds = array<i64: 9, 128, 128>}, {pipeline_mode = #tpu.pipeline_mode<synchronous>, transform_indices = @transform_2, window_bounds = array<i64: 1, 128>}, {transform_indices = @transform_3, window_bounds = array<i64: 24, 128>}, {transform_indices = @transform_4, window_bounds = array<i64: 24, 128>}]} {
    %cst = arith.constant 0.000000e+00 : f32
    %0 = vector.broadcast %cst : f32 to vector<24x128xf32>
    %c0 = arith.constant 0 : index
    %c0_0 = arith.constant 0 : index
    %1 = vector.load %arg1[%c0, %c0_0] : memref<40x128xf32, #tpu.memory_space<vmem>>, vector<24x128xf32>
    %c0_1 = arith.constant 0 : index
    %c0_2 = arith.constant 0 : index
    %c0_3 = arith.constant 0 : index
    %2 = vector.load %arg2[%c0_1, %c0_2, %c0_3] : memref<9x128x128xf32, #tpu.memory_space<vmem>>, vector<1x128x128xf32>
    %3 = vector.shape_cast %2 : vector<1x128x128xf32> to vector<128x128xf32>
    %cst_4 = arith.constant dense<0.000000e+00> : vector<24x128xf32>
    %4 = tpu.matmul %1, %3, %cst_4 {dimension_numbers = #tpu.dot_dimension_numbers<[1], [0], [0], [1], [0, 0, 1, 1], [], []>} : vector<24x128xf32>, vector<128x128xf32>, vector<24x128xf32> -> vector<24x128xf32>
    %5 = arith.addf %0, %4 : vector<24x128xf32>
    %c1 = arith.constant 1 : index
    %c0_5 = arith.constant 0 : index
    %6 = vector.load %arg1[%c1, %c0_5] : memref<40x128xf32, #tpu.memory_space<vmem>>, vector<24x128xf32>
    %c1_6 = arith.constant 1 : index
    %c0_7 = arith.constant 0 : index
    %c0_8 = arith.constant 0 : index
    %7 = vector.load %arg2[%c1_6, %c0_7, %c0_8] : memref<9x128x128xf32, #tpu.memory_space<vmem>>, vector<1x128x128xf32>
    %8 = vector.shape_cast %7 : vector<1x128x128xf32> to vector<128x128xf32>
    %cst_9 = arith.constant dense<0.000000e+00> : vector<24x128xf32>
    %9 = tpu.matmul %6, %8, %cst_9 {dimension_numbers = #tpu.dot_dimension_numbers<[1], [0], [0], [1], [0, 0, 1, 1], [], []>} : vector<24x128xf32>, vector<128x128xf32>, vector<24x128xf32> -> vector<24x128xf32>
    %10 = arith.addf %5, %9 : vector<24x128xf32>
    %c2 = arith.constant 2 : index
    %c0_10 = arith.constant 0 : index
    %11 = vector.load %arg1[%c2, %c0_10] : memref<40x128xf32, #tpu.memory_space<vmem>>, vector<24x128xf32>
    %c2_11 = arith.constant 2 : index
    %c0_12 = arith.constant 0 : index
    %c0_13 = arith.constant 0 : index
    %12 = vector.load %arg2[%c2_11, %c0_12, %c0_13] : memref<9x128x128xf32, #tpu.memory_space<vmem>>, vector<1x128x128xf32>
    %13 = vector.shape_cast %12 : vector<1x128x128xf32> to vector<128x128xf32>
    %cst_14 = arith.constant dense<0.000000e+00> : vector<24x128xf32>
    %14 = tpu.matmul %11, %13, %cst_14 {dimension_numbers = #tpu.dot_dimension_numbers<[1], [0], [0], [1], [0, 0, 1, 1], [], []>} : vector<24x128xf32>, vector<128x128xf32>, vector<24x128xf32> -> vector<24x128xf32>
    %15 = arith.addf %10, %14 : vector<24x128xf32>
    %c6 = arith.constant 6 : index
    %c0_15 = arith.constant 0 : index
    %16 = vector.load %arg1[%c6, %c0_15] : memref<40x128xf32, #tpu.memory_space<vmem>>, vector<24x128xf32>
    %c3 = arith.constant 3 : index
    %c0_16 = arith.constant 0 : index
    %c0_17 = arith.constant 0 : index
    %17 = vector.load %arg2[%c3, %c0_16, %c0_17] : memref<9x128x128xf32, #tpu.memory_space<vmem>>, vector<1x128x128xf32>
    %18 = vector.shape_cast %17 : vector<1x128x128xf32> to vector<128x128xf32>
    %cst_18 = arith.constant dense<0.000000e+00> : vector<24x128xf32>
    %19 = tpu.matmul %16, %18, %cst_18 {dimension_numbers = #tpu.dot_dimension_numbers<[1], [0], [0], [1], [0, 0, 1, 1], [], []>} : vector<24x128xf32>, vector<128x128xf32>, vector<24x128xf32> -> vector<24x128xf32>
    %20 = arith.addf %15, %19 : vector<24x128xf32>
    %c7 = arith.constant 7 : index
    %c0_19 = arith.constant 0 : index
    %21 = vector.load %arg1[%c7, %c0_19] : memref<40x128xf32, #tpu.memory_space<vmem>>, vector<24x128xf32>
    %c4 = arith.constant 4 : index
    %c0_20 = arith.constant 0 : index
    %c0_21 = arith.constant 0 : index
    %22 = vector.load %arg2[%c4, %c0_20, %c0_21] : memref<9x128x128xf32, #tpu.memory_space<vmem>>, vector<1x128x128xf32>
    %23 = vector.shape_cast %22 : vector<1x128x128xf32> to vector<128x128xf32>
    %cst_22 = arith.constant dense<0.000000e+00> : vector<24x128xf32>
    %24 = tpu.matmul %21, %23, %cst_22 {dimension_numbers = #tpu.dot_dimension_numbers<[1], [0], [0], [1], [0, 0, 1, 1], [], []>} : vector<24x128xf32>, vector<128x128xf32>, vector<24x128xf32> -> vector<24x128xf32>
    %25 = arith.addf %20, %24 : vector<24x128xf32>
    %c8 = arith.constant 8 : index
    %c0_23 = arith.constant 0 : index
    %26 = vector.load %arg1[%c8, %c0_23] : memref<40x128xf32, #tpu.memory_space<vmem>>, vector<24x128xf32>
    %c5 = arith.constant 5 : index
    %c0_24 = arith.constant 0 : index
    %c0_25 = arith.constant 0 : index
    %27 = vector.load %arg2[%c5, %c0_24, %c0_25] : memref<9x128x128xf32, #tpu.memory_space<vmem>>, vector<1x128x128xf32>
    %28 = vector.shape_cast %27 : vector<1x128x128xf32> to vector<128x128xf32>
    %cst_26 = arith.constant dense<0.000000e+00> : vector<24x128xf32>
    %29 = tpu.matmul %26, %28, %cst_26 {dimension_numbers = #tpu.dot_dimension_numbers<[1], [0], [0], [1], [0, 0, 1, 1], [], []>} : vector<24x128xf32>, vector<128x128xf32>, vector<24x128xf32> -> vector<24x128xf32>
    %30 = arith.addf %25, %29 : vector<24x128xf32>
    %c12 = arith.constant 12 : index
    %c0_27 = arith.constant 0 : index
    %31 = vector.load %arg1[%c12, %c0_27] : memref<40x128xf32, #tpu.memory_space<vmem>>, vector<24x128xf32>
    %c6_28 = arith.constant 6 : index
    %c0_29 = arith.constant 0 : index
    %c0_30 = arith.constant 0 : index
    %32 = vector.load %arg2[%c6_28, %c0_29, %c0_30] : memref<9x128x128xf32, #tpu.memory_space<vmem>>, vector<1x128x128xf32>
    %33 = vector.shape_cast %32 : vector<1x128x128xf32> to vector<128x128xf32>
    %cst_31 = arith.constant dense<0.000000e+00> : vector<24x128xf32>
    %34 = tpu.matmul %31, %33, %cst_31 {dimension_numbers = #tpu.dot_dimension_numbers<[1], [0], [0], [1], [0, 0, 1, 1], [], []>} : vector<24x128xf32>, vector<128x128xf32>, vector<24x128xf32> -> vector<24x128xf32>
    %35 = arith.addf %30, %34 : vector<24x128xf32>
    %c13 = arith.constant 13 : index
    %c0_32 = arith.constant 0 : index
    %36 = vector.load %arg1[%c13, %c0_32] : memref<40x128xf32, #tpu.memory_space<vmem>>, vector<24x128xf32>
    %c7_33 = arith.constant 7 : index
    %c0_34 = arith.constant 0 : index
    %c0_35 = arith.constant 0 : index
    %37 = vector.load %arg2[%c7_33, %c0_34, %c0_35] : memref<9x128x128xf32, #tpu.memory_space<vmem>>, vector<1x128x128xf32>
    %38 = vector.shape_cast %37 : vector<1x128x128xf32> to vector<128x128xf32>
    %cst_36 = arith.constant dense<0.000000e+00> : vector<24x128xf32>
    %39 = tpu.matmul %36, %38, %cst_36 {dimension_numbers = #tpu.dot_dimension_numbers<[1], [0], [0], [1], [0, 0, 1, 1], [], []>} : vector<24x128xf32>, vector<128x128xf32>, vector<24x128xf32> -> vector<24x128xf32>
    %40 = arith.addf %35, %39 : vector<24x128xf32>
    %c14 = arith.constant 14 : index
    %c0_37 = arith.constant 0 : index
    %41 = vector.load %arg1[%c14, %c0_37] : memref<40x128xf32, #tpu.memory_space<vmem>>, vector<24x128xf32>
    %c8_38 = arith.constant 8 : index
    %c0_39 = arith.constant 0 : index
    %c0_40 = arith.constant 0 : index
    %42 = vector.load %arg2[%c8_38, %c0_39, %c0_40] : memref<9x128x128xf32, #tpu.memory_space<vmem>>, vector<1x128x128xf32>
    %43 = vector.shape_cast %42 : vector<1x128x128xf32> to vector<128x128xf32>
    %cst_41 = arith.constant dense<0.000000e+00> : vector<24x128xf32>
    %44 = tpu.matmul %41, %43, %cst_41 {dimension_numbers = #tpu.dot_dimension_numbers<[1], [0], [0], [1], [0, 0, 1, 1], [], []>} : vector<24x128xf32>, vector<128x128xf32>, vector<24x128xf32> -> vector<24x128xf32>
    %45 = arith.addf %40, %44 : vector<24x128xf32>
    %c0_42 = arith.constant 0 : index
    %c0_43 = arith.constant 0 : index
    %46 = vector.load %arg3[%c0_42, %c0_43] : memref<1x128xf32, #tpu.memory_space<vmem>>, vector<1x128xf32>
    %47 = vector.broadcast %46 : vector<1x128xf32> to vector<24x128xf32>
    %48 = arith.addf %45, %47 : vector<24x128xf32>
    %c0_44 = arith.constant 0 : index
    %c0_45 = arith.constant 0 : index
    %49 = vector.load %arg4[%c0_44, %c0_45] : memref<24x128xf32, #tpu.memory_space<vmem>>, vector<24x128xf32>
    %50 = arith.addf %48, %49 : vector<24x128xf32>
    %cst_46 = arith.constant 0.000000e+00 : f32
    %51 = vector.broadcast %cst_46 : f32 to vector<24x128xf32>
    %52 = arith.maximumf %50, %51 : vector<24x128xf32>
    %c0_47 = arith.constant 0 : index
    %c0_48 = arith.constant 0 : index
    %53 = vector.load %arg5[%c0_47, %c0_48] : memref<24x128xf32, #tpu.memory_space<vmem>>, vector<24x128xf32>
    tpu.vector_store %arg5[%c0_47, %c0_48], %52 {strides = array<i32>} : memref<24x128xf32, #tpu.memory_space<vmem>>, vector<24x128xf32>,
    return
  }
  func.func @transform_0(%arg0: i32) -> (i32, i32) {
    %c0_i32 = arith.constant 0 : i32
    %c0_i32_0 = arith.constant 0 : i32
    return %arg0, %c0_i32 : i32, i32
  }
  func.func @transform_1(%arg0: i32) -> (i32, i32, i32) {
    %c0_i32 = arith.constant 0 : i32
    %c0_i32_0 = arith.constant 0 : i32
    %c0_i32_1 = arith.constant 0 : i32
    %c0_i32_2 = arith.constant 0 : i32
    return %c0_i32, %c0_i32_0, %c0_i32_1 : i32, i32, i32
  }
  func.func @transform_2(%arg0: i32) -> (i32, i32) {
    %c0_i32 = arith.constant 0 : i32
    %c0_i32_0 = arith.constant 0 : i32
    %c0_i32_1 = arith.constant 0 : i32
    return %c0_i32, %c0_i32_0 : i32, i32
  }
  func.func @transform_3(%arg0: i32) -> (i32, i32) {
    %c0_i32 = arith.constant 0 : i32
    %c0_i32_0 = arith.constant 0 : i32
    return %arg0, %c0_i32 : i32, i32
  }
  func.func @transform_4(%arg0: i32) -> (i32, i32) {
    %c0_i32 = arith.constant 0 : i32
    %c0_i32_0 = arith.constant 0 : i32
    return %arg0, %c0_i32 : i32, i32
  }
}

</mosaic_0001>

<bundles_post_ra>
// kernel: fair_resnet_forward.6
= control target key start
LH: loop header
LB: loop body
LE: loop exit
PB: predicated region body
PF: predicated region fallthrough
CT: control target
= control target key end

     0   :  { %s470_s15 = smov 0   ;;  %s527_s0 = inlined_call_operand.vmem [shape: f32[64,128], index: 0, kind: input, shape index: {}]   ;;  %s528_s1 = inlined_call_operand.vmem [shape: f32[64,128], index: 1, kind: input, shape index: {}]   ;;  %s529_s2 = inlined_call_operand.vmem [shape: f32[64,128], index: 2, kind: input, shape index: {}]   ;;  %s530_s3 = inlined_call_operand.vmem [shape: f32[64,128], index: 3, kind: input, shape index: {}]   ;;  %s531_s4 = inlined_call_operand.vmem [shape: f32[48,128], index: 4, kind: output, shape index: {}]  }
   0x1 LB: > { %s413_s16 = sadd.s32 4294967295, %s443_s15   ;;  %p417_p0 = scmp.ge.s32.totalorder %s443_s15, 1  ;;  %s443_s15 = sphi %s470_s15, %s14_s15  }
   0x2   : > { %p196_p1 = scmp.lt.s32.totalorder %s443_s15, 3 }
   0x4   : > { %p197_p2 = pnand %p417_p0, %p196_p1 }
   0x5   : > { %s418_s17 = sshll.u32 (!%p197_p2), %s413_s16, 2  ;;  %s261_s19 = smul.u32 (!%p197_p2), 3, %s413_s16 }
   0x6   : > { %200 = sbr.rel (%p197_p2) target bundleno = 36 (0x24), region = 36  ;;  %p238_p3 = scmp.lt.s32.totalorder (!%p197_p2), %s418_s17, 7 }
   0x7   : > { %p262_p4 = scmp.lt.s32.totalorder (!%p197_p2), %s261_s19, 5 }
   0xd   : > { %s533_s17 = smov (!%p238_p3, %s418_s17), 7  ;;  %s535_s19 = smov (!%p262_p4, %s261_s19), 5 }
   0xe   : > { %s419_s18 = sshll.u32 %s533_s17, 3  ;;  %s426_s6 = sshll.u32 %s535_s19, 3 }
   0xf   : > { %s481_s22 = scalar_lea.vmem %s527_s0, %s419_s18  ;;  %s486_s25 = scalar_lea.vmem %s528_s1, %s419_s18 }
  0x10   : > { %s491_s28 = scalar_lea.vmem %s529_s2, %s419_s18  ;;  %v267_v0 = vld [vmem:[%s481_s22] sm:$0xff]  ;;  %s259_s5 = scalar_lea.vmem %s530_s3, %s419_s18  ;;  %v268_v6 = vld [vmem:[%s481_s22 + $0x8] sm:$0xff]  ;;  %v269_v15 = vld [vmem:[%s481_s22 + $0x10] sm:$0xff] }
  0x11   : > { %v270_v1 = vld [vmem:[%s486_s25] sm:$0xff]  ;;  %v271_v7 = vld [vmem:[%s486_s25 + $0x8] sm:$0xff]  ;;  %v272_v16 = vld [vmem:[%s486_s25 + $0x10] sm:$0xff]  ;;  %s265_s9 = scalar_lea.vmem %s531_s4, %s426_s6 }
  0x12   : > { %v276_v2 = vld [vmem:[%s481_s22 + $0x1] sm:$0xff]  ;;  %v273_v3 = vmax.f32 %v267_v0, %v270_v1  ;;  %v277_v8 = vld [vmem:[%s481_s22 + $0x9] sm:$0xff]  ;;  %v274_v10 = vmax.f32 %v268_v6, %v271_v7  ;;  %v278_v17 = vld [vmem:[%s481_s22 + $0x11] sm:$0xff]  ;;  %v275_v20 = vmax.f32 %v269_v15, %v272_v16 }
  0x13   : > { %v282_v4 = vld [vmem:[%s491_s28] sm:$0xff]  ;;  %v283_v13 = vld [vmem:[%s491_s28 + $0x8] sm:$0xff]  ;;  %v284_v23 = vld [vmem:[%s491_s28 + $0x10] sm:$0xff] }
  0x14   : > { %v279_v5 = vmax.f32 %v273_v3, %v276_v2  ;;  %v288_v9 = vld [vmem:[%s259_s5] sm:$0xff]  ;;  %v280_v14 = vmax.f32 %v274_v10, %v277_v8  ;;  %v289_v19 = vld [vmem:[%s259_s5 + $0x8] sm:$0xff]  ;;  %v281_v26 = vmax.f32 %v275_v20, %v278_v17  ;;  %v290_v29 = vld [vmem:[%s259_s5 + $0x10] sm:$0xff] }
  0x15   : > { %v294_v12 = vld [vmem:[%s491_s28 + $0x1] sm:$0xff]  ;;  %v295_v25 = vld [vmem:[%s491_s28 + $0x9] sm:$0xff]  ;;  %v296_v35 = vld [vmem:[%s491_s28 + $0x11] sm:$0xff] }
  0x16   : > { %v285_v11 = vmax.f32 %v279_v5, %v282_v4  ;;  %v300_v21 = vld [vmem:[%s481_s22 + $0x5] sm:$0xff]  ;;  %v286_v22 = vmax.f32 %v280_v14, %v283_v13  ;;  %v301_v31 = vld [vmem:[%s481_s22 + $0xd] sm:$0xff]  ;;  %v287_v32 = vmax.f32 %v281_v26, %v284_v23  ;;  %v302_v40 = vld [vmem:[%s481_s22 + $0x15] sm:$0xff] }
  0x17   : > { %v306_v27 = vld [vmem:[%s486_s25 + $0x5] sm:$0xff]  ;;  %v307_v37 = vld [vmem:[%s486_s25 + $0xd] sm:$0xff]  ;;  %v308_v45 = vld [vmem:[%s486_s25 + $0x15] sm:$0xff] }
  0x18   : > { %v291_v18 = vmax.f32 %v285_v11, %v288_v9  ;;  %v292_v28 = vmax.f32 %v286_v22, %v289_v19  ;;  %v312_v33 = vld [vmem:[%s481_s22 + $0x6] sm:$0xff]  ;;  %v293_v38 = vmax.f32 %v287_v32, %v290_v29  ;;  %v313_v42 = vld [vmem:[%s481_s22 + $0xe] sm:$0xff]  ;;  %v314_v48 = vld [vmem:[%s481_s22 + $0x16] sm:$0xff] }
  0x1a   : > { %v297_v24 = vmax.f32 %v291_v18, %v294_v12  ;;  %v298_v34 = vmax.f32 %v292_v28, %v295_v25  ;;  %v299_v43 = vmax.f32 %v293_v38, %v296_v35 }
  0x1c   : > { %v303_v30 = vmax.f32 %v297_v24, %v300_v21  ;;  %v304_v39 = vmax.f32 %v298_v34, %v301_v31  ;;  %v305_v46 = vmax.f32 %v299_v43, %v302_v40 }
  0x1e   : > { %v309_v36 = vmax.f32 %v303_v30, %v306_v27  ;;  %v310_v44 = vmax.f32 %v304_v39, %v307_v37  ;;  %v311_v49 = vmax.f32 %v305_v46, %v308_v45 }
  0x20   : > { %v315_v41 = vmax.f32 %v309_v36, %v312_v33  ;;  %v316_v47 = vmax.f32 %v310_v44, %v313_v42  ;;  %v317_v50 = vmax.f32 %v311_v49, %v314_v48 }
  0x22   : > { %318 = vst [vmem:[%s265_s9] sm:$0xff] %v315_v41  ;;  %319 = vst [vmem:[%s265_s9 + $0x8] sm:$0xff] %v316_v47 }
  0x23   : > { %320 = vst [vmem:[%s265_s9 + $0x10] sm:$0xff] %v317_v50 }
  0x24 PF: > { %s14_s15 = sadd.s32 1, %s443_s15  }
  0x25   : > { %p11_p5 = scmp.ge.s32.totalorder %s14_s15, 4  }
  0x27   :  { %13 = sbr.rel (!%p11_p5) target bundleno = 1 (0x1), region = 75 }

// kernel: fair_resnet_forward.9
= control target key start
LH: loop header
LB: loop body
LE: loop exit
PB: predicated region body
PF: predicated region fallthrough
CT: control target
= control target key end

     0   :  { %10 = vsyncpa [#allocation3], 0  ;;  %v296_v3 = vmov 0.0|0.0   ;;  %vm297_vm0 = vmmov 0   ;;  %v298_v6 = vmov 0.0   ;;  %s421_s0 = inlined_call_operand.vmem [shape: f32[2,16,128], index: 0, kind: input, shape index: {}]   ;;  %s422_s1 = inlined_call_operand.vmem [shape: f32[128,128], index: 1, kind: input, shape index: {}]   ;;  %s423_s2 = inlined_call_operand.vmem [shape: f32[1,128], index: 2, kind: input, shape index: {}]   ;;  %s424_s3 = inlined_call_operand.hbm [shape: f32[2,128], index: 3, kind: output, shape index: {0}]   ;;  %s425_s4 = inlined_call_operand.hbm [shape: f32[2,128], index: 4, kind: output, shape index: {1}]  }
   0x1   :  { %v38_v0 = vld [vmem:[%s422_s1] sm:$0xff]  ;;  %v39_v1 = vld [vmem:[%s422_s1 + $0x8] sm:$0xff]  ;;  %v40_v2 = vld [vmem:[%s422_s1 + $0x10] sm:$0xff]  ;;  %219 = vmatprep.subr.bf16.mxu0 %v296_v3  ;;  %216 = vmatprep.mubr.msk.f32.mxu0 %vm297_vm0, %v298_v6 }
   0x2   :  { %v220_v4 = vpack.c.bf16 %v39_v1, %v38_v0  ;;  %v41_v5 = vld [vmem:[%s422_s1 + $0x18] sm:$0xff]  ;;  %v42_v8 = vld [vmem:[%s422_s1 + $0x20] sm:$0xff]  ;;  %v43_v9 = vld [vmem:[%s422_s1 + $0x28] sm:$0xff] }
   0x3   :  { %v223_v7 = vpack.c.bf16 %v41_v5, %v40_v2  ;;  %v18_v10 = vld [vmem:[%s421_s0] sm:$0xff]  ;;  %v19_v11 = vld [vmem:[%s421_s0 + $0x8] sm:$0xff]  ;;  %v20_v12 = vld [vmem:[%s421_s0 + $0x10] sm:$0xff]  ;;  %v226_v15 = vpack.c.bf16 %v43_v9, %v42_v8 }
   0x4   :  { %221 = vmatpush3.bf16.msra.mxu0 %v220_v4  ;;  %v21_v13 = vld [vmem:[%s421_s0 + $0x18] sm:$0xff]  ;;  %v22_v14 = vadd.f32 %v19_v11, %v18_v10 }
   0x5   :  { %222 = vmatprep.subr.bf16.mxu0 %v296_v3  ;;  %v29_v16 = vadd.f32 %v21_v13, %v20_v12 }
   0x8   :  { %224 = vmatpush3.bf16.msra.mxu0 %v223_v7 }
   0x9   :  { %11 = vsyncpa [#allocation5], 0  ;;  %225 = vmatprep.subr.bf16.mxu0 %v296_v3  ;;  %v44_v17 = vld [vmem:[%s422_s1 + $0x30] sm:$0xff]  ;;  %v45_v18 = vld [vmem:[%s422_s1 + $0x38] sm:$0xff]  ;;  %v23_v19 = vrot.slane %v22_v14, 4  ;;  %v30_v20 = vrot.slane %v29_v16, 4 }
   0xa   :  { %v229_v22 = vpack.c.bf16 %v45_v18, %v44_v17  ;;  %v46_v24 = vld [vmem:[%s422_s1 + $0x40] sm:$0xff]  ;;  %v47_v25 = vld [vmem:[%s422_s1 + $0x48] sm:$0xff]  ;;  %v48_v31 = vld [vmem:[%s422_s1 + $0x50] sm:$0xff]  ;;  %vm63_vm1 = vcmask 1041409   ;;  %s299_s28 = smov [#allocation4]  }
   0xb   :  { %v24_v21 = vadd.f32 %v23_v19, %v22_v14  ;;  %v31_v23 = vadd.f32 %v30_v20, %v29_v16  ;;  %v232_v29 = vpack.c.bf16 %v47_v25, %v46_v24  ;;  %v49_v32 = vld [vmem:[%s422_s1 + $0x58] sm:$0xff]  ;;  %v50_v38 = vld [vmem:[%s422_s1 + $0x60] sm:$0xff]  ;;  %v51_v39 = vld [vmem:[%s422_s1 + $0x68] sm:$0xff]  ;;  %s154_s29 = sshll.u32 %s299_s28, 4  ;;  %s155_s29 = int_to_ptr.vmem [resolvable:$true] %s154_s29 }
   0xc   :  { %227 = vmatpush3.bf16.msra.mxu0 %v226_v15  ;;  %v235_v36 = vpack.c.bf16 %v49_v32, %v48_v31  ;;  %v238_v42 = vpack.c.bf16 %v51_v39, %v50_v38  ;;  %v52_v44 = vld [vmem:[%s422_s1 + $0x70] sm:$0xff]  ;;  %v53_v45 = vld [vmem:[%s422_s1 + $0x78] sm:$0xff]  ;;  %s248_s30 = scalar_lea.vmem %s155_s29, 32  ;;  %p253_p1 = scmp.lt.s32.totalorder %s155_s29, %s155_s29 }
   0xd   :  { %228 = vmatprep.subr.bf16.mxu0 %v296_v3  ;;  %v25_v26 = vrot.slane %v24_v21, 2  ;;  %v32_v27 = vrot.slane %v31_v23, 2  ;;  %v241_v46 = vpack.c.bf16 %v53_v45, %v52_v44  ;;  %p249_p0 = scmp.ne.s32.totalorder %s155_s29, %s248_s30  ;;  %p254_p2 = scmp.lt.s32.totalorder %s248_s30, %s248_s30 }
   0xf   :  { %v26_v28 = vadd.f32 %v25_v26, %v24_v21  ;;  %v33_v30 = vadd.f32 %v32_v27, %v31_v23  ;;  %p255_p3 = por %p254_p2, %p253_p1 }
  0x10   :  { %230 = vmatpush3.bf16.msra.mxu0 %v229_v22 }
  0x11   :  { %231 = vmatprep.subr.bf16.mxu0 %v296_v3  ;;  %v27_v33 = vrot.slane %v26_v28, 1  ;;  %v34_v34 = vrot.slane %v33_v30, 1  ;;  %p256_p4 = pnand %p255_p3, %p249_p0 }
  0x13   :  { %v28_v35 = vadd.f32 %v27_v33, %v26_v28  ;;  %v35_v37 = vadd.f32 %v34_v34, %v33_v30 }
  0x14   :  { %233 = vmatpush3.bf16.msra.mxu0 %v232_v29 }
  0x15   :  { %234 = vmatprep.subr.bf16.mxu0 %v296_v3  ;;  %v36_v40 = vmul.f32 0.0625, %v28_v35  ;;  %v37_v41 = vmul.f32 0.0625, %v35_v37 }
  0x17   :  { %v64_v43 = vsel %vm63_vm1, %v37_v41, %v36_v40 }
  0x18   :  { %236 = vmatpush3.bf16.msra.mxu0 %v235_v36  ;;  %136 = vst [vmem:[#allocation4] sm:$0x3] %v64_v43 }
  0x19   :  { %237 = vmatprep.subr.bf16.mxu0 %v296_v3 }
  0x1c   :  { %239 = vmatpush3.bf16.msra.mxu0 %v238_v42 }
  0x1d   :  { %240 = vmatprep.subr.bf16.mxu0 %v296_v3 }
  0x20   :  { %242 = vmatpush3.bf16.msra.mxu0 %v241_v46 }
  0x23   :  { %217 = vmatmul.mubr.f32.vlgmr.msra.gmra.mrb[0].mxu0 %v64_v43 }
  0x24   :  { %259 = shalt.err (!%p256_p4)
}
  0x25   :  { %s260_s1 = scalar_lea.hbm %s425_s4, 32 }
  0x26   :  { %p261_p5 = scmp.ne.s32.totalorder %s425_s4, %s260_s1  ;;  %p264_p6 = scmp.lt.u32.totalorder %s260_s1, %s425_s4 }
  0x28   :  { %p266_p7 = pnand %p264_p6, %p261_p5 }
  0x2a   :  { %269 = shalt.err (!%p266_p7)
}
  0x2b   :  { %157 = dma.vmem_to_hbm [thread:$0]  %s155_s29, 32, %s425_s4, [#allocation5]   ;;  %v166_v47 = vld [vmem:[%s423_s2] ss:$0 sm:$0xff] }
  0x2c   :  { %s300_s14 = smov [#allocation2]  }
  0x2d   :  { %s144_s15 = sshll.u32 %s300_s14, 4  ;;  %s145_s15 = int_to_ptr.vmem [resolvable:$true] %s144_s15 }
  0x2e   :  { %s270_s16 = scalar_lea.vmem %s145_s15, 32  ;;  %p275_p9 = scmp.lt.s32.totalorder %s145_s15, %s145_s15 }
  0x2f   :  { %p271_p8 = scmp.ne.s32.totalorder %s145_s15, %s270_s16  ;;  %p276_p10 = scmp.lt.s32.totalorder %s270_s16, %s270_s16 }
  0x31   :  { %p277_p11 = por %p276_p10, %p275_p9 }
  0x33   :  { %p278_p12 = pnand %p277_p11, %p271_p8 }
  0xf6   :  { %v132_v48 = vpop.f32.mrb[0].mxu0 }
  0xf7   :  { %v133_v49 = vadd.f32 %v166_v47, %v132_v48  ;;  %v218_v50 = vpop.f32.mrb[1].mxu0 }
  0xf9   :  { %137 = vst [vmem:[#allocation2] sm:$0x3] %v133_v49 }
  0xfa   :  { %281 = shalt.err (!%p278_p12)
}
  0xfb   :  { %s282_s18 = scalar_lea.hbm %s424_s3, 32 }
  0xfc   :  { %p283_p13 = scmp.ne.s32.totalorder %s424_s3, %s282_s18  ;;  %p286_p0 = scmp.lt.u32.totalorder %s282_s18, %s424_s3 }
  0xfe   :  { %p288_p1 = pnand %p286_p0, %p283_p13 }
 0x100   :  { %291 = shalt.err (!%p288_p1)
}
 0x101   :  { %147 = dma.vmem_to_hbm [thread:$0]  %s145_s15, 32, %s424_s3, [#allocation3]  }
 0x102   :  { %292 = dma.done.wait [#allocation3], 32  }
 0x103   :  { %293 = vsyncadd [#allocation3], 4294967264 }
 0x104   :  { %294 = dma.done.wait [#allocation5], 32  }
 0x105   :  { %295 = vsyncadd [#allocation5], 4294967264 }
 0x106   :  { %164 = vsyncpa [#allocation3], 1 }
 0x107   :  { %165 = vsyncpa [#allocation5], 1 }

// kernel: fair_resnet_forward.7
= control target key start
LH: loop header
LB: loop body
LE: loop exit
PB: predicated region body
PF: predicated region fallthrough
CT: control target
= control target key end

     0   :  { %s2118_s12 = smov 0   ;;  %s2749_s0 = inlined_call_operand.vmem [shape: f32[80,128], index: 0, kind: input, shape index: {}]   ;;  %s2750_s1 = inlined_call_operand.vmem [shape: f32[9,128,128], index: 1, kind: input, shape index: {}]   ;;  %s2751_s2 = inlined_call_operand.vmem [shape: f32[1,128], index: 2, kind: input, shape index: {}]   ;;  %s2752_s3 = inlined_call_operand.vmem [shape: f32[48,128], index: 3, kind: output, shape index: {}]  }
   0x1 LB: > { %s1166_s13 = sadd.s32 4294967295, %s2093_s12   ;;  %p1170_p0 = scmp.ge.s32.totalorder %s2093_s12, 1  ;;  %s2093_s12 = sphi %s2118_s12, %s13_s12  }
   0x2   : > { %p138_p1 = scmp.lt.s32.totalorder %s2093_s12, 3 }
   0x4   : > { %p139_p2 = pnand %p1170_p0, %p138_p1 }
   0x5   : > { %v1173_v0 = vld [vmem:[%s2750_s1 + $0x80] sm:$0xff] (!%p139_p2)  ;;  %v1174_v1 = vld [vmem:[%s2750_s1 + $0x88] sm:$0xff] (!%p139_p2)  ;;  %v2095_v3 = vmov (!%p139_p2), 0.0|0.0   ;;  %v1175_v6 = vld [vmem:[%s2750_s1 + $0x90] sm:$0xff] (!%p139_p2)  ;;  %vm2096_vm0 = vmmov (!%p139_p2), 0   ;;  %v2097_v11 = vmov (!%p139_p2), 0.0  }
   0x6   : > { %142 = sbr.rel (%p139_p2) target bundleno = 391 (0x187), region = 32  ;;  %v177_v2 = vld [vmem:[%s2750_s1] sm:$0xff] (!%p139_p2)  ;;  %1844 = vmatprep.subr.bf16.mxu0 (!%p139_p2), %v2095_v3  ;;  %1868 = vmatprep.subr.bf16.mxu1 (!%p139_p2), %v2095_v3  ;;  %v1845_v4 = vpack.c.bf16 (!%p139_p2), %v1174_v1, %v1173_v0  ;;  %v178_v5 = vld [vmem:[%s2750_s1 + $0x8] sm:$0xff] (!%p139_p2)  ;;  %v1176_v7 = vld [vmem:[%s2750_s1 + $0x98] sm:$0xff] (!%p139_p2) }
   0x7   : > { %v1869_v8 = vpack.c.bf16 (!%p139_p2), %v178_v5, %v177_v2  ;;  %v179_v9 = vld [vmem:[%s2750_s1 + $0x10] sm:$0xff] (!%p139_p2)  ;;  %v180_v10 = vld [vmem:[%s2750_s1 + $0x18] sm:$0xff] (!%p139_p2)  ;;  %1548 = vmatprep.mubr.msk.f32.mxu1 (!%p139_p2), %vm2096_vm0, %v2097_v11  ;;  %1507 = vmatprep.mubr.msk.f32.mxu0 (!%p139_p2), %vm2096_vm0, %v2097_v11  ;;  %v1848_v12 = vpack.c.bf16 (!%p139_p2), %v1176_v7, %v1175_v6  ;;  %v1177_v14 = vld [vmem:[%s2750_s1 + $0xa0] sm:$0xff] (!%p139_p2)  ;;  %s162_s29 = smul.u32 (!%p139_p2), 5, %s1166_s13 }
   0x8   : > { %1846 = vmatpush3.bf16.msra.mxu0 (!%p139_p2), %v1845_v4  ;;  %v1872_v13 = vpack.c.bf16 (!%p139_p2), %v180_v10, %v179_v9  ;;  %v1178_v15 = vld [vmem:[%s2750_s1 + $0xa8] sm:$0xff] (!%p139_p2)  ;;  %v181_v16 = vld [vmem:[%s2750_s1 + $0x20] sm:$0xff] (!%p139_p2)  ;;  %v1179_v20 = vld [vmem:[%s2750_s1 + $0xb0] sm:$0xff] (!%p139_p2) }
   0x9   : > { %1870 = vmatpush3.bf16.msra.mxu1 (!%p139_p2), %v1869_v8  ;;  %1847 = vmatprep.subr.bf16.mxu0 (!%p139_p2), %v2095_v3  ;;  %v182_v17 = vld [vmem:[%s2750_s1 + $0x28] sm:$0xff] (!%p139_p2)  ;;  %v1851_v18 = vpack.c.bf16 (!%p139_p2), %v1178_v15, %v1177_v14  ;;  %v1180_v21 = vld [vmem:[%s2750_s1 + $0xb8] sm:$0xff] (!%p139_p2)  ;;  %v183_v22 = vld [vmem:[%s2750_s1 + $0x30] sm:$0xff] (!%p139_p2)  ;;  %p163_p3 = scmp.lt.s32.totalorder (!%p139_p2), %s162_s29, 9 }
   0xa   : > { %1871 = vmatprep.subr.bf16.mxu1 (!%p139_p2), %v2095_v3  ;;  %v1875_v19 = vpack.c.bf16 (!%p139_p2), %v182_v17, %v181_v16  ;;  %v184_v23 = vld [vmem:[%s2750_s1 + $0x38] sm:$0xff] (!%p139_p2)  ;;  %v1854_v24 = vpack.c.bf16 (!%p139_p2), %v1180_v21, %v1179_v20  ;;  %v1181_v26 = vld [vmem:[%s2750_s1 + $0xc0] sm:$0xff] (!%p139_p2)  ;;  %v1182_v27 = vld [vmem:[%s2750_s1 + $0xc8] sm:$0xff] (!%p139_p2) }
   0xb   : > { %v1878_v25 = vpack.c.bf16 (!%p139_p2), %v184_v23, %v183_v22  ;;  %v185_v28 = vld [vmem:[%s2750_s1 + $0x40] sm:$0xff] (!%p139_p2)  ;;  %v186_v29 = vld [vmem:[%s2750_s1 + $0x48] sm:$0xff] (!%p139_p2)  ;;  %v1857_v30 = vpack.c.bf16 (!%p139_p2), %v1182_v27, %v1181_v26  ;;  %v1183_v32 = vld [vmem:[%s2750_s1 + $0xd0] sm:$0xff] (!%p139_p2) }
   0xc   : > { %1849 = vmatpush3.bf16.msra.mxu0 (!%p139_p2), %v1848_v12  ;;  %v1881_v31 = vpack.c.bf16 (!%p139_p2), %v186_v29, %v185_v28  ;;  %v1184_v33 = vld [vmem:[%s2750_s1 + $0xd8] sm:$0xff] (!%p139_p2)  ;;  %v187_v34 = vld [vmem:[%s2750_s1 + $0x50] sm:$0xff] (!%p139_p2)  ;;  %v1185_v38 = vld [vmem:[%s2750_s1 + $0xe0] sm:$0xff] (!%p139_p2) }
   0xd   : > { %1873 = vmatpush3.bf16.msra.mxu1 %v1872_v13  ;;  %1850 = vmatprep.subr.bf16.mxu0 %v2095_v3  ;;  %v188_v35 = vld [vmem:[%s2750_s1 + $0x58] sm:$0xff]  ;;  %v1860_v36 = vpack.c.bf16 %v1184_v33, %v1183_v32  ;;  %v1186_v39 = vld [vmem:[%s2750_s1 + $0xe8] sm:$0xff]  ;;  %v189_v40 = vld [vmem:[%s2750_s1 + $0x60] sm:$0xff]  ;;  %s2754_s29 = smov (!%p163_p3, %s162_s29), 9 }
   0xe   : > { %1874 = vmatprep.subr.bf16.mxu1 %v2095_v3  ;;  %v1884_v37 = vpack.c.bf16 %v188_v35, %v187_v34  ;;  %v190_v41 = vld [vmem:[%s2750_s1 + $0x68] sm:$0xff]  ;;  %v1863_v42 = vpack.c.bf16 %v1186_v39, %v1185_v38  ;;  %v1187_v44 = vld [vmem:[%s2750_s1 + $0xf0] sm:$0xff]  ;;  %v1188_v45 = vld [vmem:[%s2750_s1 + $0xf8] sm:$0xff]  ;;  %s1171_s30 = sshll.u32 %s2754_s29, 3 }
   0xf   : > { %v1887_v43 = vpack.c.bf16 %v190_v41, %v189_v40  ;;  %v191_v46 = vld [vmem:[%s2750_s1 + $0x70] sm:$0xff]  ;;  %v192_v47 = vld [vmem:[%s2750_s1 + $0x78] sm:$0xff]  ;;  %v1866_v48 = vpack.c.bf16 %v1188_v45, %v1187_v44  ;;  %s2246_s6 = scalar_lea.vmem %s2749_s0, %s1171_s30  ;;  %v1189_v50 = vld [vmem:[%s2750_s1 + $0x100] sm:$0xff] }
  0x10   : > { %1852 = vmatpush3.bf16.msra.mxu0 %v1851_v18  ;;  %v1890_v49 = vpack.c.bf16 %v192_v47, %v191_v46  ;;  %v1190_v51 = vld [vmem:[%s2750_s1 + $0x108] sm:$0xff]  ;;  %v1205_v52 = vld [vmem:[%s2750_s1 + $0x180] sm:$0xff]  ;;  %v1191_v58 = vld [vmem:[%s2750_s1 + $0x110] sm:$0xff] }
  0x11   : > { %1876 = vmatpush3.bf16.msra.mxu1 %v1875_v19  ;;  %1853 = vmatprep.subr.bf16.mxu0 %v2095_v3  ;;  %v1206_v53 = vld [vmem:[%s2750_s1 + $0x188] sm:$0xff]  ;;  %v1893_v55 = vpack.c.bf16 %v1190_v51, %v1189_v50  ;;  %v174_v56 = vld [vmem:[%s2246_s6] sm:$0xff]  ;;  %v1192_v59 = vld [vmem:[%s2750_s1 + $0x118] sm:$0xff] }
  0x12   : > { %1877 = vmatprep.subr.bf16.mxu1 %v2095_v3  ;;  %v193_v54 = vld [vmem:[%s2246_s6 + $0x1] sm:$0xff]  ;;  %v1917_v57 = vpack.c.bf16 %v1206_v53, %v1205_v52  ;;  %v1207_v60 = vld [vmem:[%s2750_s1 + $0x190] sm:$0xff]  ;;  %v1208_v61 = vld [vmem:[%s2750_s1 + $0x198] sm:$0xff]  ;;  %v1896_v62 = vpack.c.bf16 %v1192_v59, %v1191_v58 }
  0x13   : > { %v194_v63 = vld [vmem:[%s2246_s6 + $0x9] sm:$0xff]  ;;  %v1920_v0 = vpack.c.bf16 %v1208_v61, %v1207_v60  ;;  %v1193_v1 = vld [vmem:[%s2750_s1 + $0x120] sm:$0xff]  ;;  %v195_v8 = vld [vmem:[%s2246_s6 + $0x11] sm:$0xff] }
  0x14   : > { %1855 = vmatpush3.bf16.msra.mxu0 %v1854_v24  ;;  %v1194_v2 = vld [vmem:[%s2750_s1 + $0x128] sm:$0xff]  ;;  %v1209_v5 = vld [vmem:[%s2750_s1 + $0x1a0] sm:$0xff]  ;;  %v1195_v10 = vld [vmem:[%s2750_s1 + $0x130] sm:$0xff] }
  0x15   : > { %1879 = vmatpush3.bf16.msra.mxu1 %v1878_v25  ;;  %1856 = vmatprep.subr.bf16.mxu0 %v2095_v3  ;;  %v2286_v4 = vld [vmem:[%s2246_s6 + $0x8] sm:$0xff]  ;;  %v1899_v7 = vpack.c.bf16 %v1194_v2, %v1193_v1  ;;  %v1196_v12 = vld [vmem:[%s2750_s1 + $0x138] sm:$0xff]  ;;  %v2309_v13 = vld [vmem:[%s2246_s6 + $0x10] sm:$0xff] }
  0x16   : > { %1880 = vmatprep.subr.bf16.mxu1 %v2095_v3  ;;  %v1210_v6 = vld [vmem:[%s2750_s1 + $0x1a8] sm:$0xff]  ;;  %v1211_v14 = vld [vmem:[%s2750_s1 + $0x1b0] sm:$0xff]  ;;  %v1212_v15 = vld [vmem:[%s2750_s1 + $0x1b8] sm:$0xff]  ;;  %v1902_v16 = vpack.c.bf16 %v1196_v12, %v1195_v10 }
  0x17   : > { %v1923_v9 = vpack.c.bf16 %v1210_v6, %v1209_v5  ;;  %v1926_v17 = vpack.c.bf16 %v1212_v15, %v1211_v14  ;;  %v1197_v18 = vld [vmem:[%s2750_s1 + $0x140] sm:$0xff]  ;;  %v1198_v19 = vld [vmem:[%s2750_s1 + $0x148] sm:$0xff]  ;;  %v1199_v24 = vld [vmem:[%s2750_s1 + $0x150] sm:$0xff] }
  0x18   : > { %1858 = vmatpush3.bf16.msra.mxu0 %v1857_v30  ;;  %v1213_v20 = vld [vmem:[%s2750_s1 + $0x1c0] sm:$0xff]  ;;  %v1214_v21 = vld [vmem:[%s2750_s1 + $0x1c8] sm:$0xff]  ;;  %v1905_v22 = vpack.c.bf16 %v1198_v19, %v1197_v18  ;;  %v1200_v25 = vld [vmem:[%s2750_s1 + $0x158] sm:$0xff] }
  0x19   : > { %1882 = vmatpush3.bf16.msra.mxu1 %v1881_v31  ;;  %1859 = vmatprep.subr.bf16.mxu0 %v2095_v3  ;;  %v1929_v23 = vpack.c.bf16 %v1214_v21, %v1213_v20  ;;  %v1215_v26 = vld [vmem:[%s2750_s1 + $0x1d0] sm:$0xff]  ;;  %v1216_v27 = vld [vmem:[%s2750_s1 + $0x1d8] sm:$0xff]  ;;  %v1908_v28 = vpack.c.bf16 %v1200_v25, %v1199_v24  ;;  %v1201_v30 = vld [vmem:[%s2750_s1 + $0x160] sm:$0xff] }
  0x1a   : > { %1883 = vmatprep.subr.bf16.mxu1 %v2095_v3  ;;  %v1932_v29 = vpack.c.bf16 %v1216_v27, %v1215_v26  ;;  %v1202_v31 = vld [vmem:[%s2750_s1 + $0x168] sm:$0xff]  ;;  %v1217_v32 = vld [vmem:[%s2750_s1 + $0x1e0] sm:$0xff]  ;;  %v1219_v38 = vld [vmem:[%s2750_s1 + $0x1f0] sm:$0xff] }
  0x1b   : > { %v1218_v33 = vld [vmem:[%s2750_s1 + $0x1e8] sm:$0xff]  ;;  %v1911_v34 = vpack.c.bf16 %v1202_v31, %v1201_v30  ;;  %v1220_v39 = vld [vmem:[%s2750_s1 + $0x1f8] sm:$0xff]  ;;  %v1237_v44 = vld [vmem:[%s2750_s1 + $0x280] sm:$0xff] }
  0x1c   : > { %1861 = vmatpush3.bf16.msra.mxu0 %v1860_v36  ;;  %v1935_v35 = vpack.c.bf16 %v1218_v33, %v1217_v32  ;;  %v1203_v36 = vld [vmem:[%s2750_s1 + $0x170] sm:$0xff]  ;;  %v1938_v41 = vpack.c.bf16 %v1220_v39, %v1219_v38  ;;  %v1238_v45 = vld [vmem:[%s2750_s1 + $0x288] sm:$0xff]  ;;  %v1224_v51 = vld [vmem:[%s2750_s1 + $0x218] sm:$0xff] }
  0x1d   : > { %1885 = vmatpush3.bf16.msra.mxu1 %v1884_v37  ;;  %1862 = vmatprep.subr.bf16.mxu0 %v2095_v3  ;;  %v1204_v37 = vld [vmem:[%s2750_s1 + $0x178] sm:$0xff]  ;;  %v373_v46 = vld [vmem:[%s2246_s6 + $0x2] sm:$0xff]  ;;  %v1223_v50 = vld [vmem:[%s2750_s1 + $0x210] sm:$0xff] }
  0x1e   : > { %1886 = vmatprep.subr.bf16.mxu1 %v2095_v3  ;;  %v1914_v40 = vpack.c.bf16 %v1204_v37, %v1203_v36  ;;  %v1239_v52 = vld [vmem:[%s2750_s1 + $0x290] sm:$0xff]  ;;  %v1240_v53 = vld [vmem:[%s2750_s1 + $0x298] sm:$0xff]  ;;  %v1225_v58 = vld [vmem:[%s2750_s1 + $0x220] sm:$0xff] }
  0x1f   : > { %v1226_v59 = vld [vmem:[%s2750_s1 + $0x228] sm:$0xff]  ;;  %v1241_v60 = vld [vmem:[%s2750_s1 + $0x2a0] sm:$0xff]  ;;  %v2440_v1 = vld [vmem:[%s2246_s6 + $0x16] sm:$0xff] }
  0x20   : > { %1864 = vmatpush3.bf16.msra.mxu0 %v1863_v42  ;;  %v1221_v42 = vld [vmem:[%s2750_s1 + $0x200] sm:$0xff]  ;;  %v1242_v61 = vld [vmem:[%s2750_s1 + $0x2a8] sm:$0xff]  ;;  %v1227_v2 = vld [vmem:[%s2750_s1 + $0x230] sm:$0xff] }
  0x21   : > { %1888 = vmatpush3.bf16.msra.mxu1 %v1887_v43  ;;  %1865 = vmatprep.subr.bf16.mxu0 %v2095_v3  ;;  %v1222_v43 = vld [vmem:[%s2750_s1 + $0x208] sm:$0xff]  ;;  %v1228_v5 = vld [vmem:[%s2750_s1 + $0x238] sm:$0xff]  ;;  %v1243_v6 = vld [vmem:[%s2750_s1 + $0x2b0] sm:$0xff] }
  0x22   : > { %1889 = vmatprep.subr.bf16.mxu1 %v2095_v3  ;;  %v1941_v47 = vpack.c.bf16 %v1222_v43, %v1221_v42  ;;  %v1229_v10 = vld [vmem:[%s2750_s1 + $0x240] sm:$0xff]  ;;  %v1230_v12 = vld [vmem:[%s2750_s1 + $0x248] sm:$0xff]  ;;  %v1231_v18 = vld [vmem:[%s2750_s1 + $0x250] sm:$0xff] }
  0x23   : > { %v1245_v14 = vld [vmem:[%s2750_s1 + $0x2c0] sm:$0xff]  ;;  %v1246_v15 = vld [vmem:[%s2750_s1 + $0x2c8] sm:$0xff]  ;;  %v1232_v19 = vld [vmem:[%s2750_s1 + $0x258] sm:$0xff] }
  0x24   : > { %1867 = vmatpush3.bf16.msra.mxu0 %v1866_v48  ;;  %v476_v48 = vld [vmem:[%s2246_s6 + $0x6] sm:$0xff]  ;;  %v1247_v20 = vld [vmem:[%s2750_s1 + $0x2d0] sm:$0xff]  ;;  %v1248_v21 = vld [vmem:[%s2750_s1 + $0x2d8] sm:$0xff] }
  0x25   : > { %1891 = vmatpush3.bf16.msra.mxu1 %v1890_v49  ;;  %1892 = vmatprep.subr.bf16.mxu0 %v2095_v3  ;;  %v1965_v49 = vpack.c.bf16 %v1238_v45, %v1237_v44  ;;  %v1233_v24 = vld [vmem:[%s2750_s1 + $0x260] sm:$0xff]  ;;  %v1234_v25 = vld [vmem:[%s2750_s1 + $0x268] sm:$0xff]  ;;  %v1235_v30 = vld [vmem:[%s2750_s1 + $0x270] sm:$0xff] }
  0x26   : > { %1916 = vmatprep.subr.bf16.mxu1 %v2095_v3  ;;  %v1249_v26 = vld [vmem:[%s2750_s1 + $0x2e0] sm:$0xff]  ;;  %v1250_v27 = vld [vmem:[%s2750_s1 + $0x2e8] sm:$0xff]  ;;  %v1236_v31 = vld [vmem:[%s2750_s1 + $0x278] sm:$0xff] }
  0x27   : > { %1508 = vmatmul.mubr.f32.vlgmr.msra.gmra.mrb[0].mxu0 %v193_v54  ;;  %v374_v54 = vld [vmem:[%s2246_s6 + $0xa] sm:$0xff]  ;;  %v1252_v33 = vld [vmem:[%s2750_s1 + $0x2f8] sm:$0xff]  ;;  %v1253_v36 = vld [vmem:[%s2750_s1 + $0x300] sm:$0xff] }
  0x28   : > { %1549 = vmatmul.mubr.f32.vlgmr.msra.gmra.mrb[0].mxu1 %v174_v56  ;;  %1894 = vmatpush3.bf16.msra.mxu0 %v1893_v55  ;;  %v1944_v55 = vpack.c.bf16 %v1224_v51, %v1223_v50  ;;  %v1968_v56 = vpack.c.bf16 %v1240_v53, %v1239_v52  ;;  %v1251_v32 = vld [vmem:[%s2750_s1 + $0x2f0] sm:$0xff]  ;;  %v1254_v37 = vld [vmem:[%s2750_s1 + $0x308] sm:$0xff]  ;;  %v1269_v38 = vld [vmem:[%s2750_s1 + $0x380] sm:$0xff] }
  0x29   : > { %1918 = vmatpush3.bf16.msra.mxu1 %v1917_v57  ;;  %1895 = vmatprep.subr.bf16.mxu0 %v2095_v3  ;;  %v2417_v57 = vld [vmem:[%s2246_s6 + $0xe] sm:$0xff]  ;;  %v1256_v44 = vld [vmem:[%s2750_s1 + $0x318] sm:$0xff]  ;;  %v1257_v50 = vld [vmem:[%s2750_s1 + $0x320] sm:$0xff] }
  0x2a   : > { %1919 = vmatprep.subr.bf16.mxu1 %v2095_v3  ;;  %1510 = vmatprep.mubr.msk.f32.mxu0 %vm2096_vm0, %v2097_v11  ;;  %v1270_v39 = vld [vmem:[%s2750_s1 + $0x388] sm:$0xff]  ;;  %v1255_v43 = vld [vmem:[%s2750_s1 + $0x310] sm:$0xff] }
  0x2b   : > { %1551 = vmatprep.mubr.msk.f32.mxu1 %vm2096_vm0, %v2097_v11  ;;  %1511 = vmatmul.mubr.f32.gmra.mrb[2].mxu0 %v194_v63  ;;  %v1947_v63 = vpack.c.bf16 %v1226_v59, %v1225_v58  ;;  %v2013_v42 = vpack.c.bf16 %v1270_v39, %v1269_v38  ;;  %v1271_v45 = vld [vmem:[%s2750_s1 + $0x390] sm:$0xff]  ;;  %v1258_v51 = vld [vmem:[%s2750_s1 + $0x328] sm:$0xff]  ;;  %v1260_v59 = vld [vmem:[%s2750_s1 + $0x338] sm:$0xff] }
  0x2c   : > { %1897 = vmatpush3.bf16.msra.mxu0 %v1896_v62  ;;  %1552 = vmatmul.mubr.f32.gmra.mrb[2].mxu1 %v2286_v4  ;;  %v375_v62 = vld [vmem:[%s2246_s6 + $0x12] sm:$0xff]  ;;  %v1274_v52 = vld [vmem:[%s2750_s1 + $0x3a8] sm:$0xff]  ;;  %v1289_v38 = vld [vmem:[%s2750_s1 + $0x420] sm:$0xff] }
  0x2d   : > { %1921 = vmatpush3.bf16.msra.mxu1 %v1920_v0  ;;  %1898 = vmatprep.subr.bf16.mxu0 %v2095_v3  ;;  %v1971_v0 = vpack.c.bf16 %v1242_v61, %v1241_v60  ;;  %v581_v53 = vld [vmem:[%s2246_s6 + $0x17] sm:$0xff]  ;;  %v1290_v39 = vld [vmem:[%s2750_s1 + $0x428] sm:$0xff] }
  0x2e   : > { %1922 = vmatprep.subr.bf16.mxu1 %v2095_v3  ;;  %1513 = vmatprep.mubr.msk.f32.mxu0 %vm2096_vm0, %v2097_v11  ;;  %v1259_v58 = vld [vmem:[%s2750_s1 + $0x330] sm:$0xff]  ;;  %v1276_v60 = vld [vmem:[%s2750_s1 + $0x3b8] sm:$0xff] }
  0x2f   : > { %1554 = vmatprep.mubr.msk.f32.mxu1 %vm2096_vm0, %v2097_v11  ;;  %1514 = vmatmul.mubr.f32.gmra.mrb[4].mxu0 %v195_v8  ;;  %v1950_v8 = vpack.c.bf16 %v1228_v5, %v1227_v2  ;;  %v1998_v61 = vpack.c.bf16 %v1260_v59, %v1259_v58  ;;  %v1277_v2 = vld [vmem:[%s2750_s1 + $0x3c0] sm:$0xff]  ;;  %v1278_v5 = vld [vmem:[%s2750_s1 + $0x3c8] sm:$0xff] }
  0x30   : > { %1900 = vmatpush3.bf16.msra.mxu0 %v1899_v7  ;;  %1555 = vmatmul.mubr.f32.gmra.mrb[4].mxu1 %v2309_v13  ;;  %v1244_v7 = vld [vmem:[%s2750_s1 + $0x2b8] sm:$0xff] }
  0x31   : > { %1924 = vmatpush3.bf16.msra.mxu1 %v1923_v9  ;;  %1901 = vmatprep.subr.bf16.mxu0 %v2095_v3  ;;  %v1974_v9 = vpack.c.bf16 %v1244_v7, %v1243_v6  ;;  %v2025_v7 = vpack.c.bf16 %v1278_v5, %v1277_v2  ;;  %v993_v58 = vld [vmem:[%s2246_s6 + $0x1e] sm:$0xff] }
  0x32   : > { %1925 = vmatprep.subr.bf16.mxu1 %v2095_v3  ;;  %1589 = vmatprep.mubr.msk.f32.mxu0 %vm2096_vm0, %v2097_v11 }
  0x33   : > { %1630 = vmatprep.mubr.msk.f32.mxu1 %vm2096_vm0, %v2097_v11 }
  0x34   : > { %1903 = vmatpush3.bf16.msra.mxu0 %v1902_v16  ;;  %v1953_v16 = vpack.c.bf16 %v1230_v12, %v1229_v10  ;;  %v1279_v10 = vld [vmem:[%s2750_s1 + $0x3d0] sm:$0xff]  ;;  %v1280_v12 = vld [vmem:[%s2750_s1 + $0x3d8] sm:$0xff] }
  0x35   : > { %1927 = vmatpush3.bf16.msra.mxu1 %v1926_v17  ;;  %1904 = vmatprep.subr.bf16.mxu0 %v2095_v3  ;;  %v1977_v17 = vpack.c.bf16 %v1246_v15, %v1245_v14  ;;  %v2028_v15 = vpack.c.bf16 %v1280_v12, %v1279_v10 }
  0x36   : > { %1928 = vmatprep.subr.bf16.mxu1 %v2095_v3 }
  0x38   : > { %1906 = vmatpush3.bf16.msra.mxu0 %v1905_v22  ;;  %v1956_v22 = vpack.c.bf16 %v1232_v19, %v1231_v18  ;;  %v1281_v18 = vld [vmem:[%s2750_s1 + $0x3e0] sm:$0xff]  ;;  %v1282_v19 = vld [vmem:[%s2750_s1 + $0x3e8] sm:$0xff] }
  0x39   : > { %1930 = vmatpush3.bf16.msra.mxu1 %v1929_v23  ;;  %1907 = vmatprep.subr.bf16.mxu0 %v2095_v3  ;;  %v1980_v23 = vpack.c.bf16 %v1248_v21, %v1247_v20  ;;  %v2031_v21 = vpack.c.bf16 %v1282_v19, %v1281_v18 }
  0x3a   : > { %1931 = vmatprep.subr.bf16.mxu1 %v2095_v3 }
  0x3c   : > { %1909 = vmatpush3.bf16.msra.mxu0 %v1908_v28  ;;  %v1959_v28 = vpack.c.bf16 %v1234_v25, %v1233_v24  ;;  %v1283_v24 = vld [vmem:[%s2750_s1 + $0x3f0] sm:$0xff]  ;;  %v1284_v25 = vld [vmem:[%s2750_s1 + $0x3f8] sm:$0xff] }
  0x3d   : > { %1933 = vmatpush3.bf16.msra.mxu1 %v1932_v29  ;;  %1910 = vmatprep.subr.bf16.mxu0 %v2095_v3  ;;  %v1983_v29 = vpack.c.bf16 %v1250_v27, %v1249_v26  ;;  %v2034_v27 = vpack.c.bf16 %v1284_v25, %v1283_v24 }
  0x3e   : > { %1934 = vmatprep.subr.bf16.mxu1 %v2095_v3 }
  0x40   : > { %1912 = vmatpush3.bf16.msra.mxu0 %v1911_v34  ;;  %v1962_v34 = vpack.c.bf16 %v1236_v31, %v1235_v30  ;;  %v785_v30 = vld [vmem:[%s2246_s6 + $0xc] sm:$0xff] }
  0x41   : > { %1936 = vmatpush3.bf16.msra.mxu1 %v1935_v35  ;;  %1913 = vmatprep.subr.bf16.mxu0 %v2095_v3  ;;  %v1986_v35 = vpack.c.bf16 %v1252_v33, %v1251_v32  ;;  %v888_v32 = vld [vmem:[%s2246_s6 + $0xd] sm:$0xff] }
  0x42   : > { %1937 = vmatprep.subr.bf16.mxu1 %v2095_v3  ;;  %v1287_v33 = vld [vmem:[%s2750_s1 + $0x410] sm:$0xff] }
  0x44   : > { %1915 = vmatpush3.bf16.msra.mxu0 %v1914_v40  ;;  %v579_v40 = vld [vmem:[%s2246_s6 + $0x7] sm:$0xff] }
  0x45   : > { %1939 = vmatpush3.bf16.msra.mxu1 %v1938_v41  ;;  %1940 = vmatprep.subr.bf16.mxu0 %v2095_v3  ;;  %v1989_v41 = vpack.c.bf16 %v1254_v37, %v1253_v36  ;;  %v889_v37 = vld [vmem:[%s2246_s6 + $0x15] sm:$0xff] }
  0x46   : > { %1964 = vmatprep.subr.bf16.mxu1 %v2095_v3 }
  0x47   : > { %1590 = vmatmul.mubr.f32.vlgmr.msra.gmra.mrb[6].mxu0 %v373_v46  ;;  %v1272_v46 = vld [vmem:[%s2750_s1 + $0x398] sm:$0xff] }
  0x48   : > { %1631 = vmatmul.mubr.f32.vlgmr.msra.gmra.mrb[6].mxu1 %v476_v48  ;;  %1942 = vmatpush3.bf16.msra.mxu0 %v1941_v47  ;;  %v580_v47 = vld [vmem:[%s2246_s6 + $0xf] sm:$0xff]  ;;  %v1992_v48 = vpack.c.bf16 %v1256_v44, %v1255_v43  ;;  %v1292_v44 = vld [vmem:[%s2750_s1 + $0x438] sm:$0xff] }
  0x49   : > { %1966 = vmatpush3.bf16.msra.mxu1 %v1965_v49  ;;  %1592 = vmatprep.mubr.msk.f32.mxu0 %vm2096_vm0, %v2097_v11  ;;  %v2016_v49 = vpack.c.bf16 %v1272_v46, %v1271_v45  ;;  %v1291_v43 = vld [vmem:[%s2750_s1 + $0x430] sm:$0xff]  ;;  %v1293_v46 = vld [vmem:[%s2750_s1 + $0x440] sm:$0xff] }
  0x4a   : > { %1943 = vmatprep.subr.bf16.mxu0 %v2095_v3  ;;  %1967 = vmatprep.subr.bf16.mxu1 %v2095_v3  ;;  %v2046_v45 = vpack.c.bf16 %v1292_v44, %v1291_v43 }
  0x4b   : > { %1593 = vmatmul.mubr.f32.gmra.mrb[8].mxu0 %v374_v54  ;;  %1633 = vmatprep.mubr.msk.f32.mxu1 %vm2096_vm0, %v2097_v11  ;;  %v1995_v54 = vpack.c.bf16 %v1258_v51, %v1257_v50  ;;  %v1296_v50 = vld [vmem:[%s2750_s1 + $0x458] sm:$0xff] }
  0x4c   : > { %1945 = vmatpush3.bf16.msra.mxu0 %v1944_v55  ;;  %1634 = vmatmul.mubr.f32.gmra.mrb[8].mxu1 %v2417_v57 }
  0x4d   : > { %1969 = vmatpush3.bf16.msra.mxu1 %v1968_v56  ;;  %1595 = vmatprep.mubr.msk.f32.mxu0 %vm2096_vm0, %v2097_v11  ;;  %v684_v56 = vld [vmem:[%s2246_s6 + $0x18] sm:$0xff] }
  0x4e   : > { %1946 = vmatprep.subr.bf16.mxu0 %v2095_v3  ;;  %1970 = vmatprep.subr.bf16.mxu1 %v2095_v3 }
  0x4f   : > { %1596 = vmatmul.mubr.f32.gmra.mrb[10].mxu0 %v375_v62  ;;  %1636 = vmatprep.mubr.msk.f32.mxu1 %vm2096_vm0, %v2097_v11 }
  0x50   : > { %1948 = vmatpush3.bf16.msra.mxu0 %v1947_v63  ;;  %1637 = vmatmul.mubr.f32.gmra.mrb[10].mxu1 %v2440_v1  ;;  %v1261_v63 = vld [vmem:[%s2750_s1 + $0x340] sm:$0xff] }
  0x51   : > { %1972 = vmatpush3.bf16.msra.mxu1 %v1971_v0  ;;  %1949 = vmatprep.subr.bf16.mxu0 %v2095_v3  ;;  %v1262_v0 = vld [vmem:[%s2750_s1 + $0x348] sm:$0xff] }
  0x52   : > { %1973 = vmatprep.subr.bf16.mxu1 %v2095_v3  ;;  %1671 = vmatprep.mubr.msk.f32.mxu0 %vm2096_vm0, %v2097_v11  ;;  %v2001_v6 = vpack.c.bf16 %v1262_v0, %v1261_v63 }
  0x53   : > { %1712 = vmatprep.mubr.msk.f32.mxu1 %vm2096_vm0, %v2097_v11 }
  0x54   : > { %1951 = vmatpush3.bf16.msra.mxu0 %v1950_v8  ;;  %v1263_v8 = vld [vmem:[%s2750_s1 + $0x350] sm:$0xff] }
  0x55   : > { %1975 = vmatpush3.bf16.msra.mxu1 %v1974_v9  ;;  %1952 = vmatprep.subr.bf16.mxu0 %v2095_v3  ;;  %v1264_v9 = vld [vmem:[%s2750_s1 + $0x358] sm:$0xff] }
  0x56   : > { %1976 = vmatprep.subr.bf16.mxu1 %v2095_v3  ;;  %v2004_v14 = vpack.c.bf16 %v1264_v9, %v1263_v8 }
  0x58   : > { %1954 = vmatpush3.bf16.msra.mxu0 %v1953_v16  ;;  %v1265_v16 = vld [vmem:[%s2750_s1 + $0x360] sm:$0xff] }
  0x59   : > { %1978 = vmatpush3.bf16.msra.mxu1 %v1977_v17  ;;  %1955 = vmatprep.subr.bf16.mxu0 %v2095_v3  ;;  %v1266_v17 = vld [vmem:[%s2750_s1 + $0x368] sm:$0xff] }
  0x5a   : > { %1979 = vmatprep.subr.bf16.mxu1 %v2095_v3  ;;  %v2007_v20 = vpack.c.bf16 %v1266_v17, %v1265_v16 }
  0x5c   : > { %1957 = vmatpush3.bf16.msra.mxu0 %v1956_v22  ;;  %v1267_v22 = vld [vmem:[%s2750_s1 + $0x370] sm:$0xff] }
  0x5d   : > { %1981 = vmatpush3.bf16.msra.mxu1 %v1980_v23  ;;  %1958 = vmatprep.subr.bf16.mxu0 %v2095_v3  ;;  %v1268_v23 = vld [vmem:[%s2750_s1 + $0x378] sm:$0xff] }
  0x5e   : > { %1982 = vmatprep.subr.bf16.mxu1 %v2095_v3  ;;  %v2010_v26 = vpack.c.bf16 %v1268_v23, %v1267_v22 }
  0x60   : > { %1960 = vmatpush3.bf16.msra.mxu0 %v1959_v28  ;;  %v1285_v28 = vld [vmem:[%s2750_s1 + $0x400] sm:$0xff] }
  0x61   : > { %1984 = vmatpush3.bf16.msra.mxu1 %v1983_v29  ;;  %1961 = vmatprep.subr.bf16.mxu0 %v2095_v3  ;;  %v1286_v29 = vld [vmem:[%s2750_s1 + $0x408] sm:$0xff] }
  0x62   : > { %1985 = vmatprep.subr.bf16.mxu1 %v2095_v3  ;;  %v2037_v31 = vpack.c.bf16 %v1286_v29, %v1285_v28 }
  0x64   : > { %1963 = vmatpush3.bf16.msra.mxu0 %v1962_v34  ;;  %v1288_v34 = vld [vmem:[%s2750_s1 + $0x418] sm:$0xff] }
  0x65   : > { %1987 = vmatpush3.bf16.msra.mxu1 %v1986_v35  ;;  %1988 = vmatprep.subr.bf16.mxu0 %v2095_v3  ;;  %v786_v35 = vld [vmem:[%s2246_s6 + $0x14] sm:$0xff]  ;;  %v2040_v36 = vpack.c.bf16 %v1288_v34, %v1287_v33 }
  0x66   : > { %2012 = vmatprep.subr.bf16.mxu1 %v2095_v3 }
  0x67   : > { %1672 = vmatmul.mubr.f32.vlgmr.msra.gmra.mrb[12].mxu0 %v579_v40  ;;  %v787_v40 = vld [vmem:[%s2246_s6 + $0x1c] sm:$0xff] }
  0x68   : > { %1713 = vmatmul.mubr.f32.vlgmr.msra.gmra.mrb[12].mxu1 %v2286_v4  ;;  %1990 = vmatpush3.bf16.msra.mxu0 %v1989_v41  ;;  %v1273_v4 = vld [vmem:[%s2750_s1 + $0x3a0] sm:$0xff]  ;;  %v2043_v41 = vpack.c.bf16 %v1290_v39, %v1289_v38 }
  0x69   : > { %2014 = vmatpush3.bf16.msra.mxu1 %v2013_v42  ;;  %1674 = vmatprep.mubr.msk.f32.mxu0 %vm2096_vm0, %v2097_v11  ;;  %v2019_v55 = vpack.c.bf16 %v1274_v52, %v1273_v4  ;;  %v890_v42 = vld [vmem:[%s2246_s6 + $0x1d] sm:$0xff]  ;;  %v1298_v52 = vld [vmem:[%s2750_s1 + $0x468] sm:$0xff]  ;;  %s168_s6 = smul.u32 3, %s1166_s13 }
  0x6a   : > { %1991 = vmatprep.subr.bf16.mxu0 %v2095_v3  ;;  %2015 = vmatprep.subr.bf16.mxu1 %v2095_v3  ;;  %v1297_v4 = vld [vmem:[%s2750_s1 + $0x460] sm:$0xff] }
  0x6b   : > { %1675 = vmatmul.mubr.f32.gmra.mrb[14].mxu0 %v580_v47  ;;  %1715 = vmatprep.mubr.msk.f32.mxu1 %vm2096_vm0, %v2097_v11  ;;  %v1294_v47 = vld [vmem:[%s2750_s1 + $0x448] sm:$0xff]  ;;  %p169_p4 = scmp.lt.s32.totalorder %s168_s6, 5 }
  0x6c   : > { %1993 = vmatpush3.bf16.msra.mxu0 %v1992_v48  ;;  %1716 = vmatmul.mubr.f32.gmra.mrb[14].mxu1 %v2309_v13  ;;  %v1275_v13 = vld [vmem:[%s2750_s1 + $0x3b0] sm:$0xff]  ;;  %v2049_v48 = vpack.c.bf16 %v1294_v47, %v1293_v46 }
  0x6d   : > { %2017 = vmatpush3.bf16.msra.mxu1 %v2016_v49  ;;  %1677 = vmatprep.mubr.msk.f32.mxu0 %vm2096_vm0, %v2097_v11  ;;  %v2022_v62 = vpack.c.bf16 %v1276_v60, %v1275_v13  ;;  %v1295_v49 = vld [vmem:[%s2750_s1 + $0x450] sm:$0xff]  ;;  %s2756_s6 = smov (!%p169_p4, %s168_s6), 5 }
  0x6e   : > { %1994 = vmatprep.subr.bf16.mxu0 %v2095_v3  ;;  %2018 = vmatprep.subr.bf16.mxu1 %v2095_v3  ;;  %v2052_v51 = vpack.c.bf16 %v1296_v50, %v1295_v49  ;;  %s1172_s18 = sshll.u32 %s2756_s6, 3 }
  0x6f   : > { %1678 = vmatmul.mubr.f32.gmra.mrb[16].mxu0 %v581_v53  ;;  %1718 = vmatprep.mubr.msk.f32.mxu1 %vm2096_vm0, %v2097_v11  ;;  %v2055_v53 = vpack.c.bf16 %v1298_v52, %v1297_v4  ;;  %s172_s21 = scalar_lea.vmem %s2752_s3, %s1172_s18 }
  0x70   : > { %1996 = vmatpush3.bf16.msra.mxu0 %v1995_v54  ;;  %1719 = vmatmul.mubr.f32.gmra.mrb[16].mxu1 %v684_v56  ;;  %v1299_v54 = vld [vmem:[%s2750_s1 + $0x470] sm:$0xff] }
  0x71   : > { %2020 = vmatpush3.bf16.msra.mxu1 %v2019_v55  ;;  %1997 = vmatprep.subr.bf16.mxu0 %v2095_v3  ;;  %v1300_v55 = vld [vmem:[%s2750_s1 + $0x478] sm:$0xff] }
  0x72   : > { %2021 = vmatprep.subr.bf16.mxu1 %v2095_v3  ;;  %1753 = vmatprep.mubr.msk.f32.mxu0 %vm2096_vm0, %v2097_v11  ;;  %v2058_v56 = vpack.c.bf16 %v1300_v55, %v1299_v54 }
  0x73   : > { %1794 = vmatprep.mubr.msk.f32.mxu1 %vm2096_vm0, %v2097_v11 }
  0x74   : > { %1999 = vmatpush3.bf16.msra.mxu0 %v1998_v61 }
  0x75   : > { %2023 = vmatpush3.bf16.msra.mxu1 %v2022_v62  ;;  %2000 = vmatprep.subr.bf16.mxu0 %v2095_v3 }
  0x76   : > { %2024 = vmatprep.subr.bf16.mxu1 %v2095_v3 }
  0x78   : > { %2002 = vmatpush3.bf16.msra.mxu0 %v2001_v6 }
  0x79   : > { %2026 = vmatpush3.bf16.msra.mxu1 %v2025_v7  ;;  %2003 = vmatprep.subr.bf16.mxu0 %v2095_v3 }
  0x7a   : > { %2027 = vmatprep.subr.bf16.mxu1 %v2095_v3 }
  0x7c   : > { %2005 = vmatpush3.bf16.msra.mxu0 %v2004_v14 }
  0x7d   : > { %2029 = vmatpush3.bf16.msra.mxu1 %v2028_v15  ;;  %2006 = vmatprep.subr.bf16.mxu0 %v2095_v3 }
  0x7e   : > { %2030 = vmatprep.subr.bf16.mxu1 %v2095_v3 }
  0x80   : > { %2008 = vmatpush3.bf16.msra.mxu0 %v2007_v20 }
  0x81   : > { %2032 = vmatpush3.bf16.msra.mxu1 %v2031_v21  ;;  %2009 = vmatprep.subr.bf16.mxu0 %v2095_v3 }
  0x82   : > { %2033 = vmatprep.subr.bf16.mxu1 %v2095_v3 }
  0x84   : > { %2011 = vmatpush3.bf16.msra.mxu0 %v2010_v26 }
  0x85   : > { %2035 = vmatpush3.bf16.msra.mxu1 %v2034_v27  ;;  %2036 = vmatprep.subr.bf16.mxu0 %v2095_v3 }
  0x86   : > { %2060 = vmatprep.subr.bf16.mxu1 %v2095_v3 }
  0x87   : > { %1754 = vmatmul.mubr.f32.vlgmr.msra.gmra.mrb[18].mxu0 %v785_v30 }
  0x88   : > { %1795 = vmatmul.mubr.f32.vlgmr.msra.gmra.mrb[18].mxu1 %v888_v32  ;;  %2038 = vmatpush3.bf16.msra.mxu0 %v2037_v31 }
  0x89   : > { %2068 = vmatpush3.bf16.msra.mxu1 %v2037_v31  ;;  %1756 = vmatprep.mubr.msk.f32.mxu0 %vm2096_vm0, %v2097_v11 }
  0x8a   : > { %2039 = vmatprep.subr.bf16.mxu0 %v2095_v3  ;;  %2061 = vmatprep.subr.bf16.mxu1 %v2095_v3 }
  0x8b   : > { %1757 = vmatmul.mubr.f32.gmra.mrb[20].mxu0 %v786_v35  ;;  %1797 = vmatprep.mubr.msk.f32.mxu1 %vm2096_vm0, %v2097_v11 }
  0x8c   : > { %2041 = vmatpush3.bf16.msra.mxu0 %v2040_v36  ;;  %1798 = vmatmul.mubr.f32.gmra.mrb[20].mxu1 %v889_v37 }
  0x8d   : > { %2069 = vmatpush3.bf16.msra.mxu1 %v2040_v36  ;;  %1759 = vmatprep.mubr.msk.f32.mxu0 %vm2096_vm0, %v2097_v11 }
  0x8e   : > { %2042 = vmatprep.subr.bf16.mxu0 %v2095_v3  ;;  %2062 = vmatprep.subr.bf16.mxu1 %v2095_v3 }
  0x8f   : > { %1760 = vmatmul.mubr.f32.gmra.mrb[22].mxu0 %v787_v40  ;;  %1800 = vmatprep.mubr.msk.f32.mxu1 %vm2096_vm0, %v2097_v11 }
  0x90   : > { %2044 = vmatpush3.bf16.msra.mxu0 %v2043_v41  ;;  %1801 = vmatmul.mubr.f32.gmra.mrb[22].mxu1 %v890_v42 }
  0x91   : > { %2070 = vmatpush3.bf16.msra.mxu1 %v2043_v41  ;;  %2045 = vmatprep.subr.bf16.mxu0 %v2095_v3 }
  0x92   : > { %2063 = vmatprep.subr.bf16.mxu1 %v2095_v3  ;;  %1835 = vmatprep.mubr.msk.f32.mxu0 %vm2096_vm0, %v2097_v11 }
  0x93   : > { %1838 = vmatprep.mubr.msk.f32.mxu1 %vm2096_vm0, %v2097_v11 }
  0x94   : > { %2047 = vmatpush3.bf16.msra.mxu0 %v2046_v45 }
  0x95   : > { %2071 = vmatpush3.bf16.msra.mxu1 %v2046_v45  ;;  %2048 = vmatprep.subr.bf16.mxu0 %v2095_v3 }
  0x96   : > { %2064 = vmatprep.subr.bf16.mxu1 %v2095_v3 }
  0x98   : > { %2050 = vmatpush3.bf16.msra.mxu0 %v2049_v48 }
  0x99   : > { %2072 = vmatpush3.bf16.msra.mxu1 %v2049_v48  ;;  %2051 = vmatprep.subr.bf16.mxu0 %v2095_v3 }
  0x9a   : > { %2065 = vmatprep.subr.bf16.mxu1 %v2095_v3 }
  0x9c   : > { %2053 = vmatpush3.bf16.msra.mxu0 %v2052_v51 }
  0x9d   : > { %2073 = vmatpush3.bf16.msra.mxu1 %v2052_v51  ;;  %2054 = vmatprep.subr.bf16.mxu0 %v2095_v3 }
  0x9e   : > { %2066 = vmatprep.subr.bf16.mxu1 %v2095_v3 }
  0xa0   : > { %2056 = vmatpush3.bf16.msra.mxu0 %v2055_v53 }
  0xa1   : > { %2074 = vmatpush3.bf16.msra.mxu1 %v2055_v53  ;;  %2057 = vmatprep.subr.bf16.mxu0 %v2095_v3 }
  0xa2   : > { %2067 = vmatprep.subr.bf16.mxu1 %v2095_v3 }
  0xa4   : > { %2059 = vmatpush3.bf16.msra.mxu0 %v2058_v56 }
  0xa5   : > { %2075 = vmatpush3.bf16.msra.mxu1 %v2058_v56 }
  0xa7   : > { %1836 = vmatmul.mubr.f32.vlgmr.msra.gmra.mrb[24].mxu0 %v2417_v57 }
  0xa8   : > { %1839 = vmatmul.mubr.f32.vlgmr.msra.gmra.mrb[24].mxu1 %v2440_v1 }
  0xa9   : > { %1841 = vmatprep.mubr.msk.f32.mxu1 %vm2096_vm0, %v2097_v11 }
  0xac   : > { %1842 = vmatmul.mubr.f32.gmra.mrb[26].mxu1 %v993_v58 }
  0xfa   : > { %v279_v59 = vpop.f32.mrb[0].mxu0 }
  0xfb   : > { %v359_v13 = vpop.f32.mrb[0].mxu1  ;;  %v1509_v60 = vpop.f32.mrb[1].mxu0 }
  0xfc   : > { %v360_v61 = vadd.f32 %v359_v13, %v279_v59  ;;  %v1550_v62 = vpop.f32.mrb[1].mxu1 }
  0xfe   : > { %v284_v63 = vpop.f32.mrb[2].mxu0 }
  0xff   : > { %v364_v0 = vpop.f32.mrb[2].mxu1  ;;  %v1512_v2 = vpop.f32.mrb[3].mxu0 }
 0x100   : > { %v365_v3 = vadd.f32 %v364_v0, %v284_v63  ;;  %v1553_v5 = vpop.f32.mrb[3].mxu1  ;;  %v1301_v0 = vld [vmem:[%s2751_s2] ss:$0 sm:$0xff] }
 0x102   : > { %v289_v6 = vpop.f32.mrb[4].mxu0 }
 0x103   : > { %v369_v7 = vpop.f32.mrb[4].mxu1  ;;  %v1515_v57 = vpop.f32.mrb[5].mxu0 }
 0x104   : > { %v370_v8 = vadd.f32 %v369_v7, %v289_v6  ;;  %v1556_v1 = vpop.f32.mrb[5].mxu1 }
 0x11a   : > { %v459_v9 = vpop.f32.mrb[6].mxu0 }
 0x11b   : > { %v473_v10 = vadd.f32 %v459_v9, %v360_v61  ;;  %v562_v11 = vpop.f32.mrb[6].mxu1  ;;  %v1591_v12 = vpop.f32.mrb[7].mxu0 }
 0x11c   : > { %v1632_v14 = vpop.f32.mrb[7].mxu1 }
 0x11d   : > { %v576_v15 = vadd.f32 %v562_v11, %v473_v10 }
 0x11e   : > { %v464_v16 = vpop.f32.mrb[8].mxu0 }
 0x11f   : > { %v474_v17 = vadd.f32 %v464_v16, %v365_v3  ;;  %v567_v18 = vpop.f32.mrb[8].mxu1  ;;  %v1594_v19 = vpop.f32.mrb[9].mxu0 }
 0x120   : > { %v1635_v20 = vpop.f32.mrb[9].mxu1 }
 0x121   : > { %v577_v21 = vadd.f32 %v567_v18, %v474_v17 }
 0x122   : > { %v469_v22 = vpop.f32.mrb[10].mxu0 }
 0x123   : > { %v475_v23 = vadd.f32 %v469_v22, %v370_v8  ;;  %v572_v24 = vpop.f32.mrb[10].mxu1  ;;  %v1597_v25 = vpop.f32.mrb[11].mxu0 }
 0x124   : > { %v1638_v26 = vpop.f32.mrb[11].mxu1 }
 0x125   : > { %v578_v27 = vadd.f32 %v572_v24, %v475_v23 }
 0x13a   : > { %v665_v28 = vpop.f32.mrb[12].mxu0 }
 0x13b   : > { %v679_v29 = vadd.f32 %v665_v28, %v576_v15  ;;  %v768_v30 = vpop.f32.mrb[12].mxu1  ;;  %v1673_v31 = vpop.f32.mrb[13].mxu0 }
 0x13c   : > { %v1714_v32 = vpop.f32.mrb[13].mxu1 }
 0x13d   : > { %v782_v33 = vadd.f32 %v768_v30, %v679_v29 }
 0x13e   : > { %v670_v34 = vpop.f32.mrb[14].mxu0 }
 0x13f   : > { %v680_v35 = vadd.f32 %v670_v34, %v577_v21  ;;  %v773_v36 = vpop.f32.mrb[14].mxu1  ;;  %v1676_v37 = vpop.f32.mrb[15].mxu0 }
 0x140   : > { %v1717_v38 = vpop.f32.mrb[15].mxu1 }
 0x141   : > { %v783_v39 = vadd.f32 %v773_v36, %v680_v35 }
 0x142   : > { %v675_v40 = vpop.f32.mrb[16].mxu0 }
 0x143   : > { %v681_v41 = vadd.f32 %v675_v40, %v578_v27  ;;  %v778_v42 = vpop.f32.mrb[16].mxu1  ;;  %v1679_v43 = vpop.f32.mrb[17].mxu0 }
 0x144   : > { %v1720_v44 = vpop.f32.mrb[17].mxu1 }
 0x145   : > { %v784_v45 = vadd.f32 %v778_v42, %v681_v41 }
 0x15a   : > { %v871_v46 = vpop.f32.mrb[18].mxu0 }
 0x15b   : > { %v885_v47 = vadd.f32 %v871_v46, %v782_v33  ;;  %v974_v48 = vpop.f32.mrb[18].mxu1  ;;  %v1755_v49 = vpop.f32.mrb[19].mxu0 }
 0x15c   : > { %v1796_v50 = vpop.f32.mrb[19].mxu1 }
 0x15d   : > { %v988_v51 = vadd.f32 %v974_v48, %v885_v47 }
 0x15e   : > { %v876_v4 = vpop.f32.mrb[20].mxu0 }
 0x15f   : > { %v886_v52 = vadd.f32 %v876_v4, %v783_v39  ;;  %v979_v53 = vpop.f32.mrb[20].mxu1  ;;  %v1758_v54 = vpop.f32.mrb[21].mxu0 }
 0x160   : > { %v1799_v55 = vpop.f32.mrb[21].mxu1 }
 0x161   : > { %v989_v56 = vadd.f32 %v979_v53, %v886_v52 }
 0x162   : > { %v881_v58 = vpop.f32.mrb[22].mxu0 }
 0x163   : > { %v887_v59 = vadd.f32 %v881_v58, %v784_v45  ;;  %v984_v13 = vpop.f32.mrb[22].mxu1  ;;  %v1761_v60 = vpop.f32.mrb[23].mxu0 }
 0x164   : > { %v1802_v61 = vpop.f32.mrb[23].mxu1 }
 0x165   : > { %v990_v62 = vadd.f32 %v984_v13, %v887_v59 }
 0x17a   : > { %v1077_v63 = vpop.f32.mrb[24].mxu0 }
 0x17b   : > { %v1091_v2 = vadd.f32 %v1077_v63, %v988_v51  ;;  %v1082_v3 = vpop.f32.mrb[24].mxu1  ;;  %v1837_v5 = vpop.f32.mrb[25].mxu0 }
 0x17c   : > { %v1092_v6 = vadd.f32 %v1082_v3, %v989_v56  ;;  %v1840_v7 = vpop.f32.mrb[25].mxu1 }
 0x17d   : > { %v1101_v57 = vadd.f32 %v1301_v0, %v1091_v2 }
 0x17e   : > { %v1102_v8 = vadd.f32 %v1301_v0, %v1092_v6 }
 0x17f   : > { %v1104_v1 = vmax.f32 %v1101_v57, 0.0  ;;  %v1087_v9 = vpop.f32.mrb[26].mxu1 }
 0x180   : > { %v1105_v10 = vmax.f32 %v1102_v8, 0.0  ;;  %v1093_v11 = vadd.f32 %v1087_v9, %v990_v62  ;;  %v1843_v12 = vpop.f32.mrb[27].mxu1 }
 0x181   : > { %1107 = vst [vmem:[%s172_s21] sm:$0xff] %v1104_v1 }
 0x182   : > { %1108 = vst [vmem:[%s172_s21 + $0x8] sm:$0xff] %v1105_v10  ;;  %v1103_v14 = vadd.f32 %v1301_v0, %v1093_v11 }
 0x184   : > { %v1106_v15 = vmax.f32 %v1103_v14, 0.0 }
 0x186   : > { %1109 = vst [vmem:[%s172_s21 + $0x10] sm:$0xff] %v1106_v15 }
 0x187 PF: > { %s13_s12 = sadd.s32 1, %s2093_s12  }
 0x188   : > { %p10_p5 = scmp.ge.s32.totalorder %s13_s12, 4  }
 0x18a   :  { %12 = sbr.rel (!%p10_p5) target bundleno = 1 (0x1), region = 70 }

// kernel: fair_resnet_forward.8
= control target key start
LH: loop header
LB: loop body
LE: loop exit
PB: predicated region body
PF: predicated region fallthrough
CT: control target
= control target key end

     0   :  { %s2191_s15 = smov 0   ;;  %s2825_s0 = inlined_call_operand.vmem [shape: f32[80,128], index: 0, kind: input, shape index: {}]   ;;  %s2826_s1 = inlined_call_operand.vmem [shape: f32[9,128,128], index: 1, kind: input, shape index: {}]   ;;  %s2827_s2 = inlined_call_operand.vmem [shape: f32[1,128], index: 2, kind: input, shape index: {}]   ;;  %s2828_s3 = inlined_call_operand.vmem [shape: f32[48,128], index: 3, kind: input, shape index: {}]   ;;  %s2829_s4 = inlined_call_operand.vmem [shape: f32[48,128], index: 4, kind: output, shape index: {}]  }
   0x1 LB: > { %s1233_s16 = sadd.s32 4294967295, %s2161_s15   ;;  %p1237_p0 = scmp.ge.s32.totalorder %s2161_s15, 1  ;;  %s2161_s15 = sphi %s2191_s15, %s14_s15  }
   0x2   : > { %p174_p1 = scmp.lt.s32.totalorder %s2161_s15, 3 }
   0x4   : > { %p175_p2 = pnand %p1237_p0, %p174_p1 }
   0x5   : > { %v1241_v0 = vld [vmem:[%s2826_s1 + $0x80] sm:$0xff] (!%p175_p2)  ;;  %v1242_v1 = vld [vmem:[%s2826_s1 + $0x88] sm:$0xff] (!%p175_p2)  ;;  %v2163_v3 = vmov (!%p175_p2), 0.0|0.0   ;;  %v1243_v6 = vld [vmem:[%s2826_s1 + $0x90] sm:$0xff] (!%p175_p2)  ;;  %vm2164_vm0 = vmmov (!%p175_p2), 0   ;;  %v2165_v11 = vmov (!%p175_p2), 0.0  }
   0x6   : > { %178 = sbr.rel (%p175_p2) target bundleno = 393 (0x189), region = 36  ;;  %v226_v2 = vld [vmem:[%s2826_s1] sm:$0xff] (!%p175_p2)  ;;  %1912 = vmatprep.subr.bf16.mxu0 (!%p175_p2), %v2163_v3  ;;  %1936 = vmatprep.subr.bf16.mxu1 (!%p175_p2), %v2163_v3  ;;  %v1913_v4 = vpack.c.bf16 (!%p175_p2), %v1242_v1, %v1241_v0  ;;  %v227_v5 = vld [vmem:[%s2826_s1 + $0x8] sm:$0xff] (!%p175_p2)  ;;  %v1244_v7 = vld [vmem:[%s2826_s1 + $0x98] sm:$0xff] (!%p175_p2) }
   0x7   : > { %v1937_v8 = vpack.c.bf16 (!%p175_p2), %v227_v5, %v226_v2  ;;  %v228_v9 = vld [vmem:[%s2826_s1 + $0x10] sm:$0xff] (!%p175_p2)  ;;  %v229_v10 = vld [vmem:[%s2826_s1 + $0x18] sm:$0xff] (!%p175_p2)  ;;  %1616 = vmatprep.mubr.msk.f32.mxu1 (!%p175_p2), %vm2164_vm0, %v2165_v11  ;;  %1575 = vmatprep.mubr.msk.f32.mxu0 (!%p175_p2), %vm2164_vm0, %v2165_v11  ;;  %v1916_v12 = vpack.c.bf16 (!%p175_p2), %v1244_v7, %v1243_v6  ;;  %v1245_v14 = vld [vmem:[%s2826_s1 + $0xa0] sm:$0xff] (!%p175_p2)  ;;  %s205_s7 = smul.u32 (!%p175_p2), 5, %s1233_s16 }
   0x8   : > { %1914 = vmatpush3.bf16.msra.mxu0 (!%p175_p2), %v1913_v4  ;;  %v1940_v13 = vpack.c.bf16 (!%p175_p2), %v229_v10, %v228_v9  ;;  %v1246_v15 = vld [vmem:[%s2826_s1 + $0xa8] sm:$0xff] (!%p175_p2)  ;;  %v230_v16 = vld [vmem:[%s2826_s1 + $0x20] sm:$0xff] (!%p175_p2)  ;;  %v1247_v20 = vld [vmem:[%s2826_s1 + $0xb0] sm:$0xff] (!%p175_p2) }
   0x9   : > { %1938 = vmatpush3.bf16.msra.mxu1 (!%p175_p2), %v1937_v8  ;;  %1915 = vmatprep.subr.bf16.mxu0 (!%p175_p2), %v2163_v3  ;;  %v231_v17 = vld [vmem:[%s2826_s1 + $0x28] sm:$0xff] (!%p175_p2)  ;;  %v1919_v18 = vpack.c.bf16 (!%p175_p2), %v1246_v15, %v1245_v14  ;;  %v1248_v21 = vld [vmem:[%s2826_s1 + $0xb8] sm:$0xff] (!%p175_p2)  ;;  %v232_v22 = vld [vmem:[%s2826_s1 + $0x30] sm:$0xff] (!%p175_p2)  ;;  %p206_p3 = scmp.lt.s32.totalorder (!%p175_p2), %s205_s7, 9 }
   0xa   : > { %1939 = vmatprep.subr.bf16.mxu1 (!%p175_p2), %v2163_v3  ;;  %v1943_v19 = vpack.c.bf16 (!%p175_p2), %v231_v17, %v230_v16  ;;  %v233_v23 = vld [vmem:[%s2826_s1 + $0x38] sm:$0xff] (!%p175_p2)  ;;  %v1922_v24 = vpack.c.bf16 (!%p175_p2), %v1248_v21, %v1247_v20  ;;  %v1249_v26 = vld [vmem:[%s2826_s1 + $0xc0] sm:$0xff] (!%p175_p2)  ;;  %v1250_v27 = vld [vmem:[%s2826_s1 + $0xc8] sm:$0xff] (!%p175_p2) }
   0xb   : > { %v1946_v25 = vpack.c.bf16 (!%p175_p2), %v233_v23, %v232_v22  ;;  %v234_v28 = vld [vmem:[%s2826_s1 + $0x40] sm:$0xff] (!%p175_p2)  ;;  %v235_v29 = vld [vmem:[%s2826_s1 + $0x48] sm:$0xff] (!%p175_p2)  ;;  %v1925_v30 = vpack.c.bf16 (!%p175_p2), %v1250_v27, %v1249_v26  ;;  %v1251_v32 = vld [vmem:[%s2826_s1 + $0xd0] sm:$0xff] (!%p175_p2) }
   0xc   : > { %1917 = vmatpush3.bf16.msra.mxu0 (!%p175_p2), %v1916_v12  ;;  %v1949_v31 = vpack.c.bf16 (!%p175_p2), %v235_v29, %v234_v28  ;;  %v1252_v33 = vld [vmem:[%s2826_s1 + $0xd8] sm:$0xff] (!%p175_p2)  ;;  %v236_v34 = vld [vmem:[%s2826_s1 + $0x50] sm:$0xff] (!%p175_p2)  ;;  %v1253_v38 = vld [vmem:[%s2826_s1 + $0xe0] sm:$0xff] (!%p175_p2) }
   0xd   : > { %1941 = vmatpush3.bf16.msra.mxu1 %v1940_v13  ;;  %1918 = vmatprep.subr.bf16.mxu0 %v2163_v3  ;;  %v237_v35 = vld [vmem:[%s2826_s1 + $0x58] sm:$0xff]  ;;  %v1928_v36 = vpack.c.bf16 %v1252_v33, %v1251_v32  ;;  %v1254_v39 = vld [vmem:[%s2826_s1 + $0xe8] sm:$0xff]  ;;  %v238_v40 = vld [vmem:[%s2826_s1 + $0x60] sm:$0xff]  ;;  %s2831_s7 = smov (!%p206_p3, %s205_s7), 9 }
   0xe   : > { %1942 = vmatprep.subr.bf16.mxu1 %v2163_v3  ;;  %v1952_v37 = vpack.c.bf16 %v237_v35, %v236_v34  ;;  %v239_v41 = vld [vmem:[%s2826_s1 + $0x68] sm:$0xff]  ;;  %v1931_v42 = vpack.c.bf16 %v1254_v39, %v1253_v38  ;;  %v1255_v44 = vld [vmem:[%s2826_s1 + $0xf0] sm:$0xff]  ;;  %v1256_v45 = vld [vmem:[%s2826_s1 + $0xf8] sm:$0xff]  ;;  %s1238_s9 = sshll.u32 %s2831_s7, 3 }
   0xf   : > { %v1955_v43 = vpack.c.bf16 %v239_v41, %v238_v40  ;;  %v240_v46 = vld [vmem:[%s2826_s1 + $0x70] sm:$0xff]  ;;  %v241_v47 = vld [vmem:[%s2826_s1 + $0x78] sm:$0xff]  ;;  %v1934_v48 = vpack.c.bf16 %v1256_v45, %v1255_v44  ;;  %s2319_s12 = scalar_lea.vmem %s2825_s0, %s1238_s9  ;;  %v1257_v50 = vld [vmem:[%s2826_s1 + $0x100] sm:$0xff] }
  0x10   : > { %1920 = vmatpush3.bf16.msra.mxu0 %v1919_v18  ;;  %v1958_v49 = vpack.c.bf16 %v241_v47, %v240_v46  ;;  %v1258_v51 = vld [vmem:[%s2826_s1 + $0x108] sm:$0xff]  ;;  %v1273_v52 = vld [vmem:[%s2826_s1 + $0x180] sm:$0xff]  ;;  %v1259_v58 = vld [vmem:[%s2826_s1 + $0x110] sm:$0xff] }
  0x11   : > { %1944 = vmatpush3.bf16.msra.mxu1 %v1943_v19  ;;  %1921 = vmatprep.subr.bf16.mxu0 %v2163_v3  ;;  %v1274_v53 = vld [vmem:[%s2826_s1 + $0x188] sm:$0xff]  ;;  %v1961_v55 = vpack.c.bf16 %v1258_v51, %v1257_v50  ;;  %v223_v56 = vld [vmem:[%s2319_s12] sm:$0xff]  ;;  %v1260_v59 = vld [vmem:[%s2826_s1 + $0x118] sm:$0xff] }
  0x12   : > { %1945 = vmatprep.subr.bf16.mxu1 %v2163_v3  ;;  %v242_v54 = vld [vmem:[%s2319_s12 + $0x1] sm:$0xff]  ;;  %v1985_v57 = vpack.c.bf16 %v1274_v53, %v1273_v52  ;;  %v1275_v60 = vld [vmem:[%s2826_s1 + $0x190] sm:$0xff]  ;;  %v1276_v61 = vld [vmem:[%s2826_s1 + $0x198] sm:$0xff]  ;;  %v1964_v62 = vpack.c.bf16 %v1260_v59, %v1259_v58 }
  0x13   : > { %v243_v63 = vld [vmem:[%s2319_s12 + $0x9] sm:$0xff]  ;;  %v1988_v0 = vpack.c.bf16 %v1276_v61, %v1275_v60  ;;  %v1261_v1 = vld [vmem:[%s2826_s1 + $0x120] sm:$0xff]  ;;  %v244_v8 = vld [vmem:[%s2319_s12 + $0x11] sm:$0xff] }
  0x14   : > { %1923 = vmatpush3.bf16.msra.mxu0 %v1922_v24  ;;  %v1262_v2 = vld [vmem:[%s2826_s1 + $0x128] sm:$0xff]  ;;  %v1277_v5 = vld [vmem:[%s2826_s1 + $0x1a0] sm:$0xff]  ;;  %v1263_v10 = vld [vmem:[%s2826_s1 + $0x130] sm:$0xff] }
  0x15   : > { %1947 = vmatpush3.bf16.msra.mxu1 %v1946_v25  ;;  %1924 = vmatprep.subr.bf16.mxu0 %v2163_v3  ;;  %v2359_v4 = vld [vmem:[%s2319_s12 + $0x8] sm:$0xff]  ;;  %v1967_v7 = vpack.c.bf16 %v1262_v2, %v1261_v1  ;;  %v1264_v12 = vld [vmem:[%s2826_s1 + $0x138] sm:$0xff]  ;;  %v2382_v13 = vld [vmem:[%s2319_s12 + $0x10] sm:$0xff] }
  0x16   : > { %1948 = vmatprep.subr.bf16.mxu1 %v2163_v3  ;;  %v1278_v6 = vld [vmem:[%s2826_s1 + $0x1a8] sm:$0xff]  ;;  %v1279_v14 = vld [vmem:[%s2826_s1 + $0x1b0] sm:$0xff]  ;;  %v1280_v15 = vld [vmem:[%s2826_s1 + $0x1b8] sm:$0xff]  ;;  %v1970_v16 = vpack.c.bf16 %v1264_v12, %v1263_v10 }
  0x17   : > { %v1991_v9 = vpack.c.bf16 %v1278_v6, %v1277_v5  ;;  %v1994_v17 = vpack.c.bf16 %v1280_v15, %v1279_v14  ;;  %v1265_v18 = vld [vmem:[%s2826_s1 + $0x140] sm:$0xff]  ;;  %v1266_v19 = vld [vmem:[%s2826_s1 + $0x148] sm:$0xff]  ;;  %v1267_v24 = vld [vmem:[%s2826_s1 + $0x150] sm:$0xff] }
  0x18   : > { %1926 = vmatpush3.bf16.msra.mxu0 %v1925_v30  ;;  %v1281_v20 = vld [vmem:[%s2826_s1 + $0x1c0] sm:$0xff]  ;;  %v1282_v21 = vld [vmem:[%s2826_s1 + $0x1c8] sm:$0xff]  ;;  %v1973_v22 = vpack.c.bf16 %v1266_v19, %v1265_v18  ;;  %v1268_v25 = vld [vmem:[%s2826_s1 + $0x158] sm:$0xff] }
  0x19   : > { %1950 = vmatpush3.bf16.msra.mxu1 %v1949_v31  ;;  %1927 = vmatprep.subr.bf16.mxu0 %v2163_v3  ;;  %v1997_v23 = vpack.c.bf16 %v1282_v21, %v1281_v20  ;;  %v1283_v26 = vld [vmem:[%s2826_s1 + $0x1d0] sm:$0xff]  ;;  %v1284_v27 = vld [vmem:[%s2826_s1 + $0x1d8] sm:$0xff]  ;;  %v1976_v28 = vpack.c.bf16 %v1268_v25, %v1267_v24  ;;  %v1269_v30 = vld [vmem:[%s2826_s1 + $0x160] sm:$0xff] }
  0x1a   : > { %1951 = vmatprep.subr.bf16.mxu1 %v2163_v3  ;;  %v2000_v29 = vpack.c.bf16 %v1284_v27, %v1283_v26  ;;  %v1270_v31 = vld [vmem:[%s2826_s1 + $0x168] sm:$0xff]  ;;  %v1285_v32 = vld [vmem:[%s2826_s1 + $0x1e0] sm:$0xff]  ;;  %v1287_v38 = vld [vmem:[%s2826_s1 + $0x1f0] sm:$0xff] }
  0x1b   : > { %v1286_v33 = vld [vmem:[%s2826_s1 + $0x1e8] sm:$0xff]  ;;  %v1979_v34 = vpack.c.bf16 %v1270_v31, %v1269_v30  ;;  %v1288_v39 = vld [vmem:[%s2826_s1 + $0x1f8] sm:$0xff]  ;;  %v1305_v44 = vld [vmem:[%s2826_s1 + $0x280] sm:$0xff] }
  0x1c   : > { %1929 = vmatpush3.bf16.msra.mxu0 %v1928_v36  ;;  %v2003_v35 = vpack.c.bf16 %v1286_v33, %v1285_v32  ;;  %v1271_v36 = vld [vmem:[%s2826_s1 + $0x170] sm:$0xff]  ;;  %v2006_v41 = vpack.c.bf16 %v1288_v39, %v1287_v38  ;;  %v1306_v45 = vld [vmem:[%s2826_s1 + $0x288] sm:$0xff]  ;;  %v1292_v51 = vld [vmem:[%s2826_s1 + $0x218] sm:$0xff] }
  0x1d   : > { %1953 = vmatpush3.bf16.msra.mxu1 %v1952_v37  ;;  %1930 = vmatprep.subr.bf16.mxu0 %v2163_v3  ;;  %v1272_v37 = vld [vmem:[%s2826_s1 + $0x178] sm:$0xff]  ;;  %v422_v46 = vld [vmem:[%s2319_s12 + $0x2] sm:$0xff]  ;;  %v1291_v50 = vld [vmem:[%s2826_s1 + $0x210] sm:$0xff] }
  0x1e   : > { %1954 = vmatprep.subr.bf16.mxu1 %v2163_v3  ;;  %v1982_v40 = vpack.c.bf16 %v1272_v37, %v1271_v36  ;;  %v1307_v52 = vld [vmem:[%s2826_s1 + $0x290] sm:$0xff]  ;;  %v1308_v53 = vld [vmem:[%s2826_s1 + $0x298] sm:$0xff]  ;;  %v1293_v58 = vld [vmem:[%s2826_s1 + $0x220] sm:$0xff] }
  0x1f   : > { %v1294_v59 = vld [vmem:[%s2826_s1 + $0x228] sm:$0xff]  ;;  %v1309_v60 = vld [vmem:[%s2826_s1 + $0x2a0] sm:$0xff]  ;;  %v2513_v1 = vld [vmem:[%s2319_s12 + $0x16] sm:$0xff] }
  0x20   : > { %1932 = vmatpush3.bf16.msra.mxu0 %v1931_v42  ;;  %v1289_v42 = vld [vmem:[%s2826_s1 + $0x200] sm:$0xff]  ;;  %v1310_v61 = vld [vmem:[%s2826_s1 + $0x2a8] sm:$0xff]  ;;  %v1295_v2 = vld [vmem:[%s2826_s1 + $0x230] sm:$0xff] }
  0x21   : > { %1956 = vmatpush3.bf16.msra.mxu1 %v1955_v43  ;;  %1933 = vmatprep.subr.bf16.mxu0 %v2163_v3  ;;  %v1290_v43 = vld [vmem:[%s2826_s1 + $0x208] sm:$0xff]  ;;  %v1296_v5 = vld [vmem:[%s2826_s1 + $0x238] sm:$0xff]  ;;  %v1311_v6 = vld [vmem:[%s2826_s1 + $0x2b0] sm:$0xff] }
  0x22   : > { %1957 = vmatprep.subr.bf16.mxu1 %v2163_v3  ;;  %v2009_v47 = vpack.c.bf16 %v1290_v43, %v1289_v42  ;;  %v1297_v10 = vld [vmem:[%s2826_s1 + $0x240] sm:$0xff]  ;;  %v1298_v12 = vld [vmem:[%s2826_s1 + $0x248] sm:$0xff]  ;;  %v1299_v18 = vld [vmem:[%s2826_s1 + $0x250] sm:$0xff] }
  0x23   : > { %v1313_v14 = vld [vmem:[%s2826_s1 + $0x2c0] sm:$0xff]  ;;  %v1314_v15 = vld [vmem:[%s2826_s1 + $0x2c8] sm:$0xff]  ;;  %v1300_v19 = vld [vmem:[%s2826_s1 + $0x258] sm:$0xff] }
  0x24   : > { %1935 = vmatpush3.bf16.msra.mxu0 %v1934_v48  ;;  %v525_v48 = vld [vmem:[%s2319_s12 + $0x6] sm:$0xff]  ;;  %v1315_v20 = vld [vmem:[%s2826_s1 + $0x2d0] sm:$0xff]  ;;  %v1316_v21 = vld [vmem:[%s2826_s1 + $0x2d8] sm:$0xff] }
  0x25   : > { %1959 = vmatpush3.bf16.msra.mxu1 %v1958_v49  ;;  %1960 = vmatprep.subr.bf16.mxu0 %v2163_v3  ;;  %v2033_v49 = vpack.c.bf16 %v1306_v45, %v1305_v44  ;;  %v1301_v24 = vld [vmem:[%s2826_s1 + $0x260] sm:$0xff]  ;;  %v1302_v25 = vld [vmem:[%s2826_s1 + $0x268] sm:$0xff]  ;;  %v1303_v30 = vld [vmem:[%s2826_s1 + $0x270] sm:$0xff] }
  0x26   : > { %1984 = vmatprep.subr.bf16.mxu1 %v2163_v3  ;;  %v1317_v26 = vld [vmem:[%s2826_s1 + $0x2e0] sm:$0xff]  ;;  %v1318_v27 = vld [vmem:[%s2826_s1 + $0x2e8] sm:$0xff]  ;;  %v1304_v31 = vld [vmem:[%s2826_s1 + $0x278] sm:$0xff] }
  0x27   : > { %1576 = vmatmul.mubr.f32.vlgmr.msra.gmra.mrb[0].mxu0 %v242_v54  ;;  %v423_v54 = vld [vmem:[%s2319_s12 + $0xa] sm:$0xff]  ;;  %v1320_v33 = vld [vmem:[%s2826_s1 + $0x2f8] sm:$0xff]  ;;  %v1321_v36 = vld [vmem:[%s2826_s1 + $0x300] sm:$0xff] }
  0x28   : > { %1617 = vmatmul.mubr.f32.vlgmr.msra.gmra.mrb[0].mxu1 %v223_v56  ;;  %1962 = vmatpush3.bf16.msra.mxu0 %v1961_v55  ;;  %v2012_v55 = vpack.c.bf16 %v1292_v51, %v1291_v50  ;;  %v2036_v56 = vpack.c.bf16 %v1308_v53, %v1307_v52  ;;  %v1319_v32 = vld [vmem:[%s2826_s1 + $0x2f0] sm:$0xff]  ;;  %v1322_v37 = vld [vmem:[%s2826_s1 + $0x308] sm:$0xff]  ;;  %v1337_v38 = vld [vmem:[%s2826_s1 + $0x380] sm:$0xff] }
  0x29   : > { %1986 = vmatpush3.bf16.msra.mxu1 %v1985_v57  ;;  %1963 = vmatprep.subr.bf16.mxu0 %v2163_v3  ;;  %v2490_v57 = vld [vmem:[%s2319_s12 + $0xe] sm:$0xff]  ;;  %v1324_v44 = vld [vmem:[%s2826_s1 + $0x318] sm:$0xff]  ;;  %v1325_v50 = vld [vmem:[%s2826_s1 + $0x320] sm:$0xff] }
  0x2a   : > { %1987 = vmatprep.subr.bf16.mxu1 %v2163_v3  ;;  %1578 = vmatprep.mubr.msk.f32.mxu0 %vm2164_vm0, %v2165_v11  ;;  %v1338_v39 = vld [vmem:[%s2826_s1 + $0x388] sm:$0xff]  ;;  %v1323_v43 = vld [vmem:[%s2826_s1 + $0x310] sm:$0xff] }
  0x2b   : > { %1619 = vmatprep.mubr.msk.f32.mxu1 %vm2164_vm0, %v2165_v11  ;;  %1579 = vmatmul.mubr.f32.gmra.mrb[2].mxu0 %v243_v63  ;;  %v2015_v63 = vpack.c.bf16 %v1294_v59, %v1293_v58  ;;  %v2081_v42 = vpack.c.bf16 %v1338_v39, %v1337_v38  ;;  %v1339_v45 = vld [vmem:[%s2826_s1 + $0x390] sm:$0xff]  ;;  %v1326_v51 = vld [vmem:[%s2826_s1 + $0x328] sm:$0xff]  ;;  %v1328_v59 = vld [vmem:[%s2826_s1 + $0x338] sm:$0xff] }
  0x2c   : > { %1965 = vmatpush3.bf16.msra.mxu0 %v1964_v62  ;;  %1620 = vmatmul.mubr.f32.gmra.mrb[2].mxu1 %v2359_v4  ;;  %v424_v62 = vld [vmem:[%s2319_s12 + $0x12] sm:$0xff]  ;;  %v1342_v52 = vld [vmem:[%s2826_s1 + $0x3a8] sm:$0xff]  ;;  %v1357_v38 = vld [vmem:[%s2826_s1 + $0x420] sm:$0xff] }
  0x2d   : > { %1989 = vmatpush3.bf16.msra.mxu1 %v1988_v0  ;;  %1966 = vmatprep.subr.bf16.mxu0 %v2163_v3  ;;  %v2039_v0 = vpack.c.bf16 %v1310_v61, %v1309_v60  ;;  %v630_v53 = vld [vmem:[%s2319_s12 + $0x17] sm:$0xff]  ;;  %v1358_v39 = vld [vmem:[%s2826_s1 + $0x428] sm:$0xff] }
  0x2e   : > { %1990 = vmatprep.subr.bf16.mxu1 %v2163_v3  ;;  %1581 = vmatprep.mubr.msk.f32.mxu0 %vm2164_vm0, %v2165_v11  ;;  %v1327_v58 = vld [vmem:[%s2826_s1 + $0x330] sm:$0xff]  ;;  %v1344_v60 = vld [vmem:[%s2826_s1 + $0x3b8] sm:$0xff] }
  0x2f   : > { %1622 = vmatprep.mubr.msk.f32.mxu1 %vm2164_vm0, %v2165_v11  ;;  %1582 = vmatmul.mubr.f32.gmra.mrb[4].mxu0 %v244_v8  ;;  %v2018_v8 = vpack.c.bf16 %v1296_v5, %v1295_v2  ;;  %v2066_v61 = vpack.c.bf16 %v1328_v59, %v1327_v58  ;;  %v1345_v2 = vld [vmem:[%s2826_s1 + $0x3c0] sm:$0xff]  ;;  %v1346_v5 = vld [vmem:[%s2826_s1 + $0x3c8] sm:$0xff] }
  0x30   : > { %1968 = vmatpush3.bf16.msra.mxu0 %v1967_v7  ;;  %1623 = vmatmul.mubr.f32.gmra.mrb[4].mxu1 %v2382_v13  ;;  %v1312_v7 = vld [vmem:[%s2826_s1 + $0x2b8] sm:$0xff] }
  0x31   : > { %1992 = vmatpush3.bf16.msra.mxu1 %v1991_v9  ;;  %1969 = vmatprep.subr.bf16.mxu0 %v2163_v3  ;;  %v2042_v9 = vpack.c.bf16 %v1312_v7, %v1311_v6  ;;  %v2093_v7 = vpack.c.bf16 %v1346_v5, %v1345_v2  ;;  %v1042_v58 = vld [vmem:[%s2319_s12 + $0x1e] sm:$0xff] }
  0x32   : > { %1993 = vmatprep.subr.bf16.mxu1 %v2163_v3  ;;  %1657 = vmatprep.mubr.msk.f32.mxu0 %vm2164_vm0, %v2165_v11 }
  0x33   : > { %1698 = vmatprep.mubr.msk.f32.mxu1 %vm2164_vm0, %v2165_v11 }
  0x34   : > { %1971 = vmatpush3.bf16.msra.mxu0 %v1970_v16  ;;  %v2021_v16 = vpack.c.bf16 %v1298_v12, %v1297_v10  ;;  %v1347_v10 = vld [vmem:[%s2826_s1 + $0x3d0] sm:$0xff]  ;;  %v1348_v12 = vld [vmem:[%s2826_s1 + $0x3d8] sm:$0xff] }
  0x35   : > { %1995 = vmatpush3.bf16.msra.mxu1 %v1994_v17  ;;  %1972 = vmatprep.subr.bf16.mxu0 %v2163_v3  ;;  %v2045_v17 = vpack.c.bf16 %v1314_v15, %v1313_v14  ;;  %v2096_v15 = vpack.c.bf16 %v1348_v12, %v1347_v10 }
  0x36   : > { %1996 = vmatprep.subr.bf16.mxu1 %v2163_v3 }
  0x38   : > { %1974 = vmatpush3.bf16.msra.mxu0 %v1973_v22  ;;  %v2024_v22 = vpack.c.bf16 %v1300_v19, %v1299_v18  ;;  %v1349_v18 = vld [vmem:[%s2826_s1 + $0x3e0] sm:$0xff]  ;;  %v1350_v19 = vld [vmem:[%s2826_s1 + $0x3e8] sm:$0xff] }
  0x39   : > { %1998 = vmatpush3.bf16.msra.mxu1 %v1997_v23  ;;  %1975 = vmatprep.subr.bf16.mxu0 %v2163_v3  ;;  %v2048_v23 = vpack.c.bf16 %v1316_v21, %v1315_v20  ;;  %v2099_v21 = vpack.c.bf16 %v1350_v19, %v1349_v18 }
  0x3a   : > { %1999 = vmatprep.subr.bf16.mxu1 %v2163_v3 }
  0x3c   : > { %1977 = vmatpush3.bf16.msra.mxu0 %v1976_v28  ;;  %v2027_v28 = vpack.c.bf16 %v1302_v25, %v1301_v24  ;;  %v1351_v24 = vld [vmem:[%s2826_s1 + $0x3f0] sm:$0xff]  ;;  %v1352_v25 = vld [vmem:[%s2826_s1 + $0x3f8] sm:$0xff] }
  0x3d   : > { %2001 = vmatpush3.bf16.msra.mxu1 %v2000_v29  ;;  %1978 = vmatprep.subr.bf16.mxu0 %v2163_v3  ;;  %v2051_v29 = vpack.c.bf16 %v1318_v27, %v1317_v26  ;;  %v2102_v27 = vpack.c.bf16 %v1352_v25, %v1351_v24 }
  0x3e   : > { %2002 = vmatprep.subr.bf16.mxu1 %v2163_v3 }
  0x40   : > { %1980 = vmatpush3.bf16.msra.mxu0 %v1979_v34  ;;  %v2030_v34 = vpack.c.bf16 %v1304_v31, %v1303_v30  ;;  %v834_v30 = vld [vmem:[%s2319_s12 + $0xc] sm:$0xff] }
  0x41   : > { %2004 = vmatpush3.bf16.msra.mxu1 %v2003_v35  ;;  %1981 = vmatprep.subr.bf16.mxu0 %v2163_v3  ;;  %v2054_v35 = vpack.c.bf16 %v1320_v33, %v1319_v32  ;;  %v937_v32 = vld [vmem:[%s2319_s12 + $0xd] sm:$0xff] }
  0x42   : > { %2005 = vmatprep.subr.bf16.mxu1 %v2163_v3  ;;  %v1355_v33 = vld [vmem:[%s2826_s1 + $0x410] sm:$0xff] }
  0x44   : > { %1983 = vmatpush3.bf16.msra.mxu0 %v1982_v40  ;;  %v628_v40 = vld [vmem:[%s2319_s12 + $0x7] sm:$0xff] }
  0x45   : > { %2007 = vmatpush3.bf16.msra.mxu1 %v2006_v41  ;;  %2008 = vmatprep.subr.bf16.mxu0 %v2163_v3  ;;  %v2057_v41 = vpack.c.bf16 %v1322_v37, %v1321_v36  ;;  %v938_v37 = vld [vmem:[%s2319_s12 + $0x15] sm:$0xff] }
  0x46   : > { %2032 = vmatprep.subr.bf16.mxu1 %v2163_v3 }
  0x47   : > { %1658 = vmatmul.mubr.f32.vlgmr.msra.gmra.mrb[6].mxu0 %v422_v46  ;;  %v1340_v46 = vld [vmem:[%s2826_s1 + $0x398] sm:$0xff] }
  0x48   : > { %1699 = vmatmul.mubr.f32.vlgmr.msra.gmra.mrb[6].mxu1 %v525_v48  ;;  %2010 = vmatpush3.bf16.msra.mxu0 %v2009_v47  ;;  %v629_v47 = vld [vmem:[%s2319_s12 + $0xf] sm:$0xff]  ;;  %v2060_v48 = vpack.c.bf16 %v1324_v44, %v1323_v43  ;;  %v1360_v44 = vld [vmem:[%s2826_s1 + $0x438] sm:$0xff] }
  0x49   : > { %2034 = vmatpush3.bf16.msra.mxu1 %v2033_v49  ;;  %1660 = vmatprep.mubr.msk.f32.mxu0 %vm2164_vm0, %v2165_v11  ;;  %v2084_v49 = vpack.c.bf16 %v1340_v46, %v1339_v45  ;;  %v1359_v43 = vld [vmem:[%s2826_s1 + $0x430] sm:$0xff]  ;;  %v1361_v46 = vld [vmem:[%s2826_s1 + $0x440] sm:$0xff] }
  0x4a   : > { %2011 = vmatprep.subr.bf16.mxu0 %v2163_v3  ;;  %2035 = vmatprep.subr.bf16.mxu1 %v2163_v3  ;;  %v2114_v45 = vpack.c.bf16 %v1360_v44, %v1359_v43 }
  0x4b   : > { %1661 = vmatmul.mubr.f32.gmra.mrb[8].mxu0 %v423_v54  ;;  %1701 = vmatprep.mubr.msk.f32.mxu1 %vm2164_vm0, %v2165_v11  ;;  %v2063_v54 = vpack.c.bf16 %v1326_v51, %v1325_v50  ;;  %v1364_v50 = vld [vmem:[%s2826_s1 + $0x458] sm:$0xff] }
  0x4c   : > { %2013 = vmatpush3.bf16.msra.mxu0 %v2012_v55  ;;  %1702 = vmatmul.mubr.f32.gmra.mrb[8].mxu1 %v2490_v57 }
  0x4d   : > { %2037 = vmatpush3.bf16.msra.mxu1 %v2036_v56  ;;  %1663 = vmatprep.mubr.msk.f32.mxu0 %vm2164_vm0, %v2165_v11  ;;  %v733_v56 = vld [vmem:[%s2319_s12 + $0x18] sm:$0xff] }
  0x4e   : > { %2014 = vmatprep.subr.bf16.mxu0 %v2163_v3  ;;  %2038 = vmatprep.subr.bf16.mxu1 %v2163_v3 }
  0x4f   : > { %1664 = vmatmul.mubr.f32.gmra.mrb[10].mxu0 %v424_v62  ;;  %1704 = vmatprep.mubr.msk.f32.mxu1 %vm2164_vm0, %v2165_v11 }
  0x50   : > { %2016 = vmatpush3.bf16.msra.mxu0 %v2015_v63  ;;  %1705 = vmatmul.mubr.f32.gmra.mrb[10].mxu1 %v2513_v1  ;;  %v1329_v63 = vld [vmem:[%s2826_s1 + $0x340] sm:$0xff] }
  0x51   : > { %2040 = vmatpush3.bf16.msra.mxu1 %v2039_v0  ;;  %2017 = vmatprep.subr.bf16.mxu0 %v2163_v3  ;;  %v1330_v0 = vld [vmem:[%s2826_s1 + $0x348] sm:$0xff] }
  0x52   : > { %2041 = vmatprep.subr.bf16.mxu1 %v2163_v3  ;;  %1739 = vmatprep.mubr.msk.f32.mxu0 %vm2164_vm0, %v2165_v11  ;;  %v2069_v6 = vpack.c.bf16 %v1330_v0, %v1329_v63 }
  0x53   : > { %1780 = vmatprep.mubr.msk.f32.mxu1 %vm2164_vm0, %v2165_v11 }
  0x54   : > { %2019 = vmatpush3.bf16.msra.mxu0 %v2018_v8  ;;  %v1331_v8 = vld [vmem:[%s2826_s1 + $0x350] sm:$0xff] }
  0x55   : > { %2043 = vmatpush3.bf16.msra.mxu1 %v2042_v9  ;;  %2020 = vmatprep.subr.bf16.mxu0 %v2163_v3  ;;  %v1332_v9 = vld [vmem:[%s2826_s1 + $0x358] sm:$0xff] }
  0x56   : > { %2044 = vmatprep.subr.bf16.mxu1 %v2163_v3  ;;  %v2072_v14 = vpack.c.bf16 %v1332_v9, %v1331_v8 }
  0x58   : > { %2022 = vmatpush3.bf16.msra.mxu0 %v2021_v16  ;;  %v1333_v16 = vld [vmem:[%s2826_s1 + $0x360] sm:$0xff] }
  0x59   : > { %2046 = vmatpush3.bf16.msra.mxu1 %v2045_v17  ;;  %2023 = vmatprep.subr.bf16.mxu0 %v2163_v3  ;;  %v1334_v17 = vld [vmem:[%s2826_s1 + $0x368] sm:$0xff] }
  0x5a   : > { %2047 = vmatprep.subr.bf16.mxu1 %v2163_v3  ;;  %v2075_v20 = vpack.c.bf16 %v1334_v17, %v1333_v16 }
  0x5c   : > { %2025 = vmatpush3.bf16.msra.mxu0 %v2024_v22  ;;  %v1335_v22 = vld [vmem:[%s2826_s1 + $0x370] sm:$0xff] }
  0x5d   : > { %2049 = vmatpush3.bf16.msra.mxu1 %v2048_v23  ;;  %2026 = vmatprep.subr.bf16.mxu0 %v2163_v3  ;;  %v1336_v23 = vld [vmem:[%s2826_s1 + $0x378] sm:$0xff] }
  0x5e   : > { %2050 = vmatprep.subr.bf16.mxu1 %v2163_v3  ;;  %v2078_v26 = vpack.c.bf16 %v1336_v23, %v1335_v22 }
  0x60   : > { %2028 = vmatpush3.bf16.msra.mxu0 %v2027_v28  ;;  %v1353_v28 = vld [vmem:[%s2826_s1 + $0x400] sm:$0xff] }
  0x61   : > { %2052 = vmatpush3.bf16.msra.mxu1 %v2051_v29  ;;  %2029 = vmatprep.subr.bf16.mxu0 %v2163_v3  ;;  %v1354_v29 = vld [vmem:[%s2826_s1 + $0x408] sm:$0xff] }
  0x62   : > { %2053 = vmatprep.subr.bf16.mxu1 %v2163_v3  ;;  %v2105_v31 = vpack.c.bf16 %v1354_v29, %v1353_v28 }
  0x64   : > { %2031 = vmatpush3.bf16.msra.mxu0 %v2030_v34  ;;  %v1356_v34 = vld [vmem:[%s2826_s1 + $0x418] sm:$0xff] }
  0x65   : > { %2055 = vmatpush3.bf16.msra.mxu1 %v2054_v35  ;;  %2056 = vmatprep.subr.bf16.mxu0 %v2163_v3  ;;  %v835_v35 = vld [vmem:[%s2319_s12 + $0x14] sm:$0xff]  ;;  %v2108_v36 = vpack.c.bf16 %v1356_v34, %v1355_v33 }
  0x66   : > { %2080 = vmatprep.subr.bf16.mxu1 %v2163_v3 }
  0x67   : > { %1740 = vmatmul.mubr.f32.vlgmr.msra.gmra.mrb[12].mxu0 %v628_v40  ;;  %v836_v40 = vld [vmem:[%s2319_s12 + $0x1c] sm:$0xff] }
  0x68   : > { %1781 = vmatmul.mubr.f32.vlgmr.msra.gmra.mrb[12].mxu1 %v2359_v4  ;;  %2058 = vmatpush3.bf16.msra.mxu0 %v2057_v41  ;;  %v1341_v4 = vld [vmem:[%s2826_s1 + $0x3a0] sm:$0xff]  ;;  %v2111_v41 = vpack.c.bf16 %v1358_v39, %v1357_v38 }
  0x69   : > { %2082 = vmatpush3.bf16.msra.mxu1 %v2081_v42  ;;  %1742 = vmatprep.mubr.msk.f32.mxu0 %vm2164_vm0, %v2165_v11  ;;  %v2087_v55 = vpack.c.bf16 %v1342_v52, %v1341_v4  ;;  %v939_v42 = vld [vmem:[%s2319_s12 + $0x1d] sm:$0xff]  ;;  %v1366_v52 = vld [vmem:[%s2826_s1 + $0x468] sm:$0xff]  ;;  %s211_s12 = smul.u32 3, %s1233_s16 }
  0x6a   : > { %2059 = vmatprep.subr.bf16.mxu0 %v2163_v3  ;;  %2083 = vmatprep.subr.bf16.mxu1 %v2163_v3  ;;  %v1365_v4 = vld [vmem:[%s2826_s1 + $0x460] sm:$0xff] }
  0x6b   : > { %1743 = vmatmul.mubr.f32.gmra.mrb[14].mxu0 %v629_v47  ;;  %1783 = vmatprep.mubr.msk.f32.mxu1 %vm2164_vm0, %v2165_v11  ;;  %v1362_v47 = vld [vmem:[%s2826_s1 + $0x448] sm:$0xff]  ;;  %p212_p4 = scmp.lt.s32.totalorder %s211_s12, 5 }
  0x6c   : > { %2061 = vmatpush3.bf16.msra.mxu0 %v2060_v48  ;;  %1784 = vmatmul.mubr.f32.gmra.mrb[14].mxu1 %v2382_v13  ;;  %v1343_v13 = vld [vmem:[%s2826_s1 + $0x3b0] sm:$0xff]  ;;  %v2117_v48 = vpack.c.bf16 %v1362_v47, %v1361_v46 }
  0x6d   : > { %2085 = vmatpush3.bf16.msra.mxu1 %v2084_v49  ;;  %1745 = vmatprep.mubr.msk.f32.mxu0 %vm2164_vm0, %v2165_v11  ;;  %v2090_v62 = vpack.c.bf16 %v1344_v60, %v1343_v13  ;;  %v1363_v49 = vld [vmem:[%s2826_s1 + $0x450] sm:$0xff]  ;;  %s2833_s12 = smov (!%p212_p4, %s211_s12), 5 }
  0x6e   : > { %2062 = vmatprep.subr.bf16.mxu0 %v2163_v3  ;;  %2086 = vmatprep.subr.bf16.mxu1 %v2163_v3  ;;  %v2120_v51 = vpack.c.bf16 %v1364_v50, %v1363_v49  ;;  %s1239_s5 = sshll.u32 %s2833_s12, 3 }
  0x6f   : > { %1746 = vmatmul.mubr.f32.gmra.mrb[16].mxu0 %v630_v53  ;;  %1786 = vmatprep.mubr.msk.f32.mxu1 %vm2164_vm0, %v2165_v11  ;;  %v2123_v53 = vpack.c.bf16 %v1366_v52, %v1365_v4  ;;  %s215_s9 = scalar_lea.vmem %s2828_s3, %s1239_s5  ;;  %s221_s14 = scalar_lea.vmem %s2829_s4, %s1239_s5 }
  0x70   : > { %2064 = vmatpush3.bf16.msra.mxu0 %v2063_v54  ;;  %1787 = vmatmul.mubr.f32.gmra.mrb[16].mxu1 %v733_v56  ;;  %v1367_v54 = vld [vmem:[%s2826_s1 + $0x470] sm:$0xff] }
  0x71   : > { %2088 = vmatpush3.bf16.msra.mxu1 %v2087_v55  ;;  %2065 = vmatprep.subr.bf16.mxu0 %v2163_v3  ;;  %v1368_v55 = vld [vmem:[%s2826_s1 + $0x478] sm:$0xff] }
  0x72   : > { %2089 = vmatprep.subr.bf16.mxu1 %v2163_v3  ;;  %1821 = vmatprep.mubr.msk.f32.mxu0 %vm2164_vm0, %v2165_v11  ;;  %v2126_v56 = vpack.c.bf16 %v1368_v55, %v1367_v54 }
  0x73   : > { %1862 = vmatprep.mubr.msk.f32.mxu1 %vm2164_vm0, %v2165_v11 }
  0x74   : > { %2067 = vmatpush3.bf16.msra.mxu0 %v2066_v61 }
  0x75   : > { %2091 = vmatpush3.bf16.msra.mxu1 %v2090_v62  ;;  %2068 = vmatprep.subr.bf16.mxu0 %v2163_v3 }
  0x76   : > { %2092 = vmatprep.subr.bf16.mxu1 %v2163_v3 }
  0x78   : > { %2070 = vmatpush3.bf16.msra.mxu0 %v2069_v6 }
  0x79   : > { %2094 = vmatpush3.bf16.msra.mxu1 %v2093_v7  ;;  %2071 = vmatprep.subr.bf16.mxu0 %v2163_v3 }
  0x7a   : > { %2095 = vmatprep.subr.bf16.mxu1 %v2163_v3 }
  0x7c   : > { %2073 = vmatpush3.bf16.msra.mxu0 %v2072_v14 }
  0x7d   : > { %2097 = vmatpush3.bf16.msra.mxu1 %v2096_v15  ;;  %2074 = vmatprep.subr.bf16.mxu0 %v2163_v3 }
  0x7e   : > { %2098 = vmatprep.subr.bf16.mxu1 %v2163_v3 }
  0x80   : > { %2076 = vmatpush3.bf16.msra.mxu0 %v2075_v20 }
  0x81   : > { %2100 = vmatpush3.bf16.msra.mxu1 %v2099_v21  ;;  %2077 = vmatprep.subr.bf16.mxu0 %v2163_v3 }
  0x82   : > { %2101 = vmatprep.subr.bf16.mxu1 %v2163_v3 }
  0x84   : > { %2079 = vmatpush3.bf16.msra.mxu0 %v2078_v26 }
  0x85   : > { %2103 = vmatpush3.bf16.msra.mxu1 %v2102_v27  ;;  %2104 = vmatprep.subr.bf16.mxu0 %v2163_v3 }
  0x86   : > { %2128 = vmatprep.subr.bf16.mxu1 %v2163_v3 }
  0x87   : > { %1822 = vmatmul.mubr.f32.vlgmr.msra.gmra.mrb[18].mxu0 %v834_v30 }
  0x88   : > { %1863 = vmatmul.mubr.f32.vlgmr.msra.gmra.mrb[18].mxu1 %v937_v32  ;;  %2106 = vmatpush3.bf16.msra.mxu0 %v2105_v31 }
  0x89   : > { %2136 = vmatpush3.bf16.msra.mxu1 %v2105_v31  ;;  %1824 = vmatprep.mubr.msk.f32.mxu0 %vm2164_vm0, %v2165_v11 }
  0x8a   : > { %2107 = vmatprep.subr.bf16.mxu0 %v2163_v3  ;;  %2129 = vmatprep.subr.bf16.mxu1 %v2163_v3 }
  0x8b   : > { %1825 = vmatmul.mubr.f32.gmra.mrb[20].mxu0 %v835_v35  ;;  %1865 = vmatprep.mubr.msk.f32.mxu1 %vm2164_vm0, %v2165_v11 }
  0x8c   : > { %2109 = vmatpush3.bf16.msra.mxu0 %v2108_v36  ;;  %1866 = vmatmul.mubr.f32.gmra.mrb[20].mxu1 %v938_v37 }
  0x8d   : > { %2137 = vmatpush3.bf16.msra.mxu1 %v2108_v36  ;;  %1827 = vmatprep.mubr.msk.f32.mxu0 %vm2164_vm0, %v2165_v11 }
  0x8e   : > { %2110 = vmatprep.subr.bf16.mxu0 %v2163_v3  ;;  %2130 = vmatprep.subr.bf16.mxu1 %v2163_v3 }
  0x8f   : > { %1828 = vmatmul.mubr.f32.gmra.mrb[22].mxu0 %v836_v40  ;;  %1868 = vmatprep.mubr.msk.f32.mxu1 %vm2164_vm0, %v2165_v11 }
  0x90   : > { %2112 = vmatpush3.bf16.msra.mxu0 %v2111_v41  ;;  %1869 = vmatmul.mubr.f32.gmra.mrb[22].mxu1 %v939_v42 }
  0x91   : > { %2138 = vmatpush3.bf16.msra.mxu1 %v2111_v41  ;;  %2113 = vmatprep.subr.bf16.mxu0 %v2163_v3 }
  0x92   : > { %2131 = vmatprep.subr.bf16.mxu1 %v2163_v3  ;;  %1903 = vmatprep.mubr.msk.f32.mxu0 %vm2164_vm0, %v2165_v11 }
  0x93   : > { %1906 = vmatprep.mubr.msk.f32.mxu1 %vm2164_vm0, %v2165_v11 }
  0x94   : > { %2115 = vmatpush3.bf16.msra.mxu0 %v2114_v45 }
  0x95   : > { %2139 = vmatpush3.bf16.msra.mxu1 %v2114_v45  ;;  %2116 = vmatprep.subr.bf16.mxu0 %v2163_v3 }
  0x96   : > { %2132 = vmatprep.subr.bf16.mxu1 %v2163_v3 }
  0x98   : > { %2118 = vmatpush3.bf16.msra.mxu0 %v2117_v48 }
  0x99   : > { %2140 = vmatpush3.bf16.msra.mxu1 %v2117_v48  ;;  %2119 = vmatprep.subr.bf16.mxu0 %v2163_v3 }
  0x9a   : > { %2133 = vmatprep.subr.bf16.mxu1 %v2163_v3 }
  0x9c   : > { %2121 = vmatpush3.bf16.msra.mxu0 %v2120_v51 }
  0x9d   : > { %2141 = vmatpush3.bf16.msra.mxu1 %v2120_v51  ;;  %2122 = vmatprep.subr.bf16.mxu0 %v2163_v3 }
  0x9e   : > { %2134 = vmatprep.subr.bf16.mxu1 %v2163_v3 }
  0xa0   : > { %2124 = vmatpush3.bf16.msra.mxu0 %v2123_v53 }
  0xa1   : > { %2142 = vmatpush3.bf16.msra.mxu1 %v2123_v53  ;;  %2125 = vmatprep.subr.bf16.mxu0 %v2163_v3 }
  0xa2   : > { %2135 = vmatprep.subr.bf16.mxu1 %v2163_v3 }
  0xa4   : > { %2127 = vmatpush3.bf16.msra.mxu0 %v2126_v56 }
  0xa5   : > { %2143 = vmatpush3.bf16.msra.mxu1 %v2126_v56 }
  0xa7   : > { %1904 = vmatmul.mubr.f32.vlgmr.msra.gmra.mrb[24].mxu0 %v2490_v57 }
  0xa8   : > { %1907 = vmatmul.mubr.f32.vlgmr.msra.gmra.mrb[24].mxu1 %v2513_v1 }
  0xa9   : > { %1909 = vmatprep.mubr.msk.f32.mxu1 %vm2164_vm0, %v2165_v11 }
  0xac   : > { %1910 = vmatmul.mubr.f32.gmra.mrb[26].mxu1 %v1042_v58 }
  0xfa   : > { %v328_v59 = vpop.f32.mrb[0].mxu0 }
  0xfb   : > { %v408_v13 = vpop.f32.mrb[0].mxu1  ;;  %v1577_v60 = vpop.f32.mrb[1].mxu0 }
  0xfc   : > { %v409_v61 = vadd.f32 %v408_v13, %v328_v59  ;;  %v1618_v62 = vpop.f32.mrb[1].mxu1 }
  0xfe   : > { %v333_v63 = vpop.f32.mrb[2].mxu0 }
  0xff   : > { %v413_v0 = vpop.f32.mrb[2].mxu1  ;;  %v1580_v2 = vpop.f32.mrb[3].mxu0 }
 0x100   : > { %v414_v3 = vadd.f32 %v413_v0, %v333_v63  ;;  %v1621_v5 = vpop.f32.mrb[3].mxu1  ;;  %v1369_v0 = vld [vmem:[%s2827_s2] ss:$0 sm:$0xff] }
 0x102   : > { %v338_v6 = vpop.f32.mrb[4].mxu0 }
 0x103   : > { %v418_v7 = vpop.f32.mrb[4].mxu1  ;;  %v1583_v57 = vpop.f32.mrb[5].mxu0 }
 0x104   : > { %v419_v8 = vadd.f32 %v418_v7, %v338_v6  ;;  %v1624_v1 = vpop.f32.mrb[5].mxu1  ;;  %v1153_v6 = vld [vmem:[%s215_s9] sm:$0xff] }
 0x105   : > { %v1154_v1 = vld [vmem:[%s215_s9 + $0x8] sm:$0xff] }
 0x11a   : > { %v508_v9 = vpop.f32.mrb[6].mxu0 }
 0x11b   : > { %v522_v10 = vadd.f32 %v508_v9, %v409_v61  ;;  %v611_v11 = vpop.f32.mrb[6].mxu1  ;;  %v1659_v12 = vpop.f32.mrb[7].mxu0 }
 0x11c   : > { %v1700_v14 = vpop.f32.mrb[7].mxu1 }
 0x11d   : > { %v625_v15 = vadd.f32 %v611_v11, %v522_v10 }
 0x11e   : > { %v513_v16 = vpop.f32.mrb[8].mxu0 }
 0x11f   : > { %v523_v17 = vadd.f32 %v513_v16, %v414_v3  ;;  %v616_v18 = vpop.f32.mrb[8].mxu1  ;;  %v1662_v19 = vpop.f32.mrb[9].mxu0 }
 0x120   : > { %v1703_v20 = vpop.f32.mrb[9].mxu1 }
 0x121   : > { %v626_v21 = vadd.f32 %v616_v18, %v523_v17  ;;  %v1155_v17 = vld [vmem:[%s215_s9 + $0x10] sm:$0xff] }
 0x122   : > { %v518_v22 = vpop.f32.mrb[10].mxu0 }
 0x123   : > { %v524_v23 = vadd.f32 %v518_v22, %v419_v8  ;;  %v621_v24 = vpop.f32.mrb[10].mxu1  ;;  %v1665_v25 = vpop.f32.mrb[11].mxu0 }
 0x124   : > { %v1706_v26 = vpop.f32.mrb[11].mxu1 }
 0x125   : > { %v627_v27 = vadd.f32 %v621_v24, %v524_v23 }
 0x13a   : > { %v714_v28 = vpop.f32.mrb[12].mxu0 }
 0x13b   : > { %v728_v29 = vadd.f32 %v714_v28, %v625_v15  ;;  %v817_v30 = vpop.f32.mrb[12].mxu1  ;;  %v1741_v31 = vpop.f32.mrb[13].mxu0 }
 0x13c   : > { %v1782_v32 = vpop.f32.mrb[13].mxu1 }
 0x13d   : > { %v831_v33 = vadd.f32 %v817_v30, %v728_v29 }
 0x13e   : > { %v719_v34 = vpop.f32.mrb[14].mxu0 }
 0x13f   : > { %v729_v35 = vadd.f32 %v719_v34, %v626_v21  ;;  %v822_v36 = vpop.f32.mrb[14].mxu1  ;;  %v1744_v37 = vpop.f32.mrb[15].mxu0 }
 0x140   : > { %v1785_v38 = vpop.f32.mrb[15].mxu1 }
 0x141   : > { %v832_v39 = vadd.f32 %v822_v36, %v729_v35 }
 0x142   : > { %v724_v40 = vpop.f32.mrb[16].mxu0 }
 0x143   : > { %v730_v41 = vadd.f32 %v724_v40, %v627_v27  ;;  %v827_v42 = vpop.f32.mrb[16].mxu1  ;;  %v1747_v43 = vpop.f32.mrb[17].mxu0 }
 0x144   : > { %v1788_v44 = vpop.f32.mrb[17].mxu1 }
 0x145   : > { %v833_v45 = vadd.f32 %v827_v42, %v730_v41 }
 0x15a   : > { %v920_v46 = vpop.f32.mrb[18].mxu0 }
 0x15b   : > { %v934_v47 = vadd.f32 %v920_v46, %v831_v33  ;;  %v1023_v48 = vpop.f32.mrb[18].mxu1  ;;  %v1823_v49 = vpop.f32.mrb[19].mxu0 }
 0x15c   : > { %v1864_v50 = vpop.f32.mrb[19].mxu1 }
 0x15d   : > { %v1037_v51 = vadd.f32 %v1023_v48, %v934_v47 }
 0x15e   : > { %v925_v4 = vpop.f32.mrb[20].mxu0 }
 0x15f   : > { %v935_v52 = vadd.f32 %v925_v4, %v832_v39  ;;  %v1028_v53 = vpop.f32.mrb[20].mxu1  ;;  %v1826_v54 = vpop.f32.mrb[21].mxu0 }
 0x160   : > { %v1867_v55 = vpop.f32.mrb[21].mxu1 }
 0x161   : > { %v1038_v56 = vadd.f32 %v1028_v53, %v935_v52 }
 0x162   : > { %v930_v58 = vpop.f32.mrb[22].mxu0 }
 0x163   : > { %v936_v59 = vadd.f32 %v930_v58, %v833_v45  ;;  %v1033_v13 = vpop.f32.mrb[22].mxu1  ;;  %v1829_v60 = vpop.f32.mrb[23].mxu0 }
 0x164   : > { %v1870_v61 = vpop.f32.mrb[23].mxu1 }
 0x165   : > { %v1039_v62 = vadd.f32 %v1033_v13, %v936_v59 }
 0x17a   : > { %v1126_v63 = vpop.f32.mrb[24].mxu0 }
 0x17b   : > { %v1140_v2 = vadd.f32 %v1126_v63, %v1037_v51  ;;  %v1131_v3 = vpop.f32.mrb[24].mxu1  ;;  %v1905_v5 = vpop.f32.mrb[25].mxu0 }
 0x17c   : > { %v1141_v7 = vadd.f32 %v1131_v3, %v1038_v56  ;;  %v1908_v57 = vpop.f32.mrb[25].mxu1 }
 0x17d   : > { %v1150_v8 = vadd.f32 %v1369_v0, %v1140_v2 }
 0x17e   : > { %v1151_v9 = vadd.f32 %v1369_v0, %v1141_v7 }
 0x17f   : > { %v1156_v10 = vadd.f32 %v1153_v6, %v1150_v8  ;;  %v1136_v11 = vpop.f32.mrb[26].mxu1 }
 0x180   : > { %v1157_v12 = vadd.f32 %v1154_v1, %v1151_v9  ;;  %v1142_v14 = vadd.f32 %v1136_v11, %v1039_v62  ;;  %v1911_v15 = vpop.f32.mrb[27].mxu1 }
 0x181   : > { %v1159_v16 = vmax.f32 %v1156_v10, 0.0 }
 0x182   : > { %v1160_v18 = vmax.f32 %v1157_v12, 0.0  ;;  %v1152_v19 = vadd.f32 %v1369_v0, %v1142_v14 }
 0x183   : > { %1162 = vst [vmem:[%s221_s14] sm:$0xff] %v1159_v16 }
 0x184   : > { %1163 = vst [vmem:[%s221_s14 + $0x8] sm:$0xff] %v1160_v18  ;;  %v1158_v20 = vadd.f32 %v1155_v17, %v1152_v19 }
 0x186   : > { %v1161_v21 = vmax.f32 %v1158_v20, 0.0 }
 0x188   : > { %1164 = vst [vmem:[%s221_s14 + $0x10] sm:$0xff] %v1161_v21 }
 0x189 PF: > { %s14_s15 = sadd.s32 1, %s2161_s15  }
 0x18a   : > { %p11_p5 = scmp.ge.s32.totalorder %s14_s15, 4  }
 0x18c   :  { %13 = sbr.rel (!%p11_p5) target bundleno = 1 (0x1), region = 77 }

// kernel: fair_resnet_forward.5
= control target key start
LH: loop header
LB: loop body
LE: loop exit
PB: predicated region body
PF: predicated region fallthrough
CT: control target
= control target key end

     0   :  { %s12265_s21 = smov 0   ;;  %s15452_s0 = inlined_call_operand.vmem [shape: f32[256,3], index: 0, kind: input, shape index: {}]   ;;  %s15453_s1 = inlined_call_operand.vmem [shape: f32[256,3], index: 1, kind: input, shape index: {}]   ;;  %s15454_s2 = inlined_call_operand.vmem [shape: f32[256,3], index: 2, kind: input, shape index: {}]   ;;  %s15455_s3 = inlined_call_operand.vmem [shape: f32[256,3], index: 3, kind: input, shape index: {}]   ;;  %s15456_s4 = inlined_call_operand.vmem [shape: f32[49,3,128], index: 4, kind: input, shape index: {}]   ;;  %s15457_s5 = inlined_call_operand.vmem [shape: f32[1,128], index: 5, kind: input, shape index: {}]   ;;  %s15458_s6 = inlined_call_operand.vmem [shape: f32[176,128], index: 6, kind: output, shape index: {}]  }
   0x1 LB: > { %s9252_s22 = sadd.s32 4294967295, %s12226_s21   ;;  %p9256_p0 = scmp.ge.s32.totalorder %s12226_s21, 1  ;;  %s12226_s21 = sphi %s12265_s21, %s16_s21  }
   0x2   : > { %p246_p1 = scmp.lt.s32.totalorder %s12226_s21, 3 }
   0x4   : > { %p247_p2 = pnand %p9256_p0, %p246_p1 }
   0x5   : > { %v9266_v0 = vld [vmem:[%s15456_s4 + $0x4] sm:$0x7] (!%p247_p2)  ;;  %vm380_vm0 = vcmask (!%p247_p2), 1042432   ;;  %s9257_s25 = sshll.u32 (!%p247_p2), %s9252_s22, 4  ;;  %v12228_v1 = vmov (!%p247_p2), 0.0   ;;  %vm12229_vm1 = vmmov (!%p247_p2), 0  }
   0x6   : > { %250 = sbr.rel (%p247_p2) target bundleno = 1312 (0x520), region = 44  ;;  %10493 = vmatprep.subr.mxu0 (!%p247_p2), %v12228_v1  ;;  %12208 = vmatprep.subr.mxu1 (!%p247_p2), %v12228_v1  ;;  %p292_p3 = scmp.lt.s32.totalorder (!%p247_p2), %s9257_s25, 31  ;;  %vm346_vm2 = vcmask (!%p247_p2), 23552   ;;  %v9291_v2 = vld [vmem:[%s15456_s4 + $0x8] sm:$0x7] (!%p247_p2) }
   0x7   : > { %10494 = vmatpush3.msk.msra.mxu0 (!%p247_p2), %vm380_vm0, %v9266_v0  ;;  %12209 = vmatpush3.msk.msra.mxu1 (!%p247_p2), %vm380_vm0, %v9266_v0  ;;  %v332_v3 = vld [vmem:[%s15456_s4] sm:$0x7] (!%p247_p2)  ;;  %v9304_v16 = vld [vmem:[%s15456_s4 + $0xc] sm:$0x7] (!%p247_p2)  ;;  %v9317_v19 = vld [vmem:[%s15456_s4 + $0x10] sm:$0x7] (!%p247_p2) }
   0x8   : > { %10495 = vmatprep.mubr.msk.f32.mxu0 (!%p247_p2), %vm12229_vm1, %v12228_v1  ;;  %10513 = vmatprep.mubr.msk.f32.mxu1 (!%p247_p2), %vm12229_vm1, %v12228_v1  ;;  %v9330_v40 = vld [vmem:[%s15456_s4 + $0x14] sm:$0x7] (!%p247_p2)  ;;  %v9343_v43 = vld [vmem:[%s15456_s4 + $0x18] sm:$0x7] (!%p247_p2)  ;;  %v9356_v0 = vld [vmem:[%s15456_s4 + $0x1c] sm:$0x7] (!%p247_p2) }
   0x9   : > { %10563 = vmatprep.subr.mxu0 (!%p247_p2), %v12228_v1  ;;  %10528 = vmatprep.subr.mxu1 (!%p247_p2), %v12228_v1 }
   0xd   : > { %s15460_s25 = smov (!%p292_p3, %s9257_s25), 31 }
   0xe   : > { %s12288_s26 = sshll.u32 %s15460_s25, 3 }
   0xf   : > { %s12294_s29 = scalar_lea.vmem %s15453_s1, %s12288_s26  ;;  %s12344_s12 = scalar_lea.vmem %s15452_s0, %s12288_s26 }
  0x10   : > { %v333_v4 = vld [vmem:[%s12294_s29] sm:$0xff]  ;;  %v339_v5 = vld [vmem:[%s12294_s29 + $0x30] sm:$0xff]  ;;  %v334_v6 = vld [vmem:[%s12294_s29 + $0x8] sm:$0xff]  ;;  %s12670_s7 = scalar_lea.vmem %s15454_s2, %s12288_s26  ;;  %s12690_s13 = scalar_lea.vmem %s15455_s3, %s12288_s26 }
  0x11   : > { %10496 = vmatmul.mubr.msk.f32.vlgmr.msra.gmra.mrb[0].mxu0 %vm346_vm2, %v333_v4  ;;  %10514 = vmatmul.mubr.msk.f32.vlgmr.msra.gmra.mrb[0].mxu1 %vm346_vm2, %v339_v5  ;;  %v340_v7 = vld [vmem:[%s12294_s29 + $0x38] sm:$0xff]  ;;  %v335_v8 = vld [vmem:[%s12294_s29 + $0x10] sm:$0xff]  ;;  %v341_v9 = vld [vmem:[%s12294_s29 + $0x40] sm:$0xff] }
  0x12   : > { %10564 = vmatpush3.msk.msra.mxu0 %vm380_vm0, %v9291_v2  ;;  %10529 = vmatpush3.msk.msra.mxu1 %vm380_vm0, %v332_v3  ;;  %v336_v10 = vld [vmem:[%s12294_s29 + $0x18] sm:$0xff]  ;;  %v342_v11 = vld [vmem:[%s12294_s29 + $0x48] sm:$0xff]  ;;  %v337_v12 = vld [vmem:[%s12294_s29 + $0x20] sm:$0xff] }
  0x13   : > { %10498 = vmatprep.mubr.msk.f32.mxu0 %vm12229_vm1, %v12228_v1  ;;  %10516 = vmatprep.mubr.msk.f32.mxu1 %vm12229_vm1, %v12228_v1  ;;  %v343_v13 = vld [vmem:[%s12294_s29 + $0x50] sm:$0xff]  ;;  %v338_v14 = vld [vmem:[%s12294_s29 + $0x28] sm:$0xff]  ;;  %v321_v15 = vld [vmem:[%s12344_s12] sm:$0xff] }
  0x14   : > { %10598 = vmatprep.subr.mxu1 %v12228_v1  ;;  %10633 = vmatprep.subr.mxu0 %v12228_v1  ;;  %v322_v17 = vld [vmem:[%s12344_s12 + $0x8] sm:$0xff]  ;;  %v323_v20 = vld [vmem:[%s12344_s12 + $0x10] sm:$0xff]  ;;  %v324_v22 = vld [vmem:[%s12344_s12 + $0x18] sm:$0xff] }
  0x15   : > { %10499 = vmatmul.mubr.msk.f32.gmra.mrb[2].mxu0 %vm346_vm2, %v334_v6  ;;  %10517 = vmatmul.mubr.msk.f32.gmra.mrb[2].mxu1 %vm346_vm2, %v340_v7  ;;  %v660_v18 = vld [vmem:[%s12344_s12 + $0x1] sm:$0xff]  ;;  %v661_v21 = vld [vmem:[%s12344_s12 + $0x9] sm:$0xff]  ;;  %v662_v23 = vld [vmem:[%s12344_s12 + $0x11] sm:$0xff] }
  0x16   : > { %10501 = vmatprep.mubr.msk.f32.mxu0 %vm12229_vm1, %v12228_v1  ;;  %10519 = vmatprep.mubr.msk.f32.mxu1 %vm12229_vm1, %v12228_v1  ;;  %v325_v24 = vld [vmem:[%s12344_s12 + $0x20] sm:$0xff]  ;;  %v326_v26 = vld [vmem:[%s12344_s12 + $0x28] sm:$0xff]  ;;  %v327_v28 = vld [vmem:[%s12344_s12 + $0x30] sm:$0xff] }
  0x17   : > { %v663_v25 = vld [vmem:[%s12344_s12 + $0x19] sm:$0xff]  ;;  %v664_v27 = vld [vmem:[%s12344_s12 + $0x21] sm:$0xff]  ;;  %v665_v29 = vld [vmem:[%s12344_s12 + $0x29] sm:$0xff] }
  0x18   : > { %v328_v30 = vld [vmem:[%s12344_s12 + $0x38] sm:$0xff]  ;;  %v329_v32 = vld [vmem:[%s12344_s12 + $0x40] sm:$0xff]  ;;  %v330_v34 = vld [vmem:[%s12344_s12 + $0x48] sm:$0xff] }
  0x19   : > { %10502 = vmatmul.mubr.msk.f32.gmra.mrb[4].mxu0 %vm346_vm2, %v335_v8  ;;  %10520 = vmatmul.mubr.msk.f32.gmra.mrb[4].mxu1 %vm346_vm2, %v341_v9  ;;  %v666_v31 = vld [vmem:[%s12344_s12 + $0x31] sm:$0xff]  ;;  %v667_v33 = vld [vmem:[%s12344_s12 + $0x39] sm:$0xff]  ;;  %v668_v35 = vld [vmem:[%s12344_s12 + $0x41] sm:$0xff] }
  0x1a   : > { %10504 = vmatprep.mubr.msk.f32.mxu0 %vm12229_vm1, %v12228_v1  ;;  %10522 = vmatprep.mubr.msk.f32.mxu1 %vm12229_vm1, %v12228_v1  ;;  %v331_v36 = vld [vmem:[%s12344_s12 + $0x50] sm:$0xff]  ;;  %v840_v39 = vld [vmem:[%s12294_s29 + $0x1] sm:$0xff]  ;;  %v843_v46 = vld [vmem:[%s12294_s29 + $0x19] sm:$0xff] }
  0x1b   : > { %v669_v37 = vld [vmem:[%s12344_s12 + $0x49] sm:$0xff]  ;;  %v670_v38 = vld [vmem:[%s12344_s12 + $0x51] sm:$0xff]  ;;  %v844_v48 = vld [vmem:[%s12294_s29 + $0x21] sm:$0xff] }
  0x1c   : > { %v841_v41 = vld [vmem:[%s12294_s29 + $0x9] sm:$0xff]  ;;  %v842_v44 = vld [vmem:[%s12294_s29 + $0x11] sm:$0xff]  ;;  %v1023_v49 = vld [vmem:[%s12344_s12 + $0x1a] sm:$0xff] }
  0x1d   : > { %10505 = vmatmul.mubr.msk.f32.gmra.mrb[6].mxu0 %vm346_vm2, %v336_v10  ;;  %10523 = vmatmul.mubr.msk.f32.gmra.mrb[6].mxu1 %vm346_vm2, %v342_v11  ;;  %v1020_v42 = vld [vmem:[%s12344_s12 + $0x2] sm:$0xff]  ;;  %v1021_v45 = vld [vmem:[%s12344_s12 + $0xa] sm:$0xff]  ;;  %v1022_v47 = vld [vmem:[%s12344_s12 + $0x12] sm:$0xff] }
  0x1e   : > { %10507 = vmatprep.mubr.msk.f32.mxu0 %vm12229_vm1, %v12228_v1  ;;  %10525 = vmatprep.mubr.msk.f32.mxu1 %vm12229_vm1, %v12228_v1  ;;  %v845_v50 = vld [vmem:[%s12294_s29 + $0x29] sm:$0xff]  ;;  %v846_v52 = vld [vmem:[%s12294_s29 + $0x31] sm:$0xff]  ;;  %v847_v54 = vld [vmem:[%s12294_s29 + $0x39] sm:$0xff] }
  0x1f   : > { %v1024_v51 = vld [vmem:[%s12344_s12 + $0x22] sm:$0xff]  ;;  %v1025_v53 = vld [vmem:[%s12344_s12 + $0x2a] sm:$0xff]  ;;  %v1026_v55 = vld [vmem:[%s12344_s12 + $0x32] sm:$0xff] }
  0x20   : > { %v848_v56 = vld [vmem:[%s12294_s29 + $0x41] sm:$0xff]  ;;  %v849_v58 = vld [vmem:[%s12294_s29 + $0x49] sm:$0xff]  ;;  %v850_v60 = vld [vmem:[%s12294_s29 + $0x51] sm:$0xff] }
  0x21   : > { %10508 = vmatmul.mubr.msk.f32.gmra.mrb[8].mxu0 %vm346_vm2, %v337_v12  ;;  %10526 = vmatmul.mubr.msk.f32.gmra.mrb[8].mxu1 %vm346_vm2, %v343_v13  ;;  %v1027_v57 = vld [vmem:[%s12344_s12 + $0x3a] sm:$0xff]  ;;  %v1028_v59 = vld [vmem:[%s12344_s12 + $0x42] sm:$0xff]  ;;  %v1029_v61 = vld [vmem:[%s12344_s12 + $0x4a] sm:$0xff] }
  0x22   : > { %10510 = vmatprep.mubr.msk.f32.mxu0 %vm12229_vm1, %v12228_v1  ;;  %10530 = vmatprep.mubr.msk.f32.mxu1 %vm12229_vm1, %v12228_v1  ;;  %v1030_v62 = vld [vmem:[%s12344_s12 + $0x52] sm:$0xff]  ;;  %v1200_v63 = vld [vmem:[%s12294_s29 + $0x2] sm:$0xff]  ;;  %v1201_v2 = vld [vmem:[%s12294_s29 + $0xa] sm:$0xff] }
  0x23   : > { %v1380_v3 = vld [vmem:[%s12344_s12 + $0x3] sm:$0xff]  ;;  %v9369_v4 = vld [vmem:[%s15456_s4 + $0x20] sm:$0x7]  ;;  %v1202_v5 = vld [vmem:[%s12294_s29 + $0x12] sm:$0xff] }
  0x24   : > { %v12573_v6 = vld [vmem:[%s12344_s12 + $0xb] sm:$0xff]  ;;  %v1203_v7 = vld [vmem:[%s12294_s29 + $0x1a] sm:$0xff]  ;;  %v1204_v9 = vld [vmem:[%s12294_s29 + $0x22] sm:$0xff] }
  0x25   : > { %10511 = vmatmul.mubr.msk.f32.gmra.mrb[10].mxu0 %vm346_vm2, %v338_v14  ;;  %10531 = vmatmul.mubr.msk.f32.vlgmr.msra.gmra.mrb[10].mxu1 %vm346_vm2, %v321_v15  ;;  %v12587_v8 = vld [vmem:[%s12344_s12 + $0x13] sm:$0xff]  ;;  %v12598_v10 = vld [vmem:[%s12344_s12 + $0x1b] sm:$0xff]  ;;  %v1205_v11 = vld [vmem:[%s12294_s29 + $0x2a] sm:$0xff] }
  0x26   : > { %10599 = vmatpush3.msk.msra.mxu1 %vm380_vm0, %v9304_v16  ;;  %10533 = vmatprep.mubr.msk.f32.mxu1 %vm12229_vm1, %v12228_v1  ;;  %v12609_v12 = vld [vmem:[%s12344_s12 + $0x23] sm:$0xff]  ;;  %v1206_v13 = vld [vmem:[%s12294_s29 + $0x32] sm:$0xff]  ;;  %v1207_v15 = vld [vmem:[%s12294_s29 + $0x3a] sm:$0xff] }
  0x27   : > { %10565 = vmatprep.mubr.msk.f32.mxu0 %vm12229_vm1, %v12228_v1  ;;  %10668 = vmatprep.subr.mxu1 %v12228_v1  ;;  %v12620_v14 = vld [vmem:[%s12344_s12 + $0x2b] sm:$0xff]  ;;  %v12631_v16 = vld [vmem:[%s12344_s12 + $0x33] sm:$0xff] }
  0x29   : > { %10534 = vmatmul.mubr.msk.f32.gmra.mrb[12].mxu1 %vm346_vm2, %v322_v17  ;;  %10566 = vmatmul.mubr.msk.f32.vlgmr.msra.gmra.mrb[12].mxu0 %vm346_vm2, %v660_v18  ;;  %v1208_v17 = vld [vmem:[%s12294_s29 + $0x42] sm:$0xff] }
  0x2a   : > { %10634 = vmatpush3.msk.msra.mxu0 %vm380_vm0, %v9317_v19  ;;  %10536 = vmatprep.mubr.msk.f32.mxu1 %vm12229_vm1, %v12228_v1  ;;  %v12642_v18 = vld [vmem:[%s12344_s12 + $0x3b] sm:$0xff]  ;;  %v1209_v19 = vld [vmem:[%s12294_s29 + $0x4a] sm:$0xff] }
  0x2b   : > { %10568 = vmatprep.mubr.msk.f32.mxu0 %vm12229_vm1, %v12228_v1  ;;  %10703 = vmatprep.subr.mxu0 %v12228_v1 }
  0x2d   : > { %10537 = vmatmul.mubr.msk.f32.gmra.mrb[14].mxu1 %vm346_vm2, %v323_v20  ;;  %10569 = vmatmul.mubr.msk.f32.gmra.mrb[14].mxu0 %vm346_vm2, %v661_v21  ;;  %v12653_v20 = vld [vmem:[%s12344_s12 + $0x43] sm:$0xff]  ;;  %v1210_v21 = vld [vmem:[%s12294_s29 + $0x52] sm:$0xff] }
  0x2e   : > { %10539 = vmatprep.mubr.msk.f32.mxu1 %vm12229_vm1, %v12228_v1  ;;  %10571 = vmatprep.mubr.msk.f32.mxu0 %vm12229_vm1, %v12228_v1 }
  0x31   : > { %10540 = vmatmul.mubr.msk.f32.gmra.mrb[16].mxu1 %vm346_vm2, %v324_v22  ;;  %10572 = vmatmul.mubr.msk.f32.gmra.mrb[16].mxu0 %vm346_vm2, %v662_v23  ;;  %v12664_v22 = vld [vmem:[%s12344_s12 + $0x4b] sm:$0xff]  ;;  %v12680_v23 = vld [vmem:[%s12344_s12 + $0x53] sm:$0xff] }
  0x32   : > { %10542 = vmatprep.mubr.msk.f32.mxu1 %vm12229_vm1, %v12228_v1  ;;  %10574 = vmatprep.mubr.msk.f32.mxu0 %vm12229_vm1, %v12228_v1 }
  0x35   : > { %10543 = vmatmul.mubr.msk.f32.gmra.mrb[18].mxu1 %vm346_vm2, %v325_v24  ;;  %10575 = vmatmul.mubr.msk.f32.gmra.mrb[18].mxu0 %vm346_vm2, %v663_v25  ;;  %v1560_v24 = vld [vmem:[%s12670_s7] sm:$0xff] }
  0x36   : > { %10545 = vmatprep.mubr.msk.f32.mxu1 %vm12229_vm1, %v12228_v1  ;;  %10577 = vmatprep.mubr.msk.f32.mxu0 %vm12229_vm1, %v12228_v1  ;;  %v9382_v25 = vld [vmem:[%s15456_s4 + $0x24] sm:$0x7] }
  0x39   : > { %10546 = vmatmul.mubr.msk.f32.gmra.mrb[20].mxu1 %vm346_vm2, %v326_v26  ;;  %10578 = vmatmul.mubr.msk.f32.gmra.mrb[20].mxu0 %vm346_vm2, %v664_v27  ;;  %v1561_v26 = vld [vmem:[%s12670_s7 + $0x8] sm:$0xff]  ;;  %v1740_v27 = vld [vmem:[%s12690_s13] sm:$0xff] }
  0x3a   : > { %10548 = vmatprep.mubr.msk.f32.mxu1 %vm12229_vm1, %v12228_v1  ;;  %10580 = vmatprep.mubr.msk.f32.mxu0 %vm12229_vm1, %v12228_v1 }
  0x3d   : > { %10549 = vmatmul.mubr.msk.f32.gmra.mrb[22].mxu1 %vm346_vm2, %v327_v28  ;;  %10581 = vmatmul.mubr.msk.f32.gmra.mrb[22].mxu0 %vm346_vm2, %v665_v29  ;;  %v9395_v28 = vld [vmem:[%s15456_s4 + $0x28] sm:$0x7]  ;;  %v1562_v29 = vld [vmem:[%s12670_s7 + $0x10] sm:$0xff] }
  0x3e   : > { %10551 = vmatprep.mubr.msk.f32.mxu1 %vm12229_vm1, %v12228_v1  ;;  %10583 = vmatprep.mubr.msk.f32.mxu0 %vm12229_vm1, %v12228_v1 }
  0x41   : > { %10552 = vmatmul.mubr.msk.f32.gmra.mrb[24].mxu1 %vm346_vm2, %v328_v30  ;;  %10584 = vmatmul.mubr.msk.f32.gmra.mrb[24].mxu0 %vm346_vm2, %v666_v31  ;;  %v1741_v30 = vld [vmem:[%s12690_s13 + $0x8] sm:$0xff]  ;;  %v1563_v31 = vld [vmem:[%s12670_s7 + $0x18] sm:$0xff] }
  0x42   : > { %10554 = vmatprep.mubr.msk.f32.mxu1 %vm12229_vm1, %v12228_v1  ;;  %10586 = vmatprep.mubr.msk.f32.mxu0 %vm12229_vm1, %v12228_v1 }
  0x45   : > { %10555 = vmatmul.mubr.msk.f32.gmra.mrb[26].mxu1 %vm346_vm2, %v329_v32  ;;  %10587 = vmatmul.mubr.msk.f32.gmra.mrb[26].mxu0 %vm346_vm2, %v667_v33  ;;  %v1742_v32 = vld [vmem:[%s12690_s13 + $0x10] sm:$0xff]  ;;  %v1564_v33 = vld [vmem:[%s12670_s7 + $0x20] sm:$0xff] }
  0x46   : > { %10557 = vmatprep.mubr.msk.f32.mxu1 %vm12229_vm1, %v12228_v1  ;;  %10589 = vmatprep.mubr.msk.f32.mxu0 %vm12229_vm1, %v12228_v1 }
  0x49   : > { %10558 = vmatmul.mubr.msk.f32.gmra.mrb[28].mxu1 %vm346_vm2, %v330_v34  ;;  %10590 = vmatmul.mubr.msk.f32.gmra.mrb[28].mxu0 %vm346_vm2, %v668_v35  ;;  %v1743_v34 = vld [vmem:[%s12690_s13 + $0x18] sm:$0xff]  ;;  %v1565_v35 = vld [vmem:[%s12670_s7 + $0x28] sm:$0xff] }
  0x4a   : > { %10560 = vmatprep.mubr.msk.f32.mxu1 %vm12229_vm1, %v12228_v1  ;;  %10592 = vmatprep.mubr.msk.f32.mxu0 %vm12229_vm1, %v12228_v1 }
  0x4d   : > { %10561 = vmatmul.mubr.msk.f32.gmra.mrb[30].mxu1 %vm346_vm2, %v331_v36  ;;  %10593 = vmatmul.mubr.msk.f32.gmra.mrb[30].mxu0 %vm346_vm2, %v669_v37  ;;  %v1744_v36 = vld [vmem:[%s12690_s13 + $0x20] sm:$0xff]  ;;  %v1566_v37 = vld [vmem:[%s12670_s7 + $0x30] sm:$0xff] }
  0x4e   : > { %10595 = vmatprep.mubr.msk.f32.mxu0 %vm12229_vm1, %v12228_v1  ;;  %10600 = vmatprep.mubr.msk.f32.mxu1 %vm12229_vm1, %v12228_v1 }
  0x51   : > { %10596 = vmatmul.mubr.msk.f32.gmra.mrb[32].mxu0 %vm346_vm2, %v670_v38  ;;  %10601 = vmatmul.mubr.msk.f32.vlgmr.msra.gmra.mrb[32].mxu1 %vm346_vm2, %v840_v39  ;;  %v1745_v38 = vld [vmem:[%s12690_s13 + $0x28] sm:$0xff]  ;;  %v1567_v39 = vld [vmem:[%s12670_s7 + $0x38] sm:$0xff] }
  0x52   : > { %10669 = vmatpush3.msk.msra.mxu1 %vm380_vm0, %v9330_v40  ;;  %10603 = vmatprep.mubr.msk.f32.mxu1 %vm12229_vm1, %v12228_v1  ;;  %v1746_v40 = vld [vmem:[%s12690_s13 + $0x30] sm:$0xff] }
  0x53   : > { %10635 = vmatprep.mubr.msk.f32.mxu0 %vm12229_vm1, %v12228_v1  ;;  %10738 = vmatprep.subr.mxu1 %v12228_v1 }
  0x55   : > { %10604 = vmatmul.mubr.msk.f32.gmra.mrb[34].mxu1 %vm346_vm2, %v841_v41  ;;  %10636 = vmatmul.mubr.msk.f32.vlgmr.msra.gmra.mrb[34].mxu0 %vm346_vm2, %v1020_v42  ;;  %v1568_v41 = vld [vmem:[%s12670_s7 + $0x40] sm:$0xff]  ;;  %v1747_v42 = vld [vmem:[%s12690_s13 + $0x38] sm:$0xff] }
  0x56   : > { %10704 = vmatpush3.msk.msra.mxu0 %vm380_vm0, %v9343_v43  ;;  %10606 = vmatprep.mubr.msk.f32.mxu1 %vm12229_vm1, %v12228_v1  ;;  %v1569_v43 = vld [vmem:[%s12670_s7 + $0x48] sm:$0xff] }
  0x57   : > { %10638 = vmatprep.mubr.msk.f32.mxu0 %vm12229_vm1, %v12228_v1  ;;  %10773 = vmatprep.subr.mxu0 %v12228_v1 }
  0x59   : > { %10607 = vmatmul.mubr.msk.f32.gmra.mrb[36].mxu1 %vm346_vm2, %v842_v44  ;;  %10639 = vmatmul.mubr.msk.f32.gmra.mrb[36].mxu0 %vm346_vm2, %v1021_v45  ;;  %v1748_v44 = vld [vmem:[%s12690_s13 + $0x40] sm:$0xff]  ;;  %v1570_v45 = vld [vmem:[%s12670_s7 + $0x50] sm:$0xff] }
  0x5a   : > { %10609 = vmatprep.mubr.msk.f32.mxu1 %vm12229_vm1, %v12228_v1  ;;  %10641 = vmatprep.mubr.msk.f32.mxu0 %vm12229_vm1, %v12228_v1 }
  0x5d   : > { %10610 = vmatmul.mubr.msk.f32.gmra.mrb[38].mxu1 %vm346_vm2, %v843_v46  ;;  %10642 = vmatmul.mubr.msk.f32.gmra.mrb[38].mxu0 %vm346_vm2, %v1022_v47  ;;  %v1749_v46 = vld [vmem:[%s12690_s13 + $0x48] sm:$0xff]  ;;  %v1750_v47 = vld [vmem:[%s12690_s13 + $0x50] sm:$0xff] }
  0x5e   : > { %10612 = vmatprep.mubr.msk.f32.mxu1 %vm12229_vm1, %v12228_v1  ;;  %10644 = vmatprep.mubr.msk.f32.mxu0 %vm12229_vm1, %v12228_v1 }
  0x61   : > { %10613 = vmatmul.mubr.msk.f32.gmra.mrb[40].mxu1 %vm346_vm2, %v844_v48  ;;  %10645 = vmatmul.mubr.msk.f32.gmra.mrb[40].mxu0 %vm346_vm2, %v1023_v49  ;;  %v1920_v48 = vld [vmem:[%s12670_s7 + $0x1] sm:$0xff]  ;;  %v9408_v49 = vld [vmem:[%s15456_s4 + $0x2c] sm:$0x7] }
  0x62   : > { %10615 = vmatprep.mubr.msk.f32.mxu1 %vm12229_vm1, %v12228_v1  ;;  %10647 = vmatprep.mubr.msk.f32.mxu0 %vm12229_vm1, %v12228_v1 }
  0x65   : > { %10616 = vmatmul.mubr.msk.f32.gmra.mrb[42].mxu1 %vm346_vm2, %v845_v50  ;;  %10648 = vmatmul.mubr.msk.f32.gmra.mrb[42].mxu0 %vm346_vm2, %v1024_v51  ;;  %v1921_v50 = vld [vmem:[%s12670_s7 + $0x9] sm:$0xff]  ;;  %v2100_v51 = vld [vmem:[%s12690_s13 + $0x1] sm:$0xff] }
  0x66   : > { %10618 = vmatprep.mubr.msk.f32.mxu1 %vm12229_vm1, %v12228_v1  ;;  %10650 = vmatprep.mubr.msk.f32.mxu0 %vm12229_vm1, %v12228_v1 }
  0x69   : > { %10619 = vmatmul.mubr.msk.f32.gmra.mrb[44].mxu1 %vm346_vm2, %v846_v52  ;;  %10651 = vmatmul.mubr.msk.f32.gmra.mrb[44].mxu0 %vm346_vm2, %v1025_v53  ;;  %v9421_v52 = vld [vmem:[%s15456_s4 + $0x30] sm:$0x7] }
  0x6a   : > { %10621 = vmatprep.mubr.msk.f32.mxu1 %vm12229_vm1, %v12228_v1  ;;  %10653 = vmatprep.mubr.msk.f32.mxu0 %vm12229_vm1, %v12228_v1  ;;  %v1922_v53 = vld [vmem:[%s12670_s7 + $0x11] sm:$0xff] }
  0x6d   : > { %10622 = vmatmul.mubr.msk.f32.gmra.mrb[46].mxu1 %vm346_vm2, %v847_v54  ;;  %10654 = vmatmul.mubr.msk.f32.gmra.mrb[46].mxu0 %vm346_vm2, %v1026_v55  ;;  %v2101_v54 = vld [vmem:[%s12690_s13 + $0x9] sm:$0xff]  ;;  %v1923_v55 = vld [vmem:[%s12670_s7 + $0x19] sm:$0xff] }
  0x6e   : > { %10624 = vmatprep.mubr.msk.f32.mxu1 %vm12229_vm1, %v12228_v1  ;;  %10656 = vmatprep.mubr.msk.f32.mxu0 %vm12229_vm1, %v12228_v1 }
  0x71   : > { %10625 = vmatmul.mubr.msk.f32.gmra.mrb[48].mxu1 %vm346_vm2, %v848_v56  ;;  %10657 = vmatmul.mubr.msk.f32.gmra.mrb[48].mxu0 %vm346_vm2, %v1027_v57  ;;  %v2102_v56 = vld [vmem:[%s12690_s13 + $0x11] sm:$0xff]  ;;  %v1924_v57 = vld [vmem:[%s12670_s7 + $0x21] sm:$0xff] }
  0x72   : > { %10627 = vmatprep.mubr.msk.f32.mxu1 %vm12229_vm1, %v12228_v1  ;;  %10659 = vmatprep.mubr.msk.f32.mxu0 %vm12229_vm1, %v12228_v1 }
  0x75   : > { %10628 = vmatmul.mubr.msk.f32.gmra.mrb[50].mxu1 %vm346_vm2, %v849_v58  ;;  %10660 = vmatmul.mubr.msk.f32.gmra.mrb[50].mxu0 %vm346_vm2, %v1028_v59  ;;  %v2103_v58 = vld [vmem:[%s12690_s13 + $0x19] sm:$0xff] }
  0x76   : > { %10630 = vmatprep.mubr.msk.f32.mxu1 %vm12229_vm1, %v12228_v1  ;;  %10662 = vmatprep.mubr.msk.f32.mxu0 %vm12229_vm1, %v12228_v1 }
  0x79   : > { %10631 = vmatmul.mubr.msk.f32.gmra.mrb[52].mxu1 %vm346_vm2, %v850_v60  ;;  %10663 = vmatmul.mubr.msk.f32.gmra.mrb[52].mxu0 %vm346_vm2, %v1029_v61 }
  0x7a   : > { %10665 = vmatprep.mubr.msk.f32.mxu0 %vm12229_vm1, %v12228_v1  ;;  %10670 = vmatprep.mubr.msk.f32.mxu1 %vm12229_vm1, %v12228_v1 }
  0x7d   : > { %10666 = vmatmul.mubr.msk.f32.gmra.mrb[54].mxu0 %vm346_vm2, %v1030_v62  ;;  %10671 = vmatmul.mubr.msk.f32.vlgmr.msra.gmra.mrb[54].mxu1 %vm346_vm2, %v1200_v63  ;;  %v1925_v63 = vld [vmem:[%s12670_s7 + $0x29] sm:$0xff] }
  0x7e   : > { %10739 = vmatpush3.msk.msra.mxu1 %vm380_vm0, %v9356_v0  ;;  %10673 = vmatprep.mubr.msk.f32.mxu1 %vm12229_vm1, %v12228_v1  ;;  %v2104_v0 = vld [vmem:[%s12690_s13 + $0x21] sm:$0xff] }
  0x7f   : > { %10705 = vmatprep.mubr.msk.f32.mxu0 %vm12229_vm1, %v12228_v1  ;;  %10808 = vmatprep.subr.mxu1 %v12228_v1 }
  0x81   : > { %10674 = vmatmul.mubr.msk.f32.gmra.mrb[56].mxu1 %vm346_vm2, %v1201_v2  ;;  %10706 = vmatmul.mubr.msk.f32.vlgmr.msra.gmra.mrb[56].mxu0 %vm346_vm2, %v1380_v3 }
  0x82   : > { %10774 = vmatpush3.msk.msra.mxu0 %vm380_vm0, %v9369_v4  ;;  %10676 = vmatprep.mubr.msk.f32.mxu1 %vm12229_vm1, %v12228_v1 }
  0x83   : > { %10708 = vmatprep.mubr.msk.f32.mxu0 %vm12229_vm1, %v12228_v1  ;;  %10843 = vmatprep.subr.mxu0 %v12228_v1 }
  0x85   : > { %10677 = vmatmul.mubr.msk.f32.gmra.mrb[58].mxu1 %vm346_vm2, %v1202_v5  ;;  %10709 = vmatmul.mubr.msk.f32.gmra.mrb[58].mxu0 %vm346_vm2, %v12573_v6 }
  0x86   : > { %10679 = vmatprep.mubr.msk.f32.mxu1 %vm12229_vm1, %v12228_v1  ;;  %10711 = vmatprep.mubr.msk.f32.mxu0 %vm12229_vm1, %v12228_v1 }
  0x89   : > { %10680 = vmatmul.mubr.msk.f32.gmra.mrb[60].mxu1 %vm346_vm2, %v1203_v7  ;;  %10712 = vmatmul.mubr.msk.f32.gmra.mrb[60].mxu0 %vm346_vm2, %v12587_v8  ;;  %v1926_v7 = vld [vmem:[%s12670_s7 + $0x31] sm:$0xff] }
  0x8a   : > { %10682 = vmatprep.mubr.msk.f32.mxu1 %vm12229_vm1, %v12228_v1  ;;  %10714 = vmatprep.mubr.msk.f32.mxu0 %vm12229_vm1, %v12228_v1 }
  0x8d   : > { %10683 = vmatmul.mubr.msk.f32.gmra.mrb[62].mxu1 %vm346_vm2, %v1204_v9  ;;  %10715 = vmatmul.mubr.msk.f32.gmra.mrb[62].mxu0 %vm346_vm2, %v12598_v10  ;;  %v2105_v9 = vld [vmem:[%s12690_s13 + $0x29] sm:$0xff] }
  0x8e   : > { %10685 = vmatprep.mubr.msk.f32.mxu1 %vm12229_vm1, %v12228_v1  ;;  %10717 = vmatprep.mubr.msk.f32.mxu0 %vm12229_vm1, %v12228_v1 }
  0x91   : > { %10686 = vmatmul.mubr.msk.f32.gmra.mrb[64].mxu1 %vm346_vm2, %v1205_v11  ;;  %10718 = vmatmul.mubr.msk.f32.gmra.mrb[64].mxu0 %vm346_vm2, %v12609_v12 }
  0x92   : > { %10688 = vmatprep.mubr.msk.f32.mxu1 %vm12229_vm1, %v12228_v1  ;;  %10720 = vmatprep.mubr.msk.f32.mxu0 %vm12229_vm1, %v12228_v1 }
  0x95   : > { %10689 = vmatmul.mubr.msk.f32.gmra.mrb[66].mxu1 %vm346_vm2, %v1206_v13  ;;  %10721 = vmatmul.mubr.msk.f32.gmra.mrb[66].mxu0 %vm346_vm2, %v12620_v14 }
  0x96   : > { %10691 = vmatprep.mubr.msk.f32.mxu1 %vm12229_vm1, %v12228_v1  ;;  %10723 = vmatprep.mubr.msk.f32.mxu0 %vm12229_vm1, %v12228_v1 }
  0x99   : > { %10692 = vmatmul.mubr.msk.f32.gmra.mrb[68].mxu1 %vm346_vm2, %v1207_v15  ;;  %10724 = vmatmul.mubr.msk.f32.gmra.mrb[68].mxu0 %vm346_vm2, %v12631_v16 }
  0x9a   : > { %10694 = vmatprep.mubr.msk.f32.mxu1 %vm12229_vm1, %v12228_v1  ;;  %10726 = vmatprep.mubr.msk.f32.mxu0 %vm12229_vm1, %v12228_v1 }
  0x9d   : > { %10695 = vmatmul.mubr.msk.f32.gmra.mrb[70].mxu1 %vm346_vm2, %v1208_v17  ;;  %10727 = vmatmul.mubr.msk.f32.gmra.mrb[70].mxu0 %vm346_vm2, %v12642_v18 }
  0x9e   : > { %10697 = vmatprep.mubr.msk.f32.mxu1 %vm12229_vm1, %v12228_v1  ;;  %10729 = vmatprep.mubr.msk.f32.mxu0 %vm12229_vm1, %v12228_v1 }
  0xa1   : > { %10698 = vmatmul.mubr.msk.f32.gmra.mrb[72].mxu1 %vm346_vm2, %v1209_v19  ;;  %10730 = vmatmul.mubr.msk.f32.gmra.mrb[72].mxu0 %vm346_vm2, %v12653_v20  ;;  %v1927_v19 = vld [vmem:[%s12670_s7 + $0x39] sm:$0xff] }
  0xa2   : > { %10700 = vmatprep.mubr.msk.f32.mxu1 %vm12229_vm1, %v12228_v1  ;;  %10732 = vmatprep.mubr.msk.f32.mxu0 %vm12229_vm1, %v12228_v1 }
  0xa5   : > { %10701 = vmatmul.mubr.msk.f32.gmra.mrb[74].mxu1 %vm346_vm2, %v1210_v21  ;;  %10733 = vmatmul.mubr.msk.f32.gmra.mrb[74].mxu0 %vm346_vm2, %v12664_v22  ;;  %v2106_v21 = vld [vmem:[%s12690_s13 + $0x31] sm:$0xff] }
  0xa6   : > { %10735 = vmatprep.mubr.msk.f32.mxu0 %vm12229_vm1, %v12228_v1  ;;  %10740 = vmatprep.mubr.msk.f32.mxu1 %vm12229_vm1, %v12228_v1 }
  0xa9   : > { %10736 = vmatmul.mubr.msk.f32.gmra.mrb[76].mxu0 %vm346_vm2, %v12680_v23  ;;  %10741 = vmatmul.mubr.msk.f32.vlgmr.msra.gmra.mrb[76].mxu1 %vm346_vm2, %v1560_v24 }
  0xaa   : > { %10809 = vmatpush3.msk.msra.mxu1 %vm380_vm0, %v9382_v25  ;;  %10743 = vmatprep.mubr.msk.f32.mxu1 %vm12229_vm1, %v12228_v1 }
  0xab   : > { %10775 = vmatprep.mubr.msk.f32.mxu0 %vm12229_vm1, %v12228_v1  ;;  %10878 = vmatprep.subr.mxu1 %v12228_v1 }
  0xad   : > { %10744 = vmatmul.mubr.msk.f32.gmra.mrb[78].mxu1 %vm346_vm2, %v1561_v26  ;;  %10776 = vmatmul.mubr.msk.f32.vlgmr.msra.gmra.mrb[78].mxu0 %vm346_vm2, %v1740_v27 }
  0xae   : > { %10844 = vmatpush3.msk.msra.mxu0 %vm380_vm0, %v9395_v28  ;;  %10746 = vmatprep.mubr.msk.f32.mxu1 %vm12229_vm1, %v12228_v1  ;;  %v1928_v28 = vld [vmem:[%s12670_s7 + $0x41] sm:$0xff] }
  0xaf   : > { %10778 = vmatprep.mubr.msk.f32.mxu0 %vm12229_vm1, %v12228_v1  ;;  %10913 = vmatprep.subr.mxu0 %v12228_v1 }
  0xb1   : > { %10747 = vmatmul.mubr.msk.f32.gmra.mrb[80].mxu1 %vm346_vm2, %v1562_v29  ;;  %10779 = vmatmul.mubr.msk.f32.gmra.mrb[80].mxu0 %vm346_vm2, %v1741_v30  ;;  %v2107_v29 = vld [vmem:[%s12690_s13 + $0x39] sm:$0xff] }
  0xb2   : > { %10749 = vmatprep.mubr.msk.f32.mxu1 %vm12229_vm1, %v12228_v1  ;;  %10781 = vmatprep.mubr.msk.f32.mxu0 %vm12229_vm1, %v12228_v1 }
  0xb5   : > { %10750 = vmatmul.mubr.msk.f32.gmra.mrb[82].mxu1 %vm346_vm2, %v1563_v31  ;;  %10782 = vmatmul.mubr.msk.f32.gmra.mrb[82].mxu0 %vm346_vm2, %v1742_v32 }
  0xb6   : > { %10752 = vmatprep.mubr.msk.f32.mxu1 %vm12229_vm1, %v12228_v1  ;;  %10784 = vmatprep.mubr.msk.f32.mxu0 %vm12229_vm1, %v12228_v1 }
  0xb9   : > { %10753 = vmatmul.mubr.msk.f32.gmra.mrb[84].mxu1 %vm346_vm2, %v1564_v33  ;;  %10785 = vmatmul.mubr.msk.f32.gmra.mrb[84].mxu0 %vm346_vm2, %v1743_v34  ;;  %v1929_v34 = vld [vmem:[%s12670_s7 + $0x49] sm:$0xff] }
  0xba   : > { %10755 = vmatprep.mubr.msk.f32.mxu1 %vm12229_vm1, %v12228_v1  ;;  %10787 = vmatprep.mubr.msk.f32.mxu0 %vm12229_vm1, %v12228_v1 }
  0xbd   : > { %10756 = vmatmul.mubr.msk.f32.gmra.mrb[86].mxu1 %vm346_vm2, %v1565_v35  ;;  %10788 = vmatmul.mubr.msk.f32.gmra.mrb[86].mxu0 %vm346_vm2, %v1744_v36  ;;  %v2108_v35 = vld [vmem:[%s12690_s13 + $0x41] sm:$0xff] }
  0xbe   : > { %10758 = vmatprep.mubr.msk.f32.mxu1 %vm12229_vm1, %v12228_v1  ;;  %10790 = vmatprep.mubr.msk.f32.mxu0 %vm12229_vm1, %v12228_v1 }
  0xc1   : > { %10759 = vmatmul.mubr.msk.f32.gmra.mrb[88].mxu1 %vm346_vm2, %v1566_v37  ;;  %10791 = vmatmul.mubr.msk.f32.gmra.mrb[88].mxu0 %vm346_vm2, %v1745_v38 }
  0xc2   : > { %10761 = vmatprep.mubr.msk.f32.mxu1 %vm12229_vm1, %v12228_v1  ;;  %10793 = vmatprep.mubr.msk.f32.mxu0 %vm12229_vm1, %v12228_v1 }
  0xc5   : > { %10762 = vmatmul.mubr.msk.f32.gmra.mrb[90].mxu1 %vm346_vm2, %v1567_v39  ;;  %10794 = vmatmul.mubr.msk.f32.gmra.mrb[90].mxu0 %vm346_vm2, %v1746_v40 }
  0xc6   : > { %10764 = vmatprep.mubr.msk.f32.mxu1 %vm12229_vm1, %v12228_v1  ;;  %10796 = vmatprep.mubr.msk.f32.mxu0 %vm12229_vm1, %v12228_v1 }
  0xc9   : > { %10765 = vmatmul.mubr.msk.f32.gmra.mrb[92].mxu1 %vm346_vm2, %v1568_v41  ;;  %10797 = vmatmul.mubr.msk.f32.gmra.mrb[92].mxu0 %vm346_vm2, %v1747_v42  ;;  %v1930_v41 = vld [vmem:[%s12670_s7 + $0x51] sm:$0xff]  ;;  %v2109_v42 = vld [vmem:[%s12690_s13 + $0x49] sm:$0xff] }
  0xca   : > { %10767 = vmatprep.mubr.msk.f32.mxu1 %vm12229_vm1, %v12228_v1  ;;  %10799 = vmatprep.mubr.msk.f32.mxu0 %vm12229_vm1, %v12228_v1 }
  0xcd   : > { %10768 = vmatmul.mubr.msk.f32.gmra.mrb[94].mxu1 %vm346_vm2, %v1569_v43  ;;  %10800 = vmatmul.mubr.msk.f32.gmra.mrb[94].mxu0 %vm346_vm2, %v1748_v44 }
  0xce   : > { %10770 = vmatprep.mubr.msk.f32.mxu1 %vm12229_vm1, %v12228_v1  ;;  %10802 = vmatprep.mubr.msk.f32.mxu0 %vm12229_vm1, %v12228_v1 }
  0xd1   : > { %10771 = vmatmul.mubr.msk.f32.gmra.mrb[96].mxu1 %vm346_vm2, %v1570_v45  ;;  %10803 = vmatmul.mubr.msk.f32.gmra.mrb[96].mxu0 %vm346_vm2, %v1749_v46 }
  0xd2   : > { %10805 = vmatprep.mubr.msk.f32.mxu0 %vm12229_vm1, %v12228_v1  ;;  %10810 = vmatprep.mubr.msk.f32.mxu1 %vm12229_vm1, %v12228_v1 }
  0xd5   : > { %10806 = vmatmul.mubr.msk.f32.gmra.mrb[98].mxu0 %vm346_vm2, %v1750_v47  ;;  %10811 = vmatmul.mubr.msk.f32.vlgmr.msra.gmra.mrb[98].mxu1 %vm346_vm2, %v1920_v48 }
  0xd6   : > { %10879 = vmatpush3.msk.msra.mxu1 %vm380_vm0, %v9408_v49  ;;  %10813 = vmatprep.mubr.msk.f32.mxu1 %vm12229_vm1, %v12228_v1  ;;  %v2110_v49 = vld [vmem:[%s12690_s13 + $0x51] sm:$0xff] }
  0xd7   : > { %10845 = vmatprep.mubr.msk.f32.mxu0 %vm12229_vm1, %v12228_v1  ;;  %10948 = vmatprep.subr.mxu1 %v12228_v1 }
  0xd9   : > { %10814 = vmatmul.mubr.msk.f32.gmra.mrb[100].mxu1 %vm346_vm2, %v1921_v50  ;;  %10846 = vmatmul.mubr.msk.f32.vlgmr.msra.gmra.mrb[100].mxu0 %vm346_vm2, %v2100_v51  ;;  %v2280_v50 = vld [vmem:[%s12670_s7 + $0x2] sm:$0xff]  ;;  %v9434_v51 = vld [vmem:[%s15456_s4 + $0x34] sm:$0x7] }
  0xda   : > { %10914 = vmatpush3.msk.msra.mxu0 %vm380_vm0, %v9421_v52  ;;  %10816 = vmatprep.mubr.msk.f32.mxu1 %vm12229_vm1, %v12228_v1 }
  0xdb   : > { %10848 = vmatprep.mubr.msk.f32.mxu0 %vm12229_vm1, %v12228_v1  ;;  %10983 = vmatprep.subr.mxu0 %v12228_v1 }
  0xdd   : > { %10817 = vmatmul.mubr.msk.f32.gmra.mrb[102].mxu1 %vm346_vm2, %v1922_v53  ;;  %10849 = vmatmul.mubr.msk.f32.gmra.mrb[102].mxu0 %vm346_vm2, %v2101_v54 }
  0xde   : > { %10819 = vmatprep.mubr.msk.f32.mxu1 %vm12229_vm1, %v12228_v1  ;;  %10851 = vmatprep.mubr.msk.f32.mxu0 %vm12229_vm1, %v12228_v1 }
  0xe1   : > { %10820 = vmatmul.mubr.msk.f32.gmra.mrb[104].mxu1 %vm346_vm2, %v1923_v55  ;;  %10852 = vmatmul.mubr.msk.f32.gmra.mrb[104].mxu0 %vm346_vm2, %v2102_v56 }
  0xe2   : > { %10822 = vmatprep.mubr.msk.f32.mxu1 %vm12229_vm1, %v12228_v1  ;;  %10854 = vmatprep.mubr.msk.f32.mxu0 %vm12229_vm1, %v12228_v1 }
  0xe4   : > { %v450_v59 = vpop.f32.mrb[0].mxu0  ;;  %v12830_v60 = vpop.f32.mrb[0].mxu1 }
  0xe5   : > { %v10497_v61 = vpop.f32.mrb[1].mxu0  ;;  %10823 = vmatmul.mubr.msk.f32.gmra.mrb[106].mxu1 %vm346_vm2, %v1924_v57  ;;  %10855 = vmatmul.mubr.msk.f32.gmra.mrb[106].mxu0 %vm346_vm2, %v2103_v58  ;;  %v10515_v62 = vpop.f32.mrb[1].mxu1  ;;  %v2281_v58 = vld [vmem:[%s12670_s7 + $0xa] sm:$0xff] }
  0xe6   : > { %10825 = vmatprep.mubr.msk.f32.mxu1 %vm12229_vm1, %v12228_v1  ;;  %10857 = vmatprep.mubr.msk.f32.mxu0 %vm12229_vm1, %v12228_v1  ;;  %v9447_v61 = vld [vmem:[%s15456_s4 + $0x38] sm:$0x7] }
  0xe8   : > { %v455_v2 = vpop.f32.mrb[2].mxu0  ;;  %v12840_v3 = vpop.f32.mrb[2].mxu1 }
  0xe9   : > { %v10500_v4 = vpop.f32.mrb[3].mxu0  ;;  %10826 = vmatmul.mubr.msk.f32.gmra.mrb[108].mxu1 %vm346_vm2, %v1925_v63  ;;  %10858 = vmatmul.mubr.msk.f32.gmra.mrb[108].mxu0 %vm346_vm2, %v2104_v0  ;;  %v10518_v5 = vpop.f32.mrb[3].mxu1 }
  0xea   : > { %10828 = vmatprep.mubr.msk.f32.mxu1 %vm12229_vm1, %v12228_v1  ;;  %10860 = vmatprep.mubr.msk.f32.mxu0 %vm12229_vm1, %v12228_v1 }
  0xec   : > { %v460_v11 = vpop.f32.mrb[4].mxu0  ;;  %v12850_v13 = vpop.f32.mrb[4].mxu1 }
  0xed   : > { %v10503_v15 = vpop.f32.mrb[5].mxu0  ;;  %10829 = vmatmul.mubr.msk.f32.gmra.mrb[110].mxu1 %vm346_vm2, %v1926_v7  ;;  %10861 = vmatmul.mubr.msk.f32.gmra.mrb[110].mxu0 %vm346_vm2, %v2105_v9  ;;  %v10521_v17 = vpop.f32.mrb[5].mxu1  ;;  %v2282_v7 = vld [vmem:[%s12670_s7 + $0x12] sm:$0xff]  ;;  %v2461_v9 = vld [vmem:[%s12690_s13 + $0xa] sm:$0xff] }
  0xee   : > { %10831 = vmatprep.mubr.msk.f32.mxu1 %vm12229_vm1, %v12228_v1  ;;  %10863 = vmatprep.mubr.msk.f32.mxu0 %vm12229_vm1, %v12228_v1 }
  0xf0   : > { %v465_v24 = vpop.f32.mrb[6].mxu0  ;;  %v12860_v25 = vpop.f32.mrb[6].mxu1 }
  0xf1   : > { %v10506_v26 = vpop.f32.mrb[7].mxu0  ;;  %10832 = vmatmul.mubr.msk.f32.gmra.mrb[112].mxu1 %vm346_vm2, %v1927_v19  ;;  %10864 = vmatmul.mubr.msk.f32.gmra.mrb[112].mxu0 %vm346_vm2, %v2106_v21  ;;  %v10524_v27 = vpop.f32.mrb[7].mxu1 }
  0xf2   : > { %10834 = vmatprep.mubr.msk.f32.mxu1 %vm12229_vm1, %v12228_v1  ;;  %10866 = vmatprep.mubr.msk.f32.mxu0 %vm12229_vm1, %v12228_v1  ;;  %v2283_v26 = vld [vmem:[%s12670_s7 + $0x1a] sm:$0xff]  ;;  %v2462_v27 = vld [vmem:[%s12690_s13 + $0x12] sm:$0xff] }
  0xf4   : > { %v12870_v30 = vpop.f32.mrb[8].mxu0  ;;  %v12872_v31 = vpop.f32.mrb[8].mxu1 }
  0xf5   : > { %v10509_v32 = vpop.f32.mrb[9].mxu0  ;;  %10835 = vmatmul.mubr.msk.f32.gmra.mrb[114].mxu1 %vm346_vm2, %v1928_v28  ;;  %10867 = vmatmul.mubr.msk.f32.gmra.mrb[114].mxu0 %vm346_vm2, %v2107_v29  ;;  %v10527_v33 = vpop.f32.mrb[9].mxu1 }
  0xf6   : > { %10837 = vmatprep.mubr.msk.f32.mxu1 %vm12229_vm1, %v12228_v1  ;;  %10869 = vmatprep.mubr.msk.f32.mxu0 %vm12229_vm1, %v12228_v1 }
  0xf8   : > { %v12882_v36 = vpop.f32.mrb[10].mxu0  ;;  %v606_v37 = vpop.f32.mrb[10].mxu1 }
  0xf9   : > { %v607_v38 = vadd.f32 %v606_v37, %v450_v59  ;;  %v10512_v39 = vpop.f32.mrb[11].mxu0  ;;  %10838 = vmatmul.mubr.msk.f32.gmra.mrb[116].mxu1 %vm346_vm2, %v1929_v34  ;;  %10870 = vmatmul.mubr.msk.f32.gmra.mrb[116].mxu0 %vm346_vm2, %v2108_v35  ;;  %v10532_v40 = vpop.f32.mrb[11].mxu1  ;;  %v2460_v59 = vld [vmem:[%s12690_s13 + $0x2] sm:$0xff]  ;;  %v2463_v37 = vld [vmem:[%s12690_s13 + $0x1a] sm:$0xff] }
  0xfa   : > { %10840 = vmatprep.mubr.msk.f32.mxu1 %vm12229_vm1, %v12228_v1  ;;  %10872 = vmatprep.mubr.msk.f32.mxu0 %vm12229_vm1, %v12228_v1  ;;  %v2284_v35 = vld [vmem:[%s12670_s7 + $0x22] sm:$0xff] }
  0xfc   : > { %v611_v43 = vpop.f32.mrb[12].mxu1  ;;  %v775_v44 = vpop.f32.mrb[12].mxu0 }
  0xfd   : > { %v612_v45 = vadd.f32 %v611_v43, %v455_v2  ;;  %v12892_v46 = vadd.f32 %v775_v44, %v607_v38  ;;  %v10567_v47 = vpop.f32.mrb[13].mxu0  ;;  %10841 = vmatmul.mubr.msk.f32.gmra.mrb[118].mxu1 %vm346_vm2, %v1930_v41  ;;  %10873 = vmatmul.mubr.msk.f32.gmra.mrb[118].mxu0 %vm346_vm2, %v2109_v42  ;;  %v10535_v48 = vpop.f32.mrb[13].mxu1  ;;  %v2285_v43 = vld [vmem:[%s12670_s7 + $0x2a] sm:$0xff]  ;;  %v2464_v44 = vld [vmem:[%s12690_s13 + $0x22] sm:$0xff] }
  0xfe   : > { %10875 = vmatprep.mubr.msk.f32.mxu0 %vm12229_vm1, %v12228_v1  ;;  %10880 = vmatprep.mubr.msk.f32.mxu1 %vm12229_vm1, %v12228_v1 }
 0x100   : > { %v616_v52 = vpop.f32.mrb[14].mxu1  ;;  %v780_v53 = vpop.f32.mrb[14].mxu0 }
 0x101   : > { %v617_v54 = vadd.f32 %v616_v52, %v460_v11  ;;  %v12905_v55 = vadd.f32 %v780_v53, %v612_v45  ;;  %v10570_v56 = vpop.f32.mrb[15].mxu0  ;;  %10876 = vmatmul.mubr.msk.f32.gmra.mrb[120].mxu0 %vm346_vm2, %v2110_v49  ;;  %10881 = vmatmul.mubr.msk.f32.vlgmr.msra.gmra.mrb[120].mxu1 %vm346_vm2, %v2280_v50  ;;  %v10538_v57 = vpop.f32.mrb[15].mxu1  ;;  %v2465_v52 = vld [vmem:[%s12690_s13 + $0x2a] sm:$0xff] }
 0x102   : > { %10949 = vmatpush3.msk.msra.mxu1 %vm380_vm0, %v9434_v51  ;;  %10883 = vmatprep.mubr.msk.f32.mxu1 %vm12229_vm1, %v12228_v1  ;;  %v2286_v51 = vld [vmem:[%s12670_s7 + $0x32] sm:$0xff] }
 0x103   : > { %10915 = vmatprep.mubr.msk.f32.mxu0 %vm12229_vm1, %v12228_v1  ;;  %11018 = vmatprep.subr.mxu1 %v12228_v1 }
 0x104   : > { %v621_v62 = vpop.f32.mrb[16].mxu1  ;;  %v785_v63 = vpop.f32.mrb[16].mxu0 }
 0x105   : > { %v622_v0 = vadd.f32 %v621_v62, %v465_v24  ;;  %v12920_v2 = vadd.f32 %v785_v63, %v617_v54  ;;  %v10573_v4 = vpop.f32.mrb[17].mxu0  ;;  %10884 = vmatmul.mubr.msk.f32.gmra.mrb[122].mxu1 %vm346_vm2, %v2281_v58  ;;  %10916 = vmatmul.mubr.msk.f32.vlgmr.msra.gmra.mrb[122].mxu0 %vm346_vm2, %v2460_v59  ;;  %v10541_v5 = vpop.f32.mrb[17].mxu1  ;;  %v2287_v59 = vld [vmem:[%s12670_s7 + $0x3a] sm:$0xff] }
 0x106   : > { %10984 = vmatpush3.msk.msra.mxu0 %vm380_vm0, %v9447_v61  ;;  %10886 = vmatprep.mubr.msk.f32.mxu1 %vm12229_vm1, %v12228_v1  ;;  %v2466_v61 = vld [vmem:[%s12690_s13 + $0x32] sm:$0xff] }
 0x107   : > { %10918 = vmatprep.mubr.msk.f32.mxu0 %vm12229_vm1, %v12228_v1  ;;  %11053 = vmatprep.subr.mxu0 %v12228_v1 }
 0x108   : > { %v626_v11 = vpop.f32.mrb[18].mxu1  ;;  %v790_v15 = vpop.f32.mrb[18].mxu0 }
 0x109   : > { %v627_v17 = vadd.f32 %v626_v11, %v12870_v30  ;;  %v12933_v19 = vadd.f32 %v790_v15, %v622_v0  ;;  %v10576_v21 = vpop.f32.mrb[19].mxu0  ;;  %10887 = vmatmul.mubr.msk.f32.gmra.mrb[124].mxu1 %vm346_vm2, %v2282_v7  ;;  %10919 = vmatmul.mubr.msk.f32.gmra.mrb[124].mxu0 %vm346_vm2, %v2461_v9  ;;  %v10544_v24 = vpop.f32.mrb[19].mxu1  ;;  %v2288_v7 = vld [vmem:[%s12670_s7 + $0x42] sm:$0xff]  ;;  %v2467_v9 = vld [vmem:[%s12690_s13 + $0x3a] sm:$0xff] }
 0x10a   : > { %10889 = vmatprep.mubr.msk.f32.mxu1 %vm12229_vm1, %v12228_v1  ;;  %10921 = vmatprep.mubr.msk.f32.mxu0 %vm12229_vm1, %v12228_v1 }
 0x10c   : > { %v631_v28 = vpop.f32.mrb[20].mxu1  ;;  %v795_v29 = vpop.f32.mrb[20].mxu0 }
 0x10d   : > { %v632_v30 = vadd.f32 %v631_v28, %v12882_v36  ;;  %v12944_v32 = vadd.f32 %v795_v29, %v627_v17  ;;  %v10579_v33 = vpop.f32.mrb[21].mxu0  ;;  %10890 = vmatmul.mubr.msk.f32.gmra.mrb[126].mxu1 %vm346_vm2, %v2283_v26  ;;  %10922 = vmatmul.mubr.msk.f32.gmra.mrb[126].mxu0 %vm346_vm2, %v2462_v27  ;;  %v10547_v34 = vpop.f32.mrb[21].mxu1  ;;  %v2289_v26 = vld [vmem:[%s12670_s7 + $0x4a] sm:$0xff]  ;;  %v2468_v27 = vld [vmem:[%s12690_s13 + $0x42] sm:$0xff] }
 0x10e   : > { %10892 = vmatprep.mubr.msk.f32.mxu1 %vm12229_vm1, %v12228_v1  ;;  %10924 = vmatprep.mubr.msk.f32.mxu0 %vm12229_vm1, %v12228_v1 }
 0x110   : > { %v636_v38 = vpop.f32.mrb[22].mxu1  ;;  %v800_v36 = vpop.f32.mrb[22].mxu0 }
 0x111   : > { %v637_v39 = vadd.f32 %v636_v38, %v12830_v60  ;;  %v12955_v40 = vadd.f32 %v800_v36, %v632_v30  ;;  %v10582_v41 = vpop.f32.mrb[23].mxu0  ;;  %10893 = vmatmul.mubr.msk.f32.gmra.mrb[128].mxu1 %vm346_vm2, %v2284_v35  ;;  %10925 = vmatmul.mubr.msk.f32.gmra.mrb[128].mxu0 %vm346_vm2, %v2463_v37  ;;  %v10550_v42 = vpop.f32.mrb[23].mxu1  ;;  %v2290_v35 = vld [vmem:[%s12670_s7 + $0x52] sm:$0xff]  ;;  %v2469_v37 = vld [vmem:[%s12690_s13 + $0x4a] sm:$0xff] }
 0x112   : > { %10895 = vmatprep.mubr.msk.f32.mxu1 %vm12229_vm1, %v12228_v1  ;;  %10927 = vmatprep.mubr.msk.f32.mxu0 %vm12229_vm1, %v12228_v1 }
 0x114   : > { %v641_v45 = vpop.f32.mrb[24].mxu1  ;;  %v805_v60 = vpop.f32.mrb[24].mxu0 }
 0x115   : > { %v642_v47 = vadd.f32 %v641_v45, %v12840_v3  ;;  %v12966_v48 = vadd.f32 %v805_v60, %v637_v39  ;;  %v10585_v49 = vpop.f32.mrb[25].mxu0  ;;  %10896 = vmatmul.mubr.msk.f32.gmra.mrb[130].mxu1 %vm346_vm2, %v2285_v43  ;;  %10928 = vmatmul.mubr.msk.f32.gmra.mrb[130].mxu0 %vm346_vm2, %v2464_v44  ;;  %v10553_v50 = vpop.f32.mrb[25].mxu1  ;;  %v2470_v43 = vld [vmem:[%s12690_s13 + $0x52] sm:$0xff]  ;;  %v2640_v44 = vld [vmem:[%s12670_s7 + $0x3] sm:$0xff] }
 0x116   : > { %10898 = vmatprep.mubr.msk.f32.mxu1 %vm12229_vm1, %v12228_v1  ;;  %10930 = vmatprep.mubr.msk.f32.mxu0 %vm12229_vm1, %v12228_v1 }
 0x118   : > { %v646_v53 = vpop.f32.mrb[26].mxu1  ;;  %v810_v3 = vpop.f32.mrb[26].mxu0 }
 0x119   : > { %v647_v54 = vadd.f32 %v646_v53, %v12850_v13  ;;  %v12977_v56 = vadd.f32 %v810_v3, %v642_v47  ;;  %v10588_v57 = vpop.f32.mrb[27].mxu0  ;;  %10899 = vmatmul.mubr.msk.f32.gmra.mrb[132].mxu1 %vm346_vm2, %v2286_v51  ;;  %10931 = vmatmul.mubr.msk.f32.gmra.mrb[132].mxu0 %vm346_vm2, %v2465_v52  ;;  %v10556_v58 = vpop.f32.mrb[27].mxu1  ;;  %v2641_v52 = vld [vmem:[%s12670_s7 + $0xb] sm:$0xff] }
 0x11a   : > { %10901 = vmatprep.mubr.msk.f32.mxu1 %vm12229_vm1, %v12228_v1  ;;  %10933 = vmatprep.mubr.msk.f32.mxu0 %vm12229_vm1, %v12228_v1 }
 0x11c   : > { %v651_v62 = vpop.f32.mrb[28].mxu1  ;;  %v815_v13 = vpop.f32.mrb[28].mxu0 }
 0x11d   : > { %v652_v63 = vadd.f32 %v651_v62, %v12860_v25  ;;  %v12988_v0 = vadd.f32 %v815_v13, %v647_v54  ;;  %v10591_v4 = vpop.f32.mrb[29].mxu0  ;;  %10902 = vmatmul.mubr.msk.f32.gmra.mrb[134].mxu1 %vm346_vm2, %v2287_v59  ;;  %10934 = vmatmul.mubr.msk.f32.gmra.mrb[134].mxu0 %vm346_vm2, %v2466_v61  ;;  %v10559_v5 = vpop.f32.mrb[29].mxu1  ;;  %v2642_v61 = vld [vmem:[%s12670_s7 + $0x13] sm:$0xff] }
 0x11e   : > { %10904 = vmatprep.mubr.msk.f32.mxu1 %vm12229_vm1, %v12228_v1  ;;  %10936 = vmatprep.mubr.msk.f32.mxu0 %vm12229_vm1, %v12228_v1  ;;  %v2643_v5 = vld [vmem:[%s12670_s7 + $0x1b] sm:$0xff] }
 0x120   : > { %v656_v11 = vpop.f32.mrb[30].mxu1  ;;  %v820_v25 = vpop.f32.mrb[30].mxu0 }
 0x121   : > { %v657_v15 = vadd.f32 %v656_v11, %v12872_v31  ;;  %v12999_v17 = vadd.f32 %v820_v25, %v652_v63  ;;  %v10594_v21 = vpop.f32.mrb[31].mxu0  ;;  %10905 = vmatmul.mubr.msk.f32.gmra.mrb[136].mxu1 %vm346_vm2, %v2288_v7  ;;  %10937 = vmatmul.mubr.msk.f32.gmra.mrb[136].mxu0 %vm346_vm2, %v2467_v9  ;;  %v10562_v24 = vpop.f32.mrb[31].mxu1 }
 0x122   : > { %10907 = vmatprep.mubr.msk.f32.mxu1 %vm12229_vm1, %v12228_v1  ;;  %10939 = vmatprep.mubr.msk.f32.mxu0 %vm12229_vm1, %v12228_v1 }
 0x124   : > { %v825_v28 = vpop.f32.mrb[32].mxu0  ;;  %v955_v31 = vpop.f32.mrb[32].mxu1 }
 0x125   : > { %v13009_v29 = vadd.f32 %v825_v28, %v657_v15  ;;  %v1009_v30 = vadd.f32 %v955_v31, %v12892_v46  ;;  %v10597_v33 = vpop.f32.mrb[33].mxu0  ;;  %10908 = vmatmul.mubr.msk.f32.gmra.mrb[138].mxu1 %vm346_vm2, %v2289_v26  ;;  %10940 = vmatmul.mubr.msk.f32.gmra.mrb[138].mxu0 %vm346_vm2, %v2468_v27  ;;  %v10602_v34 = vpop.f32.mrb[33].mxu1  ;;  %v2644_v15 = vld [vmem:[%s12670_s7 + $0x23] sm:$0xff]  ;;  %v2645_v28 = vld [vmem:[%s12670_s7 + $0x2b] sm:$0xff] }
 0x126   : > { %10910 = vmatprep.mubr.msk.f32.mxu1 %vm12229_vm1, %v12228_v1  ;;  %10942 = vmatprep.mubr.msk.f32.mxu0 %vm12229_vm1, %v12228_v1 }
 0x128   : > { %v960_v38 = vpop.f32.mrb[34].mxu1  ;;  %v1135_v36 = vpop.f32.mrb[34].mxu0 }
 0x129   : > { %v1010_v46 = vadd.f32 %v960_v38, %v12905_v55  ;;  %v13021_v39 = vadd.f32 %v1135_v36, %v1009_v30  ;;  %v10637_v41 = vpop.f32.mrb[35].mxu0  ;;  %10911 = vmatmul.mubr.msk.f32.gmra.mrb[140].mxu1 %vm346_vm2, %v2290_v35  ;;  %10943 = vmatmul.mubr.msk.f32.gmra.mrb[140].mxu0 %vm346_vm2, %v2469_v37  ;;  %v10605_v42 = vpop.f32.mrb[35].mxu1  ;;  %v9460_v55 = vld [vmem:[%s15456_s4 + $0x3c] sm:$0x7]  ;;  %v2646_v35 = vld [vmem:[%s12670_s7 + $0x33] sm:$0xff] }
 0x12a   : > { %10945 = vmatprep.mubr.msk.f32.mxu0 %vm12229_vm1, %v12228_v1  ;;  %10950 = vmatprep.mubr.msk.f32.mxu1 %vm12229_vm1, %v12228_v1  ;;  %v2647_v41 = vld [vmem:[%s12670_s7 + $0x3b] sm:$0xff] }
 0x12c   : > { %v965_v45 = vpop.f32.mrb[36].mxu1  ;;  %v1140_v60 = vpop.f32.mrb[36].mxu0 }
 0x12d   : > { %v1011_v47 = vadd.f32 %v965_v45, %v12920_v2  ;;  %v13035_v49 = vadd.f32 %v1140_v60, %v1010_v46  ;;  %v10640_v50 = vpop.f32.mrb[37].mxu0  ;;  %10946 = vmatmul.mubr.msk.f32.gmra.mrb[142].mxu0 %vm346_vm2, %v2470_v43  ;;  %10951 = vmatmul.mubr.msk.f32.vlgmr.msra.gmra.mrb[142].mxu1 %vm346_vm2, %v2640_v44  ;;  %v10608_v51 = vpop.f32.mrb[37].mxu1  ;;  %v9473_v2 = vld [vmem:[%s15456_s4 + $0x40] sm:$0x7]  ;;  %v2648_v45 = vld [vmem:[%s12670_s7 + $0x43] sm:$0xff] }
 0x12e   : > { %11019 = vmatpush3.msk.msra.mxu1 %vm380_vm0, %v9460_v55  ;;  %10953 = vmatprep.mubr.msk.f32.mxu1 %vm12229_vm1, %v12228_v1 }
 0x12f   : > { %10985 = vmatprep.mubr.msk.f32.mxu0 %vm12229_vm1, %v12228_v1  ;;  %11088 = vmatprep.subr.mxu1 %v12228_v1 }
 0x130   : > { %v970_v53 = vpop.f32.mrb[38].mxu1  ;;  %v1145_v3 = vpop.f32.mrb[38].mxu0 }
 0x131   : > { %v1012_v54 = vadd.f32 %v970_v53, %v12933_v19  ;;  %v13050_v57 = vadd.f32 %v1145_v3, %v1011_v47  ;;  %v10643_v58 = vpop.f32.mrb[39].mxu0  ;;  %10954 = vmatmul.mubr.msk.f32.gmra.mrb[144].mxu1 %vm346_vm2, %v2641_v52  ;;  %10986 = vmatmul.mubr.msk.f32.vlgmr.msra.gmra.mrb[144].mxu0 %vm346_vm2, %v12573_v6  ;;  %v10611_v59 = vpop.f32.mrb[39].mxu1  ;;  %v2649_v52 = vld [vmem:[%s12670_s7 + $0x4b] sm:$0xff] }
 0x132   : > { %11054 = vmatpush3.msk.msra.mxu0 %vm380_vm0, %v9473_v2  ;;  %10956 = vmatprep.mubr.msk.f32.mxu1 %vm12229_vm1, %v12228_v1  ;;  %v2650_v58 = vld [vmem:[%s12670_s7 + $0x53] sm:$0xff] }
 0x133   : > { %10988 = vmatprep.mubr.msk.f32.mxu0 %vm12229_vm1, %v12228_v1  ;;  %11123 = vmatprep.subr.mxu0 %v12228_v1 }
 0x134   : > { %v975_v19 = vpop.f32.mrb[40].mxu1  ;;  %v1150_v62 = vpop.f32.mrb[40].mxu0 }
 0x135   : > { %v1013_v13 = vadd.f32 %v975_v19, %v12944_v32  ;;  %v13063_v63 = vadd.f32 %v1150_v62, %v1012_v54  ;;  %v10646_v6 = vpop.f32.mrb[41].mxu0  ;;  %10957 = vmatmul.mubr.msk.f32.gmra.mrb[146].mxu1 %vm346_vm2, %v2642_v61  ;;  %10989 = vmatmul.mubr.msk.f32.gmra.mrb[146].mxu0 %vm346_vm2, %v12587_v8  ;;  %v10614_v4 = vpop.f32.mrb[41].mxu1 }
 0x136   : > { %10959 = vmatprep.mubr.msk.f32.mxu1 %vm12229_vm1, %v12228_v1  ;;  %10991 = vmatprep.mubr.msk.f32.mxu0 %vm12229_vm1, %v12228_v1  ;;  %v3000_v6 = vld [vmem:[%s12294_s29 + $0xb] sm:$0xff] }
 0x138   : > { %v980_v7 = vpop.f32.mrb[42].mxu1  ;;  %v1155_v9 = vpop.f32.mrb[42].mxu0 }
 0x139   : > { %v1014_v32 = vadd.f32 %v980_v7, %v12955_v40  ;;  %v13074_v11 = vadd.f32 %v1155_v9, %v1013_v13  ;;  %v10649_v25 = vpop.f32.mrb[43].mxu0  ;;  %10960 = vmatmul.mubr.msk.f32.gmra.mrb[148].mxu1 %vm346_vm2, %v2643_v5  ;;  %10992 = vmatmul.mubr.msk.f32.gmra.mrb[148].mxu0 %vm346_vm2, %v12598_v10  ;;  %v10617_v8 = vpop.f32.mrb[43].mxu1  ;;  %v2830_v13 = vld [vmem:[%s12344_s12 + $0x5b] sm:$0xff] }
 0x13a   : > { %10962 = vmatprep.mubr.msk.f32.mxu1 %vm12229_vm1, %v12228_v1  ;;  %10994 = vmatprep.mubr.msk.f32.mxu0 %vm12229_vm1, %v12228_v1  ;;  %v3001_v25 = vld [vmem:[%s12294_s29 + $0x13] sm:$0xff] }
 0x13b   : > { %v3180_v8 = vld [vmem:[%s12344_s12 + $0xc] sm:$0xff] }
 0x13c   : > { %v985_v21 = vpop.f32.mrb[44].mxu1  ;;  %v1160_v24 = vpop.f32.mrb[44].mxu0 }
 0x13d   : > { %v1015_v40 = vadd.f32 %v985_v21, %v12966_v48  ;;  %v13085_v26 = vadd.f32 %v1160_v24, %v1014_v32  ;;  %v10652_v27 = vpop.f32.mrb[45].mxu0  ;;  %10963 = vmatmul.mubr.msk.f32.gmra.mrb[150].mxu1 %vm346_vm2, %v2644_v15  ;;  %10995 = vmatmul.mubr.msk.f32.gmra.mrb[150].mxu0 %vm346_vm2, %v12609_v12  ;;  %v10620_v10 = vpop.f32.mrb[45].mxu1 }
 0x13e   : > { %10965 = vmatprep.mubr.msk.f32.mxu1 %vm12229_vm1, %v12228_v1  ;;  %10997 = vmatprep.mubr.msk.f32.mxu0 %vm12229_vm1, %v12228_v1 }
 0x140   : > { %v990_v31 = vpop.f32.mrb[46].mxu1  ;;  %v1165_v30 = vpop.f32.mrb[46].mxu0 }
 0x141   : > { %v1016_v48 = vadd.f32 %v990_v31, %v12977_v56  ;;  %v13096_v33 = vadd.f32 %v1165_v30, %v1015_v40  ;;  %v10655_v34 = vpop.f32.mrb[47].mxu0  ;;  %10966 = vmatmul.mubr.msk.f32.gmra.mrb[152].mxu1 %vm346_vm2, %v2645_v28  ;;  %10998 = vmatmul.mubr.msk.f32.gmra.mrb[152].mxu0 %vm346_vm2, %v12620_v14  ;;  %v10623_v12 = vpop.f32.mrb[47].mxu1  ;;  %v3002_v28 = vld [vmem:[%s12294_s29 + $0x1b] sm:$0xff] }
 0x142   : > { %10968 = vmatprep.mubr.msk.f32.mxu1 %vm12229_vm1, %v12228_v1  ;;  %11000 = vmatprep.mubr.msk.f32.mxu0 %vm12229_vm1, %v12228_v1  ;;  %v3181_v31 = vld [vmem:[%s12344_s12 + $0x14] sm:$0xff] }
 0x144   : > { %v995_v37 = vpop.f32.mrb[48].mxu1  ;;  %v1170_v38 = vpop.f32.mrb[48].mxu0 }
 0x145   : > { %v1017_v56 = vadd.f32 %v995_v37, %v12988_v0  ;;  %v13107_v36 = vadd.f32 %v1170_v38, %v1016_v48  ;;  %v10658_v46 = vpop.f32.mrb[49].mxu0  ;;  %10969 = vmatmul.mubr.msk.f32.gmra.mrb[154].mxu1 %vm346_vm2, %v2646_v35  ;;  %11001 = vmatmul.mubr.msk.f32.gmra.mrb[154].mxu0 %vm346_vm2, %v12631_v16  ;;  %v10626_v14 = vpop.f32.mrb[49].mxu1  ;;  %v3003_v37 = vld [vmem:[%s12294_s29 + $0x23] sm:$0xff] }
 0x146   : > { %10971 = vmatprep.mubr.msk.f32.mxu1 %vm12229_vm1, %v12228_v1  ;;  %11003 = vmatprep.mubr.msk.f32.mxu0 %vm12229_vm1, %v12228_v1  ;;  %v3182_v38 = vld [vmem:[%s12344_s12 + $0x1c] sm:$0xff] }
 0x148   : > { %v1000_v42 = vpop.f32.mrb[50].mxu1  ;;  %v1175_v43 = vpop.f32.mrb[50].mxu0 }
 0x149   : > { %v1018_v0 = vadd.f32 %v1000_v42, %v12999_v17  ;;  %v13118_v44 = vadd.f32 %v1175_v43, %v1017_v56  ;;  %v10661_v55 = vpop.f32.mrb[51].mxu0  ;;  %10972 = vmatmul.mubr.msk.f32.gmra.mrb[156].mxu1 %vm346_vm2, %v2647_v41  ;;  %11004 = vmatmul.mubr.msk.f32.gmra.mrb[156].mxu0 %vm346_vm2, %v12642_v18  ;;  %v10629_v16 = vpop.f32.mrb[51].mxu1  ;;  %v3004_v43 = vld [vmem:[%s12294_s29 + $0x2b] sm:$0xff] }
 0x14a   : > { %10974 = vmatprep.mubr.msk.f32.mxu1 %vm12229_vm1, %v12228_v1  ;;  %11006 = vmatprep.mubr.msk.f32.mxu0 %vm12229_vm1, %v12228_v1 }
 0x14c   : > { %v1005_v60 = vpop.f32.mrb[52].mxu1  ;;  %v1180_v47 = vpop.f32.mrb[52].mxu0 }
 0x14d   : > { %v1019_v17 = vadd.f32 %v1005_v60, %v13009_v29  ;;  %v13129_v50 = vadd.f32 %v1180_v47, %v1018_v0  ;;  %v10664_v51 = vpop.f32.mrb[53].mxu0  ;;  %10975 = vmatmul.mubr.msk.f32.gmra.mrb[158].mxu1 %vm346_vm2, %v2648_v45  ;;  %11007 = vmatmul.mubr.msk.f32.gmra.mrb[158].mxu0 %vm346_vm2, %v12653_v20  ;;  %v10632_v18 = vpop.f32.mrb[53].mxu1  ;;  %v3183_v0 = vld [vmem:[%s12344_s12 + $0x24] sm:$0xff] }
 0x14e   : > { %10977 = vmatprep.mubr.msk.f32.mxu1 %vm12229_vm1, %v12228_v1  ;;  %11009 = vmatprep.mubr.msk.f32.mxu0 %vm12229_vm1, %v12228_v1  ;;  %v3184_v51 = vld [vmem:[%s12344_s12 + $0x2c] sm:$0xff] }
 0x150   : > { %v1185_v2 = vpop.f32.mrb[54].mxu0  ;;  %v1315_v53 = vpop.f32.mrb[54].mxu1 }
 0x151   : > { %v13139_v29 = vadd.f32 %v1185_v2, %v1019_v17  ;;  %v1369_v3 = vadd.f32 %v1315_v53, %v13021_v39  ;;  %v10667_v54 = vpop.f32.mrb[55].mxu0  ;;  %10978 = vmatmul.mubr.msk.f32.gmra.mrb[160].mxu1 %vm346_vm2, %v2649_v52  ;;  %11010 = vmatmul.mubr.msk.f32.gmra.mrb[160].mxu0 %vm346_vm2, %v12664_v22  ;;  %v10672_v20 = vpop.f32.mrb[55].mxu1  ;;  %v3005_v17 = vld [vmem:[%s12294_s29 + $0x33] sm:$0xff] }
 0x152   : > { %10980 = vmatprep.mubr.msk.f32.mxu1 %vm12229_vm1, %v12228_v1  ;;  %11012 = vmatprep.mubr.msk.f32.mxu0 %vm12229_vm1, %v12228_v1  ;;  %v3006_v54 = vld [vmem:[%s12294_s29 + $0x3b] sm:$0xff] }
 0x153   : > { %v3185_v20 = vld [vmem:[%s12344_s12 + $0x34] sm:$0xff] }
 0x154   : > { %v1320_v59 = vpop.f32.mrb[56].mxu1  ;;  %v1495_v61 = vpop.f32.mrb[56].mxu0 }
 0x155   : > { %v1370_v39 = vadd.f32 %v1320_v59, %v13035_v49  ;;  %v13151_v19 = vadd.f32 %v1495_v61, %v1369_v3  ;;  %v10707_v62 = vpop.f32.mrb[57].mxu0  ;;  %10981 = vmatmul.mubr.msk.f32.gmra.mrb[162].mxu1 %vm346_vm2, %v2650_v58  ;;  %11013 = vmatmul.mubr.msk.f32.gmra.mrb[162].mxu0 %vm346_vm2, %v12680_v23  ;;  %v10675_v22 = vpop.f32.mrb[57].mxu1  ;;  %v9486_v49 = vld [vmem:[%s15456_s4 + $0x44] sm:$0x7] }
 0x156   : > { %11015 = vmatprep.mubr.msk.f32.mxu0 %vm12229_vm1, %v12228_v1  ;;  %11020 = vmatprep.mubr.msk.f32.mxu1 %vm12229_vm1, %v12228_v1  ;;  %v3007_v22 = vld [vmem:[%s12294_s29 + $0x43] sm:$0xff] }
 0x158   : > { %v1325_v4 = vpop.f32.mrb[58].mxu1  ;;  %v1500_v5 = vpop.f32.mrb[58].mxu0 }
 0x159   : > { %v1371_v7 = vadd.f32 %v1325_v4, %v13050_v57  ;;  %v13166_v23 = vadd.f32 %v1500_v5, %v1370_v39  ;;  %v10710_v9 = vpop.f32.mrb[59].mxu0  ;;  %11016 = vmatmul.mubr.msk.f32.gmra.mrb[164].mxu0 %vm346_vm2, %v2830_v13  ;;  %11021 = vmatmul.mubr.msk.f32.vlgmr.msra.gmra.mrb[164].mxu1 %vm346_vm2, %v3000_v6  ;;  %v10678_v32 = vpop.f32.mrb[59].mxu1  ;;  %v9499_v57 = vld [vmem:[%s15456_s4 + $0x48] sm:$0x7]  ;;  %v3186_v13 = vld [vmem:[%s12344_s12 + $0x3c] sm:$0xff] }
 0x15a   : > { %11089 = vmatpush3.msk.msra.mxu1 %vm380_vm0, %v9486_v49  ;;  %11023 = vmatprep.mubr.msk.f32.mxu1 %vm12229_vm1, %v12228_v1  ;;  %v3008_v9 = vld [vmem:[%s12294_s29 + $0x4b] sm:$0xff] }
 0x15b   : > { %11055 = vmatprep.mubr.msk.f32.mxu0 %vm12229_vm1, %v12228_v1  ;;  %11158 = vmatprep.subr.mxu1 %v12228_v1  ;;  %v3187_v32 = vld [vmem:[%s12344_s12 + $0x44] sm:$0xff] }
 0x15c   : > { %v1330_v15 = vpop.f32.mrb[60].mxu1  ;;  %v1505_v21 = vpop.f32.mrb[60].mxu0 }
 0x15d   : > { %v1372_v24 = vadd.f32 %v1330_v15, %v13063_v63  ;;  %v13182_v40 = vadd.f32 %v1505_v21, %v1371_v7  ;;  %v10713_v27 = vpop.f32.mrb[61].mxu0  ;;  %11024 = vmatmul.mubr.msk.f32.gmra.mrb[166].mxu1 %vm346_vm2, %v3001_v25  ;;  %11056 = vmatmul.mubr.msk.f32.vlgmr.msra.gmra.mrb[166].mxu0 %vm346_vm2, %v3180_v8  ;;  %v10681_v10 = vpop.f32.mrb[61].mxu1 }
 0x15e   : > { %11124 = vmatpush3.msk.msra.mxu0 %vm380_vm0, %v9499_v57  ;;  %11026 = vmatprep.mubr.msk.f32.mxu1 %vm12229_vm1, %v12228_v1  ;;  %v3188_v27 = vld [vmem:[%s12344_s12 + $0x4c] sm:$0xff] }
 0x15f   : > { %11058 = vmatprep.mubr.msk.f32.mxu0 %vm12229_vm1, %v12228_v1  ;;  %11193 = vmatprep.subr.mxu0 %v12228_v1 }
 0x160   : > { %v1335_v63 = vpop.f32.mrb[62].mxu1  ;;  %v1510_v30 = vpop.f32.mrb[62].mxu0 }
 0x161   : > { %v1373_v48 = vadd.f32 %v1335_v63, %v13074_v11  ;;  %v13195_v34 = vadd.f32 %v1510_v30, %v1372_v24  ;;  %v10716_v12 = vpop.f32.mrb[63].mxu0  ;;  %11027 = vmatmul.mubr.msk.f32.gmra.mrb[168].mxu1 %vm346_vm2, %v3002_v28  ;;  %11059 = vmatmul.mubr.msk.f32.gmra.mrb[168].mxu0 %vm346_vm2, %v3181_v31  ;;  %v10684_v35 = vpop.f32.mrb[63].mxu1  ;;  %v3009_v24 = vld [vmem:[%s12294_s29 + $0x53] sm:$0xff] }
 0x162   : > { %11029 = vmatprep.mubr.msk.f32.mxu1 %vm12229_vm1, %v12228_v1  ;;  %11061 = vmatprep.mubr.msk.f32.mxu0 %vm12229_vm1, %v12228_v1  ;;  %v3189_v12 = vld [vmem:[%s12344_s12 + $0x54] sm:$0xff] }
 0x164   : > { %v1340_v56 = vpop.f32.mrb[64].mxu1  ;;  %v1515_v11 = vpop.f32.mrb[64].mxu0 }
 0x165   : > { %v1374_v46 = vadd.f32 %v1340_v56, %v13085_v26  ;;  %v13206_v14 = vadd.f32 %v1515_v11, %v1373_v48  ;;  %v10719_v41 = vpop.f32.mrb[65].mxu0  ;;  %11030 = vmatmul.mubr.msk.f32.gmra.mrb[170].mxu1 %vm346_vm2, %v3003_v37  ;;  %11062 = vmatmul.mubr.msk.f32.gmra.mrb[170].mxu0 %vm346_vm2, %v3182_v38  ;;  %v10687_v42 = vpop.f32.mrb[65].mxu1  ;;  %v3010_v48 = vld [vmem:[%s12294_s29 + $0x5b] sm:$0xff] }
 0x166   : > { %11032 = vmatprep.mubr.msk.f32.mxu1 %vm12229_vm1, %v12228_v1  ;;  %11064 = vmatprep.mubr.msk.f32.mxu0 %vm12229_vm1, %v12228_v1  ;;  %v3360_v41 = vld [vmem:[%s12294_s29 + $0xc] sm:$0xff] }
 0x168   : > { %v1345_v55 = vpop.f32.mrb[66].mxu1  ;;  %v1520_v26 = vpop.f32.mrb[66].mxu0 }
 0x169   : > { %v1375_v16 = vadd.f32 %v1345_v55, %v13096_v33  ;;  %v13217_v45 = vadd.f32 %v1520_v26, %v1374_v46  ;;  %v10722_v60 = vpop.f32.mrb[67].mxu0  ;;  %11033 = vmatmul.mubr.msk.f32.gmra.mrb[172].mxu1 %vm346_vm2, %v3004_v43  ;;  %11065 = vmatmul.mubr.msk.f32.gmra.mrb[172].mxu0 %vm346_vm2, %v3183_v0  ;;  %v10690_v47 = vpop.f32.mrb[67].mxu1  ;;  %v3190_v46 = vld [vmem:[%s12344_s12 + $0x5c] sm:$0xff] }
 0x16a   : > { %11035 = vmatprep.mubr.msk.f32.mxu1 %vm12229_vm1, %v12228_v1  ;;  %11067 = vmatprep.mubr.msk.f32.mxu0 %vm12229_vm1, %v12228_v1  ;;  %v3361_v60 = vld [vmem:[%s12294_s29 + $0x14] sm:$0xff] }
 0x16b   : > { %v3540_v47 = vld [vmem:[%s12344_s12 + $0xd] sm:$0xff] }
 0x16c   : > { %v1350_v18 = vpop.f32.mrb[68].mxu1  ;;  %v1525_v33 = vpop.f32.mrb[68].mxu0 }
 0x16d   : > { %v1376_v52 = vadd.f32 %v1350_v18, %v13107_v36  ;;  %v13228_v2 = vadd.f32 %v1525_v33, %v1375_v16  ;;  %v10725_v53 = vpop.f32.mrb[69].mxu0  ;;  %11036 = vmatmul.mubr.msk.f32.gmra.mrb[174].mxu1 %vm346_vm2, %v3005_v17  ;;  %11068 = vmatmul.mubr.msk.f32.gmra.mrb[174].mxu0 %vm346_vm2, %v3184_v51  ;;  %v10693_v3 = vpop.f32.mrb[69].mxu1 }
 0x16e   : > { %11038 = vmatprep.mubr.msk.f32.mxu1 %vm12229_vm1, %v12228_v1  ;;  %11070 = vmatprep.mubr.msk.f32.mxu0 %vm12229_vm1, %v12228_v1  ;;  %v3362_v3 = vld [vmem:[%s12294_s29 + $0x1c] sm:$0xff] }
 0x170   : > { %v1355_v58 = vpop.f32.mrb[70].mxu1  ;;  %v1530_v36 = vpop.f32.mrb[70].mxu0 }
 0x171   : > { %v1377_v59 = vadd.f32 %v1355_v58, %v13118_v44  ;;  %v13239_v61 = vadd.f32 %v1530_v36, %v1376_v52  ;;  %v10728_v39 = vpop.f32.mrb[71].mxu0  ;;  %11039 = vmatmul.mubr.msk.f32.gmra.mrb[176].mxu1 %vm346_vm2, %v3006_v54  ;;  %11071 = vmatmul.mubr.msk.f32.gmra.mrb[176].mxu0 %vm346_vm2, %v3185_v20  ;;  %v10696_v62 = vpop.f32.mrb[71].mxu1  ;;  %v3541_v54 = vld [vmem:[%s12344_s12 + $0x15] sm:$0xff] }
 0x172   : > { %11041 = vmatprep.mubr.msk.f32.mxu1 %vm12229_vm1, %v12228_v1  ;;  %11073 = vmatprep.mubr.msk.f32.mxu0 %vm12229_vm1, %v12228_v1  ;;  %v3363_v62 = vld [vmem:[%s12294_s29 + $0x24] sm:$0xff] }
 0x174   : > { %v1360_v6 = vpop.f32.mrb[72].mxu1  ;;  %v1535_v44 = vpop.f32.mrb[72].mxu0 }
 0x175   : > { %v1378_v49 = vadd.f32 %v1360_v6, %v13129_v50  ;;  %v13250_v4 = vadd.f32 %v1535_v44, %v1377_v59  ;;  %v10731_v5 = vpop.f32.mrb[73].mxu0  ;;  %11042 = vmatmul.mubr.msk.f32.gmra.mrb[178].mxu1 %vm346_vm2, %v3007_v22  ;;  %11074 = vmatmul.mubr.msk.f32.gmra.mrb[178].mxu0 %vm346_vm2, %v3186_v13  ;;  %v10699_v7 = vpop.f32.mrb[73].mxu1  ;;  %v3542_v22 = vld [vmem:[%s12344_s12 + $0x1d] sm:$0xff] }
 0x176   : > { %11044 = vmatprep.mubr.msk.f32.mxu1 %vm12229_vm1, %v12228_v1  ;;  %11076 = vmatprep.mubr.msk.f32.mxu0 %vm12229_vm1, %v12228_v1  ;;  %v3364_v7 = vld [vmem:[%s12294_s29 + $0x2c] sm:$0xff] }
 0x178   : > { %v1365_v25 = vpop.f32.mrb[74].mxu1  ;;  %v1540_v50 = vpop.f32.mrb[74].mxu0 }
 0x179   : > { %v1379_v8 = vadd.f32 %v1365_v25, %v13139_v29  ;;  %v13261_v57 = vadd.f32 %v1540_v50, %v1378_v49  ;;  %v10734_v15 = vpop.f32.mrb[75].mxu0  ;;  %11045 = vmatmul.mubr.msk.f32.gmra.mrb[180].mxu1 %vm346_vm2, %v3008_v9  ;;  %11077 = vmatmul.mubr.msk.f32.gmra.mrb[180].mxu0 %vm346_vm2, %v3187_v32  ;;  %v10702_v21 = vpop.f32.mrb[75].mxu1  ;;  %v3543_v9 = vld [vmem:[%s12344_s12 + $0x25] sm:$0xff] }
 0x17a   : > { %11047 = vmatprep.mubr.msk.f32.mxu1 %vm12229_vm1, %v12228_v1  ;;  %11079 = vmatprep.mubr.msk.f32.mxu0 %vm12229_vm1, %v12228_v1  ;;  %v3365_v21 = vld [vmem:[%s12294_s29 + $0x34] sm:$0xff] }
 0x17c   : > { %v1545_v10 = vpop.f32.mrb[76].mxu0  ;;  %v1675_v29 = vpop.f32.mrb[76].mxu1 }
 0x17d   : > { %v13271_v28 = vadd.f32 %v1545_v10, %v1379_v8  ;;  %v1729_v31 = vadd.f32 %v1675_v29, %v13151_v19  ;;  %v10737_v63 = vpop.f32.mrb[77].mxu0  ;;  %11048 = vmatmul.mubr.msk.f32.gmra.mrb[182].mxu1 %vm346_vm2, %v3009_v24  ;;  %11080 = vmatmul.mubr.msk.f32.gmra.mrb[182].mxu0 %vm346_vm2, %v3188_v27  ;;  %v10742_v30 = vpop.f32.mrb[77].mxu1  ;;  %v3544_v24 = vld [vmem:[%s12344_s12 + $0x2d] sm:$0xff] }
 0x17e   : > { %11050 = vmatprep.mubr.msk.f32.mxu1 %vm12229_vm1, %v12228_v1  ;;  %11082 = vmatprep.mubr.msk.f32.mxu0 %vm12229_vm1, %v12228_v1  ;;  %v3366_v30 = vld [vmem:[%s12294_s29 + $0x3c] sm:$0xff] }
 0x180   : > { %v1680_v35 = vpop.f32.mrb[78].mxu1  ;;  %v1855_v37 = vpop.f32.mrb[78].mxu0 }
 0x181   : > { %v1730_v19 = vadd.f32 %v1680_v35, %v13166_v23  ;;  %v13283_v38 = vadd.f32 %v1855_v37, %v1729_v31  ;;  %v10777_v56 = vpop.f32.mrb[79].mxu0  ;;  %11051 = vmatmul.mubr.msk.f32.gmra.mrb[184].mxu1 %vm346_vm2, %v3010_v48  ;;  %11083 = vmatmul.mubr.msk.f32.gmra.mrb[184].mxu0 %vm346_vm2, %v3189_v12  ;;  %v10745_v11 = vpop.f32.mrb[79].mxu1  ;;  %v9512_v23 = vld [vmem:[%s15456_s4 + $0x4c] sm:$0x7]  ;;  %v3545_v48 = vld [vmem:[%s12344_s12 + $0x35] sm:$0xff] }
 0x182   : > { %11085 = vmatprep.mubr.msk.f32.mxu0 %vm12229_vm1, %v12228_v1  ;;  %11090 = vmatprep.mubr.msk.f32.mxu1 %vm12229_vm1, %v12228_v1  ;;  %v3367_v11 = vld [vmem:[%s12294_s29 + $0x44] sm:$0xff] }
 0x184   : > { %v1685_v42 = vpop.f32.mrb[80].mxu1  ;;  %v1860_v43 = vpop.f32.mrb[80].mxu0 }
 0x185   : > { %v1731_v0 = vadd.f32 %v1685_v42, %v13182_v40  ;;  %v13297_v55 = vadd.f32 %v1860_v43, %v1730_v19  ;;  %v10780_v26 = vpop.f32.mrb[81].mxu0  ;;  %11086 = vmatmul.mubr.msk.f32.gmra.mrb[186].mxu0 %vm346_vm2, %v3190_v46  ;;  %11091 = vmatmul.mubr.msk.f32.vlgmr.msra.gmra.mrb[186].mxu1 %vm346_vm2, %v3360_v41  ;;  %v10748_v16 = vpop.f32.mrb[81].mxu1  ;;  %v9525_v40 = vld [vmem:[%s15456_s4 + $0x50] sm:$0x7]  ;;  %v3546_v46 = vld [vmem:[%s12344_s12 + $0x3d] sm:$0xff] }
 0x186   : > { %11159 = vmatpush3.msk.msra.mxu1 %vm380_vm0, %v9512_v23  ;;  %11093 = vmatprep.mubr.msk.f32.mxu1 %vm12229_vm1, %v12228_v1  ;;  %v3368_v26 = vld [vmem:[%s12294_s29 + $0x4c] sm:$0xff] }
 0x187   : > { %11125 = vmatprep.mubr.msk.f32.mxu0 %vm12229_vm1, %v12228_v1  ;;  %11228 = vmatprep.subr.mxu1 %v12228_v1  ;;  %v3547_v16 = vld [vmem:[%s12344_s12 + $0x45] sm:$0xff] }
 0x188   : > { %v1690_v17 = vpop.f32.mrb[82].mxu1  ;;  %v1865_v51 = vpop.f32.mrb[82].mxu0 }
 0x189   : > { %v1732_v18 = vadd.f32 %v1690_v17, %v13195_v34  ;;  %v13313_v33 = vadd.f32 %v1865_v51, %v1731_v0  ;;  %v10783_v52 = vpop.f32.mrb[83].mxu0  ;;  %11094 = vmatmul.mubr.msk.f32.gmra.mrb[188].mxu1 %vm346_vm2, %v3361_v60  ;;  %11126 = vmatmul.mubr.msk.f32.vlgmr.msra.gmra.mrb[188].mxu0 %vm346_vm2, %v3540_v47  ;;  %v10751_v53 = vpop.f32.mrb[83].mxu1 }
 0x18a   : > { %11194 = vmatpush3.msk.msra.mxu0 %vm380_vm0, %v9525_v40  ;;  %11096 = vmatprep.mubr.msk.f32.mxu1 %vm12229_vm1, %v12228_v1  ;;  %v3548_v52 = vld [vmem:[%s12344_s12 + $0x4d] sm:$0xff] }
 0x18b   : > { %11128 = vmatprep.mubr.msk.f32.mxu0 %vm12229_vm1, %v12228_v1  ;;  %11263 = vmatprep.subr.mxu0 %v12228_v1 }
 0x18c   : > { %v1695_v34 = vpop.f32.mrb[84].mxu1  ;;  %v1870_v20 = vpop.f32.mrb[84].mxu0 }
 0x18d   : > { %v1733_v58 = vadd.f32 %v1695_v34, %v13206_v14  ;;  %v13326_v36 = vadd.f32 %v1870_v20, %v1732_v18  ;;  %v10786_v59 = vpop.f32.mrb[85].mxu0  ;;  %11097 = vmatmul.mubr.msk.f32.gmra.mrb[190].mxu1 %vm346_vm2, %v3362_v3  ;;  %11129 = vmatmul.mubr.msk.f32.gmra.mrb[190].mxu0 %vm346_vm2, %v3541_v54  ;;  %v10754_v39 = vpop.f32.mrb[85].mxu1  ;;  %v3369_v18 = vld [vmem:[%s12294_s29 + $0x54] sm:$0xff] }
 0x18e   : > { %11099 = vmatprep.mubr.msk.f32.mxu1 %vm12229_vm1, %v12228_v1  ;;  %11131 = vmatprep.mubr.msk.f32.mxu0 %vm12229_vm1, %v12228_v1  ;;  %v3549_v59 = vld [vmem:[%s12344_s12 + $0x55] sm:$0xff] }
 0x190   : > { %v1700_v13 = vpop.f32.mrb[86].mxu1  ;;  %v1875_v14 = vpop.f32.mrb[86].mxu0 }
 0x191   : > { %v1734_v6 = vadd.f32 %v1700_v13, %v13217_v45  ;;  %v13337_v44 = vadd.f32 %v1875_v14, %v1733_v58  ;;  %v10789_v49 = vpop.f32.mrb[87].mxu0  ;;  %11100 = vmatmul.mubr.msk.f32.gmra.mrb[192].mxu1 %vm346_vm2, %v3363_v62  ;;  %11132 = vmatmul.mubr.msk.f32.gmra.mrb[192].mxu0 %vm346_vm2, %v3542_v22  ;;  %v10757_v5 = vpop.f32.mrb[87].mxu1  ;;  %v3370_v58 = vld [vmem:[%s12294_s29 + $0x5c] sm:$0xff] }
 0x192   : > { %11102 = vmatprep.mubr.msk.f32.mxu1 %vm12229_vm1, %v12228_v1  ;;  %11134 = vmatprep.mubr.msk.f32.mxu0 %vm12229_vm1, %v12228_v1  ;;  %v3720_v49 = vld [vmem:[%s12294_s29 + $0xd] sm:$0xff] }
 0x194   : > { %v1705_v32 = vpop.f32.mrb[88].mxu1  ;;  %v1880_v45 = vpop.f32.mrb[88].mxu0 }
 0x195   : > { %v1735_v25 = vadd.f32 %v1705_v32, %v13228_v2  ;;  %v13348_v50 = vadd.f32 %v1880_v45, %v1734_v6  ;;  %v10792_v8 = vpop.f32.mrb[89].mxu0  ;;  %11103 = vmatmul.mubr.msk.f32.gmra.mrb[194].mxu1 %vm346_vm2, %v3364_v7  ;;  %11135 = vmatmul.mubr.msk.f32.gmra.mrb[194].mxu0 %vm346_vm2, %v3543_v9  ;;  %v10760_v15 = vpop.f32.mrb[89].mxu1  ;;  %v3550_v6 = vld [vmem:[%s12344_s12 + $0x5d] sm:$0xff] }
 0x196   : > { %11105 = vmatprep.mubr.msk.f32.mxu1 %vm12229_vm1, %v12228_v1  ;;  %11137 = vmatprep.mubr.msk.f32.mxu0 %vm12229_vm1, %v12228_v1  ;;  %v3721_v8 = vld [vmem:[%s12294_s29 + $0x15] sm:$0xff] }
 0x197   : > { %v3900_v15 = vld [vmem:[%s12344_s12 + $0xe] sm:$0xff] }
 0x198   : > { %v1710_v27 = vpop.f32.mrb[90].mxu1  ;;  %v1885_v2 = vpop.f32.mrb[90].mxu0 }
 0x199   : > { %v1736_v10 = vadd.f32 %v1710_v27, %v13239_v61  ;;  %v13359_v29 = vadd.f32 %v1885_v2, %v1735_v25  ;;  %v10795_v31 = vpop.f32.mrb[91].mxu0  ;;  %11106 = vmatmul.mubr.msk.f32.gmra.mrb[196].mxu1 %vm346_vm2, %v3365_v21  ;;  %11138 = vmatmul.mubr.msk.f32.gmra.mrb[196].mxu0 %vm346_vm2, %v3544_v24  ;;  %v10763_v63 = vpop.f32.mrb[91].mxu1 }
 0x19a   : > { %11108 = vmatprep.mubr.msk.f32.mxu1 %vm12229_vm1, %v12228_v1  ;;  %11140 = vmatprep.mubr.msk.f32.mxu0 %vm12229_vm1, %v12228_v1  ;;  %v3722_v63 = vld [vmem:[%s12294_s29 + $0x1d] sm:$0xff] }
 0x19c   : > { %v1715_v12 = vpop.f32.mrb[92].mxu1  ;;  %v1890_v61 = vpop.f32.mrb[92].mxu0 }
 0x19d   : > { %v1737_v35 = vadd.f32 %v1715_v12, %v13250_v4  ;;  %v13370_v37 = vadd.f32 %v1890_v61, %v1736_v10  ;;  %v10798_v19 = vpop.f32.mrb[93].mxu0  ;;  %11109 = vmatmul.mubr.msk.f32.gmra.mrb[198].mxu1 %vm346_vm2, %v3366_v30  ;;  %11141 = vmatmul.mubr.msk.f32.gmra.mrb[198].mxu0 %vm346_vm2, %v3545_v48  ;;  %v10766_v56 = vpop.f32.mrb[93].mxu1  ;;  %v3901_v30 = vld [vmem:[%s12344_s12 + $0x16] sm:$0xff] }
 0x19e   : > { %11111 = vmatprep.mubr.msk.f32.mxu1 %vm12229_vm1, %v12228_v1  ;;  %11143 = vmatprep.mubr.msk.f32.mxu0 %vm12229_vm1, %v12228_v1  ;;  %v3723_v56 = vld [vmem:[%s12294_s29 + $0x25] sm:$0xff] }
 0x1a0   : > { %v1720_v41 = vpop.f32.mrb[94].mxu1  ;;  %v1895_v4 = vpop.f32.mrb[94].mxu0 }
 0x1a1   : > { %v1738_v23 = vadd.f32 %v1720_v41, %v13261_v57  ;;  %v13381_v42 = vadd.f32 %v1895_v4, %v1737_v35  ;;  %v10801_v43 = vpop.f32.mrb[95].mxu0  ;;  %11112 = vmatmul.mubr.msk.f32.gmra.mrb[200].mxu1 %vm346_vm2, %v3367_v11  ;;  %11144 = vmatmul.mubr.msk.f32.gmra.mrb[200].mxu0 %vm346_vm2, %v3546_v46  ;;  %v10769_v0 = vpop.f32.mrb[95].mxu1  ;;  %v3902_v11 = vld [vmem:[%s12344_s12 + $0x1e] sm:$0xff] }
 0x1a2   : > { %11114 = vmatprep.mubr.msk.f32.mxu1 %vm12229_vm1, %v12228_v1  ;;  %11146 = vmatprep.mubr.msk.f32.mxu0 %vm12229_vm1, %v12228_v1  ;;  %v3724_v0 = vld [vmem:[%s12294_s29 + $0x2d] sm:$0xff] }
 0x1a4   : > { %v1725_v60 = vpop.f32.mrb[96].mxu1  ;;  %v1900_v57 = vpop.f32.mrb[96].mxu0 }
 0x1a5   : > { %v1739_v47 = vadd.f32 %v1725_v60, %v13271_v28  ;;  %v13392_v40 = vadd.f32 %v1900_v57, %v1738_v23  ;;  %v10804_v17 = vpop.f32.mrb[97].mxu0  ;;  %11115 = vmatmul.mubr.msk.f32.gmra.mrb[202].mxu1 %vm346_vm2, %v3368_v26  ;;  %11147 = vmatmul.mubr.msk.f32.gmra.mrb[202].mxu0 %vm346_vm2, %v3547_v16  ;;  %v10772_v51 = vpop.f32.mrb[97].mxu1  ;;  %v3903_v26 = vld [vmem:[%s12344_s12 + $0x26] sm:$0xff] }
 0x1a6   : > { %11117 = vmatprep.mubr.msk.f32.mxu1 %vm12229_vm1, %v12228_v1  ;;  %11149 = vmatprep.mubr.msk.f32.mxu0 %vm12229_vm1, %v12228_v1  ;;  %v3725_v51 = vld [vmem:[%s12294_s29 + $0x35] sm:$0xff] }
 0x1a8   : > { %v1905_v53 = vpop.f32.mrb[98].mxu0  ;;  %v2035_v28 = vpop.f32.mrb[98].mxu1 }
 0x1a9   : > { %v13402_v3 = vadd.f32 %v1905_v53, %v1739_v47  ;;  %v2089_v54 = vadd.f32 %v2035_v28, %v13283_v38  ;;  %v10807_v34 = vpop.f32.mrb[99].mxu0  ;;  %11118 = vmatmul.mubr.msk.f32.gmra.mrb[204].mxu1 %vm346_vm2, %v3369_v18  ;;  %11150 = vmatmul.mubr.msk.f32.gmra.mrb[204].mxu0 %vm346_vm2, %v3548_v52  ;;  %v10812_v20 = vpop.f32.mrb[99].mxu1  ;;  %v3904_v18 = vld [vmem:[%s12344_s12 + $0x2e] sm:$0xff] }
 0x1aa   : > { %11120 = vmatprep.mubr.msk.f32.mxu1 %vm12229_vm1, %v12228_v1  ;;  %11152 = vmatprep.mubr.msk.f32.mxu0 %vm12229_vm1, %v12228_v1  ;;  %v3726_v20 = vld [vmem:[%s12294_s29 + $0x3d] sm:$0xff] }
 0x1ac   : > { %v2040_v39 = vpop.f32.mrb[100].mxu1  ;;  %v2215_v62 = vpop.f32.mrb[100].mxu0 }
 0x1ad   : > { %v2090_v38 = vadd.f32 %v2040_v39, %v13297_v55  ;;  %v13414_v22 = vadd.f32 %v2215_v62, %v2089_v54  ;;  %v10847_v13 = vpop.f32.mrb[101].mxu0  ;;  %11121 = vmatmul.mubr.msk.f32.gmra.mrb[206].mxu1 %vm346_vm2, %v3370_v58  ;;  %11153 = vmatmul.mubr.msk.f32.gmra.mrb[206].mxu0 %vm346_vm2, %v3549_v59  ;;  %v10815_v14 = vpop.f32.mrb[101].mxu1  ;;  %v9538_v55 = vld [vmem:[%s15456_s4 + $0x54] sm:$0x7] }
 0x1ae   : > { %11155 = vmatprep.mubr.msk.f32.mxu0 %vm12229_vm1, %v12228_v1  ;;  %11160 = vmatprep.mubr.msk.f32.mxu1 %vm12229_vm1, %v12228_v1  ;;  %v3905_v58 = vld [vmem:[%s12344_s12 + $0x36] sm:$0xff]  ;;  %v3727_v14 = vld [vmem:[%s12294_s29 + $0x45] sm:$0xff] }
 0x1b0   : > { %v2045_v5 = vpop.f32.mrb[102].mxu1  ;;  %v2220_v7 = vpop.f32.mrb[102].mxu0 }
 0x1b1   : > { %v2091_v9 = vadd.f32 %v2045_v5, %v13313_v33  ;;  %v13428_v32 = vadd.f32 %v2220_v7, %v2090_v38  ;;  %v10850_v45 = vpop.f32.mrb[103].mxu0  ;;  %11156 = vmatmul.mubr.msk.f32.gmra.mrb[208].mxu0 %vm346_vm2, %v3550_v6  ;;  %11161 = vmatmul.mubr.msk.f32.vlgmr.msra.gmra.mrb[208].mxu1 %vm346_vm2, %v3720_v49  ;;  %v10818_v25 = vpop.f32.mrb[103].mxu1  ;;  %v9551_v33 = vld [vmem:[%s15456_s4 + $0x58] sm:$0x7]  ;;  %v3906_v6 = vld [vmem:[%s12344_s12 + $0x3e] sm:$0xff] }
 0x1b2   : > { %11229 = vmatpush3.msk.msra.mxu1 %vm380_vm0, %v9538_v55  ;;  %11163 = vmatprep.mubr.msk.f32.mxu1 %vm12229_vm1, %v12228_v1  ;;  %v3728_v45 = vld [vmem:[%s12294_s29 + $0x4d] sm:$0xff] }
 0x1b3   : > { %11195 = vmatprep.mubr.msk.f32.mxu0 %vm12229_vm1, %v12228_v1  ;;  %11298 = vmatprep.subr.mxu1 %v12228_v1  ;;  %v3907_v25 = vld [vmem:[%s12344_s12 + $0x46] sm:$0xff] }
 0x1b4   : > { %v2050_v21 = vpop.f32.mrb[104].mxu1  ;;  %v2225_v24 = vpop.f32.mrb[104].mxu0 }
 0x1b5   : > { %v2092_v27 = vadd.f32 %v2050_v21, %v13326_v36  ;;  %v13444_v2 = vadd.f32 %v2225_v24, %v2091_v9  ;;  %v10853_v10 = vpop.f32.mrb[105].mxu0  ;;  %11164 = vmatmul.mubr.msk.f32.gmra.mrb[210].mxu1 %vm346_vm2, %v3721_v8  ;;  %11196 = vmatmul.mubr.msk.f32.vlgmr.msra.gmra.mrb[210].mxu0 %vm346_vm2, %v3900_v15  ;;  %v10821_v31 = vpop.f32.mrb[105].mxu1 }
 0x1b6   : > { %11264 = vmatpush3.msk.msra.mxu0 %vm380_vm0, %v9551_v33  ;;  %11166 = vmatprep.mubr.msk.f32.mxu1 %vm12229_vm1, %v12228_v1  ;;  %v3908_v10 = vld [vmem:[%s12344_s12 + $0x4e] sm:$0xff] }
 0x1b7   : > { %11198 = vmatprep.mubr.msk.f32.mxu0 %vm12229_vm1, %v12228_v1  ;;  %11333 = vmatprep.subr.mxu0 %v12228_v1 }
 0x1b8   : > { %v2055_v36 = vpop.f32.mrb[106].mxu1  ;;  %v2230_v48 = vpop.f32.mrb[106].mxu0 }
 0x1b9   : > { %v2093_v12 = vadd.f32 %v2055_v36, %v13337_v44  ;;  %v13457_v61 = vadd.f32 %v2230_v48, %v2092_v27  ;;  %v10856_v35 = vpop.f32.mrb[107].mxu0  ;;  %11167 = vmatmul.mubr.msk.f32.gmra.mrb[212].mxu1 %vm346_vm2, %v3722_v63  ;;  %11199 = vmatmul.mubr.msk.f32.gmra.mrb[212].mxu0 %vm346_vm2, %v3901_v30  ;;  %v10824_v19 = vpop.f32.mrb[107].mxu1  ;;  %v3729_v27 = vld [vmem:[%s12294_s29 + $0x55] sm:$0xff] }
 0x1ba   : > { %11169 = vmatprep.mubr.msk.f32.mxu1 %vm12229_vm1, %v12228_v1  ;;  %11201 = vmatprep.mubr.msk.f32.mxu0 %vm12229_vm1, %v12228_v1  ;;  %v3909_v35 = vld [vmem:[%s12344_s12 + $0x56] sm:$0xff] }
 0x1bc   : > { %v2060_v46 = vpop.f32.mrb[108].mxu1  ;;  %v2235_v44 = vpop.f32.mrb[108].mxu0 }
 0x1bd   : > { %v2094_v41 = vadd.f32 %v2060_v46, %v13348_v50  ;;  %v13468_v4 = vadd.f32 %v2235_v44, %v2093_v12  ;;  %v10859_v23 = vpop.f32.mrb[109].mxu0  ;;  %11170 = vmatmul.mubr.msk.f32.gmra.mrb[214].mxu1 %vm346_vm2, %v3723_v56  ;;  %11202 = vmatmul.mubr.msk.f32.gmra.mrb[214].mxu0 %vm346_vm2, %v3902_v11  ;;  %v10827_v43 = vpop.f32.mrb[109].mxu1  ;;  %v3730_v12 = vld [vmem:[%s12294_s29 + $0x5d] sm:$0xff] }
 0x1be   : > { %11172 = vmatprep.mubr.msk.f32.mxu1 %vm12229_vm1, %v12228_v1  ;;  %11204 = vmatprep.mubr.msk.f32.mxu0 %vm12229_vm1, %v12228_v1  ;;  %v4080_v23 = vld [vmem:[%s12670_s7 + $0xb] sm:$0xff] }
 0x1c0   : > { %v2065_v16 = vpop.f32.mrb[110].mxu1  ;;  %v2240_v50 = vpop.f32.mrb[110].mxu0 }
 0x1c1   : > { %v2095_v60 = vadd.f32 %v2065_v16, %v13359_v29  ;;  %v13479_v57 = vadd.f32 %v2240_v50, %v2094_v41  ;;  %v10862_v47 = vpop.f32.mrb[111].mxu0  ;;  %11173 = vmatmul.mubr.msk.f32.gmra.mrb[216].mxu1 %vm346_vm2, %v3724_v0  ;;  %11205 = vmatmul.mubr.msk.f32.gmra.mrb[216].mxu0 %vm346_vm2, %v3903_v26  ;;  %v10830_v17 = vpop.f32.mrb[111].mxu1  ;;  %v3910_v41 = vld [vmem:[%s12344_s12 + $0x5e] sm:$0xff] }
 0x1c2   : > { %11175 = vmatprep.mubr.msk.f32.mxu1 %vm12229_vm1, %v12228_v1  ;;  %11207 = vmatprep.mubr.msk.f32.mxu0 %vm12229_vm1, %v12228_v1  ;;  %v4081_v47 = vld [vmem:[%s12670_s7 + $0x13] sm:$0xff]  ;;  %v4260_v17 = vld [vmem:[%s12690_s13 + $0xb] sm:$0xff] }
 0x1c4   : > { %v2070_v52 = vpop.f32.mrb[112].mxu1  ;;  %v2245_v29 = vpop.f32.mrb[112].mxu0 }
 0x1c5   : > { %v2096_v53 = vadd.f32 %v2070_v52, %v13370_v37  ;;  %v13490_v28 = vadd.f32 %v2245_v29, %v2095_v60  ;;  %v10865_v54 = vpop.f32.mrb[113].mxu0  ;;  %11176 = vmatmul.mubr.msk.f32.gmra.mrb[218].mxu1 %vm346_vm2, %v3725_v51  ;;  %11208 = vmatmul.mubr.msk.f32.gmra.mrb[218].mxu0 %vm346_vm2, %v3904_v18  ;;  %v10833_v34 = vpop.f32.mrb[113].mxu1 }
 0x1c6   : > { %11178 = vmatprep.mubr.msk.f32.mxu1 %vm12229_vm1, %v12228_v1  ;;  %11210 = vmatprep.mubr.msk.f32.mxu0 %vm12229_vm1, %v12228_v1  ;;  %v4082_v34 = vld [vmem:[%s12670_s7 + $0x1b] sm:$0xff] }
 0x1c8   : > { %v2075_v59 = vpop.f32.mrb[114].mxu1  ;;  %v2250_v37 = vpop.f32.mrb[114].mxu0 }
 0x1c9   : > { %v2097_v39 = vadd.f32 %v2075_v59, %v13381_v42  ;;  %v13501_v62 = vadd.f32 %v2250_v37, %v2096_v53  ;;  %v10868_v38 = vpop.f32.mrb[115].mxu0  ;;  %11179 = vmatmul.mubr.msk.f32.gmra.mrb[220].mxu1 %vm346_vm2, %v3726_v20  ;;  %11211 = vmatmul.mubr.msk.f32.gmra.mrb[220].mxu0 %vm346_vm2, %v3905_v58  ;;  %v10836_v13 = vpop.f32.mrb[115].mxu1  ;;  %v4261_v20 = vld [vmem:[%s12690_s13 + $0x13] sm:$0xff] }
 0x1ca   : > { %11181 = vmatprep.mubr.msk.f32.mxu1 %vm12229_vm1, %v12228_v1  ;;  %11213 = vmatprep.mubr.msk.f32.mxu0 %vm12229_vm1, %v12228_v1  ;;  %v4083_v13 = vld [vmem:[%s12670_s7 + $0x23] sm:$0xff] }
 0x1cc   : > { %v2080_v49 = vpop.f32.mrb[116].mxu1  ;;  %v2255_v42 = vpop.f32.mrb[116].mxu0 }
 0x1cd   : > { %v2098_v55 = vadd.f32 %v2080_v49, %v13392_v40  ;;  %v13512_v5 = vadd.f32 %v2255_v42, %v2097_v39  ;;  %v10871_v7 = vpop.f32.mrb[117].mxu0  ;;  %11182 = vmatmul.mubr.msk.f32.gmra.mrb[222].mxu1 %vm346_vm2, %v3727_v14  ;;  %11214 = vmatmul.mubr.msk.f32.gmra.mrb[222].mxu0 %vm346_vm2, %v3906_v6  ;;  %v10839_v9 = vpop.f32.mrb[117].mxu1  ;;  %v4262_v14 = vld [vmem:[%s12690_s13 + $0x1b] sm:$0xff] }
 0x1ce   : > { %11184 = vmatprep.mubr.msk.f32.mxu1 %vm12229_vm1, %v12228_v1  ;;  %11216 = vmatprep.mubr.msk.f32.mxu0 %vm12229_vm1, %v12228_v1  ;;  %v4084_v9 = vld [vmem:[%s12670_s7 + $0x2b] sm:$0xff] }
 0x1d0   : > { %v2085_v8 = vpop.f32.mrb[118].mxu1  ;;  %v2260_v40 = vpop.f32.mrb[118].mxu0 }
 0x1d1   : > { %v2099_v15 = vadd.f32 %v2085_v8, %v13402_v3  ;;  %v13523_v33 = vadd.f32 %v2260_v40, %v2098_v55  ;;  %v10874_v21 = vpop.f32.mrb[119].mxu0  ;;  %11185 = vmatmul.mubr.msk.f32.gmra.mrb[224].mxu1 %vm346_vm2, %v3728_v45  ;;  %11217 = vmatmul.mubr.msk.f32.gmra.mrb[224].mxu0 %vm346_vm2, %v3907_v25  ;;  %v10842_v24 = vpop.f32.mrb[119].mxu1  ;;  %v4263_v45 = vld [vmem:[%s12690_s13 + $0x23] sm:$0xff] }
 0x1d2   : > { %11187 = vmatprep.mubr.msk.f32.mxu1 %vm12229_vm1, %v12228_v1  ;;  %11219 = vmatprep.mubr.msk.f32.mxu0 %vm12229_vm1, %v12228_v1  ;;  %v4085_v24 = vld [vmem:[%s12670_s7 + $0x33] sm:$0xff] }
 0x1d4   : > { %v2265_v31 = vpop.f32.mrb[120].mxu0  ;;  %v2395_v3 = vpop.f32.mrb[120].mxu1 }
 0x1d5   : > { %v13533_v63 = vadd.f32 %v2265_v31, %v2099_v15  ;;  %v2449_v30 = vadd.f32 %v2395_v3, %v13414_v22  ;;  %v10877_v36 = vpop.f32.mrb[121].mxu0  ;;  %11188 = vmatmul.mubr.msk.f32.gmra.mrb[226].mxu1 %vm346_vm2, %v3729_v27  ;;  %11220 = vmatmul.mubr.msk.f32.gmra.mrb[226].mxu0 %vm346_vm2, %v3908_v10  ;;  %v10882_v48 = vpop.f32.mrb[121].mxu1  ;;  %v4264_v27 = vld [vmem:[%s12690_s13 + $0x2b] sm:$0xff] }
 0x1d6   : > { %11190 = vmatprep.mubr.msk.f32.mxu1 %vm12229_vm1, %v12228_v1  ;;  %11222 = vmatprep.mubr.msk.f32.mxu0 %vm12229_vm1, %v12228_v1  ;;  %v4086_v48 = vld [vmem:[%s12670_s7 + $0x3b] sm:$0xff] }
 0x1d8   : > { %v2400_v19 = vpop.f32.mrb[122].mxu1  ;;  %v2575_v56 = vpop.f32.mrb[122].mxu0 }
 0x1d9   : > { %v2450_v22 = vadd.f32 %v2400_v19, %v13428_v32  ;;  %v13545_v11 = vadd.f32 %v2575_v56, %v2449_v30  ;;  %v10917_v46 = vpop.f32.mrb[123].mxu0  ;;  %11191 = vmatmul.mubr.msk.f32.gmra.mrb[228].mxu1 %vm346_vm2, %v3730_v12  ;;  %11223 = vmatmul.mubr.msk.f32.gmra.mrb[228].mxu0 %vm346_vm2, %v3909_v35  ;;  %v10885_v44 = vpop.f32.mrb[123].mxu1  ;;  %v9564_v32 = vld [vmem:[%s15456_s4 + $0x5c] sm:$0x7]  ;;  %v4265_v12 = vld [vmem:[%s12690_s13 + $0x33] sm:$0xff] }
 0x1da   : > { %11225 = vmatprep.mubr.msk.f32.mxu0 %vm12229_vm1, %v12228_v1  ;;  %11230 = vmatprep.mubr.msk.f32.mxu1 %vm12229_vm1, %v12228_v1  ;;  %v4087_v44 = vld [vmem:[%s12670_s7 + $0x43] sm:$0xff] }
 0x1dc   : > { %v2405_v43 = vpop.f32.mrb[124].mxu1  ;;  %v2580_v0 = vpop.f32.mrb[124].mxu0 }
 0x1dd   : > { %v2451_v26 = vadd.f32 %v2405_v43, %v13444_v2  ;;  %v13559_v16 = vadd.f32 %v2580_v0, %v2450_v22  ;;  %v10920_v50 = vpop.f32.mrb[125].mxu0  ;;  %11226 = vmatmul.mubr.msk.f32.gmra.mrb[230].mxu0 %vm346_vm2, %v3910_v41  ;;  %11231 = vmatmul.mubr.msk.f32.vlgmr.msra.gmra.mrb[230].mxu1 %vm346_vm2, %v4080_v23  ;;  %v10888_v60 = vpop.f32.mrb[125].mxu1  ;;  %v9577_v2 = vld [vmem:[%s15456_s4 + $0x60] sm:$0x7] }
 0x1de   : > { %11299 = vmatpush3.msk.msra.mxu1 %vm380_vm0, %v9564_v32  ;;  %11233 = vmatprep.mubr.msk.f32.mxu1 %vm12229_vm1, %v12228_v1  ;;  %v4266_v41 = vld [vmem:[%s12690_s13 + $0x3b] sm:$0xff]  ;;  %v4088_v50 = vld [vmem:[%s12670_s7 + $0x4b] sm:$0xff]  ;;  %v4267_v60 = vld [vmem:[%s12690_s13 + $0x43] sm:$0xff] }
 0x1df   : > { %11265 = vmatprep.mubr.msk.f32.mxu0 %vm12229_vm1, %v12228_v1  ;;  %11368 = vmatprep.subr.mxu1 %v12228_v1 }
 0x1e0   : > { %v2410_v51 = vpop.f32.mrb[126].mxu1  ;;  %v2585_v18 = vpop.f32.mrb[126].mxu0 }
 0x1e1   : > { %v2452_v52 = vadd.f32 %v2410_v51, %v13457_v61  ;;  %v13575_v29 = vadd.f32 %v2585_v18, %v2451_v26  ;;  %v10923_v53 = vpop.f32.mrb[127].mxu0  ;;  %11234 = vmatmul.mubr.msk.f32.gmra.mrb[232].mxu1 %vm346_vm2, %v4081_v47  ;;  %11266 = vmatmul.mubr.msk.f32.vlgmr.msra.gmra.mrb[232].mxu0 %vm346_vm2, %v4260_v17  ;;  %v10891_v54 = vpop.f32.mrb[127].mxu1 }
 0x1e2   : > { %11334 = vmatpush3.msk.msra.mxu0 %vm380_vm0, %v9577_v2  ;;  %11236 = vmatprep.mubr.msk.f32.mxu1 %vm12229_vm1, %v12228_v1  ;;  %v4268_v53 = vld [vmem:[%s12690_s13 + $0x4b] sm:$0xff] }
 0x1e3   : > { %11268 = vmatprep.mubr.msk.f32.mxu0 %vm12229_vm1, %v12228_v1  ;;  %11403 = vmatprep.subr.mxu0 %v12228_v1 }
 0x1e4   : > { %v2415_v61 = vpop.f32.mrb[128].mxu1  ;;  %v2590_v58 = vpop.f32.mrb[128].mxu0 }
 0x1e5   : > { %v2453_v59 = vadd.f32 %v2415_v61, %v13468_v4  ;;  %v13588_v37 = vadd.f32 %v2590_v58, %v2452_v52  ;;  %v10926_v39 = vpop.f32.mrb[129].mxu0  ;;  %11237 = vmatmul.mubr.msk.f32.gmra.mrb[234].mxu1 %vm346_vm2, %v4082_v34  ;;  %11269 = vmatmul.mubr.msk.f32.gmra.mrb[234].mxu0 %vm346_vm2, %v4261_v20  ;;  %v10894_v38 = vpop.f32.mrb[129].mxu1  ;;  %v4089_v52 = vld [vmem:[%s12670_s7 + $0x53] sm:$0xff] }
 0x1e6   : > { %11239 = vmatprep.mubr.msk.f32.mxu1 %vm12229_vm1, %v12228_v1  ;;  %11271 = vmatprep.mubr.msk.f32.mxu0 %vm12229_vm1, %v12228_v1  ;;  %v4269_v39 = vld [vmem:[%s12690_s13 + $0x53] sm:$0xff] }
 0x1e8   : > { %v2420_v6 = vpop.f32.mrb[130].mxu1  ;;  %v2595_v4 = vpop.f32.mrb[130].mxu0 }
 0x1e9   : > { %v2454_v49 = vadd.f32 %v2420_v6, %v13479_v57  ;;  %v13599_v42 = vadd.f32 %v2595_v4, %v2453_v59  ;;  %v10929_v55 = vpop.f32.mrb[131].mxu0  ;;  %11240 = vmatmul.mubr.msk.f32.gmra.mrb[236].mxu1 %vm346_vm2, %v4083_v13  ;;  %11272 = vmatmul.mubr.msk.f32.gmra.mrb[236].mxu0 %vm346_vm2, %v4262_v14  ;;  %v10897_v7 = vpop.f32.mrb[131].mxu1  ;;  %v4090_v59 = vld [vmem:[%s12670_s7 + $0x5b] sm:$0xff] }
 0x1ea   : > { %11242 = vmatprep.mubr.msk.f32.mxu1 %vm12229_vm1, %v12228_v1  ;;  %11274 = vmatprep.mubr.msk.f32.mxu0 %vm12229_vm1, %v12228_v1  ;;  %v4440_v55 = vld [vmem:[%s12670_s7 + $0xc] sm:$0xff] }
 0x1ec   : > { %v2425_v25 = vpop.f32.mrb[132].mxu1  ;;  %v2600_v57 = vpop.f32.mrb[132].mxu0 }
 0x1ed   : > { %v2455_v8 = vadd.f32 %v2425_v25, %v13490_v28  ;;  %v13610_v40 = vadd.f32 %v2600_v57, %v2454_v49  ;;  %v10932_v15 = vpop.f32.mrb[133].mxu0  ;;  %11243 = vmatmul.mubr.msk.f32.gmra.mrb[238].mxu1 %vm346_vm2, %v4084_v9  ;;  %11275 = vmatmul.mubr.msk.f32.gmra.mrb[238].mxu0 %vm346_vm2, %v4263_v45  ;;  %v10900_v21 = vpop.f32.mrb[133].mxu1  ;;  %v4270_v49 = vld [vmem:[%s12690_s13 + $0x5b] sm:$0xff] }
 0x1ee   : > { %11245 = vmatprep.mubr.msk.f32.mxu1 %vm12229_vm1, %v12228_v1  ;;  %11277 = vmatprep.mubr.msk.f32.mxu0 %vm12229_vm1, %v12228_v1  ;;  %v4441_v15 = vld [vmem:[%s12670_s7 + $0x14] sm:$0xff]  ;;  %v4620_v21 = vld [vmem:[%s12690_s13 + $0xc] sm:$0xff] }
 0x1f0   : > { %v2430_v10 = vpop.f32.mrb[134].mxu1  ;;  %v2605_v28 = vpop.f32.mrb[134].mxu0 }
 0x1f1   : > { %v2456_v31 = vadd.f32 %v2430_v10, %v13501_v62  ;;  %v13621_v3 = vadd.f32 %v2605_v28, %v2455_v8  ;;  %v10935_v30 = vpop.f32.mrb[135].mxu0  ;;  %11246 = vmatmul.mubr.msk.f32.gmra.mrb[240].mxu1 %vm346_vm2, %v4085_v24  ;;  %11278 = vmatmul.mubr.msk.f32.gmra.mrb[240].mxu0 %vm346_vm2, %v4264_v27  ;;  %v10903_v36 = vpop.f32.mrb[135].mxu1 }
 0x1f2   : > { %11248 = vmatprep.mubr.msk.f32.mxu1 %vm12229_vm1, %v12228_v1  ;;  %11280 = vmatprep.mubr.msk.f32.mxu0 %vm12229_vm1, %v12228_v1  ;;  %v4442_v36 = vld [vmem:[%s12670_s7 + $0x1c] sm:$0xff] }
 0x1f4   : > { %v2435_v35 = vpop.f32.mrb[136].mxu1  ;;  %v2610_v62 = vpop.f32.mrb[136].mxu0 }
 0x1f5   : > { %v2457_v19 = vadd.f32 %v2435_v35, %v13512_v5  ;;  %v13632_v56 = vadd.f32 %v2610_v62, %v2456_v31  ;;  %v10938_v22 = vpop.f32.mrb[137].mxu0  ;;  %11249 = vmatmul.mubr.msk.f32.gmra.mrb[242].mxu1 %vm346_vm2, %v4086_v48  ;;  %11281 = vmatmul.mubr.msk.f32.gmra.mrb[242].mxu0 %vm346_vm2, %v4265_v12  ;;  %v10906_v46 = vpop.f32.mrb[137].mxu1  ;;  %v4621_v48 = vld [vmem:[%s12690_s13 + $0x14] sm:$0xff] }
 0x1f6   : > { %11251 = vmatprep.mubr.msk.f32.mxu1 %vm12229_vm1, %v12228_v1  ;;  %11283 = vmatprep.mubr.msk.f32.mxu0 %vm12229_vm1, %v12228_v1  ;;  %v4443_v46 = vld [vmem:[%s12670_s7 + $0x24] sm:$0xff] }
 0x1f8   : > { %v2440_v23 = vpop.f32.mrb[138].mxu1  ;;  %v2615_v5 = vpop.f32.mrb[138].mxu0 }
 0x1f9   : > { %v2458_v32 = vadd.f32 %v2440_v23, %v13523_v33  ;;  %v13643_v43 = vadd.f32 %v2615_v5, %v2457_v19  ;;  %v10941_v0 = vpop.f32.mrb[139].mxu0  ;;  %11252 = vmatmul.mubr.msk.f32.gmra.mrb[244].mxu1 %vm346_vm2, %v4087_v44  ;;  %11284 = vmatmul.mubr.msk.f32.gmra.mrb[244].mxu0 %vm346_vm2, %v4266_v41  ;;  %v10909_v26 = vpop.f32.mrb[139].mxu1  ;;  %v4622_v44 = vld [vmem:[%s12690_s13 + $0x1c] sm:$0xff] }
 0x1fa   : > { %11254 = vmatprep.mubr.msk.f32.mxu1 %vm12229_vm1, %v12228_v1  ;;  %11286 = vmatprep.mubr.msk.f32.mxu0 %vm12229_vm1, %v12228_v1  ;;  %v4444_v26 = vld [vmem:[%s12670_s7 + $0x2c] sm:$0xff] }
 0x1fc   : > { %v2445_v47 = vpop.f32.mrb[140].mxu1  ;;  %v2620_v33 = vpop.f32.mrb[140].mxu0 }
 0x1fd   : > { %v2459_v17 = vadd.f32 %v2445_v47, %v13533_v63  ;;  %v13654_v2 = vadd.f32 %v2620_v33, %v2458_v32  ;;  %v10944_v51 = vpop.f32.mrb[141].mxu0  ;;  %11255 = vmatmul.mubr.msk.f32.gmra.mrb[246].mxu1 %vm346_vm2, %v4088_v50  ;;  %11287 = vmatmul.mubr.msk.f32.gmra.mrb[246].mxu0 %vm346_vm2, %v4267_v60  ;;  %v10912_v18 = vpop.f32.mrb[141].mxu1  ;;  %v4623_v50 = vld [vmem:[%s12690_s13 + $0x24] sm:$0xff] }
 0x1fe   : > { %11257 = vmatprep.mubr.msk.f32.mxu1 %vm12229_vm1, %v12228_v1  ;;  %11289 = vmatprep.mubr.msk.f32.mxu0 %vm12229_vm1, %v12228_v1  ;;  %v4445_v18 = vld [vmem:[%s12670_s7 + $0x34] sm:$0xff] }
 0x200   : > { %v2625_v54 = vpop.f32.mrb[142].mxu0  ;;  %v2755_v63 = vpop.f32.mrb[142].mxu1 }
 0x201   : > { %v13664_v34 = vadd.f32 %v2625_v54, %v2459_v17  ;;  %v2809_v20 = vadd.f32 %v2755_v63, %v13545_v11  ;;  %v10947_v61 = vpop.f32.mrb[143].mxu0  ;;  %11258 = vmatmul.mubr.msk.f32.gmra.mrb[248].mxu1 %vm346_vm2, %v4089_v52  ;;  %11290 = vmatmul.mubr.msk.f32.gmra.mrb[248].mxu0 %vm346_vm2, %v4268_v53  ;;  %v10952_v58 = vpop.f32.mrb[143].mxu1  ;;  %v4624_v52 = vld [vmem:[%s12690_s13 + $0x2c] sm:$0xff] }
 0x202   : > { %11260 = vmatprep.mubr.msk.f32.mxu1 %vm12229_vm1, %v12228_v1  ;;  %11292 = vmatprep.mubr.msk.f32.mxu0 %vm12229_vm1, %v12228_v1  ;;  %v4446_v58 = vld [vmem:[%s12670_s7 + $0x3c] sm:$0xff] }
 0x204   : > { %v2760_v38 = vpop.f32.mrb[144].mxu1  ;;  %v2935_v13 = vpop.f32.mrb[144].mxu0 }
 0x205   : > { %v2810_v11 = vadd.f32 %v2760_v38, %v13559_v16  ;;  %v13676_v14 = vadd.f32 %v2935_v13, %v2809_v20  ;;  %v10987_v6 = vpop.f32.mrb[145].mxu0  ;;  %11261 = vmatmul.mubr.msk.f32.gmra.mrb[250].mxu1 %vm346_vm2, %v4090_v59  ;;  %11293 = vmatmul.mubr.msk.f32.gmra.mrb[250].mxu0 %vm346_vm2, %v4269_v39  ;;  %v10955_v4 = vpop.f32.mrb[145].mxu1  ;;  %v9590_v16 = vld [vmem:[%s15456_s4 + $0x64] sm:$0x7]  ;;  %v4625_v59 = vld [vmem:[%s12690_s13 + $0x34] sm:$0xff] }
 0x206   : > { %11295 = vmatprep.mubr.msk.f32.mxu0 %vm12229_vm1, %v12228_v1  ;;  %11300 = vmatprep.mubr.msk.f32.mxu1 %vm12229_vm1, %v12228_v1  ;;  %v4447_v4 = vld [vmem:[%s12670_s7 + $0x44] sm:$0xff] }
 0x208   : > { %v2765_v7 = vpop.f32.mrb[146].mxu1  ;;  %v2940_v9 = vpop.f32.mrb[146].mxu0 }
 0x209   : > { %v2811_v45 = vadd.f32 %v2765_v7, %v13575_v29  ;;  %v13690_v25 = vadd.f32 %v2940_v9, %v2810_v11  ;;  %v10990_v57 = vpop.f32.mrb[147].mxu0  ;;  %11296 = vmatmul.mubr.msk.f32.gmra.mrb[252].mxu0 %vm346_vm2, %v4270_v49  ;;  %11301 = vmatmul.mubr.msk.f32.vlgmr.msra.gmra.mrb[252].mxu1 %vm346_vm2, %v4440_v55  ;;  %v10958_v8 = vpop.f32.mrb[147].mxu1  ;;  %v9603_v29 = vld [vmem:[%s15456_s4 + $0x68] sm:$0x7]  ;;  %v4626_v49 = vld [vmem:[%s12690_s13 + $0x3c] sm:$0xff] }
 0x20a   : > { %11369 = vmatpush3.msk.msra.mxu1 %vm380_vm0, %v9590_v16  ;;  %11303 = vmatprep.mubr.msk.f32.mxu1 %vm12229_vm1, %v12228_v1  ;;  %v4448_v57 = vld [vmem:[%s12670_s7 + $0x4c] sm:$0xff]  ;;  %v4627_v8 = vld [vmem:[%s12690_s13 + $0x44] sm:$0xff] }
 0x20b   : > { %11335 = vmatprep.mubr.msk.f32.mxu0 %vm12229_vm1, %v12228_v1  ;;  %11438 = vmatprep.subr.mxu1 %v12228_v1 }
 0x20c   : > { %v2770_v24 = vpop.f32.mrb[148].mxu1  ;;  %v2945_v27 = vpop.f32.mrb[148].mxu0 }
 0x20d   : > { %v2812_v10 = vadd.f32 %v2770_v24, %v13588_v37  ;;  %v13706_v28 = vadd.f32 %v2945_v27, %v2811_v45  ;;  %v10993_v31 = vpop.f32.mrb[149].mxu0  ;;  %11304 = vmatmul.mubr.msk.f32.gmra.mrb[254].mxu1 %vm346_vm2, %v4441_v15  ;;  %11336 = vmatmul.mubr.msk.f32.vlgmr.msra.gmra.mrb[254].mxu0 %vm346_vm2, %v4620_v21  ;;  %v10961_v30 = vpop.f32.mrb[149].mxu1 }
 0x20e   : > { %11404 = vmatpush3.msk.msra.mxu0 %vm380_vm0, %v9603_v29  ;;  %11306 = vmatprep.mubr.msk.f32.mxu1 %vm12229_vm1, %v12228_v1  ;;  %v4628_v31 = vld [vmem:[%s12690_s13 + $0x4c] sm:$0xff] }
 0x20f   : > { %11338 = vmatprep.mubr.msk.f32.mxu0 %vm12229_vm1, %v12228_v1  ;;  %11473 = vmatprep.subr.mxu0 %v12228_v1 }
 0x210   : > { %v2775_v37 = vpop.f32.mrb[150].mxu1  ;;  %v2950_v12 = vpop.f32.mrb[150].mxu0 }
 0x211   : > { %v2813_v35 = vadd.f32 %v2775_v37, %v13599_v42  ;;  %v13719_v62 = vadd.f32 %v2950_v12, %v2812_v10  ;;  %v10996_v19 = vpop.f32.mrb[151].mxu0  ;;  %11307 = vmatmul.mubr.msk.f32.gmra.mrb[0].mxu1 %vm346_vm2, %v4442_v36  ;;  %11339 = vmatmul.mubr.msk.f32.gmra.mrb[0].mxu0 %vm346_vm2, %v4621_v48  ;;  %v10964_v22 = vpop.f32.mrb[151].mxu1  ;;  %v4449_v10 = vld [vmem:[%s12670_s7 + $0x54] sm:$0xff] }
 0x212   : > { %11309 = vmatprep.mubr.msk.f32.mxu1 %vm12229_vm1, %v12228_v1  ;;  %11341 = vmatprep.mubr.msk.f32.mxu0 %vm12229_vm1, %v12228_v1  ;;  %v4629_v19 = vld [vmem:[%s12690_s13 + $0x54] sm:$0xff] }
 0x214   : > { %v2780_v41 = vpop.f32.mrb[152].mxu1  ;;  %v2955_v42 = vpop.f32.mrb[152].mxu0 }
 0x215   : > { %v2814_v23 = vadd.f32 %v2780_v41, %v13610_v40  ;;  %v13730_v5 = vadd.f32 %v2955_v42, %v2813_v35  ;;  %v10999_v32 = vpop.f32.mrb[153].mxu0  ;;  %11310 = vmatmul.mubr.msk.f32.gmra.mrb[2].mxu1 %vm346_vm2, %v4443_v46  ;;  %11342 = vmatmul.mubr.msk.f32.gmra.mrb[2].mxu0 %vm346_vm2, %v4622_v44  ;;  %v10967_v0 = vpop.f32.mrb[153].mxu1  ;;  %v4450_v35 = vld [vmem:[%s12670_s7 + $0x5c] sm:$0xff] }
 0x216   : > { %11312 = vmatprep.mubr.msk.f32.mxu1 %vm12229_vm1, %v12228_v1  ;;  %11344 = vmatprep.mubr.msk.f32.mxu0 %vm12229_vm1, %v12228_v1  ;;  %v4800_v32 = vld [vmem:[%s12670_s7 + $0xd] sm:$0xff] }
 0x218   : > { %v2785_v60 = vpop.f32.mrb[154].mxu1  ;;  %v2960_v40 = vpop.f32.mrb[154].mxu0 }
 0x219   : > { %v2815_v47 = vadd.f32 %v2785_v60, %v13621_v3  ;;  %v13741_v33 = vadd.f32 %v2960_v40, %v2814_v23  ;;  %v11002_v17 = vpop.f32.mrb[155].mxu0  ;;  %11313 = vmatmul.mubr.msk.f32.gmra.mrb[4].mxu1 %vm346_vm2, %v4444_v26  ;;  %11345 = vmatmul.mubr.msk.f32.gmra.mrb[4].mxu0 %vm346_vm2, %v4623_v50  ;;  %v10970_v51 = vpop.f32.mrb[155].mxu1  ;;  %v4630_v23 = vld [vmem:[%s12690_s13 + $0x5c] sm:$0xff] }
 0x21a   : > { %11315 = vmatprep.mubr.msk.f32.mxu1 %vm12229_vm1, %v12228_v1  ;;  %11347 = vmatprep.mubr.msk.f32.mxu0 %vm12229_vm1, %v12228_v1  ;;  %v4801_v17 = vld [vmem:[%s12670_s7 + $0x15] sm:$0xff]  ;;  %v4980_v51 = vld [vmem:[%s12690_s13 + $0xd] sm:$0xff] }
 0x21c   : > { %v2790_v53 = vpop.f32.mrb[156].mxu1  ;;  %v2965_v3 = vpop.f32.mrb[156].mxu0 }
 0x21d   : > { %v2816_v54 = vadd.f32 %v2790_v53, %v13632_v56  ;;  %v13752_v63 = vadd.f32 %v2965_v3, %v2815_v47  ;;  %v11005_v20 = vpop.f32.mrb[157].mxu0  ;;  %11316 = vmatmul.mubr.msk.f32.gmra.mrb[6].mxu1 %vm346_vm2, %v4445_v18  ;;  %11348 = vmatmul.mubr.msk.f32.gmra.mrb[6].mxu0 %vm346_vm2, %v4624_v52  ;;  %v10973_v61 = vpop.f32.mrb[157].mxu1 }
 0x21e   : > { %11318 = vmatprep.mubr.msk.f32.mxu1 %vm12229_vm1, %v12228_v1  ;;  %11350 = vmatprep.mubr.msk.f32.mxu0 %vm12229_vm1, %v12228_v1  ;;  %v4802_v61 = vld [vmem:[%s12670_s7 + $0x1d] sm:$0xff] }
 0x220   : > { %v2795_v39 = vpop.f32.mrb[158].mxu1  ;;  %v2970_v56 = vpop.f32.mrb[158].mxu0 }
 0x221   : > { %v2817_v38 = vadd.f32 %v2795_v39, %v13643_v43  ;;  %v13763_v13 = vadd.f32 %v2970_v56, %v2816_v54  ;;  %v11008_v11 = vpop.f32.mrb[159].mxu0  ;;  %11319 = vmatmul.mubr.msk.f32.gmra.mrb[8].mxu1 %vm346_vm2, %v4446_v58  ;;  %11351 = vmatmul.mubr.msk.f32.gmra.mrb[8].mxu0 %vm346_vm2, %v4625_v59  ;;  %v10976_v6 = vpop.f32.mrb[159].mxu1  ;;  %v4981_v58 = vld [vmem:[%s12690_s13 + $0x15] sm:$0xff] }
 0x222   : > { %11321 = vmatprep.mubr.msk.f32.mxu1 %vm12229_vm1, %v12228_v1  ;;  %11353 = vmatprep.mubr.msk.f32.mxu0 %vm12229_vm1, %v12228_v1  ;;  %v4803_v6 = vld [vmem:[%s12670_s7 + $0x25] sm:$0xff] }
 0x224   : > { %v2800_v55 = vpop.f32.mrb[160].mxu1  ;;  %v2975_v43 = vpop.f32.mrb[160].mxu0 }
 0x225   : > { %v2818_v16 = vadd.f32 %v2800_v55, %v13654_v2  ;;  %v13774_v7 = vadd.f32 %v2975_v43, %v2817_v38  ;;  %v11011_v9 = vpop.f32.mrb[161].mxu0  ;;  %11322 = vmatmul.mubr.msk.f32.gmra.mrb[10].mxu1 %vm346_vm2, %v4447_v4  ;;  %11354 = vmatmul.mubr.msk.f32.gmra.mrb[10].mxu0 %vm346_vm2, %v4626_v49  ;;  %v10979_v45 = vpop.f32.mrb[161].mxu1  ;;  %v4982_v4 = vld [vmem:[%s12690_s13 + $0x1d] sm:$0xff] }
 0x226   : > { %11324 = vmatprep.mubr.msk.f32.mxu1 %vm12229_vm1, %v12228_v1  ;;  %11356 = vmatprep.mubr.msk.f32.mxu0 %vm12229_vm1, %v12228_v1  ;;  %v4804_v45 = vld [vmem:[%s12670_s7 + $0x2d] sm:$0xff] }
 0x228   : > { %v2805_v15 = vpop.f32.mrb[162].mxu1  ;;  %v2980_v2 = vpop.f32.mrb[162].mxu0 }
 0x229   : > { %v2819_v21 = vadd.f32 %v2805_v15, %v13664_v34  ;;  %v13785_v29 = vadd.f32 %v2980_v2, %v2818_v16  ;;  %v11014_v24 = vpop.f32.mrb[163].mxu0  ;;  %11325 = vmatmul.mubr.msk.f32.gmra.mrb[12].mxu1 %vm346_vm2, %v4448_v57  ;;  %11357 = vmatmul.mubr.msk.f32.gmra.mrb[12].mxu0 %vm346_vm2, %v4627_v8  ;;  %v10982_v27 = vpop.f32.mrb[163].mxu1  ;;  %v4983_v57 = vld [vmem:[%s12690_s13 + $0x25] sm:$0xff] }
 0x22a   : > { %11327 = vmatprep.mubr.msk.f32.mxu1 %vm12229_vm1, %v12228_v1  ;;  %11359 = vmatprep.mubr.msk.f32.mxu0 %vm12229_vm1, %v12228_v1  ;;  %v4805_v27 = vld [vmem:[%s12670_s7 + $0x35] sm:$0xff] }
 0x22c   : > { %v2985_v30 = vpop.f32.mrb[164].mxu0  ;;  %v3115_v34 = vpop.f32.mrb[164].mxu1 }
 0x22d   : > { %v13795_v36 = vadd.f32 %v2985_v30, %v2819_v21  ;;  %v3169_v48 = vadd.f32 %v3115_v34, %v13676_v14  ;;  %v11017_v37 = vpop.f32.mrb[165].mxu0  ;;  %11328 = vmatmul.mubr.msk.f32.gmra.mrb[14].mxu1 %vm346_vm2, %v4449_v10  ;;  %11360 = vmatmul.mubr.msk.f32.gmra.mrb[14].mxu0 %vm346_vm2, %v4628_v31  ;;  %v11022_v12 = vpop.f32.mrb[165].mxu1  ;;  %v4984_v10 = vld [vmem:[%s12690_s13 + $0x2d] sm:$0xff] }
 0x22e   : > { %11330 = vmatprep.mubr.msk.f32.mxu1 %vm12229_vm1, %v12228_v1  ;;  %11362 = vmatprep.mubr.msk.f32.mxu0 %vm12229_vm1, %v12228_v1  ;;  %v4806_v12 = vld [vmem:[%s12670_s7 + $0x3d] sm:$0xff] }
 0x230   : > { %v3120_v22 = vpop.f32.mrb[166].mxu1  ;;  %v3295_v46 = vpop.f32.mrb[166].mxu0 }
 0x231   : > { %v3170_v14 = vadd.f32 %v3120_v22, %v13690_v25  ;;  %v13807_v44 = vadd.f32 %v3295_v46, %v3169_v48  ;;  %v11057_v41 = vpop.f32.mrb[167].mxu0  ;;  %11331 = vmatmul.mubr.msk.f32.gmra.mrb[16].mxu1 %vm346_vm2, %v4450_v35  ;;  %11363 = vmatmul.mubr.msk.f32.gmra.mrb[16].mxu0 %vm346_vm2, %v4629_v19  ;;  %v11025_v42 = vpop.f32.mrb[167].mxu1  ;;  %v9616_v25 = vld [vmem:[%s15456_s4 + $0x6c] sm:$0x7]  ;;  %v4985_v35 = vld [vmem:[%s12690_s13 + $0x35] sm:$0xff] }
 0x232   : > { %11365 = vmatprep.mubr.msk.f32.mxu0 %vm12229_vm1, %v12228_v1  ;;  %11370 = vmatprep.mubr.msk.f32.mxu1 %vm12229_vm1, %v12228_v1  ;;  %v4807_v42 = vld [vmem:[%s12670_s7 + $0x45] sm:$0xff] }
 0x234   : > { %v3125_v0 = vpop.f32.mrb[168].mxu1  ;;  %v3300_v26 = vpop.f32.mrb[168].mxu0 }
 0x235   : > { %v3171_v50 = vadd.f32 %v3125_v0, %v13706_v28  ;;  %v13821_v60 = vadd.f32 %v3300_v26, %v3170_v14  ;;  %v11060_v40 = vpop.f32.mrb[169].mxu0  ;;  %11366 = vmatmul.mubr.msk.f32.gmra.mrb[18].mxu0 %vm346_vm2, %v4630_v23  ;;  %11371 = vmatmul.mubr.msk.f32.vlgmr.msra.gmra.mrb[18].mxu1 %vm346_vm2, %v4800_v32  ;;  %v11028_v47 = vpop.f32.mrb[169].mxu1  ;;  %v9629_v28 = vld [vmem:[%s15456_s4 + $0x70] sm:$0x7]  ;;  %v4986_v23 = vld [vmem:[%s12690_s13 + $0x3d] sm:$0xff] }
 0x236   : > { %11439 = vmatpush3.msk.msra.mxu1 %vm380_vm0, %v9616_v25  ;;  %11373 = vmatprep.mubr.msk.f32.mxu1 %vm12229_vm1, %v12228_v1  ;;  %v4808_v40 = vld [vmem:[%s12670_s7 + $0x4d] sm:$0xff]  ;;  %v4987_v47 = vld [vmem:[%s12690_s13 + $0x45] sm:$0xff] }
 0x237   : > { %11405 = vmatprep.mubr.msk.f32.mxu0 %vm12229_vm1, %v12228_v1  ;;  %11508 = vmatprep.subr.mxu1 %v12228_v1 }
 0x238   : > { %v3130_v18 = vpop.f32.mrb[170].mxu1  ;;  %v3305_v52 = vpop.f32.mrb[170].mxu0 }
 0x239   : > { %v3172_v53 = vadd.f32 %v3130_v18, %v13719_v62  ;;  %v13837_v3 = vadd.f32 %v3305_v52, %v3171_v50  ;;  %v11063_v54 = vpop.f32.mrb[171].mxu0  ;;  %11374 = vmatmul.mubr.msk.f32.gmra.mrb[20].mxu1 %vm346_vm2, %v4801_v17  ;;  %11406 = vmatmul.mubr.msk.f32.vlgmr.msra.gmra.mrb[20].mxu0 %vm346_vm2, %v4980_v51  ;;  %v11031_v20 = vpop.f32.mrb[171].mxu1 }
 0x23a   : > { %11474 = vmatpush3.msk.msra.mxu0 %vm380_vm0, %v9629_v28  ;;  %11376 = vmatprep.mubr.msk.f32.mxu1 %vm12229_vm1, %v12228_v1  ;;  %v4988_v54 = vld [vmem:[%s12690_s13 + $0x4d] sm:$0xff] }
 0x23b   : > { %11408 = vmatprep.mubr.msk.f32.mxu0 %vm12229_vm1, %v12228_v1  ;;  %11543 = vmatprep.subr.mxu0 %v12228_v1 }
 0x23c   : > { %v3135_v62 = vpop.f32.mrb[172].mxu1  ;;  %v3310_v59 = vpop.f32.mrb[172].mxu0 }
 0x23d   : > { %v3173_v39 = vadd.f32 %v3135_v62, %v13730_v5  ;;  %v13850_v56 = vadd.f32 %v3310_v59, %v3172_v53  ;;  %v11066_v38 = vpop.f32.mrb[173].mxu0  ;;  %11377 = vmatmul.mubr.msk.f32.gmra.mrb[22].mxu1 %vm346_vm2, %v4802_v61  ;;  %11409 = vmatmul.mubr.msk.f32.gmra.mrb[22].mxu0 %vm346_vm2, %v4981_v58  ;;  %v11034_v11 = vpop.f32.mrb[173].mxu1  ;;  %v4809_v53 = vld [vmem:[%s12670_s7 + $0x55] sm:$0xff] }
 0x23e   : > { %11379 = vmatprep.mubr.msk.f32.mxu1 %vm12229_vm1, %v12228_v1  ;;  %11411 = vmatprep.mubr.msk.f32.mxu0 %vm12229_vm1, %v12228_v1  ;;  %v4989_v38 = vld [vmem:[%s12690_s13 + $0x55] sm:$0xff] }
 0x240   : > { %v3140_v49 = vpop.f32.mrb[174].mxu1  ;;  %v3315_v5 = vpop.f32.mrb[174].mxu0 }
 0x241   : > { %v3174_v55 = vadd.f32 %v3140_v49, %v13741_v33  ;;  %v13861_v43 = vadd.f32 %v3315_v5, %v3173_v39  ;;  %v11069_v16 = vpop.f32.mrb[175].mxu0  ;;  %11380 = vmatmul.mubr.msk.f32.gmra.mrb[24].mxu1 %vm346_vm2, %v4803_v6  ;;  %11412 = vmatmul.mubr.msk.f32.gmra.mrb[24].mxu0 %vm346_vm2, %v4982_v4  ;;  %v11037_v9 = vpop.f32.mrb[175].mxu1  ;;  %v4810_v39 = vld [vmem:[%s12670_s7 + $0x5d] sm:$0xff] }
 0x242   : > { %11382 = vmatprep.mubr.msk.f32.mxu1 %vm12229_vm1, %v12228_v1  ;;  %11414 = vmatprep.mubr.msk.f32.mxu0 %vm12229_vm1, %v12228_v1  ;;  %v5160_v16 = vld [vmem:[%s12670_s7 + $0xe] sm:$0xff] }
 0x244   : > { %v3145_v8 = vpop.f32.mrb[176].mxu1  ;;  %v3320_v33 = vpop.f32.mrb[176].mxu0 }
 0x245   : > { %v3175_v15 = vadd.f32 %v3145_v8, %v13752_v63  ;;  %v13872_v2 = vadd.f32 %v3320_v33, %v3174_v55  ;;  %v11072_v21 = vpop.f32.mrb[177].mxu0  ;;  %11383 = vmatmul.mubr.msk.f32.gmra.mrb[26].mxu1 %vm346_vm2, %v4804_v45  ;;  %11415 = vmatmul.mubr.msk.f32.gmra.mrb[26].mxu0 %vm346_vm2, %v4983_v57  ;;  %v11040_v24 = vpop.f32.mrb[177].mxu1  ;;  %v4990_v55 = vld [vmem:[%s12690_s13 + $0x5d] sm:$0xff] }
 0x246   : > { %11385 = vmatprep.mubr.msk.f32.mxu1 %vm12229_vm1, %v12228_v1  ;;  %11417 = vmatprep.mubr.msk.f32.mxu0 %vm12229_vm1, %v12228_v1  ;;  %v5161_v21 = vld [vmem:[%s12670_s7 + $0x16] sm:$0xff] }
 0x247   : > { %v5340_v24 = vld [vmem:[%s12344_s12 + $0x16] sm:$0xff] }
 0x248   : > { %v3150_v31 = vpop.f32.mrb[178].mxu1  ;;  %v3325_v63 = vpop.f32.mrb[178].mxu0 }
 0x249   : > { %v3176_v30 = vadd.f32 %v3150_v31, %v13763_v13  ;;  %v13883_v34 = vadd.f32 %v3325_v63, %v3175_v15  ;;  %v11075_v48 = vpop.f32.mrb[179].mxu0  ;;  %11386 = vmatmul.mubr.msk.f32.gmra.mrb[28].mxu1 %vm346_vm2, %v4805_v27  ;;  %11418 = vmatmul.mubr.msk.f32.gmra.mrb[28].mxu0 %vm346_vm2, %v4984_v10  ;;  %v11043_v37 = vpop.f32.mrb[179].mxu1 }
 0x24a   : > { %11388 = vmatprep.mubr.msk.f32.mxu1 %vm12229_vm1, %v12228_v1  ;;  %11420 = vmatprep.mubr.msk.f32.mxu0 %vm12229_vm1, %v12228_v1  ;;  %v5162_v37 = vld [vmem:[%s12670_s7 + $0x1e] sm:$0xff] }
 0x24c   : > { %v3155_v19 = vpop.f32.mrb[180].mxu1  ;;  %v3330_v13 = vpop.f32.mrb[180].mxu0 }
 0x24d   : > { %v3177_v22 = vadd.f32 %v3155_v19, %v13774_v7  ;;  %v13894_v46 = vadd.f32 %v3330_v13, %v3176_v30  ;;  %v11078_v14 = vpop.f32.mrb[181].mxu0  ;;  %11389 = vmatmul.mubr.msk.f32.gmra.mrb[30].mxu1 %vm346_vm2, %v4806_v12  ;;  %11421 = vmatmul.mubr.msk.f32.gmra.mrb[30].mxu0 %vm346_vm2, %v4985_v35  ;;  %v11046_v41 = vpop.f32.mrb[181].mxu1  ;;  %v5341_v12 = vld [vmem:[%s12344_s12 + $0x1e] sm:$0xff] }
 0x24e   : > { %11391 = vmatprep.mubr.msk.f32.mxu1 %vm12229_vm1, %v12228_v1  ;;  %11423 = vmatprep.mubr.msk.f32.mxu0 %vm12229_vm1, %v12228_v1  ;;  %v5163_v41 = vld [vmem:[%s12670_s7 + $0x26] sm:$0xff] }
 0x250   : > { %v3160_v32 = vpop.f32.mrb[182].mxu1  ;;  %v3335_v7 = vpop.f32.mrb[182].mxu0 }
 0x251   : > { %v3178_v25 = vadd.f32 %v3160_v32, %v13785_v29  ;;  %v13905_v0 = vadd.f32 %v3335_v7, %v3177_v22  ;;  %v11081_v26 = vpop.f32.mrb[183].mxu0  ;;  %11392 = vmatmul.mubr.msk.f32.gmra.mrb[32].mxu1 %vm346_vm2, %v4807_v42  ;;  %11424 = vmatmul.mubr.msk.f32.gmra.mrb[32].mxu0 %vm346_vm2, %v4986_v23  ;;  %v11049_v50 = vpop.f32.mrb[183].mxu1  ;;  %v5342_v42 = vld [vmem:[%s12344_s12 + $0x26] sm:$0xff] }
 0x252   : > { %11394 = vmatprep.mubr.msk.f32.mxu1 %vm12229_vm1, %v12228_v1  ;;  %11426 = vmatprep.mubr.msk.f32.mxu0 %vm12229_vm1, %v12228_v1  ;;  %v5164_v50 = vld [vmem:[%s12670_s7 + $0x2e] sm:$0xff] }
 0x254   : > { %v3165_v17 = vpop.f32.mrb[184].mxu1  ;;  %v3340_v29 = vpop.f32.mrb[184].mxu0 }
 0x255   : > { %v3179_v51 = vadd.f32 %v3165_v17, %v13795_v36  ;;  %v13916_v28 = vadd.f32 %v3340_v29, %v3178_v25  ;;  %v11084_v18 = vpop.f32.mrb[185].mxu0  ;;  %11395 = vmatmul.mubr.msk.f32.gmra.mrb[34].mxu1 %vm346_vm2, %v4808_v40  ;;  %11427 = vmatmul.mubr.msk.f32.gmra.mrb[34].mxu0 %vm346_vm2, %v4987_v47  ;;  %v11052_v52 = vpop.f32.mrb[185].mxu1  ;;  %v5343_v40 = vld [vmem:[%s12344_s12 + $0x2e] sm:$0xff] }
 0x256   : > { %11397 = vmatprep.mubr.msk.f32.mxu1 %vm12229_vm1, %v12228_v1  ;;  %11429 = vmatprep.mubr.msk.f32.mxu0 %vm12229_vm1, %v12228_v1  ;;  %v5165_v52 = vld [vmem:[%s12670_s7 + $0x36] sm:$0xff] }
 0x258   : > { %v3345_v20 = vpop.f32.mrb[186].mxu0  ;;  %v3475_v36 = vpop.f32.mrb[186].mxu1 }
 0x259   : > { %v13926_v61 = vadd.f32 %v3345_v20, %v3179_v51  ;;  %v3529_v58 = vadd.f32 %v3475_v36, %v13807_v44  ;;  %v11087_v62 = vpop.f32.mrb[187].mxu0  ;;  %11398 = vmatmul.mubr.msk.f32.gmra.mrb[36].mxu1 %vm346_vm2, %v4809_v53  ;;  %11430 = vmatmul.mubr.msk.f32.gmra.mrb[36].mxu0 %vm346_vm2, %v4988_v54  ;;  %v11092_v59 = vpop.f32.mrb[187].mxu1  ;;  %v5344_v53 = vld [vmem:[%s12344_s12 + $0x36] sm:$0xff] }
 0x25a   : > { %11400 = vmatprep.mubr.msk.f32.mxu1 %vm12229_vm1, %v12228_v1  ;;  %11432 = vmatprep.mubr.msk.f32.mxu0 %vm12229_vm1, %v12228_v1  ;;  %v5166_v59 = vld [vmem:[%s12670_s7 + $0x3e] sm:$0xff] }
 0x25c   : > { %v3480_v11 = vpop.f32.mrb[188].mxu1  ;;  %v3655_v6 = vpop.f32.mrb[188].mxu0 }
 0x25d   : > { %v3530_v44 = vadd.f32 %v3480_v11, %v13821_v60  ;;  %v13938_v4 = vadd.f32 %v3655_v6, %v3529_v58  ;;  %v11127_v49 = vpop.f32.mrb[189].mxu0  ;;  %11401 = vmatmul.mubr.msk.f32.gmra.mrb[38].mxu1 %vm346_vm2, %v4810_v39  ;;  %11433 = vmatmul.mubr.msk.f32.gmra.mrb[38].mxu0 %vm346_vm2, %v4989_v38  ;;  %v11095_v5 = vpop.f32.mrb[189].mxu1  ;;  %v9642_v60 = vld [vmem:[%s15456_s4 + $0x74] sm:$0x7]  ;;  %v5345_v39 = vld [vmem:[%s12344_s12 + $0x3e] sm:$0xff] }
 0x25e   : > { %11435 = vmatprep.mubr.msk.f32.mxu0 %vm12229_vm1, %v12228_v1  ;;  %11440 = vmatprep.mubr.msk.f32.mxu1 %vm12229_vm1, %v12228_v1  ;;  %v5167_v5 = vld [vmem:[%s12670_s7 + $0x46] sm:$0xff] }
 0x260   : > { %v3485_v9 = vpop.f32.mrb[190].mxu1  ;;  %v3660_v45 = vpop.f32.mrb[190].mxu0 }
 0x261   : > { %v3531_v57 = vadd.f32 %v3485_v9, %v13837_v3  ;;  %v13952_v8 = vadd.f32 %v3660_v45, %v3530_v44  ;;  %v11130_v33 = vpop.f32.mrb[191].mxu0  ;;  %11436 = vmatmul.mubr.msk.f32.gmra.mrb[40].mxu0 %vm346_vm2, %v4990_v55  ;;  %11441 = vmatmul.mubr.msk.f32.vlgmr.msra.gmra.mrb[40].mxu1 %vm346_vm2, %v5160_v16  ;;  %v11098_v15 = vpop.f32.mrb[191].mxu1  ;;  %v9655_v3 = vld [vmem:[%s15456_s4 + $0x78] sm:$0x7]  ;;  %v5346_v55 = vld [vmem:[%s12344_s12 + $0x46] sm:$0xff] }
 0x262   : > { %11509 = vmatpush3.msk.msra.mxu1 %vm380_vm0, %v9642_v60  ;;  %11443 = vmatprep.mubr.msk.f32.mxu1 %vm12229_vm1, %v12228_v1  ;;  %v5168_v33 = vld [vmem:[%s12670_s7 + $0x4e] sm:$0xff] }
 0x263   : > { %11475 = vmatprep.mubr.msk.f32.mxu0 %vm12229_vm1, %v12228_v1  ;;  %11578 = vmatprep.subr.mxu1 %v12228_v1  ;;  %v5347_v15 = vld [vmem:[%s12344_s12 + $0x4e] sm:$0xff] }
 0x264   : > { %v3490_v27 = vpop.f32.mrb[192].mxu1  ;;  %v3665_v10 = vpop.f32.mrb[192].mxu0 }
 0x265   : > { %v3532_v31 = vadd.f32 %v3490_v27, %v13850_v56  ;;  %v13968_v63 = vadd.f32 %v3665_v10, %v3531_v57  ;;  %v11133_v30 = vpop.f32.mrb[193].mxu0  ;;  %11444 = vmatmul.mubr.msk.f32.gmra.mrb[42].mxu1 %vm346_vm2, %v5161_v21  ;;  %11476 = vmatmul.mubr.msk.f32.vlgmr.msra.gmra.mrb[42].mxu0 %vm346_vm2, %v5340_v24  ;;  %v11101_v48 = vpop.f32.mrb[193].mxu1 }
 0x266   : > { %11544 = vmatpush3.msk.msra.mxu0 %vm380_vm0, %v9655_v3  ;;  %11446 = vmatprep.mubr.msk.f32.mxu1 %vm12229_vm1, %v12228_v1  ;;  %v5348_v30 = vld [vmem:[%s12344_s12 + $0x56] sm:$0xff] }
 0x267   : > { %11478 = vmatprep.mubr.msk.f32.mxu0 %vm12229_vm1, %v12228_v1  ;;  %11613 = vmatprep.subr.mxu0 %v12228_v1 }
 0x268   : > { %v3495_v56 = vpop.f32.mrb[194].mxu1  ;;  %v3670_v35 = vpop.f32.mrb[194].mxu0 }
 0x269   : > { %v3533_v19 = vadd.f32 %v3495_v56, %v13861_v43  ;;  %v13981_v13 = vadd.f32 %v3670_v35, %v3532_v31  ;;  %v11136_v22 = vpop.f32.mrb[195].mxu0  ;;  %11447 = vmatmul.mubr.msk.f32.gmra.mrb[44].mxu1 %vm346_vm2, %v5162_v37  ;;  %11479 = vmatmul.mubr.msk.f32.gmra.mrb[44].mxu0 %vm346_vm2, %v5341_v12  ;;  %v11104_v14 = vpop.f32.mrb[195].mxu1  ;;  %v5169_v31 = vld [vmem:[%s12670_s7 + $0x56] sm:$0xff] }
 0x26a   : > { %11449 = vmatprep.mubr.msk.f32.mxu1 %vm12229_vm1, %v12228_v1  ;;  %11481 = vmatprep.mubr.msk.f32.mxu0 %vm12229_vm1, %v12228_v1  ;;  %v5349_v22 = vld [vmem:[%s12344_s12 + $0x5e] sm:$0xff] }
 0x26c   : > { %v3500_v23 = vpop.f32.mrb[196].mxu1  ;;  %v3675_v43 = vpop.f32.mrb[196].mxu0 }
 0x26d   : > { %v3534_v32 = vadd.f32 %v3500_v23, %v13872_v2  ;;  %v13992_v7 = vadd.f32 %v3675_v43, %v3533_v19  ;;  %v11139_v25 = vpop.f32.mrb[197].mxu0  ;;  %11450 = vmatmul.mubr.msk.f32.gmra.mrb[46].mxu1 %vm346_vm2, %v5163_v41  ;;  %11482 = vmatmul.mubr.msk.f32.gmra.mrb[46].mxu0 %vm346_vm2, %v5342_v42  ;;  %v11107_v26 = vpop.f32.mrb[197].mxu1  ;;  %v5170_v19 = vld [vmem:[%s12670_s7 + $0x5e] sm:$0xff] }
 0x26e   : > { %11452 = vmatprep.mubr.msk.f32.mxu1 %vm12229_vm1, %v12228_v1  ;;  %11484 = vmatprep.mubr.msk.f32.mxu0 %vm12229_vm1, %v12228_v1  ;;  %v5520_v25 = vld [vmem:[%s12294_s29 + $0x16] sm:$0xff] }
 0x270   : > { %v3505_v47 = vpop.f32.mrb[198].mxu1  ;;  %v3680_v2 = vpop.f32.mrb[198].mxu0 }
 0x271   : > { %v3535_v17 = vadd.f32 %v3505_v47, %v13883_v34  ;;  %v14003_v29 = vadd.f32 %v3680_v2, %v3534_v32  ;;  %v11142_v51 = vpop.f32.mrb[199].mxu0  ;;  %11453 = vmatmul.mubr.msk.f32.gmra.mrb[48].mxu1 %vm346_vm2, %v5164_v50  ;;  %11485 = vmatmul.mubr.msk.f32.gmra.mrb[48].mxu0 %vm346_vm2, %v5343_v40  ;;  %v11110_v18 = vpop.f32.mrb[199].mxu1  ;;  %v5350_v32 = vld [vmem:[%s12344_s12 + $0x66] sm:$0xff] }
 0x272   : > { %11455 = vmatprep.mubr.msk.f32.mxu1 %vm12229_vm1, %v12228_v1  ;;  %11487 = vmatprep.mubr.msk.f32.mxu0 %vm12229_vm1, %v12228_v1  ;;  %v5521_v51 = vld [vmem:[%s12294_s29 + $0x1e] sm:$0xff] }
 0x273   : > { %v5700_v18 = vld [vmem:[%s12344_s12 + $0x17] sm:$0xff] }
 0x274   : > { %v3510_v54 = vpop.f32.mrb[200].mxu1  ;;  %v3685_v34 = vpop.f32.mrb[200].mxu0 }
 0x275   : > { %v3536_v20 = vadd.f32 %v3510_v54, %v13894_v46  ;;  %v14014_v36 = vadd.f32 %v3685_v34, %v3535_v17  ;;  %v11145_v58 = vpop.f32.mrb[201].mxu0  ;;  %11456 = vmatmul.mubr.msk.f32.gmra.mrb[50].mxu1 %vm346_vm2, %v5165_v52  ;;  %11488 = vmatmul.mubr.msk.f32.gmra.mrb[50].mxu0 %vm346_vm2, %v5344_v53  ;;  %v11113_v62 = vpop.f32.mrb[201].mxu1 }
 0x276   : > { %11458 = vmatprep.mubr.msk.f32.mxu1 %vm12229_vm1, %v12228_v1  ;;  %11490 = vmatprep.mubr.msk.f32.mxu0 %vm12229_vm1, %v12228_v1  ;;  %v5522_v62 = vld [vmem:[%s12294_s29 + $0x26] sm:$0xff] }
 0x278   : > { %v3515_v38 = vpop.f32.mrb[202].mxu1  ;;  %v3690_v46 = vpop.f32.mrb[202].mxu0 }
 0x279   : > { %v3537_v11 = vadd.f32 %v3515_v38, %v13905_v0  ;;  %v14025_v6 = vadd.f32 %v3690_v46, %v3536_v20  ;;  %v11148_v44 = vpop.f32.mrb[203].mxu0  ;;  %11459 = vmatmul.mubr.msk.f32.gmra.mrb[52].mxu1 %vm346_vm2, %v5166_v59  ;;  %11491 = vmatmul.mubr.msk.f32.gmra.mrb[52].mxu0 %vm346_vm2, %v5345_v39  ;;  %v11116_v49 = vpop.f32.mrb[203].mxu1  ;;  %v5701_v59 = vld [vmem:[%s12344_s12 + $0x1f] sm:$0xff] }
 0x27a   : > { %11461 = vmatprep.mubr.msk.f32.mxu1 %vm12229_vm1, %v12228_v1  ;;  %11493 = vmatprep.mubr.msk.f32.mxu0 %vm12229_vm1, %v12228_v1  ;;  %v5523_v49 = vld [vmem:[%s12294_s29 + $0x2e] sm:$0xff] }
 0x27c   : > { %v3520_v16 = vpop.f32.mrb[204].mxu1  ;;  %v3695_v0 = vpop.f32.mrb[204].mxu0 }
 0x27d   : > { %v3538_v60 = vadd.f32 %v3520_v16, %v13916_v28  ;;  %v14036_v9 = vadd.f32 %v3695_v0, %v3537_v11  ;;  %v11151_v45 = vpop.f32.mrb[205].mxu0  ;;  %11462 = vmatmul.mubr.msk.f32.gmra.mrb[54].mxu1 %vm346_vm2, %v5167_v5  ;;  %11494 = vmatmul.mubr.msk.f32.gmra.mrb[54].mxu0 %vm346_vm2, %v5346_v55  ;;  %v11119_v57 = vpop.f32.mrb[205].mxu1  ;;  %v5702_v5 = vld [vmem:[%s12344_s12 + $0x27] sm:$0xff] }
 0x27e   : > { %11464 = vmatprep.mubr.msk.f32.mxu1 %vm12229_vm1, %v12228_v1  ;;  %11496 = vmatprep.mubr.msk.f32.mxu0 %vm12229_vm1, %v12228_v1  ;;  %v5524_v57 = vld [vmem:[%s12294_s29 + $0x36] sm:$0xff] }
 0x280   : > { %v3525_v21 = vpop.f32.mrb[206].mxu1  ;;  %v3700_v28 = vpop.f32.mrb[206].mxu0 }
 0x281   : > { %v3539_v24 = vadd.f32 %v3525_v21, %v13926_v61  ;;  %v14047_v3 = vadd.f32 %v3700_v28, %v3538_v60  ;;  %v11154_v27 = vpop.f32.mrb[207].mxu0  ;;  %11465 = vmatmul.mubr.msk.f32.gmra.mrb[56].mxu1 %vm346_vm2, %v5168_v33  ;;  %11497 = vmatmul.mubr.msk.f32.gmra.mrb[56].mxu0 %vm346_vm2, %v5347_v15  ;;  %v11122_v10 = vpop.f32.mrb[207].mxu1  ;;  %v5703_v33 = vld [vmem:[%s12344_s12 + $0x2f] sm:$0xff] }
 0x282   : > { %11467 = vmatprep.mubr.msk.f32.mxu1 %vm12229_vm1, %v12228_v1  ;;  %11499 = vmatprep.mubr.msk.f32.mxu0 %vm12229_vm1, %v12228_v1  ;;  %v5525_v10 = vld [vmem:[%s12294_s29 + $0x3e] sm:$0xff] }
 0x284   : > { %v3705_v48 = vpop.f32.mrb[208].mxu0  ;;  %v3835_v61 = vpop.f32.mrb[208].mxu1 }
 0x285   : > { %v14057_v37 = vadd.f32 %v3705_v48, %v3539_v24  ;;  %v3889_v12 = vadd.f32 %v3835_v61, %v13938_v4  ;;  %v11157_v56 = vpop.f32.mrb[209].mxu0  ;;  %11468 = vmatmul.mubr.msk.f32.gmra.mrb[58].mxu1 %vm346_vm2, %v5169_v31  ;;  %11500 = vmatmul.mubr.msk.f32.gmra.mrb[58].mxu0 %vm346_vm2, %v5348_v30  ;;  %v11162_v35 = vpop.f32.mrb[209].mxu1  ;;  %v5704_v31 = vld [vmem:[%s12344_s12 + $0x37] sm:$0xff] }
 0x286   : > { %11470 = vmatprep.mubr.msk.f32.mxu1 %vm12229_vm1, %v12228_v1  ;;  %11502 = vmatprep.mubr.msk.f32.mxu0 %vm12229_vm1, %v12228_v1  ;;  %v5526_v35 = vld [vmem:[%s12294_s29 + $0x46] sm:$0xff] }
 0x288   : > { %v3840_v14 = vpop.f32.mrb[210].mxu1  ;;  %v4015_v41 = vpop.f32.mrb[210].mxu0 }
 0x289   : > { %v3890_v4 = vadd.f32 %v3840_v14, %v13952_v8  ;;  %v14069_v42 = vadd.f32 %v4015_v41, %v3889_v12  ;;  %v11197_v23 = vpop.f32.mrb[211].mxu0  ;;  %11471 = vmatmul.mubr.msk.f32.gmra.mrb[60].mxu1 %vm346_vm2, %v5170_v19  ;;  %11503 = vmatmul.mubr.msk.f32.gmra.mrb[60].mxu0 %vm346_vm2, %v5349_v22  ;;  %v11165_v43 = vpop.f32.mrb[211].mxu1  ;;  %v9668_v8 = vld [vmem:[%s15456_s4 + $0x7c] sm:$0x7]  ;;  %v5705_v19 = vld [vmem:[%s12344_s12 + $0x3f] sm:$0xff] }
 0x28a   : > { %11505 = vmatprep.mubr.msk.f32.mxu0 %vm12229_vm1, %v12228_v1  ;;  %11510 = vmatprep.mubr.msk.f32.mxu1 %vm12229_vm1, %v12228_v1  ;;  %v5527_v43 = vld [vmem:[%s12294_s29 + $0x4e] sm:$0xff] }
 0x28c   : > { %v3845_v26 = vpop.f32.mrb[212].mxu1  ;;  %v4020_v50 = vpop.f32.mrb[212].mxu0 }
 0x28d   : > { %v3891_v40 = vadd.f32 %v3845_v26, %v13968_v63  ;;  %v14083_v47 = vadd.f32 %v4020_v50, %v3890_v4  ;;  %v11200_v2 = vpop.f32.mrb[213].mxu0  ;;  %11506 = vmatmul.mubr.msk.f32.gmra.mrb[62].mxu0 %vm346_vm2, %v5350_v32  ;;  %11511 = vmatmul.mubr.msk.f32.vlgmr.msra.gmra.mrb[62].mxu1 %vm346_vm2, %v5520_v25  ;;  %v11168_v17 = vpop.f32.mrb[213].mxu1  ;;  %v9681_v63 = vld [vmem:[%s15456_s4 + $0x80] sm:$0x7]  ;;  %v5706_v32 = vld [vmem:[%s12344_s12 + $0x47] sm:$0xff] }
 0x28e   : > { %11579 = vmatpush3.msk.msra.mxu1 %vm380_vm0, %v9668_v8  ;;  %11513 = vmatprep.mubr.msk.f32.mxu1 %vm12229_vm1, %v12228_v1  ;;  %v5528_v2 = vld [vmem:[%s12294_s29 + $0x56] sm:$0xff] }
 0x28f   : > { %11545 = vmatprep.mubr.msk.f32.mxu0 %vm12229_vm1, %v12228_v1  ;;  %11648 = vmatprep.subr.mxu1 %v12228_v1  ;;  %v5707_v17 = vld [vmem:[%s12344_s12 + $0x4f] sm:$0xff] }
 0x290   : > { %v3850_v52 = vpop.f32.mrb[214].mxu1  ;;  %v4025_v53 = vpop.f32.mrb[214].mxu0 }
 0x291   : > { %v3892_v54 = vadd.f32 %v3850_v52, %v13981_v13  ;;  %v14099_v34 = vadd.f32 %v4025_v53, %v3891_v40  ;;  %v11203_v20 = vpop.f32.mrb[215].mxu0  ;;  %11514 = vmatmul.mubr.msk.f32.gmra.mrb[64].mxu1 %vm346_vm2, %v5521_v51  ;;  %11546 = vmatmul.mubr.msk.f32.vlgmr.msra.gmra.mrb[64].mxu0 %vm346_vm2, %v5700_v18  ;;  %v11171_v58 = vpop.f32.mrb[215].mxu1 }
 0x292   : > { %11614 = vmatpush3.msk.msra.mxu0 %vm380_vm0, %v9681_v63  ;;  %11516 = vmatprep.mubr.msk.f32.mxu1 %vm12229_vm1, %v12228_v1  ;;  %v5708_v20 = vld [vmem:[%s12344_s12 + $0x57] sm:$0xff] }
 0x293   : > { %11548 = vmatprep.mubr.msk.f32.mxu0 %vm12229_vm1, %v12228_v1  ;;  %11683 = vmatprep.subr.mxu0 %v12228_v1 }
 0x294   : > { %v3855_v13 = vpop.f32.mrb[216].mxu1  ;;  %v4030_v39 = vpop.f32.mrb[216].mxu0 }
 0x295   : > { %v3893_v38 = vadd.f32 %v3855_v13, %v13992_v7  ;;  %v14112_v46 = vadd.f32 %v4030_v39, %v3892_v54  ;;  %v11206_v11 = vpop.f32.mrb[217].mxu0  ;;  %11517 = vmatmul.mubr.msk.f32.gmra.mrb[66].mxu1 %vm346_vm2, %v5522_v62  ;;  %11549 = vmatmul.mubr.msk.f32.gmra.mrb[66].mxu0 %vm346_vm2, %v5701_v59  ;;  %v11174_v44 = vpop.f32.mrb[217].mxu1  ;;  %v5529_v54 = vld [vmem:[%s12294_s29 + $0x5e] sm:$0xff] }
 0x296   : > { %11519 = vmatprep.mubr.msk.f32.mxu1 %vm12229_vm1, %v12228_v1  ;;  %11551 = vmatprep.mubr.msk.f32.mxu0 %vm12229_vm1, %v12228_v1  ;;  %v5709_v11 = vld [vmem:[%s12344_s12 + $0x5f] sm:$0xff] }
 0x298   : > { %v3860_v55 = vpop.f32.mrb[218].mxu1  ;;  %v4035_v7 = vpop.f32.mrb[218].mxu0 }
 0x299   : > { %v3894_v16 = vadd.f32 %v3860_v55, %v14003_v29  ;;  %v14123_v0 = vadd.f32 %v4035_v7, %v3893_v38  ;;  %v11209_v60 = vpop.f32.mrb[219].mxu0  ;;  %11520 = vmatmul.mubr.msk.f32.gmra.mrb[68].mxu1 %vm346_vm2, %v5523_v49  ;;  %11552 = vmatmul.mubr.msk.f32.gmra.mrb[68].mxu0 %vm346_vm2, %v5702_v5  ;;  %v11177_v45 = vpop.f32.mrb[219].mxu1  ;;  %v5530_v38 = vld [vmem:[%s12294_s29 + $0x66] sm:$0xff] }
 0x29a   : > { %11522 = vmatprep.mubr.msk.f32.mxu1 %vm12229_vm1, %v12228_v1  ;;  %11554 = vmatprep.mubr.msk.f32.mxu0 %vm12229_vm1, %v12228_v1  ;;  %v5880_v60 = vld [vmem:[%s12294_s29 + $0x17] sm:$0xff] }
 0x29c   : > { %v3865_v15 = vpop.f32.mrb[220].mxu1  ;;  %v4040_v29 = vpop.f32.mrb[220].mxu0 }
 0x29d   : > { %v3895_v21 = vadd.f32 %v3865_v15, %v14014_v36  ;;  %v14134_v28 = vadd.f32 %v4040_v29, %v3894_v16  ;;  %v11212_v24 = vpop.f32.mrb[221].mxu0  ;;  %11523 = vmatmul.mubr.msk.f32.gmra.mrb[70].mxu1 %vm346_vm2, %v5524_v57  ;;  %11555 = vmatmul.mubr.msk.f32.gmra.mrb[70].mxu0 %vm346_vm2, %v5703_v33  ;;  %v11180_v27 = vpop.f32.mrb[221].mxu1  ;;  %v5710_v16 = vld [vmem:[%s12344_s12 + $0x67] sm:$0xff] }
 0x29e   : > { %11525 = vmatprep.mubr.msk.f32.mxu1 %vm12229_vm1, %v12228_v1  ;;  %11557 = vmatprep.mubr.msk.f32.mxu0 %vm12229_vm1, %v12228_v1  ;;  %v5881_v24 = vld [vmem:[%s12294_s29 + $0x1f] sm:$0xff] }
 0x29f   : > { %v6060_v27 = vld [vmem:[%s12344_s12 + $0x18] sm:$0xff] }
 0x2a0   : > { %v3870_v30 = vpop.f32.mrb[222].mxu1  ;;  %v4045_v36 = vpop.f32.mrb[222].mxu0 }
 0x2a1   : > { %v3896_v48 = vadd.f32 %v3870_v30, %v14025_v6  ;;  %v14145_v61 = vadd.f32 %v4045_v36, %v3895_v21  ;;  %v11215_v12 = vpop.f32.mrb[223].mxu0  ;;  %11526 = vmatmul.mubr.msk.f32.gmra.mrb[72].mxu1 %vm346_vm2, %v5525_v10  ;;  %11558 = vmatmul.mubr.msk.f32.gmra.mrb[72].mxu0 %vm346_vm2, %v5704_v31  ;;  %v11183_v56 = vpop.f32.mrb[223].mxu1 }
 0x2a2   : > { %11528 = vmatprep.mubr.msk.f32.mxu1 %vm12229_vm1, %v12228_v1  ;;  %11560 = vmatprep.mubr.msk.f32.mxu0 %vm12229_vm1, %v12228_v1  ;;  %v5882_v56 = vld [vmem:[%s12294_s29 + $0x27] sm:$0xff] }
 0x2a4   : > { %v3875_v22 = vpop.f32.mrb[224].mxu1  ;;  %v4050_v6 = vpop.f32.mrb[224].mxu0 }
 0x2a5   : > { %v3897_v14 = vadd.f32 %v3875_v22, %v14036_v9  ;;  %v14156_v41 = vadd.f32 %v4050_v6, %v3896_v48  ;;  %v11218_v4 = vpop.f32.mrb[225].mxu0  ;;  %11529 = vmatmul.mubr.msk.f32.gmra.mrb[74].mxu1 %vm346_vm2, %v5526_v35  ;;  %11561 = vmatmul.mubr.msk.f32.gmra.mrb[74].mxu0 %vm346_vm2, %v5705_v19  ;;  %v11186_v23 = vpop.f32.mrb[225].mxu1  ;;  %v6061_v35 = vld [vmem:[%s12344_s12 + $0x20] sm:$0xff] }
 0x2a6   : > { %11531 = vmatprep.mubr.msk.f32.mxu1 %vm12229_vm1, %v12228_v1  ;;  %11563 = vmatprep.mubr.msk.f32.mxu0 %vm12229_vm1, %v12228_v1  ;;  %v5883_v23 = vld [vmem:[%s12294_s29 + $0x2f] sm:$0xff] }
 0x2a8   : > { %v3880_v25 = vpop.f32.mrb[226].mxu1  ;;  %v4055_v9 = vpop.f32.mrb[226].mxu0 }
 0x2a9   : > { %v3898_v8 = vadd.f32 %v3880_v25, %v14047_v3  ;;  %v14167_v26 = vadd.f32 %v4055_v9, %v3897_v14  ;;  %v11221_v50 = vpop.f32.mrb[227].mxu0  ;;  %11532 = vmatmul.mubr.msk.f32.gmra.mrb[76].mxu1 %vm346_vm2, %v5527_v43  ;;  %11564 = vmatmul.mubr.msk.f32.gmra.mrb[76].mxu0 %vm346_vm2, %v5706_v32  ;;  %v11189_v40 = vpop.f32.mrb[227].mxu1  ;;  %v6062_v43 = vld [vmem:[%s12344_s12 + $0x28] sm:$0xff] }
 0x2aa   : > { %11534 = vmatprep.mubr.msk.f32.mxu1 %vm12229_vm1, %v12228_v1  ;;  %11566 = vmatprep.mubr.msk.f32.mxu0 %vm12229_vm1, %v12228_v1  ;;  %v5884_v40 = vld [vmem:[%s12294_s29 + $0x37] sm:$0xff] }
 0x2ac   : > { %v3885_v51 = vpop.f32.mrb[228].mxu1  ;;  %v4060_v3 = vpop.f32.mrb[228].mxu0 }
 0x2ad   : > { %v3899_v18 = vadd.f32 %v3885_v51, %v14057_v37  ;;  %v14178_v63 = vadd.f32 %v4060_v3, %v3898_v8  ;;  %v11224_v52 = vpop.f32.mrb[229].mxu0  ;;  %11535 = vmatmul.mubr.msk.f32.gmra.mrb[78].mxu1 %vm346_vm2, %v5528_v2  ;;  %11567 = vmatmul.mubr.msk.f32.gmra.mrb[78].mxu0 %vm346_vm2, %v5707_v17  ;;  %v11192_v53 = vpop.f32.mrb[229].mxu1  ;;  %v6063_v2 = vld [vmem:[%s12344_s12 + $0x30] sm:$0xff] }
 0x2ae   : > { %11537 = vmatprep.mubr.msk.f32.mxu1 %vm12229_vm1, %v12228_v1  ;;  %11569 = vmatprep.mubr.msk.f32.mxu0 %vm12229_vm1, %v12228_v1  ;;  %v5885_v53 = vld [vmem:[%s12294_s29 + $0x3f] sm:$0xff] }
 0x2b0   : > { %v4065_v58 = vpop.f32.mrb[230].mxu0  ;;  %v4195_v37 = vpop.f32.mrb[230].mxu1 }
 0x2b1   : > { %v14188_v62 = vadd.f32 %v4065_v58, %v3899_v18  ;;  %v4249_v59 = vadd.f32 %v4195_v37, %v14069_v42  ;;  %v11227_v13 = vpop.f32.mrb[231].mxu0  ;;  %11538 = vmatmul.mubr.msk.f32.gmra.mrb[80].mxu1 %vm346_vm2, %v5529_v54  ;;  %11570 = vmatmul.mubr.msk.f32.gmra.mrb[80].mxu0 %vm346_vm2, %v5708_v20  ;;  %v11232_v39 = vpop.f32.mrb[231].mxu1  ;;  %v6064_v54 = vld [vmem:[%s12344_s12 + $0x38] sm:$0xff] }
 0x2b2   : > { %11540 = vmatprep.mubr.msk.f32.mxu1 %vm12229_vm1, %v12228_v1  ;;  %11572 = vmatprep.mubr.msk.f32.mxu0 %vm12229_vm1, %v12228_v1  ;;  %v5886_v39 = vld [vmem:[%s12294_s29 + $0x47] sm:$0xff] }
 0x2b4   : > { %v4200_v44 = vpop.f32.mrb[232].mxu1  ;;  %v4375_v49 = vpop.f32.mrb[232].mxu0 }
 0x2b5   : > { %v4250_v42 = vadd.f32 %v4200_v44, %v14083_v47  ;;  %v14200_v5 = vadd.f32 %v4375_v49, %v4249_v59  ;;  %v11267_v55 = vpop.f32.mrb[233].mxu0  ;;  %11541 = vmatmul.mubr.msk.f32.gmra.mrb[82].mxu1 %vm346_vm2, %v5530_v38  ;;  %11573 = vmatmul.mubr.msk.f32.gmra.mrb[82].mxu0 %vm346_vm2, %v5709_v11  ;;  %v11235_v7 = vpop.f32.mrb[233].mxu1  ;;  %v9694_v47 = vld [vmem:[%s15456_s4 + $0x84] sm:$0x7] }
 0x2b6   : > { %11575 = vmatprep.mubr.msk.f32.mxu0 %vm12229_vm1, %v12228_v1  ;;  %11580 = vmatprep.mubr.msk.f32.mxu1 %vm12229_vm1, %v12228_v1  ;;  %v6065_v38 = vld [vmem:[%s12344_s12 + $0x40] sm:$0xff]  ;;  %v5887_v7 = vld [vmem:[%s12294_s29 + $0x4f] sm:$0xff] }
 0x2b8   : > { %v4205_v45 = vpop.f32.mrb[234].mxu1  ;;  %v4380_v57 = vpop.f32.mrb[234].mxu0 }
 0x2b9   : > { %v4251_v33 = vadd.f32 %v4205_v45, %v14099_v34  ;;  %v14214_v15 = vadd.f32 %v4380_v57, %v4250_v42  ;;  %v11270_v29 = vpop.f32.mrb[235].mxu0  ;;  %11576 = vmatmul.mubr.msk.f32.gmra.mrb[84].mxu0 %vm346_vm2, %v5710_v16  ;;  %11581 = vmatmul.mubr.msk.f32.vlgmr.msra.gmra.mrb[84].mxu1 %vm346_vm2, %v5880_v60  ;;  %v11238_v21 = vpop.f32.mrb[235].mxu1  ;;  %v9707_v34 = vld [vmem:[%s15456_s4 + $0x88] sm:$0x7] }
 0x2ba   : > { %11649 = vmatpush3.msk.msra.mxu1 %vm380_vm0, %v9694_v47  ;;  %11583 = vmatprep.mubr.msk.f32.mxu1 %vm12229_vm1, %v12228_v1  ;;  %v6066_v16 = vld [vmem:[%s12344_s12 + $0x48] sm:$0xff]  ;;  %v5888_v29 = vld [vmem:[%s12294_s29 + $0x57] sm:$0xff] }
 0x2bb   : > { %11615 = vmatprep.mubr.msk.f32.mxu0 %vm12229_vm1, %v12228_v1  ;;  %11718 = vmatprep.subr.mxu1 %v12228_v1  ;;  %v6067_v21 = vld [vmem:[%s12344_s12 + $0x50] sm:$0xff] }
 0x2bc   : > { %v4210_v10 = vpop.f32.mrb[236].mxu1  ;;  %v4385_v31 = vpop.f32.mrb[236].mxu0 }
 0x2bd   : > { %v4252_v30 = vadd.f32 %v4210_v10, %v14112_v46  ;;  %v14230_v36 = vadd.f32 %v4385_v31, %v4251_v33  ;;  %v11273_v48 = vpop.f32.mrb[237].mxu0  ;;  %11584 = vmatmul.mubr.msk.f32.gmra.mrb[86].mxu1 %vm346_vm2, %v5881_v24  ;;  %11616 = vmatmul.mubr.msk.f32.vlgmr.msra.gmra.mrb[86].mxu0 %vm346_vm2, %v6060_v27  ;;  %v11241_v12 = vpop.f32.mrb[237].mxu1 }
 0x2be   : > { %11684 = vmatpush3.msk.msra.mxu0 %vm380_vm0, %v9707_v34  ;;  %11586 = vmatprep.mubr.msk.f32.mxu1 %vm12229_vm1, %v12228_v1  ;;  %v6068_v48 = vld [vmem:[%s12344_s12 + $0x58] sm:$0xff] }
 0x2bf   : > { %11618 = vmatprep.mubr.msk.f32.mxu0 %vm12229_vm1, %v12228_v1  ;;  %11753 = vmatprep.subr.mxu0 %v12228_v1 }
 0x2c0   : > { %v4215_v46 = vpop.f32.mrb[238].mxu1  ;;  %v4390_v19 = vpop.f32.mrb[238].mxu0 }
 0x2c1   : > { %v4253_v22 = vadd.f32 %v4215_v46, %v14123_v0  ;;  %v14243_v6 = vadd.f32 %v4390_v19, %v4252_v30  ;;  %v11276_v14 = vpop.f32.mrb[239].mxu0  ;;  %11587 = vmatmul.mubr.msk.f32.gmra.mrb[88].mxu1 %vm346_vm2, %v5882_v56  ;;  %11619 = vmatmul.mubr.msk.f32.gmra.mrb[88].mxu0 %vm346_vm2, %v6061_v35  ;;  %v11244_v4 = vpop.f32.mrb[239].mxu1  ;;  %v5889_v30 = vld [vmem:[%s12294_s29 + $0x5f] sm:$0xff] }
 0x2c2   : > { %11589 = vmatprep.mubr.msk.f32.mxu1 %vm12229_vm1, %v12228_v1  ;;  %11621 = vmatprep.mubr.msk.f32.mxu0 %vm12229_vm1, %v12228_v1  ;;  %v6069_v14 = vld [vmem:[%s12344_s12 + $0x60] sm:$0xff] }
 0x2c4   : > { %v4220_v32 = vpop.f32.mrb[240].mxu1  ;;  %v4395_v0 = vpop.f32.mrb[240].mxu0 }
 0x2c5   : > { %v4254_v25 = vadd.f32 %v4220_v32, %v14134_v28  ;;  %v14254_v9 = vadd.f32 %v4395_v0, %v4253_v22  ;;  %v11279_v8 = vpop.f32.mrb[241].mxu0  ;;  %11590 = vmatmul.mubr.msk.f32.gmra.mrb[90].mxu1 %vm346_vm2, %v5883_v23  ;;  %11622 = vmatmul.mubr.msk.f32.gmra.mrb[90].mxu0 %vm346_vm2, %v6062_v43  ;;  %v11247_v50 = vpop.f32.mrb[241].mxu1  ;;  %v5890_v22 = vld [vmem:[%s12294_s29 + $0x67] sm:$0xff] }
 0x2c6   : > { %11592 = vmatprep.mubr.msk.f32.mxu1 %vm12229_vm1, %v12228_v1  ;;  %11624 = vmatprep.mubr.msk.f32.mxu0 %vm12229_vm1, %v12228_v1  ;;  %v6240_v8 = vld [vmem:[%s12294_s29 + $0x18] sm:$0xff] }
 0x2c8   : > { %v4225_v17 = vpop.f32.mrb[242].mxu1  ;;  %v4400_v28 = vpop.f32.mrb[242].mxu0 }
 0x2c9   : > { %v4255_v51 = vadd.f32 %v4225_v17, %v14145_v61  ;;  %v14265_v3 = vadd.f32 %v4400_v28, %v4254_v25  ;;  %v11282_v18 = vpop.f32.mrb[243].mxu0  ;;  %11593 = vmatmul.mubr.msk.f32.gmra.mrb[92].mxu1 %vm346_vm2, %v5884_v40  ;;  %11625 = vmatmul.mubr.msk.f32.gmra.mrb[92].mxu0 %vm346_vm2, %v6063_v2  ;;  %v11250_v52 = vpop.f32.mrb[243].mxu1  ;;  %v6070_v25 = vld [vmem:[%s12344_s12 + $0x68] sm:$0xff] }
 0x2ca   : > { %11595 = vmatprep.mubr.msk.f32.mxu1 %vm12229_vm1, %v12228_v1  ;;  %11627 = vmatprep.mubr.msk.f32.mxu0 %vm12229_vm1, %v12228_v1  ;;  %v6241_v18 = vld [vmem:[%s12294_s29 + $0x20] sm:$0xff] }
 0x2cb   : > { %v6420_v52 = vld [vmem:[%s12344_s12 + $0x19] sm:$0xff] }
 0x2cc   : > { %v4230_v20 = vpop.f32.mrb[244].mxu1  ;;  %v4405_v61 = vpop.f32.mrb[244].mxu0 }
 0x2cd   : > { %v4256_v58 = vadd.f32 %v4230_v20, %v14156_v41  ;;  %v14276_v37 = vadd.f32 %v4405_v61, %v4255_v51  ;;  %v11285_v59 = vpop.f32.mrb[245].mxu0  ;;  %11596 = vmatmul.mubr.msk.f32.gmra.mrb[94].mxu1 %vm346_vm2, %v5885_v53  ;;  %11628 = vmatmul.mubr.msk.f32.gmra.mrb[94].mxu0 %vm346_vm2, %v6064_v54  ;;  %v11253_v13 = vpop.f32.mrb[245].mxu1 }
 0x2ce   : > { %11598 = vmatprep.mubr.msk.f32.mxu1 %vm12229_vm1, %v12228_v1  ;;  %11630 = vmatprep.mubr.msk.f32.mxu0 %vm12229_vm1, %v12228_v1  ;;  %v6242_v13 = vld [vmem:[%s12294_s29 + $0x28] sm:$0xff] }
 0x2d0   : > { %v4235_v11 = vpop.f32.mrb[246].mxu1  ;;  %v4410_v41 = vpop.f32.mrb[246].mxu0 }
 0x2d1   : > { %v4257_v44 = vadd.f32 %v4235_v11, %v14167_v26  ;;  %v14287_v49 = vadd.f32 %v4410_v41, %v4256_v58  ;;  %v11288_v42 = vpop.f32.mrb[247].mxu0  ;;  %11599 = vmatmul.mubr.msk.f32.gmra.mrb[96].mxu1 %vm346_vm2, %v5886_v39  ;;  %11631 = vmatmul.mubr.msk.f32.gmra.mrb[96].mxu0 %vm346_vm2, %v6065_v38  ;;  %v11256_v55 = vpop.f32.mrb[247].mxu1  ;;  %v6421_v39 = vld [vmem:[%s12344_s12 + $0x21] sm:$0xff] }
 0x2d2   : > { %11601 = vmatprep.mubr.msk.f32.mxu1 %vm12229_vm1, %v12228_v1  ;;  %11633 = vmatprep.mubr.msk.f32.mxu0 %vm12229_vm1, %v12228_v1  ;;  %v6243_v55 = vld [vmem:[%s12294_s29 + $0x30] sm:$0xff] }
 0x2d4   : > { %v4240_v60 = vpop.f32.mrb[248].mxu1  ;;  %v4415_v26 = vpop.f32.mrb[248].mxu0 }
 0x2d5   : > { %v4258_v47 = vadd.f32 %v4240_v60, %v14178_v63  ;;  %v14298_v45 = vadd.f32 %v4415_v26, %v4257_v44  ;;  %v11291_v57 = vpop.f32.mrb[249].mxu0  ;;  %11602 = vmatmul.mubr.msk.f32.gmra.mrb[98].mxu1 %vm346_vm2, %v5887_v7  ;;  %11634 = vmatmul.mubr.msk.f32.gmra.mrb[98].mxu0 %vm346_vm2, %v6066_v16  ;;  %v11259_v33 = vpop.f32.mrb[249].mxu1  ;;  %v6422_v7 = vld [vmem:[%s12344_s12 + $0x29] sm:$0xff] }
 0x2d6   : > { %11604 = vmatprep.mubr.msk.f32.mxu1 %vm12229_vm1, %v12228_v1  ;;  %11636 = vmatprep.mubr.msk.f32.mxu0 %vm12229_vm1, %v12228_v1  ;;  %v6244_v33 = vld [vmem:[%s12294_s29 + $0x38] sm:$0xff] }
 0x2d8   : > { %v4245_v24 = vpop.f32.mrb[250].mxu1  ;;  %v4420_v63 = vpop.f32.mrb[250].mxu0 }
 0x2d9   : > { %v4259_v27 = vadd.f32 %v4245_v24, %v14188_v62  ;;  %v14309_v34 = vadd.f32 %v4420_v63, %v4258_v47  ;;  %v11294_v10 = vpop.f32.mrb[251].mxu0  ;;  %11605 = vmatmul.mubr.msk.f32.gmra.mrb[100].mxu1 %vm346_vm2, %v5888_v29  ;;  %11637 = vmatmul.mubr.msk.f32.gmra.mrb[100].mxu0 %vm346_vm2, %v6067_v21  ;;  %v11262_v31 = vpop.f32.mrb[251].mxu1  ;;  %v6423_v29 = vld [vmem:[%s12344_s12 + $0x31] sm:$0xff] }
 0x2da   : > { %11607 = vmatprep.mubr.msk.f32.mxu1 %vm12229_vm1, %v12228_v1  ;;  %11639 = vmatprep.mubr.msk.f32.mxu0 %vm12229_vm1, %v12228_v1  ;;  %v6245_v31 = vld [vmem:[%s12294_s29 + $0x40] sm:$0xff] }
 0x2dc   : > { %v4425_v12 = vpop.f32.mrb[252].mxu0  ;;  %v4555_v62 = vpop.f32.mrb[252].mxu1 }
 0x2dd   : > { %v14319_v56 = vadd.f32 %v4425_v12, %v4259_v27  ;;  %v4609_v35 = vadd.f32 %v4555_v62, %v14200_v5  ;;  %v11297_v46 = vpop.f32.mrb[253].mxu0  ;;  %11608 = vmatmul.mubr.msk.f32.gmra.mrb[102].mxu1 %vm346_vm2, %v5889_v30  ;;  %11640 = vmatmul.mubr.msk.f32.gmra.mrb[102].mxu0 %vm346_vm2, %v6068_v48  ;;  %v11302_v19 = vpop.f32.mrb[253].mxu1  ;;  %v6424_v30 = vld [vmem:[%s12344_s12 + $0x39] sm:$0xff] }
 0x2de   : > { %11610 = vmatprep.mubr.msk.f32.mxu1 %vm12229_vm1, %v12228_v1  ;;  %11642 = vmatprep.mubr.msk.f32.mxu0 %vm12229_vm1, %v12228_v1  ;;  %v6246_v19 = vld [vmem:[%s12294_s29 + $0x48] sm:$0xff] }
 0x2e0   : > { %v4560_v4 = vpop.f32.mrb[254].mxu1  ;;  %v4735_v23 = vpop.f32.mrb[254].mxu0 }
 0x2e1   : > { %v4610_v5 = vadd.f32 %v4560_v4, %v14214_v15  ;;  %v14331_v43 = vadd.f32 %v4735_v23, %v4609_v35  ;;  %v11337_v32 = vpop.f32.mrb[255].mxu0  ;;  %11611 = vmatmul.mubr.msk.f32.gmra.mrb[104].mxu1 %vm346_vm2, %v5890_v22  ;;  %11643 = vmatmul.mubr.msk.f32.gmra.mrb[104].mxu0 %vm346_vm2, %v6069_v14  ;;  %v11305_v0 = vpop.f32.mrb[255].mxu1  ;;  %v9720_v15 = vld [vmem:[%s15456_s4 + $0x8c] sm:$0x7]  ;;  %v6425_v22 = vld [vmem:[%s12344_s12 + $0x41] sm:$0xff] }
 0x2e2   : > { %11645 = vmatprep.mubr.msk.f32.mxu0 %vm12229_vm1, %v12228_v1  ;;  %11650 = vmatprep.mubr.msk.f32.mxu1 %vm12229_vm1, %v12228_v1  ;;  %v6247_v0 = vld [vmem:[%s12294_s29 + $0x50] sm:$0xff] }
 0x2e4   : > { %v4565_v50 = vpop.f32.mrb[0].mxu1  ;;  %v4740_v40 = vpop.f32.mrb[0].mxu0 }
 0x2e5   : > { %v4611_v2 = vadd.f32 %v4565_v50, %v14230_v36  ;;  %v14345_v17 = vadd.f32 %v4740_v40, %v4610_v5  ;;  %v11340_v28 = vpop.f32.mrb[1].mxu0  ;;  %11646 = vmatmul.mubr.msk.f32.gmra.mrb[106].mxu0 %vm346_vm2, %v6070_v25  ;;  %11651 = vmatmul.mubr.msk.f32.vlgmr.msra.gmra.mrb[106].mxu1 %vm346_vm2, %v6240_v8  ;;  %v11308_v51 = vpop.f32.mrb[1].mxu1  ;;  %v9733_v36 = vld [vmem:[%s15456_s4 + $0x90] sm:$0x7] }
 0x2e6   : > { %11719 = vmatpush3.msk.msra.mxu1 %vm380_vm0, %v9720_v15  ;;  %11653 = vmatprep.mubr.msk.f32.mxu1 %vm12229_vm1, %v12228_v1  ;;  %v6426_v25 = vld [vmem:[%s12344_s12 + $0x49] sm:$0xff]  ;;  %v6248_v28 = vld [vmem:[%s12294_s29 + $0x58] sm:$0xff] }
 0x2e7   : > { %11685 = vmatprep.mubr.msk.f32.mxu0 %vm12229_vm1, %v12228_v1  ;;  %11788 = vmatprep.subr.mxu1 %v12228_v1  ;;  %v6427_v51 = vld [vmem:[%s12344_s12 + $0x51] sm:$0xff] }
 0x2e8   : > { %v4570_v53 = vpop.f32.mrb[2].mxu1  ;;  %v4745_v54 = vpop.f32.mrb[2].mxu0 }
 0x2e9   : > { %v4612_v20 = vadd.f32 %v4570_v53, %v14243_v6  ;;  %v14361_v61 = vadd.f32 %v4745_v54, %v4611_v2  ;;  %v11343_v58 = vpop.f32.mrb[3].mxu0  ;;  %11654 = vmatmul.mubr.msk.f32.gmra.mrb[108].mxu1 %vm346_vm2, %v6241_v18  ;;  %11686 = vmatmul.mubr.msk.f32.vlgmr.msra.gmra.mrb[108].mxu0 %vm346_vm2, %v6420_v52  ;;  %v11311_v59 = vpop.f32.mrb[3].mxu1 }
 0x2ea   : > { %11754 = vmatpush3.msk.msra.mxu0 %vm380_vm0, %v9733_v36  ;;  %11656 = vmatprep.mubr.msk.f32.mxu1 %vm12229_vm1, %v12228_v1  ;;  %v6428_v58 = vld [vmem:[%s12344_s12 + $0x59] sm:$0xff] }
 0x2eb   : > { %11688 = vmatprep.mubr.msk.f32.mxu0 %vm12229_vm1, %v12228_v1  ;;  %11823 = vmatprep.subr.mxu0 %v12228_v1 }
 0x2ec   : > { %v4575_v6 = vpop.f32.mrb[4].mxu1  ;;  %v4750_v38 = vpop.f32.mrb[4].mxu0 }
 0x2ed   : > { %v4613_v11 = vadd.f32 %v4575_v6, %v14254_v9  ;;  %v14374_v41 = vadd.f32 %v4750_v38, %v4612_v20  ;;  %v11346_v44 = vpop.f32.mrb[5].mxu0  ;;  %11657 = vmatmul.mubr.msk.f32.gmra.mrb[110].mxu1 %vm346_vm2, %v6242_v13  ;;  %11689 = vmatmul.mubr.msk.f32.gmra.mrb[110].mxu0 %vm346_vm2, %v6421_v39  ;;  %v11314_v42 = vpop.f32.mrb[5].mxu1  ;;  %v6249_v20 = vld [vmem:[%s12294_s29 + $0x60] sm:$0xff] }
 0x2ee   : > { %11659 = vmatprep.mubr.msk.f32.mxu1 %vm12229_vm1, %v12228_v1  ;;  %11691 = vmatprep.mubr.msk.f32.mxu0 %vm12229_vm1, %v12228_v1  ;;  %v6429_v44 = vld [vmem:[%s12344_s12 + $0x61] sm:$0xff] }
 0x2f0   : > { %v4580_v16 = vpop.f32.mrb[6].mxu1  ;;  %v4755_v9 = vpop.f32.mrb[6].mxu0 }
 0x2f1   : > { %v4614_v60 = vadd.f32 %v4580_v16, %v14265_v3  ;;  %v11349_v26 = vpop.f32.mrb[7].mxu0  ;;  %11660 = vmatmul.mubr.msk.f32.gmra.mrb[112].mxu1 %vm346_vm2, %v6243_v55  ;;  %11692 = vmatmul.mubr.msk.f32.gmra.mrb[112].mxu0 %vm346_vm2, %v6422_v7  ;;  %v11317_v47 = vpop.f32.mrb[7].mxu1  ;;  %v14387_v57 = vadd.f32 %v4755_v9, %v4613_v11  ;;  %v6250_v11 = vld [vmem:[%s12294_s29 + $0x68] sm:$0xff] }
 0x2f2   : > { %11662 = vmatprep.mubr.msk.f32.mxu1 %vm12229_vm1, %v12228_v1  ;;  %11694 = vmatprep.mubr.msk.f32.mxu0 %vm12229_vm1, %v12228_v1  ;;  %v6600_v26 = vld [vmem:[%s12670_s7 + $0x16] sm:$0xff] }
 0x2f4   : > { %v4585_v21 = vpop.f32.mrb[8].mxu1  ;;  %v4760_v3 = vpop.f32.mrb[8].mxu0 }
 0x2f5   : > { %v4615_v24 = vadd.f32 %v4585_v21, %v14276_v37  ;;  %v11352_v63 = vpop.f32.mrb[9].mxu0  ;;  %11663 = vmatmul.mubr.msk.f32.gmra.mrb[114].mxu1 %vm346_vm2, %v6244_v33  ;;  %11695 = vmatmul.mubr.msk.f32.gmra.mrb[114].mxu0 %vm346_vm2, %v6423_v29  ;;  %v11320_v27 = vpop.f32.mrb[9].mxu1  ;;  %v14398_v10 = vadd.f32 %v4760_v3, %v4614_v60  ;;  %v6430_v60 = vld [vmem:[%s12344_s12 + $0x69] sm:$0xff] }
 0x2f6   : > { %11665 = vmatprep.mubr.msk.f32.mxu1 %vm12229_vm1, %v12228_v1  ;;  %11697 = vmatprep.mubr.msk.f32.mxu0 %vm12229_vm1, %v12228_v1  ;;  %v6601_v63 = vld [vmem:[%s12670_s7 + $0x1e] sm:$0xff]  ;;  %v6780_v27 = vld [vmem:[%s12690_s13 + $0x16] sm:$0xff] }
 0x2f8   : > { %v4590_v48 = vpop.f32.mrb[10].mxu1  ;;  %v4765_v37 = vpop.f32.mrb[10].mxu0 }
 0x2f9   : > { %v4616_v12 = vadd.f32 %v4590_v48, %v14287_v49  ;;  %v11355_v62 = vpop.f32.mrb[11].mxu0  ;;  %11666 = vmatmul.mubr.msk.f32.gmra.mrb[116].mxu1 %vm346_vm2, %v6245_v31  ;;  %11698 = vmatmul.mubr.msk.f32.gmra.mrb[116].mxu0 %vm346_vm2, %v6424_v30  ;;  %v11323_v35 = vpop.f32.mrb[11].mxu1  ;;  %v14409_v46 = vadd.f32 %v4765_v37, %v4615_v24 }
 0x2fa   : > { %11668 = vmatprep.mubr.msk.f32.mxu1 %vm12229_vm1, %v12228_v1  ;;  %11700 = vmatprep.mubr.msk.f32.mxu0 %vm12229_vm1, %v12228_v1  ;;  %v6602_v35 = vld [vmem:[%s12670_s7 + $0x26] sm:$0xff] }
 0x2fc   : > { %v4595_v14 = vpop.f32.mrb[12].mxu1  ;;  %v4770_v49 = vpop.f32.mrb[12].mxu0 }
 0x2fd   : > { %v4617_v4 = vadd.f32 %v4595_v14, %v14298_v45  ;;  %v11358_v23 = vpop.f32.mrb[13].mxu0  ;;  %11669 = vmatmul.mubr.msk.f32.gmra.mrb[118].mxu1 %vm346_vm2, %v6246_v19  ;;  %11701 = vmatmul.mubr.msk.f32.gmra.mrb[118].mxu0 %vm346_vm2, %v6425_v22  ;;  %v11326_v5 = vpop.f32.mrb[13].mxu1  ;;  %v14420_v32 = vadd.f32 %v4770_v49, %v4616_v12  ;;  %v6781_v19 = vld [vmem:[%s12690_s13 + $0x1e] sm:$0xff] }
 0x2fe   : > { %11671 = vmatprep.mubr.msk.f32.mxu1 %vm12229_vm1, %v12228_v1  ;;  %11703 = vmatprep.mubr.msk.f32.mxu0 %vm12229_vm1, %v12228_v1  ;;  %v6603_v5 = vld [vmem:[%s12670_s7 + $0x2e] sm:$0xff] }
 0x300   : > { %v4600_v8 = vpop.f32.mrb[14].mxu1  ;;  %v4775_v45 = vpop.f32.mrb[14].mxu0 }
 0x301   : > { %v4618_v15 = vadd.f32 %v4600_v8, %v14309_v34  ;;  %v11361_v50 = vpop.f32.mrb[15].mxu0  ;;  %11672 = vmatmul.mubr.msk.f32.gmra.mrb[120].mxu1 %vm346_vm2, %v6247_v0  ;;  %11704 = vmatmul.mubr.msk.f32.gmra.mrb[120].mxu0 %vm346_vm2, %v6426_v25  ;;  %v11329_v40 = vpop.f32.mrb[15].mxu1  ;;  %v14431_v2 = vadd.f32 %v4775_v45, %v4617_v4  ;;  %v6782_v0 = vld [vmem:[%s12690_s13 + $0x26] sm:$0xff] }
 0x302   : > { %11674 = vmatprep.mubr.msk.f32.mxu1 %vm12229_vm1, %v12228_v1  ;;  %11706 = vmatprep.mubr.msk.f32.mxu0 %vm12229_vm1, %v12228_v1  ;;  %v6604_v40 = vld [vmem:[%s12670_s7 + $0x36] sm:$0xff] }
 0x304   : > { %v4605_v18 = vpop.f32.mrb[16].mxu1  ;;  %v4780_v34 = vpop.f32.mrb[16].mxu0 }
 0x305   : > { %v4619_v52 = vadd.f32 %v4605_v18, %v14319_v56  ;;  %v11364_v36 = vpop.f32.mrb[17].mxu0  ;;  %11675 = vmatmul.mubr.msk.f32.gmra.mrb[122].mxu1 %vm346_vm2, %v6248_v28  ;;  %11707 = vmatmul.mubr.msk.f32.gmra.mrb[122].mxu0 %vm346_vm2, %v6427_v51  ;;  %v11332_v53 = vpop.f32.mrb[17].mxu1  ;;  %v14442_v54 = vadd.f32 %v4780_v34, %v4618_v15  ;;  %v6783_v28 = vld [vmem:[%s12690_s13 + $0x2e] sm:$0xff] }
 0x306   : > { %11677 = vmatprep.mubr.msk.f32.mxu1 %vm12229_vm1, %v12228_v1  ;;  %11709 = vmatprep.mubr.msk.f32.mxu0 %vm12229_vm1, %v12228_v1  ;;  %v6605_v53 = vld [vmem:[%s12670_s7 + $0x3e] sm:$0xff] }
 0x308   : > { %v4785_v59 = vpop.f32.mrb[18].mxu0  ;;  %v4915_v56 = vpop.f32.mrb[18].mxu1 }
 0x309   : > { %v4969_v13 = vadd.f32 %v4915_v56, %v14331_v43  ;;  %v11367_v39 = vpop.f32.mrb[19].mxu0  ;;  %11678 = vmatmul.mubr.msk.f32.gmra.mrb[124].mxu1 %vm346_vm2, %v6249_v20  ;;  %11710 = vmatmul.mubr.msk.f32.gmra.mrb[124].mxu0 %vm346_vm2, %v6428_v58  ;;  %v11372_v6 = vpop.f32.mrb[19].mxu1  ;;  %v14453_v38 = vadd.f32 %v4785_v59, %v4619_v52  ;;  %v6784_v20 = vld [vmem:[%s12690_s13 + $0x36] sm:$0xff] }
 0x30a   : > { %11680 = vmatprep.mubr.msk.f32.mxu1 %vm12229_vm1, %v12228_v1  ;;  %11712 = vmatprep.mubr.msk.f32.mxu0 %vm12229_vm1, %v12228_v1  ;;  %v6606_v6 = vld [vmem:[%s12670_s7 + $0x46] sm:$0xff] }
 0x30c   : > { %v4920_v42 = vpop.f32.mrb[20].mxu1  ;;  %v5095_v43 = vpop.f32.mrb[20].mxu0 }
 0x30d   : > { %v4970_v55 = vadd.f32 %v4920_v42, %v14345_v17  ;;  %v11407_v7 = vpop.f32.mrb[21].mxu0  ;;  %11681 = vmatmul.mubr.msk.f32.gmra.mrb[126].mxu1 %vm346_vm2, %v6250_v11  ;;  %11713 = vmatmul.mubr.msk.f32.gmra.mrb[126].mxu0 %vm346_vm2, %v6429_v44  ;;  %v11375_v16 = vpop.f32.mrb[21].mxu1  ;;  %v14464_v9 = vadd.f32 %v5095_v43, %v4969_v13  ;;  %v9746_v17 = vld [vmem:[%s15456_s4 + $0x94] sm:$0x7]  ;;  %v6785_v11 = vld [vmem:[%s12690_s13 + $0x3e] sm:$0xff] }
 0x30e   : > { %11715 = vmatprep.mubr.msk.f32.mxu0 %vm12229_vm1, %v12228_v1  ;;  %11720 = vmatprep.mubr.msk.f32.mxu1 %vm12229_vm1, %v12228_v1  ;;  %v6607_v16 = vld [vmem:[%s12670_s7 + $0x4e] sm:$0xff] }
 0x310   : > { %v4925_v47 = vpop.f32.mrb[22].mxu1  ;;  %v5100_v33 = vpop.f32.mrb[22].mxu0 }
 0x311   : > { %v4971_v29 = vadd.f32 %v4925_v47, %v14361_v61  ;;  %v11410_v21 = vpop.f32.mrb[23].mxu0  ;;  %11716 = vmatmul.mubr.msk.f32.gmra.mrb[128].mxu0 %vm346_vm2, %v6430_v60  ;;  %11721 = vmatmul.mubr.msk.f32.vlgmr.msra.gmra.mrb[128].mxu1 %vm346_vm2, %v6600_v26  ;;  %v11378_v3 = vpop.f32.mrb[23].mxu1  ;;  %v14478_v24 = vadd.f32 %v5100_v33, %v4970_v55  ;;  %v9759_v61 = vld [vmem:[%s15456_s4 + $0x98] sm:$0x7]  ;;  %v6786_v60 = vld [vmem:[%s12690_s13 + $0x46] sm:$0xff] }
 0x312   : > { %11789 = vmatpush3.msk.msra.mxu1 %vm380_vm0, %v9746_v17  ;;  %11723 = vmatprep.mubr.msk.f32.mxu1 %vm12229_vm1, %v12228_v1  ;;  %v6608_v21 = vld [vmem:[%s12670_s7 + $0x56] sm:$0xff]  ;;  %v6787_v3 = vld [vmem:[%s12690_s13 + $0x4e] sm:$0xff] }
 0x313   : > { %11755 = vmatprep.mubr.msk.f32.mxu0 %vm12229_vm1, %v12228_v1  ;;  %11858 = vmatprep.subr.mxu1 %v12228_v1 }
 0x314   : > { %v4930_v31 = vpop.f32.mrb[24].mxu1  ;;  %v5105_v30 = vpop.f32.mrb[24].mxu0 }
 0x315   : > { %v4972_v48 = vadd.f32 %v4930_v31, %v14374_v41  ;;  %v11413_v37 = vpop.f32.mrb[25].mxu0  ;;  %11724 = vmatmul.mubr.msk.f32.gmra.mrb[130].mxu1 %vm346_vm2, %v6601_v63  ;;  %11756 = vmatmul.mubr.msk.f32.vlgmr.msra.gmra.mrb[130].mxu0 %vm346_vm2, %v6780_v27  ;;  %v11381_v12 = vpop.f32.mrb[25].mxu1  ;;  %v14494_v62 = vadd.f32 %v5105_v30, %v4971_v29 }
 0x316   : > { %11824 = vmatpush3.msk.msra.mxu0 %vm380_vm0, %v9759_v61  ;;  %11726 = vmatprep.mubr.msk.f32.mxu1 %vm12229_vm1, %v12228_v1  ;;  %v6788_v37 = vld [vmem:[%s12690_s13 + $0x56] sm:$0xff] }
 0x317   : > { %11758 = vmatprep.mubr.msk.f32.mxu0 %vm12229_vm1, %v12228_v1  ;;  %11893 = vmatprep.subr.mxu0 %v12228_v1 }
 0x318   : > { %v4935_v41 = vpop.f32.mrb[26].mxu1  ;;  %v5110_v22 = vpop.f32.mrb[26].mxu0 }
 0x319   : > { %v4973_v14 = vadd.f32 %v4935_v41, %v14387_v57  ;;  %v11416_v49 = vpop.f32.mrb[27].mxu0  ;;  %11727 = vmatmul.mubr.msk.f32.gmra.mrb[132].mxu1 %vm346_vm2, %v6602_v35  ;;  %11759 = vmatmul.mubr.msk.f32.gmra.mrb[132].mxu0 %vm346_vm2, %v6781_v19  ;;  %v11384_v4 = vpop.f32.mrb[27].mxu1  ;;  %v14507_v23 = vadd.f32 %v5110_v22, %v4972_v48  ;;  %v6609_v48 = vld [vmem:[%s12670_s7 + $0x5e] sm:$0xff] }
 0x31a   : > { %11729 = vmatprep.mubr.msk.f32.mxu1 %vm12229_vm1, %v12228_v1  ;;  %11761 = vmatprep.mubr.msk.f32.mxu0 %vm12229_vm1, %v12228_v1  ;;  %v6789_v49 = vld [vmem:[%s12690_s13 + $0x5e] sm:$0xff] }
 0x31c   : > { %v4940_v25 = vpop.f32.mrb[28].mxu1  ;;  %v5115_v57 = vpop.f32.mrb[28].mxu0 }
 0x31d   : > { %v4974_v8 = vadd.f32 %v4940_v25, %v14398_v10  ;;  %v14516_v45 = vadd.f32 %v5115_v57, %v4973_v14  ;;  %v11419_v15 = vpop.f32.mrb[29].mxu0  ;;  %11730 = vmatmul.mubr.msk.f32.gmra.mrb[134].mxu1 %vm346_vm2, %v6603_v5  ;;  %11762 = vmatmul.mubr.msk.f32.gmra.mrb[134].mxu0 %vm346_vm2, %v6782_v0  ;;  %v11387_v50 = vpop.f32.mrb[29].mxu1  ;;  %v6610_v14 = vld [vmem:[%s12670_s7 + $0x66] sm:$0xff] }
 0x31e   : > { %11732 = vmatprep.mubr.msk.f32.mxu1 %vm12229_vm1, %v12228_v1  ;;  %11764 = vmatprep.mubr.msk.f32.mxu0 %vm12229_vm1, %v12228_v1  ;;  %v6960_v15 = vld [vmem:[%s12670_s7 + $0x17] sm:$0xff] }
 0x320   : > { %v4945_v51 = vpop.f32.mrb[30].mxu1  ;;  %v5120_v10 = vpop.f32.mrb[30].mxu0 }
 0x321   : > { %v4975_v18 = vadd.f32 %v4945_v51, %v14409_v46  ;;  %v14527_v34 = vadd.f32 %v5120_v10, %v4974_v8  ;;  %v11422_v52 = vpop.f32.mrb[31].mxu0  ;;  %11733 = vmatmul.mubr.msk.f32.gmra.mrb[136].mxu1 %vm346_vm2, %v6604_v40  ;;  %11765 = vmatmul.mubr.msk.f32.gmra.mrb[136].mxu0 %vm346_vm2, %v6783_v28  ;;  %v11390_v36 = vpop.f32.mrb[31].mxu1  ;;  %v6790_v8 = vld [vmem:[%s12690_s13 + $0x66] sm:$0xff] }
 0x322   : > { %11735 = vmatprep.mubr.msk.f32.mxu1 %vm12229_vm1, %v12228_v1  ;;  %11767 = vmatprep.mubr.msk.f32.mxu0 %vm12229_vm1, %v12228_v1  ;;  %v6961_v52 = vld [vmem:[%s12670_s7 + $0x1f] sm:$0xff]  ;;  %v7140_v36 = vld [vmem:[%s12690_s13 + $0x17] sm:$0xff] }
 0x324   : > { %v4950_v58 = vpop.f32.mrb[32].mxu1  ;;  %v5125_v46 = vpop.f32.mrb[32].mxu0 }
 0x325   : > { %v4976_v59 = vadd.f32 %v4950_v58, %v14420_v32  ;;  %v14538_v56 = vadd.f32 %v5125_v46, %v4975_v18  ;;  %v11425_v13 = vpop.f32.mrb[33].mxu0  ;;  %11736 = vmatmul.mubr.msk.f32.gmra.mrb[138].mxu1 %vm346_vm2, %v6605_v53  ;;  %11768 = vmatmul.mubr.msk.f32.gmra.mrb[138].mxu0 %vm346_vm2, %v6784_v20  ;;  %v11393_v39 = vpop.f32.mrb[33].mxu1 }
 0x326   : > { %11738 = vmatprep.mubr.msk.f32.mxu1 %vm12229_vm1, %v12228_v1  ;;  %11770 = vmatprep.mubr.msk.f32.mxu0 %vm12229_vm1, %v12228_v1  ;;  %v6962_v39 = vld [vmem:[%s12670_s7 + $0x27] sm:$0xff] }
 0x328   : > { %v4955_v44 = vpop.f32.mrb[34].mxu1  ;;  %v5130_v32 = vpop.f32.mrb[34].mxu0 }
 0x329   : > { %v4977_v42 = vadd.f32 %v4955_v44, %v14431_v2  ;;  %v14549_v43 = vadd.f32 %v5130_v32, %v4976_v59  ;;  %v11428_v55 = vpop.f32.mrb[35].mxu0  ;;  %11739 = vmatmul.mubr.msk.f32.gmra.mrb[140].mxu1 %vm346_vm2, %v6606_v6  ;;  %11771 = vmatmul.mubr.msk.f32.gmra.mrb[140].mxu0 %vm346_vm2, %v6785_v11  ;;  %v11396_v7 = vpop.f32.mrb[35].mxu1  ;;  %v7141_v6 = vld [vmem:[%s12690_s13 + $0x1f] sm:$0xff] }
 0x32a   : > { %11741 = vmatprep.mubr.msk.f32.mxu1 %vm12229_vm1, %v12228_v1  ;;  %11773 = vmatprep.mubr.msk.f32.mxu0 %vm12229_vm1, %v12228_v1  ;;  %v6963_v7 = vld [vmem:[%s12670_s7 + $0x2f] sm:$0xff] }
 0x32c   : > { %v4960_v26 = vpop.f32.mrb[36].mxu1  ;;  %v5135_v2 = vpop.f32.mrb[36].mxu0 }
 0x32d   : > { %v4978_v17 = vadd.f32 %v4960_v26, %v14442_v54  ;;  %v14560_v47 = vadd.f32 %v5135_v2, %v4977_v42  ;;  %v11431_v33 = vpop.f32.mrb[37].mxu0  ;;  %11742 = vmatmul.mubr.msk.f32.gmra.mrb[142].mxu1 %vm346_vm2, %v6607_v16  ;;  %11774 = vmatmul.mubr.msk.f32.gmra.mrb[142].mxu0 %vm346_vm2, %v6786_v60  ;;  %v11399_v29 = vpop.f32.mrb[37].mxu1  ;;  %v7142_v16 = vld [vmem:[%s12690_s13 + $0x27] sm:$0xff] }
 0x32e   : > { %11744 = vmatprep.mubr.msk.f32.mxu1 %vm12229_vm1, %v12228_v1  ;;  %11776 = vmatprep.mubr.msk.f32.mxu0 %vm12229_vm1, %v12228_v1  ;;  %v6964_v29 = vld [vmem:[%s12670_s7 + $0x37] sm:$0xff] }
 0x330   : > { %v4965_v63 = vpop.f32.mrb[38].mxu1  ;;  %v5140_v54 = vpop.f32.mrb[38].mxu0 }
 0x331   : > { %v4979_v27 = vadd.f32 %v4965_v63, %v14453_v38  ;;  %v14571_v61 = vadd.f32 %v5140_v54, %v4978_v17  ;;  %v11434_v31 = vpop.f32.mrb[39].mxu0  ;;  %11745 = vmatmul.mubr.msk.f32.gmra.mrb[144].mxu1 %vm346_vm2, %v6608_v21  ;;  %11777 = vmatmul.mubr.msk.f32.gmra.mrb[144].mxu0 %vm346_vm2, %v6787_v3  ;;  %v11402_v30 = vpop.f32.mrb[39].mxu1  ;;  %v7143_v21 = vld [vmem:[%s12690_s13 + $0x2f] sm:$0xff] }
 0x332   : > { %11747 = vmatprep.mubr.msk.f32.mxu1 %vm12229_vm1, %v12228_v1  ;;  %11779 = vmatprep.mubr.msk.f32.mxu0 %vm12229_vm1, %v12228_v1  ;;  %v6965_v30 = vld [vmem:[%s12670_s7 + $0x3f] sm:$0xff] }
 0x334   : > { %v5145_v12 = vpop.f32.mrb[40].mxu0  ;;  %v5275_v38 = vpop.f32.mrb[40].mxu1 }
 0x335   : > { %v14581_v35 = vadd.f32 %v5145_v12, %v4979_v27  ;;  %v5329_v19 = vadd.f32 %v5275_v38, %v14464_v9  ;;  %v11437_v41 = vpop.f32.mrb[41].mxu0  ;;  %11748 = vmatmul.mubr.msk.f32.gmra.mrb[146].mxu1 %vm346_vm2, %v6609_v48  ;;  %11780 = vmatmul.mubr.msk.f32.gmra.mrb[146].mxu0 %vm346_vm2, %v6788_v37  ;;  %v11442_v22 = vpop.f32.mrb[41].mxu1  ;;  %v7144_v48 = vld [vmem:[%s12690_s13 + $0x37] sm:$0xff] }
 0x336   : > { %11750 = vmatprep.mubr.msk.f32.mxu1 %vm12229_vm1, %v12228_v1  ;;  %11782 = vmatprep.mubr.msk.f32.mxu0 %vm12229_vm1, %v12228_v1  ;;  %v6966_v22 = vld [vmem:[%s12670_s7 + $0x47] sm:$0xff] }
 0x338   : > { %v5280_v4 = vpop.f32.mrb[42].mxu1  ;;  %v5455_v5 = vpop.f32.mrb[42].mxu0 }
 0x339   : > { %v5330_v9 = vadd.f32 %v5280_v4, %v14478_v24  ;;  %v14593_v0 = vadd.f32 %v5455_v5, %v5329_v19  ;;  %v11477_v25 = vpop.f32.mrb[43].mxu0  ;;  %11751 = vmatmul.mubr.msk.f32.gmra.mrb[148].mxu1 %vm346_vm2, %v6610_v14  ;;  %11783 = vmatmul.mubr.msk.f32.gmra.mrb[148].mxu0 %vm346_vm2, %v6789_v49  ;;  %v11445_v57 = vpop.f32.mrb[43].mxu1  ;;  %v9772_v24 = vld [vmem:[%s15456_s4 + $0x9c] sm:$0x7]  ;;  %v7145_v14 = vld [vmem:[%s12690_s13 + $0x3f] sm:$0xff] }
 0x33a   : > { %11785 = vmatprep.mubr.msk.f32.mxu0 %vm12229_vm1, %v12228_v1  ;;  %11790 = vmatprep.mubr.msk.f32.mxu1 %vm12229_vm1, %v12228_v1  ;;  %v6967_v57 = vld [vmem:[%s12670_s7 + $0x4f] sm:$0xff] }
 0x33c   : > { %v5285_v50 = vpop.f32.mrb[44].mxu1  ;;  %v5460_v40 = vpop.f32.mrb[44].mxu0 }
 0x33d   : > { %v5331_v28 = vadd.f32 %v5285_v50, %v14494_v62  ;;  %v14607_v51 = vadd.f32 %v5460_v40, %v5330_v9  ;;  %v11480_v10 = vpop.f32.mrb[45].mxu0  ;;  %11786 = vmatmul.mubr.msk.f32.gmra.mrb[150].mxu0 %vm346_vm2, %v6790_v8  ;;  %11791 = vmatmul.mubr.msk.f32.vlgmr.msra.gmra.mrb[150].mxu1 %vm346_vm2, %v6960_v15  ;;  %v11448_v18 = vpop.f32.mrb[45].mxu1  ;;  %v9785_v62 = vld [vmem:[%s15456_s4 + $0xa0] sm:$0x7]  ;;  %v7146_v8 = vld [vmem:[%s12690_s13 + $0x47] sm:$0xff] }
 0x33e   : > { %11859 = vmatpush3.msk.msra.mxu1 %vm380_vm0, %v9772_v24  ;;  %11793 = vmatprep.mubr.msk.f32.mxu1 %vm12229_vm1, %v12228_v1  ;;  %v6968_v10 = vld [vmem:[%s12670_s7 + $0x57] sm:$0xff]  ;;  %v7147_v18 = vld [vmem:[%s12690_s13 + $0x4f] sm:$0xff] }
 0x33f   : > { %11825 = vmatprep.mubr.msk.f32.mxu0 %vm12229_vm1, %v12228_v1  ;;  %11928 = vmatprep.subr.mxu1 %v12228_v1 }
 0x340   : > { %v5290_v53 = vpop.f32.mrb[46].mxu1  ;;  %v5465_v20 = vpop.f32.mrb[46].mxu0 }
 0x341   : > { %v5332_v58 = vadd.f32 %v5290_v53, %v14507_v23  ;;  %v14623_v46 = vadd.f32 %v5465_v20, %v5331_v28  ;;  %v11483_v59 = vpop.f32.mrb[47].mxu0  ;;  %11794 = vmatmul.mubr.msk.f32.gmra.mrb[152].mxu1 %vm346_vm2, %v6961_v52  ;;  %11826 = vmatmul.mubr.msk.f32.vlgmr.msra.gmra.mrb[152].mxu0 %vm346_vm2, %v7140_v36  ;;  %v11451_v13 = vpop.f32.mrb[47].mxu1 }
 0x342   : > { %11894 = vmatpush3.msk.msra.mxu0 %vm380_vm0, %v9785_v62  ;;  %11796 = vmatprep.mubr.msk.f32.mxu1 %vm12229_vm1, %v12228_v1  ;;  %v7148_v59 = vld [vmem:[%s12690_s13 + $0x57] sm:$0xff] }
 0x343   : > { %11828 = vmatprep.mubr.msk.f32.mxu0 %vm12229_vm1, %v12228_v1  ;;  %11963 = vmatprep.subr.mxu0 %v12228_v1 }
 0x344   : > { %v5295_v23 = vpop.f32.mrb[48].mxu1  ;;  %v5470_v11 = vpop.f32.mrb[48].mxu0 }
 0x345   : > { %v5333_v44 = vadd.f32 %v5295_v23, %v14516_v45  ;;  %v14636_v32 = vadd.f32 %v5470_v11, %v5332_v58  ;;  %v11486_v42 = vpop.f32.mrb[49].mxu0  ;;  %11797 = vmatmul.mubr.msk.f32.gmra.mrb[154].mxu1 %vm346_vm2, %v6962_v39  ;;  %11829 = vmatmul.mubr.msk.f32.gmra.mrb[154].mxu0 %vm346_vm2, %v7141_v6  ;;  %v11454_v55 = vpop.f32.mrb[49].mxu1  ;;  %v6969_v58 = vld [vmem:[%s12670_s7 + $0x5f] sm:$0xff] }
 0x346   : > { %11799 = vmatprep.mubr.msk.f32.mxu1 %vm12229_vm1, %v12228_v1  ;;  %11831 = vmatprep.mubr.msk.f32.mxu0 %vm12229_vm1, %v12228_v1  ;;  %v7149_v42 = vld [vmem:[%s12690_s13 + $0x5f] sm:$0xff] }
 0x348   : > { %v5300_v60 = vpop.f32.mrb[50].mxu1  ;;  %v5475_v45 = vpop.f32.mrb[50].mxu0 }
 0x349   : > { %v5334_v26 = vadd.f32 %v5300_v60, %v14527_v34  ;;  %v14647_v2 = vadd.f32 %v5475_v45, %v5333_v44  ;;  %v11489_v17 = vpop.f32.mrb[51].mxu0  ;;  %11800 = vmatmul.mubr.msk.f32.gmra.mrb[156].mxu1 %vm346_vm2, %v6963_v7  ;;  %11832 = vmatmul.mubr.msk.f32.gmra.mrb[156].mxu0 %vm346_vm2, %v7142_v16  ;;  %v11457_v33 = vpop.f32.mrb[51].mxu1  ;;  %v6970_v44 = vld [vmem:[%s12670_s7 + $0x67] sm:$0xff] }
 0x34a   : > { %11802 = vmatprep.mubr.msk.f32.mxu1 %vm12229_vm1, %v12228_v1  ;;  %11834 = vmatprep.mubr.msk.f32.mxu0 %vm12229_vm1, %v12228_v1  ;;  %v7320_v17 = vld [vmem:[%s12670_s7 + $0x18] sm:$0xff] }
 0x34c   : > { %v5305_v3 = vpop.f32.mrb[52].mxu1  ;;  %v5480_v34 = vpop.f32.mrb[52].mxu0 }
 0x34d   : > { %v5335_v63 = vadd.f32 %v5305_v3, %v14538_v56  ;;  %v14658_v54 = vadd.f32 %v5480_v34, %v5334_v26  ;;  %v11492_v27 = vpop.f32.mrb[53].mxu0  ;;  %11803 = vmatmul.mubr.msk.f32.gmra.mrb[158].mxu1 %vm346_vm2, %v6964_v29  ;;  %11835 = vmatmul.mubr.msk.f32.gmra.mrb[158].mxu0 %vm346_vm2, %v7143_v21  ;;  %v11460_v31 = vpop.f32.mrb[53].mxu1  ;;  %v7150_v26 = vld [vmem:[%s12690_s13 + $0x67] sm:$0xff] }
 0x34e   : > { %11805 = vmatprep.mubr.msk.f32.mxu1 %vm12229_vm1, %v12228_v1  ;;  %11837 = vmatprep.mubr.msk.f32.mxu0 %vm12229_vm1, %v12228_v1  ;;  %v7321_v27 = vld [vmem:[%s12670_s7 + $0x20] sm:$0xff]  ;;  %v7500_v31 = vld [vmem:[%s12690_s13 + $0x18] sm:$0xff] }
 0x350   : > { %v5310_v37 = vpop.f32.mrb[54].mxu1  ;;  %v5485_v56 = vpop.f32.mrb[54].mxu0 }
 0x351   : > { %v5336_v12 = vadd.f32 %v5310_v37, %v14549_v43  ;;  %v14669_v38 = vadd.f32 %v5485_v56, %v5335_v63  ;;  %v11495_v19 = vpop.f32.mrb[55].mxu0  ;;  %11806 = vmatmul.mubr.msk.f32.gmra.mrb[160].mxu1 %vm346_vm2, %v6965_v30  ;;  %11838 = vmatmul.mubr.msk.f32.gmra.mrb[160].mxu0 %vm346_vm2, %v7144_v48  ;;  %v11463_v41 = vpop.f32.mrb[55].mxu1 }
 0x352   : > { %11808 = vmatprep.mubr.msk.f32.mxu1 %vm12229_vm1, %v12228_v1  ;;  %11840 = vmatprep.mubr.msk.f32.mxu0 %vm12229_vm1, %v12228_v1  ;;  %v7322_v41 = vld [vmem:[%s12670_s7 + $0x28] sm:$0xff] }
 0x354   : > { %v5315_v49 = vpop.f32.mrb[56].mxu1  ;;  %v5490_v43 = vpop.f32.mrb[56].mxu0 }
 0x355   : > { %v5337_v4 = vadd.f32 %v5315_v49, %v14560_v47  ;;  %v14680_v5 = vadd.f32 %v5490_v43, %v5336_v12  ;;  %v11498_v9 = vpop.f32.mrb[57].mxu0  ;;  %11809 = vmatmul.mubr.msk.f32.gmra.mrb[162].mxu1 %vm346_vm2, %v6966_v22  ;;  %11841 = vmatmul.mubr.msk.f32.gmra.mrb[162].mxu0 %vm346_vm2, %v7145_v14  ;;  %v11466_v25 = vpop.f32.mrb[57].mxu1  ;;  %v7501_v22 = vld [vmem:[%s12690_s13 + $0x20] sm:$0xff] }
 0x356   : > { %11811 = vmatprep.mubr.msk.f32.mxu1 %vm12229_vm1, %v12228_v1  ;;  %11843 = vmatprep.mubr.msk.f32.mxu0 %vm12229_vm1, %v12228_v1  ;;  %v7323_v25 = vld [vmem:[%s12670_s7 + $0x30] sm:$0xff] }
 0x358   : > { %v5320_v15 = vpop.f32.mrb[58].mxu1  ;;  %v5495_v47 = vpop.f32.mrb[58].mxu0 }
 0x359   : > { %v5338_v24 = vadd.f32 %v5320_v15, %v14571_v61  ;;  %v14691_v50 = vadd.f32 %v5495_v47, %v5337_v4  ;;  %v11501_v40 = vpop.f32.mrb[59].mxu0  ;;  %11812 = vmatmul.mubr.msk.f32.gmra.mrb[164].mxu1 %vm346_vm2, %v6967_v57  ;;  %11844 = vmatmul.mubr.msk.f32.gmra.mrb[164].mxu0 %vm346_vm2, %v7146_v8  ;;  %v11469_v28 = vpop.f32.mrb[59].mxu1  ;;  %v7502_v57 = vld [vmem:[%s12690_s13 + $0x28] sm:$0xff] }
 0x35a   : > { %11814 = vmatprep.mubr.msk.f32.mxu1 %vm12229_vm1, %v12228_v1  ;;  %11846 = vmatprep.mubr.msk.f32.mxu0 %vm12229_vm1, %v12228_v1  ;;  %v7324_v28 = vld [vmem:[%s12670_s7 + $0x38] sm:$0xff] }
 0x35c   : > { %v5325_v52 = vpop.f32.mrb[60].mxu1  ;;  %v5500_v61 = vpop.f32.mrb[60].mxu0 }
 0x35d   : > { %v5339_v36 = vadd.f32 %v5325_v52, %v14581_v35  ;;  %v14702_v62 = vadd.f32 %v5500_v61, %v5338_v24  ;;  %v11504_v53 = vpop.f32.mrb[61].mxu0  ;;  %11815 = vmatmul.mubr.msk.f32.gmra.mrb[166].mxu1 %vm346_vm2, %v6968_v10  ;;  %11847 = vmatmul.mubr.msk.f32.gmra.mrb[166].mxu0 %vm346_vm2, %v7147_v18  ;;  %v11472_v20 = vpop.f32.mrb[61].mxu1  ;;  %v7503_v10 = vld [vmem:[%s12690_s13 + $0x30] sm:$0xff] }
 0x35e   : > { %11817 = vmatprep.mubr.msk.f32.mxu1 %vm12229_vm1, %v12228_v1  ;;  %11849 = vmatprep.mubr.msk.f32.mxu0 %vm12229_vm1, %v12228_v1  ;;  %v7325_v20 = vld [vmem:[%s12670_s7 + $0x40] sm:$0xff] }
 0x360   : > { %v5505_v13 = vpop.f32.mrb[62].mxu0  ;;  %v5635_v35 = vpop.f32.mrb[62].mxu1 }
 0x361   : > { %v14712_v39 = vadd.f32 %v5505_v13, %v5339_v36  ;;  %v5689_v6 = vadd.f32 %v5635_v35, %v14593_v0  ;;  %v11507_v23 = vpop.f32.mrb[63].mxu0  ;;  %11818 = vmatmul.mubr.msk.f32.gmra.mrb[168].mxu1 %vm346_vm2, %v6969_v58  ;;  %11850 = vmatmul.mubr.msk.f32.gmra.mrb[168].mxu0 %vm346_vm2, %v7148_v59  ;;  %v11512_v11 = vpop.f32.mrb[63].mxu1  ;;  %v7504_v58 = vld [vmem:[%s12690_s13 + $0x38] sm:$0xff] }
 0x362   : > { %11820 = vmatprep.mubr.msk.f32.mxu1 %vm12229_vm1, %v12228_v1  ;;  %11852 = vmatprep.mubr.msk.f32.mxu0 %vm12229_vm1, %v12228_v1  ;;  %v7326_v11 = vld [vmem:[%s12670_s7 + $0x48] sm:$0xff] }
 0x364   : > { %v5640_v55 = vpop.f32.mrb[64].mxu1  ;;  %v5815_v7 = vpop.f32.mrb[64].mxu0 }
 0x365   : > { %v5690_v0 = vadd.f32 %v5640_v55, %v14607_v51  ;;  %v14724_v16 = vadd.f32 %v5815_v7, %v5689_v6  ;;  %v11547_v60 = vpop.f32.mrb[65].mxu0  ;;  %11821 = vmatmul.mubr.msk.f32.gmra.mrb[170].mxu1 %vm346_vm2, %v6970_v44  ;;  %11853 = vmatmul.mubr.msk.f32.gmra.mrb[170].mxu0 %vm346_vm2, %v7149_v42  ;;  %v11515_v45 = vpop.f32.mrb[65].mxu1  ;;  %v9798_v51 = vld [vmem:[%s15456_s4 + $0xa4] sm:$0x7] }
 0x366   : > { %11855 = vmatprep.mubr.msk.f32.mxu0 %vm12229_vm1, %v12228_v1  ;;  %11860 = vmatprep.mubr.msk.f32.mxu1 %vm12229_vm1, %v12228_v1  ;;  %v7505_v44 = vld [vmem:[%s12690_s13 + $0x40] sm:$0xff]  ;;  %v7327_v45 = vld [vmem:[%s12670_s7 + $0x50] sm:$0xff] }
 0x368   : > { %v5645_v33 = vpop.f32.mrb[66].mxu1  ;;  %v5820_v29 = vpop.f32.mrb[66].mxu0 }
 0x369   : > { %v5691_v21 = vadd.f32 %v5645_v33, %v14623_v46  ;;  %v14738_v3 = vadd.f32 %v5820_v29, %v5690_v0  ;;  %v11550_v34 = vpop.f32.mrb[67].mxu0  ;;  %11856 = vmatmul.mubr.msk.f32.gmra.mrb[172].mxu0 %vm346_vm2, %v7150_v26  ;;  %11861 = vmatmul.mubr.msk.f32.vlgmr.msra.gmra.mrb[172].mxu1 %vm346_vm2, %v7320_v17  ;;  %v11518_v63 = vpop.f32.mrb[67].mxu1  ;;  %v9811_v46 = vld [vmem:[%s15456_s4 + $0xa8] sm:$0x7] }
 0x36a   : > { %11929 = vmatpush3.msk.msra.mxu1 %vm380_vm0, %v9798_v51  ;;  %11863 = vmatprep.mubr.msk.f32.mxu1 %vm12229_vm1, %v12228_v1  ;;  %v7506_v26 = vld [vmem:[%s12690_s13 + $0x48] sm:$0xff]  ;;  %v7328_v34 = vld [vmem:[%s12670_s7 + $0x58] sm:$0xff]  ;;  %v7507_v63 = vld [vmem:[%s12690_s13 + $0x50] sm:$0xff] }
 0x36b   : > { %11895 = vmatprep.mubr.msk.f32.mxu0 %vm12229_vm1, %v12228_v1  ;;  %11998 = vmatprep.subr.mxu1 %v12228_v1 }
 0x36c   : > { %v5650_v30 = vpop.f32.mrb[68].mxu1  ;;  %v5825_v48 = vpop.f32.mrb[68].mxu0 }
 0x36d   : > { %v5692_v37 = vadd.f32 %v5650_v30, %v14636_v32  ;;  %v14754_v56 = vadd.f32 %v5825_v48, %v5691_v21  ;;  %v11553_v12 = vpop.f32.mrb[69].mxu0  ;;  %11864 = vmatmul.mubr.msk.f32.gmra.mrb[174].mxu1 %vm346_vm2, %v7321_v27  ;;  %11896 = vmatmul.mubr.msk.f32.vlgmr.msra.gmra.mrb[174].mxu0 %vm346_vm2, %v7500_v31  ;;  %v11521_v19 = vpop.f32.mrb[69].mxu1 }
 0x36e   : > { %11964 = vmatpush3.msk.msra.mxu0 %vm380_vm0, %v9811_v46  ;;  %11866 = vmatprep.mubr.msk.f32.mxu1 %vm12229_vm1, %v12228_v1  ;;  %v7508_v12 = vld [vmem:[%s12690_s13 + $0x58] sm:$0xff] }
 0x36f   : > { %11898 = vmatprep.mubr.msk.f32.mxu0 %vm12229_vm1, %v12228_v1  ;;  %12033 = vmatprep.subr.mxu0 %v12228_v1 }
 0x370   : > { %v5655_v32 = vpop.f32.mrb[70].mxu1  ;;  %v5830_v14 = vpop.f32.mrb[70].mxu0 }
 0x371   : > { %v5693_v49 = vadd.f32 %v5655_v32, %v14647_v2  ;;  %v14767_v43 = vadd.f32 %v5830_v14, %v5692_v37  ;;  %v11556_v4 = vpop.f32.mrb[71].mxu0  ;;  %11867 = vmatmul.mubr.msk.f32.gmra.mrb[176].mxu1 %vm346_vm2, %v7322_v41  ;;  %11899 = vmatmul.mubr.msk.f32.gmra.mrb[176].mxu0 %vm346_vm2, %v7501_v22  ;;  %v11524_v9 = vpop.f32.mrb[71].mxu1  ;;  %v7329_v37 = vld [vmem:[%s12670_s7 + $0x60] sm:$0xff] }
 0x372   : > { %11869 = vmatprep.mubr.msk.f32.mxu1 %vm12229_vm1, %v12228_v1  ;;  %11901 = vmatprep.mubr.msk.f32.mxu0 %vm12229_vm1, %v12228_v1  ;;  %v7509_v4 = vld [vmem:[%s12690_s13 + $0x60] sm:$0xff] }
 0x374   : > { %v5660_v8 = vpop.f32.mrb[72].mxu1  ;;  %v5835_v2 = vpop.f32.mrb[72].mxu0 }
 0x375   : > { %v5694_v15 = vadd.f32 %v5660_v8, %v14658_v54  ;;  %v14778_v47 = vadd.f32 %v5835_v2, %v5693_v49  ;;  %v11559_v24 = vpop.f32.mrb[73].mxu0  ;;  %11870 = vmatmul.mubr.msk.f32.gmra.mrb[178].mxu1 %vm346_vm2, %v7323_v25  ;;  %11902 = vmatmul.mubr.msk.f32.gmra.mrb[178].mxu0 %vm346_vm2, %v7502_v57  ;;  %v11527_v40 = vpop.f32.mrb[73].mxu1  ;;  %v7330_v49 = vld [vmem:[%s12670_s7 + $0x68] sm:$0xff] }
 0x376   : > { %11872 = vmatprep.mubr.msk.f32.mxu1 %vm12229_vm1, %v12228_v1  ;;  %11904 = vmatprep.mubr.msk.f32.mxu0 %vm12229_vm1, %v12228_v1  ;;  %v7680_v24 = vld [vmem:[%s12670_s7 + $0x19] sm:$0xff] }
 0x378   : > { %v5665_v18 = vpop.f32.mrb[74].mxu1  ;;  %v5840_v54 = vpop.f32.mrb[74].mxu0 }
 0x379   : > { %v5695_v52 = vadd.f32 %v5665_v18, %v14669_v38  ;;  %v14789_v61 = vadd.f32 %v5840_v54, %v5694_v15  ;;  %v11562_v36 = vpop.f32.mrb[75].mxu0  ;;  %11873 = vmatmul.mubr.msk.f32.gmra.mrb[180].mxu1 %vm346_vm2, %v7324_v28  ;;  %11905 = vmatmul.mubr.msk.f32.gmra.mrb[180].mxu0 %vm346_vm2, %v7503_v10  ;;  %v11530_v53 = vpop.f32.mrb[75].mxu1  ;;  %v7510_v15 = vld [vmem:[%s12690_s13 + $0x68] sm:$0xff] }
 0x37a   : > { %11875 = vmatprep.mubr.msk.f32.mxu1 %vm12229_vm1, %v12228_v1  ;;  %11907 = vmatprep.mubr.msk.f32.mxu0 %vm12229_vm1, %v12228_v1  ;;  %v7681_v36 = vld [vmem:[%s12670_s7 + $0x21] sm:$0xff] }
 0x37b   : > { %v7860_v53 = vld [vmem:[%s12344_s12 + $0x21] sm:$0xff] }
 0x37c   : > { %v5670_v59 = vpop.f32.mrb[76].mxu1  ;;  %v5845_v38 = vpop.f32.mrb[76].mxu0 }
 0x37d   : > { %v5696_v13 = vadd.f32 %v5670_v59, %v14680_v5  ;;  %v14800_v35 = vadd.f32 %v5845_v38, %v5695_v52  ;;  %v11565_v6 = vpop.f32.mrb[77].mxu0  ;;  %11876 = vmatmul.mubr.msk.f32.gmra.mrb[182].mxu1 %vm346_vm2, %v7325_v20  ;;  %11908 = vmatmul.mubr.msk.f32.gmra.mrb[182].mxu0 %vm346_vm2, %v7504_v58  ;;  %v11533_v23 = vpop.f32.mrb[77].mxu1 }
 0x37e   : > { %11878 = vmatprep.mubr.msk.f32.mxu1 %vm12229_vm1, %v12228_v1  ;;  %11910 = vmatprep.mubr.msk.f32.mxu0 %vm12229_vm1, %v12228_v1  ;;  %v7682_v23 = vld [vmem:[%s12670_s7 + $0x29] sm:$0xff] }
 0x380   : > { %v5675_v42 = vpop.f32.mrb[78].mxu1  ;;  %v5850_v5 = vpop.f32.mrb[78].mxu0 }
 0x381   : > { %v5697_v55 = vadd.f32 %v5675_v42, %v14691_v50  ;;  %v14811_v7 = vadd.f32 %v5850_v5, %v5696_v13  ;;  %v11568_v0 = vpop.f32.mrb[79].mxu0  ;;  %11879 = vmatmul.mubr.msk.f32.gmra.mrb[184].mxu1 %vm346_vm2, %v7326_v11  ;;  %11911 = vmatmul.mubr.msk.f32.gmra.mrb[184].mxu0 %vm346_vm2, %v7505_v44  ;;  %v11536_v60 = vpop.f32.mrb[79].mxu1  ;;  %v7861_v11 = vld [vmem:[%s12344_s12 + $0x29] sm:$0xff] }
 0x382   : > { %11881 = vmatprep.mubr.msk.f32.mxu1 %vm12229_vm1, %v12228_v1  ;;  %11913 = vmatprep.mubr.msk.f32.mxu0 %vm12229_vm1, %v12228_v1  ;;  %v7683_v60 = vld [vmem:[%s12670_s7 + $0x31] sm:$0xff] }
 0x384   : > { %v5680_v17 = vpop.f32.mrb[80].mxu1  ;;  %v5855_v50 = vpop.f32.mrb[80].mxu0 }
 0x385   : > { %v5698_v51 = vadd.f32 %v5680_v17, %v14702_v62  ;;  %v14822_v33 = vadd.f32 %v5855_v50, %v5697_v55  ;;  %v11571_v29 = vpop.f32.mrb[81].mxu0  ;;  %11882 = vmatmul.mubr.msk.f32.gmra.mrb[186].mxu1 %vm346_vm2, %v7327_v45  ;;  %11914 = vmatmul.mubr.msk.f32.gmra.mrb[186].mxu0 %vm346_vm2, %v7506_v26  ;;  %v11539_v21 = vpop.f32.mrb[81].mxu1  ;;  %v7862_v45 = vld [vmem:[%s12344_s12 + $0x31] sm:$0xff] }
 0x386   : > { %11884 = vmatprep.mubr.msk.f32.mxu1 %vm12229_vm1, %v12228_v1  ;;  %11916 = vmatprep.mubr.msk.f32.mxu0 %vm12229_vm1, %v12228_v1  ;;  %v7684_v21 = vld [vmem:[%s12670_s7 + $0x39] sm:$0xff] }
 0x388   : > { %v5685_v27 = vpop.f32.mrb[82].mxu1  ;;  %v5860_v62 = vpop.f32.mrb[82].mxu0 }
 0x389   : > { %v5699_v31 = vadd.f32 %v5685_v27, %v14712_v39  ;;  %v14833_v46 = vadd.f32 %v5860_v62, %v5698_v51  ;;  %v11574_v30 = vpop.f32.mrb[83].mxu0  ;;  %11885 = vmatmul.mubr.msk.f32.gmra.mrb[188].mxu1 %vm346_vm2, %v7328_v34  ;;  %11917 = vmatmul.mubr.msk.f32.gmra.mrb[188].mxu0 %vm346_vm2, %v7507_v63  ;;  %v11542_v48 = vpop.f32.mrb[83].mxu1  ;;  %v7863_v34 = vld [vmem:[%s12344_s12 + $0x39] sm:$0xff] }
 0x38a   : > { %11887 = vmatprep.mubr.msk.f32.mxu1 %vm12229_vm1, %v12228_v1  ;;  %11919 = vmatprep.mubr.msk.f32.mxu0 %vm12229_vm1, %v12228_v1  ;;  %v7685_v48 = vld [vmem:[%s12670_s7 + $0x41] sm:$0xff] }
 0x38c   : > { %v5865_v19 = vpop.f32.mrb[84].mxu0  ;;  %v5995_v39 = vpop.f32.mrb[84].mxu1 }
 0x38d   : > { %v14843_v41 = vadd.f32 %v5865_v19, %v5699_v31  ;;  %v6049_v22 = vadd.f32 %v5995_v39, %v14724_v16  ;;  %v11577_v32 = vpop.f32.mrb[85].mxu0  ;;  %11888 = vmatmul.mubr.msk.f32.gmra.mrb[190].mxu1 %vm346_vm2, %v7329_v37  ;;  %11920 = vmatmul.mubr.msk.f32.gmra.mrb[190].mxu0 %vm346_vm2, %v7508_v12  ;;  %v11582_v14 = vpop.f32.mrb[85].mxu1  ;;  %v7864_v37 = vld [vmem:[%s12344_s12 + $0x41] sm:$0xff] }
 0x38e   : > { %11890 = vmatprep.mubr.msk.f32.mxu1 %vm12229_vm1, %v12228_v1  ;;  %11922 = vmatprep.mubr.msk.f32.mxu0 %vm12229_vm1, %v12228_v1  ;;  %v7686_v14 = vld [vmem:[%s12670_s7 + $0x49] sm:$0xff] }
 0x390   : > { %v6000_v9 = vpop.f32.mrb[86].mxu1  ;;  %v6175_v25 = vpop.f32.mrb[86].mxu0 }
 0x391   : > { %v6050_v16 = vadd.f32 %v6000_v9, %v14738_v3  ;;  %v14855_v57 = vadd.f32 %v6175_v25, %v6049_v22  ;;  %v11617_v8 = vpop.f32.mrb[87].mxu0  ;;  %11891 = vmatmul.mubr.msk.f32.gmra.mrb[192].mxu1 %vm346_vm2, %v7330_v49  ;;  %11923 = vmatmul.mubr.msk.f32.gmra.mrb[192].mxu0 %vm346_vm2, %v7509_v4  ;;  %v11585_v2 = vpop.f32.mrb[87].mxu1  ;;  %v9824_v3 = vld [vmem:[%s15456_s4 + $0xac] sm:$0x7] }
 0x392   : > { %11925 = vmatprep.mubr.msk.f32.mxu0 %vm12229_vm1, %v12228_v1  ;;  %11930 = vmatprep.mubr.msk.f32.mxu1 %vm12229_vm1, %v12228_v1  ;;  %v7865_v49 = vld [vmem:[%s12344_s12 + $0x49] sm:$0xff]  ;;  %v7687_v2 = vld [vmem:[%s12670_s7 + $0x51] sm:$0xff] }
 0x394   : > { %v6005_v40 = vpop.f32.mrb[88].mxu1  ;;  %v6180_v28 = vpop.f32.mrb[88].mxu0 }
 0x395   : > { %v6051_v10 = vadd.f32 %v6005_v40, %v14754_v56  ;;  %v14869_v18 = vadd.f32 %v6180_v28, %v6050_v16  ;;  %v11620_v54 = vpop.f32.mrb[89].mxu0  ;;  %11926 = vmatmul.mubr.msk.f32.gmra.mrb[194].mxu0 %vm346_vm2, %v7510_v15  ;;  %11931 = vmatmul.mubr.msk.f32.vlgmr.msra.gmra.mrb[194].mxu1 %vm346_vm2, %v7680_v24  ;;  %v11588_v52 = vpop.f32.mrb[89].mxu1  ;;  %v9837_v56 = vld [vmem:[%s15456_s4 + $0xb0] sm:$0x7] }
 0x396   : > { %11999 = vmatpush3.msk.msra.mxu1 %vm380_vm0, %v9824_v3  ;;  %11933 = vmatprep.mubr.msk.f32.mxu1 %vm12229_vm1, %v12228_v1  ;;  %v7866_v15 = vld [vmem:[%s12344_s12 + $0x51] sm:$0xff]  ;;  %v7688_v54 = vld [vmem:[%s12670_s7 + $0x59] sm:$0xff] }
 0x397   : > { %11965 = vmatprep.mubr.msk.f32.mxu0 %vm12229_vm1, %v12228_v1  ;;  %12068 = vmatprep.subr.mxu1 %v12228_v1  ;;  %v7867_v52 = vld [vmem:[%s12344_s12 + $0x59] sm:$0xff] }
 0x398   : > { %v6010_v20 = vpop.f32.mrb[90].mxu1  ;;  %v6185_v58 = vpop.f32.mrb[90].mxu0 }
 0x399   : > { %v6052_v59 = vadd.f32 %v6010_v20, %v14767_v43  ;;  %v14885_v38 = vadd.f32 %v6185_v58, %v6051_v10  ;;  %v11623_v13 = vpop.f32.mrb[91].mxu0  ;;  %11934 = vmatmul.mubr.msk.f32.gmra.mrb[196].mxu1 %vm346_vm2, %v7681_v36  ;;  %11966 = vmatmul.mubr.msk.f32.vlgmr.msra.gmra.mrb[196].mxu0 %vm346_vm2, %v7860_v53  ;;  %v11591_v6 = vpop.f32.mrb[91].mxu1 }
 0x39a   : > { %12034 = vmatpush3.msk.msra.mxu0 %vm380_vm0, %v9837_v56  ;;  %11936 = vmatprep.mubr.msk.f32.mxu1 %vm12229_vm1, %v12228_v1  ;;  %v7868_v13 = vld [vmem:[%s12344_s12 + $0x61] sm:$0xff] }
 0x39b   : > { %11968 = vmatprep.mubr.msk.f32.mxu0 %vm12229_vm1, %v12228_v1  ;;  %12103 = vmatprep.subr.mxu0 %v12228_v1 }
 0x39c   : > { %v6015_v43 = vpop.f32.mrb[92].mxu1  ;;  %v6190_v44 = vpop.f32.mrb[92].mxu0 }
 0x39d   : > { %v6053_v42 = vadd.f32 %v6015_v43, %v14778_v47  ;;  %v14898_v5 = vadd.f32 %v6190_v44, %v6052_v59  ;;  %v11626_v55 = vpop.f32.mrb[93].mxu0  ;;  %11937 = vmatmul.mubr.msk.f32.gmra.mrb[198].mxu1 %vm346_vm2, %v7682_v23  ;;  %11969 = vmatmul.mubr.msk.f32.gmra.mrb[198].mxu0 %vm346_vm2, %v7861_v11  ;;  %v11594_v0 = vpop.f32.mrb[93].mxu1  ;;  %v7689_v59 = vld [vmem:[%s12670_s7 + $0x61] sm:$0xff] }
 0x39e   : > { %11939 = vmatprep.mubr.msk.f32.mxu1 %vm12229_vm1, %v12228_v1  ;;  %11971 = vmatprep.mubr.msk.f32.mxu0 %vm12229_vm1, %v12228_v1  ;;  %v7869_v55 = vld [vmem:[%s12344_s12 + $0x69] sm:$0xff] }
 0x3a0   : > { %v6020_v26 = vpop.f32.mrb[94].mxu1  ;;  %v6195_v47 = vpop.f32.mrb[94].mxu0 }
 0x3a1   : > { %v6054_v17 = vadd.f32 %v6020_v26, %v14789_v61  ;;  %v14909_v50 = vadd.f32 %v6195_v47, %v6053_v42  ;;  %v11629_v51 = vpop.f32.mrb[95].mxu0  ;;  %11940 = vmatmul.mubr.msk.f32.gmra.mrb[200].mxu1 %vm346_vm2, %v7683_v60  ;;  %11972 = vmatmul.mubr.msk.f32.gmra.mrb[200].mxu0 %vm346_vm2, %v7862_v45  ;;  %v11597_v29 = vpop.f32.mrb[95].mxu1  ;;  %v7690_v42 = vld [vmem:[%s12670_s7 + $0x69] sm:$0xff] }
 0x3a2   : > { %11942 = vmatprep.mubr.msk.f32.mxu1 %vm12229_vm1, %v12228_v1  ;;  %11974 = vmatprep.mubr.msk.f32.mxu0 %vm12229_vm1, %v12228_v1  ;;  %v8040_v51 = vld [vmem:[%s12294_s29 + $0x21] sm:$0xff] }
 0x3a4   : > { %v6025_v63 = vpop.f32.mrb[96].mxu1  ;;  %v6200_v61 = vpop.f32.mrb[96].mxu0 }
 0x3a5   : > { %v6055_v27 = vadd.f32 %v6025_v63, %v14800_v35  ;;  %v14920_v62 = vadd.f32 %v6200_v61, %v6054_v17  ;;  %v11632_v31 = vpop.f32.mrb[97].mxu0  ;;  %11943 = vmatmul.mubr.msk.f32.gmra.mrb[202].mxu1 %vm346_vm2, %v7684_v21  ;;  %11975 = vmatmul.mubr.msk.f32.gmra.mrb[202].mxu0 %vm346_vm2, %v7863_v34  ;;  %v11600_v30 = vpop.f32.mrb[97].mxu1  ;;  %v7870_v17 = vld [vmem:[%s12344_s12 + $0x71] sm:$0xff] }
 0x3a6   : > { %11945 = vmatprep.mubr.msk.f32.mxu1 %vm12229_vm1, %v12228_v1  ;;  %11977 = vmatprep.mubr.msk.f32.mxu0 %vm12229_vm1, %v12228_v1  ;;  %v8041_v31 = vld [vmem:[%s12294_s29 + $0x29] sm:$0xff] }
 0x3a7   : > { %v8220_v30 = vld [vmem:[%s12344_s12 + $0x22] sm:$0xff] }
 0x3a8   : > { %v6030_v12 = vpop.f32.mrb[98].mxu1  ;;  %v6205_v35 = vpop.f32.mrb[98].mxu0 }
 0x3a9   : > { %v6056_v19 = vadd.f32 %v6030_v12, %v14811_v7  ;;  %v14931_v39 = vadd.f32 %v6205_v35, %v6055_v27  ;;  %v11635_v22 = vpop.f32.mrb[99].mxu0  ;;  %11946 = vmatmul.mubr.msk.f32.gmra.mrb[204].mxu1 %vm346_vm2, %v7685_v48  ;;  %11978 = vmatmul.mubr.msk.f32.gmra.mrb[204].mxu0 %vm346_vm2, %v7864_v37  ;;  %v11603_v32 = vpop.f32.mrb[99].mxu1 }
 0x3aa   : > { %11948 = vmatprep.mubr.msk.f32.mxu1 %vm12229_vm1, %v12228_v1  ;;  %11980 = vmatprep.mubr.msk.f32.mxu0 %vm12229_vm1, %v12228_v1  ;;  %v8042_v32 = vld [vmem:[%s12294_s29 + $0x31] sm:$0xff] }
 0x3ac   : > { %v6035_v4 = vpop.f32.mrb[100].mxu1  ;;  %v6210_v7 = vpop.f32.mrb[100].mxu0 }
 0x3ad   : > { %v6057_v9 = vadd.f32 %v6035_v4, %v14822_v33  ;;  %v14942_v25 = vadd.f32 %v6210_v7, %v6056_v19  ;;  %v11638_v16 = vpop.f32.mrb[101].mxu0  ;;  %11949 = vmatmul.mubr.msk.f32.gmra.mrb[206].mxu1 %vm346_vm2, %v7686_v14  ;;  %11981 = vmatmul.mubr.msk.f32.gmra.mrb[206].mxu0 %vm346_vm2, %v7865_v49  ;;  %v11606_v8 = vpop.f32.mrb[101].mxu1  ;;  %v8221_v14 = vld [vmem:[%s12344_s12 + $0x2a] sm:$0xff] }
 0x3ae   : > { %11951 = vmatprep.mubr.msk.f32.mxu1 %vm12229_vm1, %v12228_v1  ;;  %11983 = vmatprep.mubr.msk.f32.mxu0 %vm12229_vm1, %v12228_v1  ;;  %v8043_v8 = vld [vmem:[%s12294_s29 + $0x39] sm:$0xff] }
 0x3b0   : > { %v6040_v24 = vpop.f32.mrb[102].mxu1  ;;  %v6215_v33 = vpop.f32.mrb[102].mxu0 }
 0x3b1   : > { %v6058_v3 = vadd.f32 %v6040_v24, %v14833_v46  ;;  %v14953_v40 = vadd.f32 %v6215_v33, %v6057_v9  ;;  %v11641_v28 = vpop.f32.mrb[103].mxu0  ;;  %11952 = vmatmul.mubr.msk.f32.gmra.mrb[208].mxu1 %vm346_vm2, %v7687_v2  ;;  %11984 = vmatmul.mubr.msk.f32.gmra.mrb[208].mxu0 %vm346_vm2, %v7866_v15  ;;  %v11609_v10 = vpop.f32.mrb[103].mxu1  ;;  %v8222_v2 = vld [vmem:[%s12344_s12 + $0x32] sm:$0xff] }
 0x3b2   : > { %11954 = vmatprep.mubr.msk.f32.mxu1 %vm12229_vm1, %v12228_v1  ;;  %11986 = vmatprep.mubr.msk.f32.mxu0 %vm12229_vm1, %v12228_v1  ;;  %v8044_v10 = vld [vmem:[%s12294_s29 + $0x41] sm:$0xff] }
 0x3b4   : > { %v6045_v36 = vpop.f32.mrb[104].mxu1  ;;  %v6220_v46 = vpop.f32.mrb[104].mxu0 }
 0x3b5   : > { %v6059_v53 = vadd.f32 %v6045_v36, %v14843_v41  ;;  %v14964_v56 = vadd.f32 %v6220_v46, %v6058_v3  ;;  %v11644_v20 = vpop.f32.mrb[105].mxu0  ;;  %11955 = vmatmul.mubr.msk.f32.gmra.mrb[210].mxu1 %vm346_vm2, %v7688_v54  ;;  %11987 = vmatmul.mubr.msk.f32.gmra.mrb[210].mxu0 %vm346_vm2, %v7867_v52  ;;  %v11612_v58 = vpop.f32.mrb[105].mxu1  ;;  %v8223_v54 = vld [vmem:[%s12344_s12 + $0x3a] sm:$0xff] }
 0x3b6   : > { %11957 = vmatprep.mubr.msk.f32.mxu1 %vm12229_vm1, %v12228_v1  ;;  %11989 = vmatprep.mubr.msk.f32.mxu0 %vm12229_vm1, %v12228_v1  ;;  %v8045_v58 = vld [vmem:[%s12294_s29 + $0x49] sm:$0xff] }
 0x3b8   : > { %v6225_v6 = vpop.f32.mrb[106].mxu0  ;;  %v6355_v41 = vpop.f32.mrb[106].mxu1 }
 0x3b9   : > { %v14974_v23 = vadd.f32 %v6225_v6, %v6059_v53  ;;  %v6409_v11 = vadd.f32 %v6355_v41, %v14855_v57  ;;  %v11647_v43 = vpop.f32.mrb[107].mxu0  ;;  %11958 = vmatmul.mubr.msk.f32.gmra.mrb[212].mxu1 %vm346_vm2, %v7689_v59  ;;  %11990 = vmatmul.mubr.msk.f32.gmra.mrb[212].mxu0 %vm346_vm2, %v7868_v13  ;;  %v11652_v44 = vpop.f32.mrb[107].mxu1  ;;  %v8224_v59 = vld [vmem:[%s12344_s12 + $0x42] sm:$0xff] }
 0x3ba   : > { %11960 = vmatprep.mubr.msk.f32.mxu1 %vm12229_vm1, %v12228_v1  ;;  %11992 = vmatprep.mubr.msk.f32.mxu0 %vm12229_vm1, %v12228_v1  ;;  %v8046_v44 = vld [vmem:[%s12294_s29 + $0x51] sm:$0xff] }
 0x3bc   : > { %v6360_v0 = vpop.f32.mrb[108].mxu1  ;;  %v6535_v60 = vpop.f32.mrb[108].mxu0 }
 0x3bd   : > { %v6410_v57 = vadd.f32 %v6360_v0, %v14869_v18  ;;  %v14986_v45 = vadd.f32 %v6535_v60, %v6409_v11  ;;  %v11687_v26 = vpop.f32.mrb[109].mxu0  ;;  %11961 = vmatmul.mubr.msk.f32.gmra.mrb[214].mxu1 %vm346_vm2, %v7690_v42  ;;  %11993 = vmatmul.mubr.msk.f32.gmra.mrb[214].mxu0 %vm346_vm2, %v7869_v55  ;;  %v11655_v47 = vpop.f32.mrb[109].mxu1  ;;  %v9850_v18 = vld [vmem:[%s15456_s4 + $0xb4] sm:$0x7]  ;;  %v8225_v42 = vld [vmem:[%s12344_s12 + $0x4a] sm:$0xff] }
 0x3be   : > { %11995 = vmatprep.mubr.msk.f32.mxu0 %vm12229_vm1, %v12228_v1  ;;  %12000 = vmatprep.mubr.msk.f32.mxu1 %vm12229_vm1, %v12228_v1  ;;  %v8047_v47 = vld [vmem:[%s12294_s29 + $0x59] sm:$0xff] }
 0x3c0   : > { %v6365_v29 = vpop.f32.mrb[110].mxu1  ;;  %v6540_v21 = vpop.f32.mrb[110].mxu0 }
 0x3c1   : > { %v6411_v34 = vadd.f32 %v6365_v29, %v14885_v38  ;;  %v15000_v63 = vadd.f32 %v6540_v21, %v6410_v57  ;;  %v11690_v61 = vpop.f32.mrb[111].mxu0  ;;  %11996 = vmatmul.mubr.msk.f32.gmra.mrb[216].mxu0 %vm346_vm2, %v7870_v17  ;;  %12001 = vmatmul.mubr.msk.f32.vlgmr.msra.gmra.mrb[216].mxu1 %vm346_vm2, %v8040_v51  ;;  %v11658_v27 = vpop.f32.mrb[111].mxu1  ;;  %v9863_v38 = vld [vmem:[%s15456_s4 + $0xb8] sm:$0x7] }
 0x3c2   : > { %12069 = vmatpush3.msk.msra.mxu1 %vm380_vm0, %v9850_v18  ;;  %12003 = vmatprep.mubr.msk.f32.mxu1 %vm12229_vm1, %v12228_v1  ;;  %v8226_v17 = vld [vmem:[%s12344_s12 + $0x52] sm:$0xff]  ;;  %v8048_v61 = vld [vmem:[%s12294_s29 + $0x61] sm:$0xff] }
 0x3c3   : > { %12035 = vmatprep.mubr.msk.f32.mxu0 %vm12229_vm1, %v12228_v1  ;;  %12138 = vmatprep.subr.mxu1 %v12228_v1  ;;  %v8227_v27 = vld [vmem:[%s12344_s12 + $0x5a] sm:$0xff] }
 0x3c4   : > { %v6370_v48 = vpop.f32.mrb[112].mxu1  ;;  %v6545_v37 = vpop.f32.mrb[112].mxu0 }
 0x3c5   : > { %v6412_v12 = vadd.f32 %v6370_v48, %v14898_v5  ;;  %v15016_v35 = vadd.f32 %v6545_v37, %v6411_v34  ;;  %v11693_v19 = vpop.f32.mrb[113].mxu0  ;;  %12004 = vmatmul.mubr.msk.f32.gmra.mrb[218].mxu1 %vm346_vm2, %v8041_v31  ;;  %12036 = vmatmul.mubr.msk.f32.vlgmr.msra.gmra.mrb[218].mxu0 %vm346_vm2, %v8220_v30  ;;  %v11661_v22 = vpop.f32.mrb[113].mxu1 }
 0x3c6   : > { %12104 = vmatpush3.msk.msra.mxu0 %vm380_vm0, %v9863_v38  ;;  %12006 = vmatprep.mubr.msk.f32.mxu1 %vm12229_vm1, %v12228_v1  ;;  %v8228_v19 = vld [vmem:[%s12344_s12 + $0x62] sm:$0xff] }
 0x3c7   : > { %12038 = vmatprep.mubr.msk.f32.mxu0 %vm12229_vm1, %v12228_v1  ;;  %12173 = vmatprep.subr.mxu0 %v12228_v1 }
 0x3c8   : > { %v6375_v5 = vpop.f32.mrb[114].mxu1  ;;  %v6550_v49 = vpop.f32.mrb[114].mxu0 }
 0x3c9   : > { %v6413_v4 = vadd.f32 %v6375_v5, %v14909_v50  ;;  %v15029_v7 = vadd.f32 %v6550_v49, %v6412_v12  ;;  %v11696_v9 = vpop.f32.mrb[115].mxu0  ;;  %12007 = vmatmul.mubr.msk.f32.gmra.mrb[220].mxu1 %vm346_vm2, %v8042_v32  ;;  %12039 = vmatmul.mubr.msk.f32.gmra.mrb[220].mxu0 %vm346_vm2, %v8221_v14  ;;  %v11664_v16 = vpop.f32.mrb[115].mxu1  ;;  %v8049_v12 = vld [vmem:[%s12294_s29 + $0x69] sm:$0xff] }
 0x3ca   : > { %12009 = vmatprep.mubr.msk.f32.mxu1 %vm12229_vm1, %v12228_v1  ;;  %12041 = vmatprep.mubr.msk.f32.mxu0 %vm12229_vm1, %v12228_v1  ;;  %v8229_v9 = vld [vmem:[%s12344_s12 + $0x6a] sm:$0xff] }
 0x3cc   : > { %v6380_v15 = vpop.f32.mrb[116].mxu1  ;;  %v6555_v50 = vpop.f32.mrb[116].mxu0 }
 0x3cd   : > { %v6414_v24 = vadd.f32 %v6380_v15, %v14920_v62  ;;  %v15040_v33 = vadd.f32 %v6555_v50, %v6413_v4  ;;  %v11699_v3 = vpop.f32.mrb[117].mxu0  ;;  %12010 = vmatmul.mubr.msk.f32.gmra.mrb[222].mxu1 %vm346_vm2, %v8043_v8  ;;  %12042 = vmatmul.mubr.msk.f32.gmra.mrb[222].mxu0 %vm346_vm2, %v8222_v2  ;;  %v11667_v28 = vpop.f32.mrb[117].mxu1  ;;  %v8050_v4 = vld [vmem:[%s12294_s29 + $0x71] sm:$0xff] }
 0x3ce   : > { %12012 = vmatprep.mubr.msk.f32.mxu1 %vm12229_vm1, %v12228_v1  ;;  %12044 = vmatprep.mubr.msk.f32.mxu0 %vm12229_vm1, %v12228_v1  ;;  %v8400_v3 = vld [vmem:[%s12294_s29 + $0x22] sm:$0xff] }
 0x3d0   : > { %v6385_v52 = vpop.f32.mrb[118].mxu1  ;;  %v6560_v62 = vpop.f32.mrb[118].mxu0 }
 0x3d1   : > { %v6415_v36 = vadd.f32 %v6385_v52, %v14931_v39  ;;  %v15051_v46 = vadd.f32 %v6560_v62, %v6414_v24  ;;  %v11702_v53 = vpop.f32.mrb[119].mxu0  ;;  %12013 = vmatmul.mubr.msk.f32.gmra.mrb[224].mxu1 %vm346_vm2, %v8044_v10  ;;  %12045 = vmatmul.mubr.msk.f32.gmra.mrb[224].mxu0 %vm346_vm2, %v8223_v54  ;;  %v11670_v20 = vpop.f32.mrb[119].mxu1  ;;  %v8230_v24 = vld [vmem:[%s12344_s12 + $0x72] sm:$0xff] }
 0x3d2   : > { %12015 = vmatprep.mubr.msk.f32.mxu1 %vm12229_vm1, %v12228_v1  ;;  %12047 = vmatprep.mubr.msk.f32.mxu0 %vm12229_vm1, %v12228_v1  ;;  %v8401_v53 = vld [vmem:[%s12294_s29 + $0x2a] sm:$0xff] }
 0x3d3   : > { %v8580_v20 = vld [vmem:[%s12344_s12 + $0x23] sm:$0xff] }
 0x3d4   : > { %v6390_v13 = vpop.f32.mrb[120].mxu1  ;;  %v6565_v39 = vpop.f32.mrb[120].mxu0 }
 0x3d5   : > { %v6416_v6 = vadd.f32 %v6390_v13, %v14942_v25  ;;  %v15062_v41 = vadd.f32 %v6565_v39, %v6415_v36  ;;  %v11705_v11 = vpop.f32.mrb[121].mxu0  ;;  %12016 = vmatmul.mubr.msk.f32.gmra.mrb[226].mxu1 %vm346_vm2, %v8045_v58  ;;  %12048 = vmatmul.mubr.msk.f32.gmra.mrb[226].mxu0 %vm346_vm2, %v8224_v59  ;;  %v11673_v43 = vpop.f32.mrb[121].mxu1 }
 0x3d6   : > { %12018 = vmatprep.mubr.msk.f32.mxu1 %vm12229_vm1, %v12228_v1  ;;  %12050 = vmatprep.mubr.msk.f32.mxu0 %vm12229_vm1, %v12228_v1  ;;  %v8402_v43 = vld [vmem:[%s12294_s29 + $0x32] sm:$0xff] }
 0x3d8   : > { %v6395_v55 = vpop.f32.mrb[122].mxu1  ;;  %v6570_v25 = vpop.f32.mrb[122].mxu0 }
 0x3d9   : > { %v6417_v0 = vadd.f32 %v6395_v55, %v14953_v40  ;;  %v15073_v60 = vadd.f32 %v6570_v25, %v6416_v6  ;;  %v11708_v57 = vpop.f32.mrb[123].mxu0  ;;  %12019 = vmatmul.mubr.msk.f32.gmra.mrb[228].mxu1 %vm346_vm2, %v8046_v44  ;;  %12051 = vmatmul.mubr.msk.f32.gmra.mrb[228].mxu0 %vm346_vm2, %v8225_v42  ;;  %v11676_v26 = vpop.f32.mrb[123].mxu1  ;;  %v8581_v44 = vld [vmem:[%s12344_s12 + $0x2b] sm:$0xff] }
 0x3da   : > { %12021 = vmatprep.mubr.msk.f32.mxu1 %vm12229_vm1, %v12228_v1  ;;  %12053 = vmatprep.mubr.msk.f32.mxu0 %vm12229_vm1, %v12228_v1  ;;  %v8403_v26 = vld [vmem:[%s12294_s29 + $0x3a] sm:$0xff] }
 0x3dc   : > { %v6400_v51 = vpop.f32.mrb[124].mxu1  ;;  %v6575_v40 = vpop.f32.mrb[124].mxu0 }
 0x3dd   : > { %v6418_v18 = vadd.f32 %v6400_v51, %v14964_v56  ;;  %v15084_v29 = vadd.f32 %v6575_v40, %v6417_v0  ;;  %v11711_v21 = vpop.f32.mrb[125].mxu0  ;;  %12022 = vmatmul.mubr.msk.f32.gmra.mrb[230].mxu1 %vm346_vm2, %v8047_v47  ;;  %12054 = vmatmul.mubr.msk.f32.gmra.mrb[230].mxu0 %vm346_vm2, %v8226_v17  ;;  %v11679_v34 = vpop.f32.mrb[125].mxu1  ;;  %v8582_v47 = vld [vmem:[%s12344_s12 + $0x33] sm:$0xff] }
 0x3de   : > { %12024 = vmatprep.mubr.msk.f32.mxu1 %vm12229_vm1, %v12228_v1  ;;  %12056 = vmatprep.mubr.msk.f32.mxu0 %vm12229_vm1, %v12228_v1  ;;  %v8404_v34 = vld [vmem:[%s12294_s29 + $0x42] sm:$0xff] }
 0x3e0   : > { %v6405_v31 = vpop.f32.mrb[126].mxu1  ;;  %v6580_v56 = vpop.f32.mrb[126].mxu0 }
 0x3e1   : > { %v6419_v30 = vadd.f32 %v6405_v31, %v14974_v23  ;;  %v15095_v38 = vadd.f32 %v6580_v56, %v6418_v18  ;;  %v11714_v48 = vpop.f32.mrb[127].mxu0  ;;  %12025 = vmatmul.mubr.msk.f32.gmra.mrb[232].mxu1 %vm346_vm2, %v8048_v61  ;;  %12057 = vmatmul.mubr.msk.f32.gmra.mrb[232].mxu0 %vm346_vm2, %v8227_v27  ;;  %v11682_v37 = vpop.f32.mrb[127].mxu1  ;;  %v8583_v61 = vld [vmem:[%s12344_s12 + $0x3b] sm:$0xff] }
 0x3e2   : > { %12027 = vmatprep.mubr.msk.f32.mxu1 %vm12229_vm1, %v12228_v1  ;;  %12059 = vmatprep.mubr.msk.f32.mxu0 %vm12229_vm1, %v12228_v1  ;;  %v8405_v37 = vld [vmem:[%s12294_s29 + $0x4a] sm:$0xff] }
 0x3e4   : > { %v6585_v22 = vpop.f32.mrb[128].mxu0  ;;  %v6715_v23 = vpop.f32.mrb[128].mxu1 }
 0x3e5   : > { %v15105_v32 = vadd.f32 %v6585_v22, %v6419_v30  ;;  %v6769_v14 = vadd.f32 %v6715_v23, %v14986_v45  ;;  %v11717_v5 = vpop.f32.mrb[129].mxu0  ;;  %12028 = vmatmul.mubr.msk.f32.gmra.mrb[234].mxu1 %vm346_vm2, %v8049_v12  ;;  %12060 = vmatmul.mubr.msk.f32.gmra.mrb[234].mxu0 %vm346_vm2, %v8228_v19  ;;  %v11722_v49 = vpop.f32.mrb[129].mxu1  ;;  %v8584_v12 = vld [vmem:[%s12344_s12 + $0x43] sm:$0xff] }
 0x3e6   : > { %12030 = vmatprep.mubr.msk.f32.mxu1 %vm12229_vm1, %v12228_v1  ;;  %12062 = vmatprep.mubr.msk.f32.mxu0 %vm12229_vm1, %v12228_v1  ;;  %v8406_v49 = vld [vmem:[%s12294_s29 + $0x52] sm:$0xff] }
 0x3e8   : > { %v6720_v16 = vpop.f32.mrb[130].mxu1  ;;  %v6895_v8 = vpop.f32.mrb[130].mxu0 }
 0x3e9   : > { %v6770_v45 = vadd.f32 %v6720_v16, %v15000_v63  ;;  %v15117_v2 = vadd.f32 %v6895_v8, %v6769_v14  ;;  %v11757_v15 = vpop.f32.mrb[131].mxu0  ;;  %12031 = vmatmul.mubr.msk.f32.gmra.mrb[236].mxu1 %vm346_vm2, %v8050_v4  ;;  %12063 = vmatmul.mubr.msk.f32.gmra.mrb[236].mxu0 %vm346_vm2, %v8229_v9  ;;  %v11725_v50 = vpop.f32.mrb[131].mxu1  ;;  %v9876_v63 = vld [vmem:[%s15456_s4 + $0xbc] sm:$0x7]  ;;  %v8585_v4 = vld [vmem:[%s12344_s12 + $0x4b] sm:$0xff] }
 0x3ea   : > { %12065 = vmatprep.mubr.msk.f32.mxu0 %vm12229_vm1, %v12228_v1  ;;  %12070 = vmatprep.mubr.msk.f32.mxu1 %vm12229_vm1, %v12228_v1  ;;  %v8407_v50 = vld [vmem:[%s12294_s29 + $0x5a] sm:$0xff] }
 0x3ec   : > { %v6725_v28 = vpop.f32.mrb[132].mxu1  ;;  %v6900_v10 = vpop.f32.mrb[132].mxu0 }
 0x3ed   : > { %v6771_v54 = vadd.f32 %v6725_v28, %v15016_v35  ;;  %v15131_v52 = vadd.f32 %v6900_v10, %v6770_v45  ;;  %v11760_v62 = vpop.f32.mrb[133].mxu0  ;;  %12066 = vmatmul.mubr.msk.f32.gmra.mrb[238].mxu0 %vm346_vm2, %v8230_v24  ;;  %12071 = vmatmul.mubr.msk.f32.vlgmr.msra.gmra.mrb[238].mxu1 %vm346_vm2, %v8400_v3  ;;  %v11728_v36 = vpop.f32.mrb[133].mxu1  ;;  %v9889_v35 = vld [vmem:[%s15456_s4 + $0xc0] sm:$0x7]  ;;  %v8586_v24 = vld [vmem:[%s12344_s12 + $0x53] sm:$0xff] }
 0x3ee   : > { %12139 = vmatpush3.msk.msra.mxu1 %vm380_vm0, %v9876_v63  ;;  %12073 = vmatprep.mubr.msk.f32.mxu1 %vm12229_vm1, %v12228_v1  ;;  %v8408_v62 = vld [vmem:[%s12294_s29 + $0x62] sm:$0xff] }
 0x3ef   : > { %12105 = vmatprep.mubr.msk.f32.mxu0 %vm12229_vm1, %v12228_v1  ;;  %v8587_v36 = vld [vmem:[%s12344_s12 + $0x5b] sm:$0xff] }
 0x3f0   : > { %v6730_v58 = vpop.f32.mrb[134].mxu1  ;;  %v6905_v59 = vpop.f32.mrb[134].mxu0 }
 0x3f1   : > { %v6772_v13 = vadd.f32 %v6730_v58, %v15029_v7  ;;  %v15146_v39 = vadd.f32 %v6905_v59, %v6771_v54  ;;  %v11763_v6 = vpop.f32.mrb[135].mxu0  ;;  %12074 = vmatmul.mubr.msk.f32.gmra.mrb[240].mxu1 %vm346_vm2, %v8401_v53  ;;  %12106 = vmatmul.mubr.msk.f32.vlgmr.msra.gmra.mrb[240].mxu0 %vm346_vm2, %v8580_v20  ;;  %v11731_v11 = vpop.f32.mrb[135].mxu1 }
 0x3f2   : > { %12174 = vmatpush3.msk.msra.mxu0 %vm380_vm0, %v9889_v35  ;;  %12076 = vmatprep.mubr.msk.f32.mxu1 %vm12229_vm1, %v12228_v1  ;;  %v8588_v6 = vld [vmem:[%s12344_s12 + $0x63] sm:$0xff] }
 0x3f3   : > { %12108 = vmatprep.mubr.msk.f32.mxu0 %vm12229_vm1, %v12228_v1 }
 0x3f4   : > { %v6735_v7 = vpop.f32.mrb[136].mxu1  ;;  %v6910_v42 = vpop.f32.mrb[136].mxu0 }
 0x3f5   : > { %v6773_v55 = vadd.f32 %v6735_v7, %v15040_v33  ;;  %v15158_v25 = vadd.f32 %v6910_v42, %v6772_v13  ;;  %v11766_v0 = vpop.f32.mrb[137].mxu0  ;;  %12077 = vmatmul.mubr.msk.f32.gmra.mrb[242].mxu1 %vm346_vm2, %v8402_v43  ;;  %12109 = vmatmul.mubr.msk.f32.gmra.mrb[242].mxu0 %vm346_vm2, %v8581_v44  ;;  %v11734_v57 = vpop.f32.mrb[137].mxu1  ;;  %v8409_v13 = vld [vmem:[%s12294_s29 + $0x6a] sm:$0xff] }
 0x3f6   : > { %12079 = vmatprep.mubr.msk.f32.mxu1 %vm12229_vm1, %v12228_v1  ;;  %12111 = vmatprep.mubr.msk.f32.mxu0 %vm12229_vm1, %v12228_v1  ;;  %v8589_v0 = vld [vmem:[%s12344_s12 + $0x6b] sm:$0xff] }
 0x3f8   : > { %v6740_v17 = vpop.f32.mrb[138].mxu1  ;;  %v6915_v33 = vpop.f32.mrb[138].mxu0 }
 0x3f9   : > { %v6774_v51 = vadd.f32 %v6740_v17, %v15051_v46  ;;  %v15169_v40 = vadd.f32 %v6915_v33, %v6773_v55  ;;  %v11769_v18 = vpop.f32.mrb[139].mxu0  ;;  %12080 = vmatmul.mubr.msk.f32.gmra.mrb[244].mxu1 %vm346_vm2, %v8403_v26  ;;  %12112 = vmatmul.mubr.msk.f32.gmra.mrb[244].mxu0 %vm346_vm2, %v8582_v47  ;;  %v11737_v21 = vpop.f32.mrb[139].mxu1  ;;  %v8410_v55 = vld [vmem:[%s12294_s29 + $0x72] sm:$0xff] }
 0x3fa   : > { %12082 = vmatprep.mubr.msk.f32.mxu1 %vm12229_vm1, %v12228_v1  ;;  %12114 = vmatprep.mubr.msk.f32.mxu0 %vm12229_vm1, %v12228_v1  ;;  %v8760_v18 = vld [vmem:[%s12294_s29 + $0x23] sm:$0xff] }
 0x3fc   : > { %v6745_v27 = vpop.f32.mrb[140].mxu1  ;;  %v6920_v46 = vpop.f32.mrb[140].mxu0 }
 0x3fd   : > { %v6775_v31 = vadd.f32 %v6745_v27, %v15062_v41  ;;  %v15180_v56 = vadd.f32 %v6920_v46, %v6774_v51  ;;  %v11772_v30 = vpop.f32.mrb[141].mxu0  ;;  %12083 = vmatmul.mubr.msk.f32.gmra.mrb[246].mxu1 %vm346_vm2, %v8404_v34  ;;  %12115 = vmatmul.mubr.msk.f32.gmra.mrb[246].mxu0 %vm346_vm2, %v8583_v61  ;;  %v11740_v48 = vpop.f32.mrb[141].mxu1  ;;  %v8590_v51 = vld [vmem:[%s12344_s12 + $0x73] sm:$0xff] }
 0x3fe   : > { %12085 = vmatprep.mubr.msk.f32.mxu1 %vm12229_vm1, %v12228_v1  ;;  %12117 = vmatprep.mubr.msk.f32.mxu0 %vm12229_vm1, %v12228_v1  ;;  %v8940_v30 = vld [vmem:[%s12344_s12 + $0x24] sm:$0xff] }
 0x400   : > { %v6750_v19 = vpop.f32.mrb[142].mxu1  ;;  %v6925_v41 = vpop.f32.mrb[142].mxu0 }
 0x401   : > { %v6776_v22 = vadd.f32 %v6750_v19, %v15073_v60  ;;  %v15191_v23 = vadd.f32 %v6925_v41, %v6775_v31  ;;  %v11775_v14 = vpop.f32.mrb[143].mxu0  ;;  %12086 = vmatmul.mubr.msk.f32.gmra.mrb[248].mxu1 %vm346_vm2, %v8405_v37  ;;  %12118 = vmatmul.mubr.msk.f32.gmra.mrb[248].mxu0 %vm346_vm2, %v8584_v12  ;;  %v11743_v5 = vpop.f32.mrb[143].mxu1  ;;  %v8761_v31 = vld [vmem:[%s12294_s29 + $0x2b] sm:$0xff] }
 0x402   : > { %12088 = vmatprep.mubr.msk.f32.mxu1 %vm12229_vm1, %v12228_v1  ;;  %12120 = vmatprep.mubr.msk.f32.mxu0 %vm12229_vm1, %v12228_v1  ;;  %v8941_v14 = vld [vmem:[%s12344_s12 + $0x2c] sm:$0xff] }
 0x404   : > { %v6755_v9 = vpop.f32.mrb[144].mxu1  ;;  %v6930_v60 = vpop.f32.mrb[144].mxu0 }
 0x405   : > { %v6777_v16 = vadd.f32 %v6755_v9, %v15084_v29  ;;  %v15202_v8 = vadd.f32 %v6930_v60, %v6776_v22  ;;  %v11778_v45 = vpop.f32.mrb[145].mxu0  ;;  %12089 = vmatmul.mubr.msk.f32.gmra.mrb[250].mxu1 %vm346_vm2, %v8406_v49  ;;  %12121 = vmatmul.mubr.msk.f32.gmra.mrb[250].mxu0 %vm346_vm2, %v8585_v4  ;;  %v11746_v15 = vpop.f32.mrb[145].mxu1  ;;  %v8762_v22 = vld [vmem:[%s12294_s29 + $0x33] sm:$0xff] }
 0x406   : > { %12091 = vmatprep.mubr.msk.f32.mxu1 %vm12229_vm1, %v12228_v1  ;;  %12123 = vmatprep.mubr.msk.f32.mxu0 %vm12229_vm1, %v12228_v1  ;;  %v8942_v45 = vld [vmem:[%s12344_s12 + $0x34] sm:$0xff] }
 0x408   : > { %v6760_v3 = vpop.f32.mrb[146].mxu1  ;;  %v6935_v29 = vpop.f32.mrb[146].mxu0 }
 0x409   : > { %v6778_v63 = vadd.f32 %v6760_v3, %v15095_v38  ;;  %v15213_v28 = vadd.f32 %v6935_v29, %v6777_v16  ;;  %v11781_v10 = vpop.f32.mrb[147].mxu0  ;;  %12092 = vmatmul.mubr.msk.f32.gmra.mrb[252].mxu1 %vm346_vm2, %v8407_v50  ;;  %12124 = vmatmul.mubr.msk.f32.gmra.mrb[252].mxu0 %vm346_vm2, %v8586_v24  ;;  %v11749_v54 = vpop.f32.mrb[147].mxu1  ;;  %v8763_v16 = vld [vmem:[%s12294_s29 + $0x3b] sm:$0xff] }
 0x40a   : > { %12094 = vmatprep.mubr.msk.f32.mxu1 %vm12229_vm1, %v12228_v1  ;;  %12126 = vmatprep.mubr.msk.f32.mxu0 %vm12229_vm1, %v12228_v1  ;;  %v8943_v10 = vld [vmem:[%s12344_s12 + $0x3c] sm:$0xff] }
 0x40c   : > { %v6765_v53 = vpop.f32.mrb[148].mxu1  ;;  %v6940_v38 = vpop.f32.mrb[148].mxu0 }
 0x40d   : > { %v6779_v20 = vadd.f32 %v6765_v53, %v15105_v32  ;;  %v15224_v35 = vadd.f32 %v6940_v38, %v6778_v63  ;;  %v11784_v58 = vpop.f32.mrb[149].mxu0  ;;  %12095 = vmatmul.mubr.msk.f32.gmra.mrb[254].mxu1 %vm346_vm2, %v8408_v62  ;;  %12127 = vmatmul.mubr.msk.f32.gmra.mrb[254].mxu0 %vm346_vm2, %v8587_v36  ;;  %v11752_v59 = vpop.f32.mrb[149].mxu1  ;;  %v8764_v63 = vld [vmem:[%s12294_s29 + $0x43] sm:$0xff] }
 0x40e   : > { %12097 = vmatprep.mubr.msk.f32.mxu1 %vm12229_vm1, %v12228_v1  ;;  %12129 = vmatprep.mubr.msk.f32.mxu0 %vm12229_vm1, %v12228_v1  ;;  %v8944_v58 = vld [vmem:[%s12344_s12 + $0x44] sm:$0xff] }
 0x410   : > { %v6945_v11 = vpop.f32.mrb[150].mxu0  ;;  %v7075_v32 = vpop.f32.mrb[150].mxu1 }
 0x411   : > { %v15234_v43 = vadd.f32 %v6945_v11, %v6779_v20  ;;  %v7129_v44 = vadd.f32 %v7075_v32, %v15117_v2  ;;  %v11787_v7 = vpop.f32.mrb[151].mxu0  ;;  %12098 = vmatmul.mubr.msk.f32.gmra.mrb[0].mxu1 %vm346_vm2, %v8409_v13  ;;  %12130 = vmatmul.mubr.msk.f32.gmra.mrb[0].mxu0 %vm346_vm2, %v8588_v6  ;;  %v11792_v42 = vpop.f32.mrb[151].mxu1  ;;  %v8765_v20 = vld [vmem:[%s12294_s29 + $0x4b] sm:$0xff] }
 0x412   : > { %12100 = vmatprep.mubr.msk.f32.mxu1 %vm12229_vm1, %v12228_v1  ;;  %12132 = vmatprep.mubr.msk.f32.mxu0 %vm12229_vm1, %v12228_v1  ;;  %v8945_v7 = vld [vmem:[%s12344_s12 + $0x4c] sm:$0xff] }
 0x414   : > { %v7080_v57 = vpop.f32.mrb[152].mxu1  ;;  %v7255_v26 = vpop.f32.mrb[152].mxu0 }
 0x415   : > { %v7130_v2 = vadd.f32 %v7080_v57, %v15131_v52  ;;  %v15246_v47 = vadd.f32 %v7255_v26, %v7129_v44  ;;  %v11827_v17 = vpop.f32.mrb[153].mxu0  ;;  %12101 = vmatmul.mubr.msk.f32.gmra.mrb[2].mxu1 %vm346_vm2, %v8410_v55  ;;  %12133 = vmatmul.mubr.msk.f32.gmra.mrb[2].mxu0 %vm346_vm2, %v8589_v0  ;;  %v11795_v33 = vpop.f32.mrb[153].mxu1  ;;  %v8766_v44 = vld [vmem:[%s12294_s29 + $0x53] sm:$0xff] }
 0x416   : > { %12135 = vmatprep.mubr.msk.f32.mxu0 %vm12229_vm1, %v12228_v1  ;;  %12140 = vmatprep.mubr.msk.f32.mxu1 %vm12229_vm1, %v12228_v1  ;;  %v8946_v17 = vld [vmem:[%s12344_s12 + $0x54] sm:$0xff] }
 0x418   : > { %v7085_v21 = vpop.f32.mrb[154].mxu1  ;;  %v7260_v52 = vpop.f32.mrb[154].mxu0 }
 0x419   : > { %v7131_v34 = vadd.f32 %v7085_v21, %v15146_v39  ;;  %v15257_v61 = vadd.f32 %v7260_v52, %v7130_v2  ;;  %v11830_v27 = vpop.f32.mrb[155].mxu0  ;;  %12136 = vmatmul.mubr.msk.f32.gmra.mrb[4].mxu0 %vm346_vm2, %v8590_v51  ;;  %12141 = vmatmul.mubr.msk.f32.vlgmr.msra.gmra.mrb[4].mxu1 %vm346_vm2, %v8760_v18  ;;  %v11798_v46 = vpop.f32.mrb[155].mxu1  ;;  %v8767_v2 = vld [vmem:[%s12294_s29 + $0x5b] sm:$0xff] }
 0x41a   : > { %12143 = vmatprep.mubr.msk.f32.mxu1 %vm12229_vm1, %v12228_v1  ;;  %12175 = vmatprep.mubr.msk.f32.mxu0 %vm12229_vm1, %v12228_v1  ;;  %v8947_v27 = vld [vmem:[%s12344_s12 + $0x5c] sm:$0xff] }
 0x41c   : > { %v7090_v48 = vpop.f32.mrb[156].mxu1  ;;  %v7265_v39 = vpop.f32.mrb[156].mxu0 }
 0x41d   : > { %v7132_v37 = vadd.f32 %v7090_v48, %v15158_v25  ;;  %v15268_v12 = vadd.f32 %v7265_v39, %v7131_v34  ;;  %v11833_v19 = vpop.f32.mrb[157].mxu0  ;;  %12144 = vmatmul.mubr.msk.f32.gmra.mrb[6].mxu1 %vm346_vm2, %v8761_v31  ;;  %12176 = vmatmul.mubr.msk.f32.vlgmr.msra.gmra.mrb[6].mxu0 %vm346_vm2, %v8940_v30  ;;  %v11801_v41 = vpop.f32.mrb[157].mxu1  ;;  %v8768_v34 = vld [vmem:[%s12294_s29 + $0x63] sm:$0xff] }
 0x41e   : > { %12146 = vmatprep.mubr.msk.f32.mxu1 %vm12229_vm1, %v12228_v1  ;;  %12178 = vmatprep.mubr.msk.f32.mxu0 %vm12229_vm1, %v12228_v1  ;;  %v8948_v19 = vld [vmem:[%s12344_s12 + $0x64] sm:$0xff] }
 0x420   : > { %v7095_v5 = vpop.f32.mrb[158].mxu1  ;;  %v7270_v25 = vpop.f32.mrb[158].mxu0 }
 0x421   : > { %v7133_v49 = vadd.f32 %v7095_v5, %v15169_v40  ;;  %v15279_v4 = vadd.f32 %v7270_v25, %v7132_v37  ;;  %v11836_v9 = vpop.f32.mrb[159].mxu0  ;;  %12147 = vmatmul.mubr.msk.f32.gmra.mrb[8].mxu1 %vm346_vm2, %v8762_v22  ;;  %12179 = vmatmul.mubr.msk.f32.gmra.mrb[8].mxu0 %vm346_vm2, %v8941_v14  ;;  %v11804_v60 = vpop.f32.mrb[159].mxu1  ;;  %v8769_v37 = vld [vmem:[%s12294_s29 + $0x6b] sm:$0xff] }
 0x422   : > { %12149 = vmatprep.mubr.msk.f32.mxu1 %vm12229_vm1, %v12228_v1  ;;  %12181 = vmatprep.mubr.msk.f32.mxu0 %vm12229_vm1, %v12228_v1  ;;  %v8949_v9 = vld [vmem:[%s12344_s12 + $0x6c] sm:$0xff] }
 0x424   : > { %v7100_v15 = vpop.f32.mrb[160].mxu1  ;;  %v7275_v40 = vpop.f32.mrb[160].mxu0 }
 0x425   : > { %v7134_v50 = vadd.f32 %v7100_v15, %v15180_v56  ;;  %v15290_v24 = vadd.f32 %v7275_v40, %v7133_v49  ;;  %v11839_v3 = vpop.f32.mrb[161].mxu0  ;;  %12150 = vmatmul.mubr.msk.f32.gmra.mrb[10].mxu1 %vm346_vm2, %v8763_v16  ;;  %12182 = vmatmul.mubr.msk.f32.gmra.mrb[10].mxu0 %vm346_vm2, %v8942_v45  ;;  %v11807_v29 = vpop.f32.mrb[161].mxu1  ;;  %v8770_v49 = vld [vmem:[%s12294_s29 + $0x73] sm:$0xff]  ;;  %s315_s29 = smul.u32 11, %s9252_s22 }
 0x426   : > { %12152 = vmatprep.mubr.msk.f32.mxu1 %vm12229_vm1, %v12228_v1  ;;  %12184 = vmatprep.mubr.msk.f32.mxu0 %vm12229_vm1, %v12228_v1 }
 0x427   : > { %p316_p4 = scmp.lt.s32.totalorder %s315_s29, 21 }
 0x428   : > { %v7105_v54 = vpop.f32.mrb[162].mxu1  ;;  %v7280_v56 = vpop.f32.mrb[162].mxu0 }
 0x429   : > { %v7135_v62 = vadd.f32 %v7105_v54, %v15191_v23  ;;  %v15301_v36 = vadd.f32 %v7280_v56, %v7134_v50  ;;  %v11842_v53 = vpop.f32.mrb[163].mxu0  ;;  %12153 = vmatmul.mubr.msk.f32.gmra.mrb[12].mxu1 %vm346_vm2, %v8764_v63  ;;  %12185 = vmatmul.mubr.msk.f32.gmra.mrb[12].mxu0 %vm346_vm2, %v8943_v10  ;;  %v11810_v38 = vpop.f32.mrb[163].mxu1  ;;  %v8950_v50 = vld [vmem:[%s12344_s12 + $0x74] sm:$0xff]  ;;  %s15462_s29 = smov (!%p316_p4, %s315_s29), 21 }
 0x42a   : > { %12155 = vmatprep.mubr.msk.f32.mxu1 %vm12229_vm1, %v12228_v1  ;;  %12187 = vmatprep.mubr.msk.f32.mxu0 %vm12229_vm1, %v12228_v1  ;;  %s9265_s17 = sshll.u32 %s15462_s29, 3 }
 0x42b   : > { %s15417_s20 = scalar_lea.vmem %s15458_s6, %s9265_s17 }
 0x42c   : > { %v7110_v59 = vpop.f32.mrb[164].mxu1  ;;  %v7285_v23 = vpop.f32.mrb[164].mxu0 }
 0x42d   : > { %v7136_v13 = vadd.f32 %v7110_v59, %v15202_v8  ;;  %v15312_v6 = vadd.f32 %v7285_v23, %v7135_v62  ;;  %v11845_v11 = vpop.f32.mrb[165].mxu0  ;;  %12156 = vmatmul.mubr.msk.f32.gmra.mrb[14].mxu1 %vm346_vm2, %v8765_v20  ;;  %12188 = vmatmul.mubr.msk.f32.gmra.mrb[14].mxu0 %vm346_vm2, %v8944_v58  ;;  %v11813_v32 = vpop.f32.mrb[165].mxu1 }
 0x42e   : > { %12158 = vmatprep.mubr.msk.f32.mxu1 %vm12229_vm1, %v12228_v1  ;;  %12190 = vmatprep.mubr.msk.f32.mxu0 %vm12229_vm1, %v12228_v1 }
 0x430   : > { %v7115_v42 = vpop.f32.mrb[166].mxu1  ;;  %v7290_v8 = vpop.f32.mrb[166].mxu0 }
 0x431   : > { %v7137_v55 = vadd.f32 %v7115_v42, %v15213_v28  ;;  %v15323_v0 = vadd.f32 %v7290_v8, %v7136_v13  ;;  %v11848_v57 = vpop.f32.mrb[167].mxu0  ;;  %12159 = vmatmul.mubr.msk.f32.gmra.mrb[16].mxu1 %vm346_vm2, %v8766_v44  ;;  %12191 = vmatmul.mubr.msk.f32.gmra.mrb[16].mxu0 %vm346_vm2, %v8945_v7  ;;  %v11816_v26 = vpop.f32.mrb[167].mxu1 }
 0x432   : > { %12161 = vmatprep.mubr.msk.f32.mxu1 %vm12229_vm1, %v12228_v1  ;;  %12193 = vmatprep.mubr.msk.f32.mxu0 %vm12229_vm1, %v12228_v1 }
 0x434   : > { %v7120_v33 = vpop.f32.mrb[168].mxu1  ;;  %v7295_v28 = vpop.f32.mrb[168].mxu0 }
 0x435   : > { %v7138_v51 = vadd.f32 %v7120_v33, %v15224_v35  ;;  %v15334_v18 = vadd.f32 %v7295_v28, %v7137_v55  ;;  %v11851_v21 = vpop.f32.mrb[169].mxu0  ;;  %12162 = vmatmul.mubr.msk.f32.gmra.mrb[18].mxu1 %vm346_vm2, %v8767_v2  ;;  %12194 = vmatmul.mubr.msk.f32.gmra.mrb[18].mxu0 %vm346_vm2, %v8946_v17  ;;  %v11819_v52 = vpop.f32.mrb[169].mxu1 }
 0x436   : > { %12164 = vmatprep.mubr.msk.f32.mxu1 %vm12229_vm1, %v12228_v1  ;;  %12196 = vmatprep.mubr.msk.f32.mxu0 %vm12229_vm1, %v12228_v1 }
 0x438   : > { %v7125_v46 = vpop.f32.mrb[170].mxu1  ;;  %v7300_v35 = vpop.f32.mrb[170].mxu0 }
 0x439   : > { %v7139_v31 = vadd.f32 %v7125_v46, %v15234_v43  ;;  %v15345_v30 = vadd.f32 %v7300_v35, %v7138_v51  ;;  %v11854_v48 = vpop.f32.mrb[171].mxu0  ;;  %12165 = vmatmul.mubr.msk.f32.gmra.mrb[20].mxu1 %vm346_vm2, %v8768_v34  ;;  %12197 = vmatmul.mubr.msk.f32.gmra.mrb[20].mxu0 %vm346_vm2, %v8947_v27  ;;  %v11822_v39 = vpop.f32.mrb[171].mxu1 }
 0x43a   : > { %12167 = vmatprep.mubr.msk.f32.mxu1 %vm12229_vm1, %v12228_v1  ;;  %12199 = vmatprep.mubr.msk.f32.mxu0 %vm12229_vm1, %v12228_v1 }
 0x43c   : > { %v7305_v41 = vpop.f32.mrb[172].mxu0  ;;  %v7435_v43 = vpop.f32.mrb[172].mxu1 }
 0x43d   : > { %v15355_v22 = vadd.f32 %v7305_v41, %v7139_v31  ;;  %v7489_v14 = vadd.f32 %v7435_v43, %v15246_v47  ;;  %v11857_v5 = vpop.f32.mrb[173].mxu0  ;;  %12168 = vmatmul.mubr.msk.f32.gmra.mrb[22].mxu1 %vm346_vm2, %v8769_v37  ;;  %12200 = vmatmul.mubr.msk.f32.gmra.mrb[22].mxu0 %vm346_vm2, %v8948_v19  ;;  %v11862_v25 = vpop.f32.mrb[173].mxu1 }
 0x43e   : > { %12170 = vmatprep.mubr.msk.f32.mxu1 %vm12229_vm1, %v12228_v1  ;;  %12202 = vmatprep.mubr.msk.f32.mxu0 %vm12229_vm1, %v12228_v1 }
 0x440   : > { %v7440_v60 = vpop.f32.mrb[174].mxu1  ;;  %v7615_v16 = vpop.f32.mrb[174].mxu0 }
 0x441   : > { %v7490_v45 = vadd.f32 %v7440_v60, %v15257_v61  ;;  %v15367_v47 = vadd.f32 %v7615_v16, %v7489_v14  ;;  %v11897_v15 = vpop.f32.mrb[175].mxu0  ;;  %12171 = vmatmul.mubr.msk.f32.gmra.mrb[24].mxu1 %vm346_vm2, %v8770_v49  ;;  %12203 = vmatmul.mubr.msk.f32.gmra.mrb[24].mxu0 %vm346_vm2, %v8949_v9  ;;  %v11865_v40 = vpop.f32.mrb[175].mxu1 }
 0x442   : > { %12205 = vmatprep.mubr.msk.f32.mxu0 %vm12229_vm1, %v12228_v1 }
 0x444   : > { %v7445_v3 = vpop.f32.mrb[176].mxu1  ;;  %v7620_v29 = vpop.f32.mrb[176].mxu0 }
 0x445   : > { %v7491_v63 = vadd.f32 %v7445_v3, %v15268_v12  ;;  %v7670_v10 = vadd.f32 %v7620_v29, %v7490_v45  ;;  %v11900_v54 = vpop.f32.mrb[177].mxu0  ;;  %12206 = vmatmul.mubr.msk.f32.gmra.mrb[26].mxu0 %vm346_vm2, %v8950_v50  ;;  %v11868_v61 = vpop.f32.mrb[177].mxu1 }
 0x448   : > { %v7450_v56 = vpop.f32.mrb[178].mxu1  ;;  %v7625_v62 = vpop.f32.mrb[178].mxu0 }
 0x449   : > { %v7492_v53 = vadd.f32 %v7450_v56, %v15279_v4  ;;  %v7671_v38 = vadd.f32 %v7625_v62, %v7491_v63  ;;  %v11903_v20 = vpop.f32.mrb[179].mxu0  ;;  %v11871_v58 = vpop.f32.mrb[179].mxu1 }
 0x44c   : > { %v7455_v59 = vpop.f32.mrb[180].mxu1  ;;  %v7630_v23 = vpop.f32.mrb[180].mxu0 }
 0x44d   : > { %v7493_v1 = vadd.f32 %v7455_v59, %v15290_v24  ;;  %v7672_v13 = vadd.f32 %v7630_v23, %v7492_v53  ;;  %v11906_v11 = vpop.f32.mrb[181].mxu0  ;;  %v11874_v32 = vpop.f32.mrb[181].mxu1 }
 0x450   : > { %v7460_v12 = vpop.f32.mrb[182].mxu1  ;;  %v7635_v44 = vpop.f32.mrb[182].mxu0 }
 0x451   : > { %v7494_v7 = vadd.f32 %v7460_v12, %v15301_v36  ;;  %v7673_v42 = vadd.f32 %v7635_v44, %v7493_v1  ;;  %v11909_v8 = vpop.f32.mrb[183].mxu0  ;;  %v11877_v55 = vpop.f32.mrb[183].mxu1 }
 0x454   : > { %v7465_v57 = vpop.f32.mrb[184].mxu1  ;;  %v7640_v26 = vpop.f32.mrb[184].mxu0 }
 0x455   : > { %v7495_v4 = vadd.f32 %v7465_v57, %v15312_v6  ;;  %v7674_v2 = vadd.f32 %v7640_v26, %v7494_v7  ;;  %v11912_v17 = vpop.f32.mrb[185].mxu0  ;;  %v11880_v33 = vpop.f32.mrb[185].mxu1 }
 0x458   : > { %v7470_v28 = vpop.f32.mrb[186].mxu1  ;;  %v7645_v51 = vpop.f32.mrb[186].mxu0 }
 0x459   : > { %v7496_v24 = vadd.f32 %v7470_v28, %v15323_v0  ;;  %v7675_v21 = vadd.f32 %v7645_v51, %v7495_v4  ;;  %v11915_v52 = vpop.f32.mrb[187].mxu0  ;;  %v11883_v34 = vpop.f32.mrb[187].mxu1 }
 0x45c   : > { %v7475_v27 = vpop.f32.mrb[188].mxu1  ;;  %v7650_v46 = vpop.f32.mrb[188].mxu0 }
 0x45d   : > { %v7497_v36 = vadd.f32 %v7475_v27, %v15334_v18  ;;  %v7676_v35 = vadd.f32 %v7650_v46, %v7496_v24  ;;  %v11918_v31 = vpop.f32.mrb[189].mxu0  ;;  %v11886_v48 = vpop.f32.mrb[189].mxu1 }
 0x460   : > { %v7480_v39 = vpop.f32.mrb[190].mxu1  ;;  %v7655_v37 = vpop.f32.mrb[190].mxu0 }
 0x461   : > { %v7498_v6 = vadd.f32 %v7480_v39, %v15345_v30  ;;  %v7677_v19 = vadd.f32 %v7655_v37, %v7497_v36  ;;  %v11921_v41 = vpop.f32.mrb[191].mxu0  ;;  %v11889_v43 = vpop.f32.mrb[191].mxu1 }
 0x464   : > { %v7485_v14 = vpop.f32.mrb[192].mxu1  ;;  %v7660_v5 = vpop.f32.mrb[192].mxu0 }
 0x465   : > { %v7499_v0 = vadd.f32 %v7485_v14, %v15355_v22  ;;  %v7678_v25 = vadd.f32 %v7660_v5, %v7498_v6  ;;  %v11924_v49 = vpop.f32.mrb[193].mxu0  ;;  %v11892_v9 = vpop.f32.mrb[193].mxu1 }
 0x468   : > { %v7665_v60 = vpop.f32.mrb[194].mxu0  ;;  %v7795_v16 = vpop.f32.mrb[194].mxu1 }
 0x469   : > { %v7679_v18 = vadd.f32 %v7665_v60, %v7499_v0  ;;  %v7849_v45 = vadd.f32 %v7795_v16, %v15367_v47  ;;  %v11927_v15 = vpop.f32.mrb[195].mxu0  ;;  %v11932_v40 = vpop.f32.mrb[195].mxu1 }
 0x46c   : > { %v7800_v50 = vpop.f32.mrb[196].mxu1  ;;  %v7975_v3 = vpop.f32.mrb[196].mxu0 }
 0x46d   : > { %v7850_v30 = vadd.f32 %v7800_v50, %v7670_v10  ;;  %v8029_v29 = vadd.f32 %v7975_v3, %v7849_v45  ;;  %v11967_v63 = vpop.f32.mrb[197].mxu0  ;;  %v11935_v54 = vpop.f32.mrb[197].mxu1 }
 0x470   : > { %v7805_v61 = vpop.f32.mrb[198].mxu1  ;;  %v7980_v56 = vpop.f32.mrb[198].mxu0 }
 0x471   : > { %v7851_v62 = vadd.f32 %v7805_v61, %v7671_v38  ;;  %v8030_v22 = vadd.f32 %v7980_v56, %v7850_v30  ;;  %v11970_v53 = vpop.f32.mrb[199].mxu0  ;;  %v11938_v20 = vpop.f32.mrb[199].mxu1 }
 0x474   : > { %v7810_v58 = vpop.f32.mrb[200].mxu1  ;;  %v7985_v59 = vpop.f32.mrb[200].mxu0 }
 0x475   : > { %v7852_v23 = vadd.f32 %v7810_v58, %v7672_v13  ;;  %v8031_v1 = vadd.f32 %v7985_v59, %v7851_v62  ;;  %v11973_v11 = vpop.f32.mrb[201].mxu0  ;;  %v11941_v47 = vpop.f32.mrb[201].mxu1 }
 0x478   : > { %v7815_v32 = vpop.f32.mrb[202].mxu1  ;;  %v7990_v12 = vpop.f32.mrb[202].mxu0 }
 0x479   : > { %v7853_v44 = vadd.f32 %v7815_v32, %v7673_v42  ;;  %v8032_v7 = vadd.f32 %v7990_v12, %v7852_v23  ;;  %v11976_v10 = vpop.f32.mrb[203].mxu0  ;;  %v11944_v8 = vpop.f32.mrb[203].mxu1 }
 0x47c   : > { %v7820_v55 = vpop.f32.mrb[204].mxu1  ;;  %v7995_v57 = vpop.f32.mrb[204].mxu0 }
 0x47d   : > { %v7854_v26 = vadd.f32 %v7820_v55, %v7674_v2  ;;  %v8033_v4 = vadd.f32 %v7995_v57, %v7853_v44  ;;  %v11979_v38 = vpop.f32.mrb[205].mxu0  ;;  %v11947_v17 = vpop.f32.mrb[205].mxu1 }
 0x480   : > { %v7825_v33 = vpop.f32.mrb[206].mxu1  ;;  %v8000_v28 = vpop.f32.mrb[206].mxu0 }
 0x481   : > { %v7855_v51 = vadd.f32 %v7825_v33, %v7675_v21  ;;  %v8034_v24 = vadd.f32 %v8000_v28, %v7854_v26  ;;  %v11982_v13 = vpop.f32.mrb[207].mxu0  ;;  %v11950_v52 = vpop.f32.mrb[207].mxu1 }
 0x484   : > { %v7830_v34 = vpop.f32.mrb[208].mxu1  ;;  %v8005_v27 = vpop.f32.mrb[208].mxu0 }
 0x485   : > { %v7856_v46 = vadd.f32 %v7830_v34, %v7676_v35  ;;  %v8035_v36 = vadd.f32 %v8005_v27, %v7855_v51  ;;  %v11985_v42 = vpop.f32.mrb[209].mxu0  ;;  %v11953_v31 = vpop.f32.mrb[209].mxu1 }
 0x488   : > { %v7835_v48 = vpop.f32.mrb[210].mxu1  ;;  %v8010_v39 = vpop.f32.mrb[210].mxu0 }
 0x489   : > { %v7857_v37 = vadd.f32 %v7835_v48, %v7677_v19  ;;  %v8036_v6 = vadd.f32 %v8010_v39, %v7856_v46  ;;  %v11988_v2 = vpop.f32.mrb[211].mxu0  ;;  %v11956_v41 = vpop.f32.mrb[211].mxu1 }
 0x48c   : > { %v7840_v43 = vpop.f32.mrb[212].mxu1  ;;  %v8015_v14 = vpop.f32.mrb[212].mxu0 }
 0x48d   : > { %v7858_v5 = vadd.f32 %v7840_v43, %v7678_v25  ;;  %v8037_v0 = vadd.f32 %v8015_v14, %v7857_v37  ;;  %v11991_v21 = vpop.f32.mrb[213].mxu0  ;;  %v11959_v49 = vpop.f32.mrb[213].mxu1 }
 0x490   : > { %v7845_v9 = vpop.f32.mrb[214].mxu1  ;;  %v8020_v60 = vpop.f32.mrb[214].mxu0 }
 0x491   : > { %v7859_v16 = vadd.f32 %v7845_v9, %v7679_v18  ;;  %v8038_v45 = vadd.f32 %v8020_v60, %v7858_v5  ;;  %v11994_v35 = vpop.f32.mrb[215].mxu0  ;;  %v11962_v15 = vpop.f32.mrb[215].mxu1 }
 0x494   : > { %v8025_v40 = vpop.f32.mrb[216].mxu0  ;;  %v8155_v50 = vpop.f32.mrb[216].mxu1 }
 0x495   : > { %v8039_v3 = vadd.f32 %v8025_v40, %v7859_v16  ;;  %v8209_v30 = vadd.f32 %v8155_v50, %v8029_v29  ;;  %v11997_v19 = vpop.f32.mrb[217].mxu0  ;;  %v12002_v63 = vpop.f32.mrb[217].mxu1 }
 0x498   : > { %v8160_v54 = vpop.f32.mrb[218].mxu1  ;;  %v8335_v61 = vpop.f32.mrb[218].mxu0 }
 0x499   : > { %v8210_v56 = vadd.f32 %v8160_v54, %v8030_v22  ;;  %v8389_v62 = vadd.f32 %v8335_v61, %v8209_v30  ;;  %v12037_v25 = vpop.f32.mrb[219].mxu0  ;;  %v12005_v53 = vpop.f32.mrb[219].mxu1 }
 0x49c   : > { %v8165_v20 = vpop.f32.mrb[220].mxu1  ;;  %v8340_v58 = vpop.f32.mrb[220].mxu0 }
 0x49d   : > { %v8211_v59 = vadd.f32 %v8165_v20, %v8031_v1  ;;  %v8390_v23 = vadd.f32 %v8340_v58, %v8210_v56  ;;  %v12040_v18 = vpop.f32.mrb[221].mxu0  ;;  %v12008_v11 = vpop.f32.mrb[221].mxu1 }
 0x4a0   : > { %v8170_v47 = vpop.f32.mrb[222].mxu1  ;;  %v8345_v32 = vpop.f32.mrb[222].mxu0 }
 0x4a1   : > { %v8212_v12 = vadd.f32 %v8170_v47, %v8032_v7  ;;  %v8391_v44 = vadd.f32 %v8345_v32, %v8211_v59  ;;  %v12043_v10 = vpop.f32.mrb[223].mxu0  ;;  %v12011_v29 = vpop.f32.mrb[223].mxu1 }
 0x4a4   : > { %v8175_v8 = vpop.f32.mrb[224].mxu1  ;;  %v8350_v55 = vpop.f32.mrb[224].mxu0 }
 0x4a5   : > { %v8213_v57 = vadd.f32 %v8175_v8, %v8033_v4  ;;  %v8392_v26 = vadd.f32 %v8350_v55, %v8212_v12  ;;  %v12046_v22 = vpop.f32.mrb[225].mxu0  ;;  %v12014_v38 = vpop.f32.mrb[225].mxu1 }
 0x4a8   : > { %v8180_v17 = vpop.f32.mrb[226].mxu1  ;;  %v8355_v33 = vpop.f32.mrb[226].mxu0 }
 0x4a9   : > { %v8214_v28 = vadd.f32 %v8180_v17, %v8034_v24  ;;  %v8393_v51 = vadd.f32 %v8355_v33, %v8213_v57  ;;  %v12049_v1 = vpop.f32.mrb[227].mxu0  ;;  %v12017_v13 = vpop.f32.mrb[227].mxu1 }
 0x4ac   : > { %v8185_v52 = vpop.f32.mrb[228].mxu1  ;;  %v8360_v34 = vpop.f32.mrb[228].mxu0 }
 0x4ad   : > { %v8215_v27 = vadd.f32 %v8185_v52, %v8035_v36  ;;  %v8394_v46 = vadd.f32 %v8360_v34, %v8214_v28  ;;  %v12052_v7 = vpop.f32.mrb[229].mxu0  ;;  %v12020_v42 = vpop.f32.mrb[229].mxu1 }
 0x4b0   : > { %v8190_v31 = vpop.f32.mrb[230].mxu1  ;;  %v8365_v48 = vpop.f32.mrb[230].mxu0 }
 0x4b1   : > { %v8216_v39 = vadd.f32 %v8190_v31, %v8036_v6  ;;  %v8395_v37 = vadd.f32 %v8365_v48, %v8215_v27  ;;  %v12055_v4 = vpop.f32.mrb[231].mxu0  ;;  %v12023_v2 = vpop.f32.mrb[231].mxu1 }
 0x4b4   : > { %v8195_v41 = vpop.f32.mrb[232].mxu1  ;;  %v8370_v43 = vpop.f32.mrb[232].mxu0 }
 0x4b5   : > { %v8217_v14 = vadd.f32 %v8195_v41, %v8037_v0  ;;  %v8396_v5 = vadd.f32 %v8370_v43, %v8216_v39  ;;  %v12058_v24 = vpop.f32.mrb[233].mxu0  ;;  %v12026_v21 = vpop.f32.mrb[233].mxu1 }
 0x4b8   : > { %v8200_v49 = vpop.f32.mrb[234].mxu1  ;;  %v8375_v9 = vpop.f32.mrb[234].mxu0 }
 0x4b9   : > { %v8218_v60 = vadd.f32 %v8200_v49, %v8038_v45  ;;  %v8397_v16 = vadd.f32 %v8375_v9, %v8217_v14  ;;  %v12061_v36 = vpop.f32.mrb[235].mxu0  ;;  %v12029_v35 = vpop.f32.mrb[235].mxu1 }
 0x4bc   : > { %v8205_v15 = vpop.f32.mrb[236].mxu1  ;;  %v8380_v40 = vpop.f32.mrb[236].mxu0 }
 0x4bd   : > { %v8219_v50 = vadd.f32 %v8205_v15, %v8039_v3  ;;  %v8398_v30 = vadd.f32 %v8380_v40, %v8218_v60  ;;  %v12064_v6 = vpop.f32.mrb[237].mxu0  ;;  %v12032_v19 = vpop.f32.mrb[237].mxu1 }
 0x4c0   : > { %v8385_v63 = vpop.f32.mrb[238].mxu0  ;;  %v8515_v54 = vpop.f32.mrb[238].mxu1 }
 0x4c1   : > { %v8399_v61 = vadd.f32 %v8385_v63, %v8219_v50  ;;  %v8569_v56 = vadd.f32 %v8515_v54, %v8389_v62  ;;  %v12067_v0 = vpop.f32.mrb[239].mxu0  ;;  %v12072_v25 = vpop.f32.mrb[239].mxu1 }
 0x4c4   : > { %v8520_v53 = vpop.f32.mrb[240].mxu1  ;;  %v8695_v20 = vpop.f32.mrb[240].mxu0 }
 0x4c5   : > { %v8570_v58 = vadd.f32 %v8520_v53, %v8390_v23  ;;  %v8749_v59 = vadd.f32 %v8695_v20, %v8569_v56  ;;  %v12107_v45 = vpop.f32.mrb[241].mxu0  ;;  %v12075_v18 = vpop.f32.mrb[241].mxu1 }
 0x4c8   : > { %v8525_v11 = vpop.f32.mrb[242].mxu1  ;;  %v8700_v47 = vpop.f32.mrb[242].mxu0 }
 0x4c9   : > { %v8571_v32 = vadd.f32 %v8525_v11, %v8391_v44  ;;  %v15385_v12 = vadd.f32 %v8700_v47, %v8570_v58  ;;  %v12110_v3 = vpop.f32.mrb[243].mxu0  ;;  %v12078_v10 = vpop.f32.mrb[243].mxu1  ;;  %v15410_v11 = vld [vmem:[%s15457_s5] ss:$0 sm:$0xff] }
 0x4cc   : > { %v8530_v29 = vpop.f32.mrb[244].mxu1  ;;  %v8705_v8 = vpop.f32.mrb[244].mxu0 }
 0x4cd   : > { %v8572_v55 = vadd.f32 %v8530_v29, %v8392_v26  ;;  %v15387_v57 = vadd.f32 %v8705_v8, %v8571_v32  ;;  %v12113_v62 = vpop.f32.mrb[245].mxu0  ;;  %v12081_v22 = vpop.f32.mrb[245].mxu1 }
 0x4d0   : > { %v8535_v38 = vpop.f32.mrb[246].mxu1  ;;  %v8710_v17 = vpop.f32.mrb[246].mxu0 }
 0x4d1   : > { %v8573_v23 = vadd.f32 %v8535_v38, %v8393_v51  ;;  %v15389_v33 = vadd.f32 %v8710_v17, %v8572_v55  ;;  %v12116_v28 = vpop.f32.mrb[247].mxu0  ;;  %v12084_v1 = vpop.f32.mrb[247].mxu1 }
 0x4d4   : > { %v8540_v13 = vpop.f32.mrb[248].mxu1  ;;  %v8715_v44 = vpop.f32.mrb[248].mxu0 }
 0x4d5   : > { %v8574_v52 = vadd.f32 %v8540_v13, %v8394_v46  ;;  %v15391_v34 = vadd.f32 %v8715_v44, %v8573_v23  ;;  %v12119_v27 = vpop.f32.mrb[249].mxu0  ;;  %v12087_v7 = vpop.f32.mrb[249].mxu1 }
 0x4d8   : > { %v8545_v42 = vpop.f32.mrb[250].mxu1  ;;  %v8720_v26 = vpop.f32.mrb[250].mxu0 }
 0x4d9   : > { %v8575_v31 = vadd.f32 %v8545_v42, %v8395_v37  ;;  %v15393_v48 = vadd.f32 %v8720_v26, %v8574_v52  ;;  %v12122_v39 = vpop.f32.mrb[251].mxu0  ;;  %v12090_v4 = vpop.f32.mrb[251].mxu1 }
 0x4dc   : > { %v8550_v2 = vpop.f32.mrb[252].mxu1  ;;  %v8725_v51 = vpop.f32.mrb[252].mxu0 }
 0x4dd   : > { %v8576_v41 = vadd.f32 %v8550_v2, %v8396_v5  ;;  %v15395_v43 = vadd.f32 %v8725_v51, %v8575_v31  ;;  %v12125_v14 = vpop.f32.mrb[253].mxu0  ;;  %v12093_v24 = vpop.f32.mrb[253].mxu1 }
 0x4e0   : > { %v8555_v46 = vpop.f32.mrb[254].mxu1  ;;  %v8730_v21 = vpop.f32.mrb[254].mxu0 }
 0x4e1   : > { %v8577_v49 = vadd.f32 %v8555_v46, %v8397_v16  ;;  %v15397_v9 = vadd.f32 %v8730_v21, %v8576_v41  ;;  %v12128_v60 = vpop.f32.mrb[255].mxu0  ;;  %v12096_v36 = vpop.f32.mrb[255].mxu1 }
 0x4e4   : > { %v8560_v37 = vpop.f32.mrb[0].mxu1  ;;  %v8735_v35 = vpop.f32.mrb[0].mxu0 }
 0x4e5   : > { %v8578_v15 = vadd.f32 %v8560_v37, %v8398_v30  ;;  %v15399_v40 = vadd.f32 %v8735_v35, %v8577_v49  ;;  %v12131_v50 = vpop.f32.mrb[1].mxu0  ;;  %v12099_v6 = vpop.f32.mrb[1].mxu1 }
 0x4e8   : > { %v8565_v5 = vpop.f32.mrb[2].mxu1  ;;  %v8740_v19 = vpop.f32.mrb[2].mxu0 }
 0x4e9   : > { %v8579_v63 = vadd.f32 %v8565_v5, %v8399_v61  ;;  %v15403_v54 = vadd.f32 %v8740_v19, %v8578_v15  ;;  %v12134_v56 = vpop.f32.mrb[3].mxu0  ;;  %v12102_v16 = vpop.f32.mrb[3].mxu1 }
 0x4ec   : > { %v8745_v0 = vpop.f32.mrb[4].mxu0  ;;  %v8875_v25 = vpop.f32.mrb[4].mxu1 }
 0x4ed   : > { %v15405_v53 = vadd.f32 %v8745_v0, %v8579_v63  ;;  %v8929_v20 = vadd.f32 %v8875_v25, %v8749_v59  ;;  %v12137_v30 = vpop.f32.mrb[5].mxu0  ;;  %v12142_v58 = vpop.f32.mrb[5].mxu1 }
 0x4f0   : > { %v8880_v45 = vpop.f32.mrb[6].mxu1  ;;  %v9055_v18 = vpop.f32.mrb[6].mxu0 }
 0x4f1   : > { %v8930_v61 = vadd.f32 %v8880_v45, %v15385_v12  ;;  %v9109_v47 = vadd.f32 %v9055_v18, %v8929_v20  ;;  %v12177_v32 = vpop.f32.mrb[7].mxu0  ;;  %v12145_v3 = vpop.f32.mrb[7].mxu1 }
 0x4f3   : > { %v9127_v10 = vadd.f32 %v15410_v11, %v9109_v47 }
 0x4f4   : > { %v8885_v59 = vpop.f32.mrb[8].mxu1  ;;  %v9060_v29 = vpop.f32.mrb[8].mxu0 }
 0x4f5   : > { %v9138_v8 = vmax.f32 %v9127_v10, 0.0  ;;  %v8931_v55 = vadd.f32 %v8885_v59, %v15387_v57  ;;  %v9110_v62 = vadd.f32 %v9060_v29, %v8930_v61  ;;  %v12180_v12 = vpop.f32.mrb[9].mxu0  ;;  %v12148_v22 = vpop.f32.mrb[9].mxu1 }
 0x4f7   : > { %9149 = vst [vmem:[%s15417_s20] sm:$0xff] %v9138_v8  ;;  %v9128_v38 = vadd.f32 %v15410_v11, %v9110_v62 }
 0x4f8   : > { %v8890_v17 = vpop.f32.mrb[10].mxu1  ;;  %v9065_v23 = vpop.f32.mrb[10].mxu0 }
 0x4f9   : > { %v9139_v28 = vmax.f32 %v9128_v38, 0.0  ;;  %v8932_v1 = vadd.f32 %v8890_v17, %v15389_v33  ;;  %v9111_v13 = vadd.f32 %v9065_v23, %v8931_v55  ;;  %v12183_v44 = vpop.f32.mrb[11].mxu0  ;;  %v12151_v52 = vpop.f32.mrb[11].mxu1 }
 0x4fb   : > { %9150 = vst [vmem:[%s15417_s20 + $0x8] sm:$0xff] %v9139_v28  ;;  %v9129_v27 = vadd.f32 %v15410_v11, %v9111_v13 }
 0x4fc   : > { %v8895_v7 = vpop.f32.mrb[12].mxu1  ;;  %v9070_v57 = vpop.f32.mrb[12].mxu0 }
 0x4fd   : > { %v9140_v42 = vmax.f32 %v9129_v27, 0.0  ;;  %v8933_v26 = vadd.f32 %v8895_v7, %v15391_v34  ;;  %v9112_v31 = vadd.f32 %v9070_v57, %v8932_v1  ;;  %v12186_v39 = vpop.f32.mrb[13].mxu0  ;;  %v12154_v4 = vpop.f32.mrb[13].mxu1 }
 0x4ff   : > { %9151 = vst [vmem:[%s15417_s20 + $0x10] sm:$0xff] %v9140_v42  ;;  %v9130_v2 = vadd.f32 %v15410_v11, %v9112_v31 }
 0x500   : > { %v8900_v51 = vpop.f32.mrb[14].mxu1  ;;  %v9075_v33 = vpop.f32.mrb[14].mxu0 }
 0x501   : > { %v9141_v41 = vmax.f32 %v9130_v2, 0.0  ;;  %v8934_v14 = vadd.f32 %v8900_v51, %v15393_v48  ;;  %v9113_v24 = vadd.f32 %v9075_v33, %v8933_v26  ;;  %v12189_v46 = vpop.f32.mrb[15].mxu0  ;;  %v12157_v21 = vpop.f32.mrb[15].mxu1 }
 0x503   : > { %9152 = vst [vmem:[%s15417_s20 + $0x18] sm:$0xff] %v9141_v41  ;;  %v9131_v49 = vadd.f32 %v15410_v11, %v9113_v24 }
 0x504   : > { %v8905_v60 = vpop.f32.mrb[16].mxu1  ;;  %v9080_v34 = vpop.f32.mrb[16].mxu0 }
 0x505   : > { %v9142_v36 = vmax.f32 %v9131_v49, 0.0  ;;  %v8935_v37 = vadd.f32 %v8905_v60, %v15395_v43  ;;  %v9114_v35 = vadd.f32 %v9080_v34, %v8934_v14  ;;  %v12192_v15 = vpop.f32.mrb[17].mxu0  ;;  %v12160_v50 = vpop.f32.mrb[17].mxu1 }
 0x507   : > { %9153 = vst [vmem:[%s15417_s20 + $0x20] sm:$0xff] %v9142_v36  ;;  %v9132_v6 = vadd.f32 %v15410_v11, %v9114_v35 }
 0x508   : > { %v8910_v5 = vpop.f32.mrb[18].mxu1  ;;  %v9085_v48 = vpop.f32.mrb[18].mxu0 }
 0x509   : > { %v9143_v19 = vmax.f32 %v9132_v6, 0.0  ;;  %v8936_v63 = vadd.f32 %v8910_v5, %v15397_v9  ;;  %v9115_v56 = vadd.f32 %v9085_v48, %v8935_v37  ;;  %v12195_v16 = vpop.f32.mrb[19].mxu0  ;;  %v12163_v0 = vpop.f32.mrb[19].mxu1 }
 0x50b   : > { %9154 = vst [vmem:[%s15417_s20 + $0x28] sm:$0xff] %v9143_v19  ;;  %v9133_v25 = vadd.f32 %v15410_v11, %v9115_v56 }
 0x50c   : > { %v8915_v20 = vpop.f32.mrb[20].mxu1  ;;  %v9090_v43 = vpop.f32.mrb[20].mxu0 }
 0x50d   : > { %v9144_v30 = vmax.f32 %v9133_v25, 0.0  ;;  %v8937_v58 = vadd.f32 %v8915_v20, %v15399_v40  ;;  %v9116_v45 = vadd.f32 %v9090_v43, %v8936_v63  ;;  %v12198_v18 = vpop.f32.mrb[21].mxu0  ;;  %v12166_v61 = vpop.f32.mrb[21].mxu1 }
 0x50f   : > { %9155 = vst [vmem:[%s15417_s20 + $0x30] sm:$0xff] %v9144_v30  ;;  %v9134_v47 = vadd.f32 %v15410_v11, %v9116_v45 }
 0x510   : > { %v8920_v32 = vpop.f32.mrb[22].mxu1  ;;  %v9095_v9 = vpop.f32.mrb[22].mxu0 }
 0x511   : > { %v9145_v3 = vmax.f32 %v9134_v47, 0.0  ;;  %v8938_v10 = vadd.f32 %v8920_v32, %v15403_v54  ;;  %v9117_v59 = vadd.f32 %v9095_v9, %v8937_v58  ;;  %v12201_v29 = vpop.f32.mrb[23].mxu0  ;;  %v12169_v8 = vpop.f32.mrb[23].mxu1 }
 0x513   : > { %9156 = vst [vmem:[%s15417_s20 + $0x38] sm:$0xff] %v9145_v3  ;;  %v9135_v55 = vadd.f32 %v15410_v11, %v9117_v59 }
 0x514   : > { %v8925_v40 = vpop.f32.mrb[24].mxu1  ;;  %v9100_v62 = vpop.f32.mrb[24].mxu0 }
 0x515   : > { %v9146_v12 = vmax.f32 %v9135_v55, 0.0  ;;  %v8939_v22 = vadd.f32 %v8925_v40, %v15405_v53  ;;  %v9118_v38 = vadd.f32 %v9100_v62, %v8938_v10  ;;  %v12204_v17 = vpop.f32.mrb[25].mxu0  ;;  %v12172_v23 = vpop.f32.mrb[25].mxu1 }
 0x517   : > { %9157 = vst [vmem:[%s15417_s20 + $0x40] sm:$0xff] %v9146_v12  ;;  %v9136_v28 = vadd.f32 %v15410_v11, %v9118_v38 }
 0x518   : > { %v9105_v54 = vpop.f32.mrb[26].mxu0 }
 0x519   : > { %v9147_v1 = vmax.f32 %v9136_v28, 0.0  ;;  %v9119_v13 = vadd.f32 %v9105_v54, %v8939_v22  ;;  %v12207_v44 = vpop.f32.mrb[27].mxu0 }
 0x51b   : > { %9158 = vst [vmem:[%s15417_s20 + $0x48] sm:$0xff] %v9147_v1  ;;  %v9137_v52 = vadd.f32 %v15410_v11, %v9119_v13 }
 0x51d   : > { %v9148_v27 = vmax.f32 %v9137_v52, 0.0 }
 0x51f   : > { %9159 = vst [vmem:[%s15417_s20 + $0x50] sm:$0xff] %v9148_v27 }
 0x520 PF: > { %s16_s21 = sadd.s32 1, %s12226_s21  }
 0x521   : > { %p13_p5 = scmp.ge.s32.totalorder %s16_s21, 4  }
 0x523   :  { %15 = sbr.rel (!%p13_p5) target bundleno = 1 (0x1), region = 131 }

</bundles_post_ra>
